<compile_context>
chip_gen: v5e
topology: v5e:2x2
jax: 0.10.0
libtpu: 0.0.40
codegen_flags: <defaults>
</compile_context>

<pallas_src>
import jax
import jax.numpy as jnp
from jax.experimental import pallas as pl
from jax.experimental.pallas import tpu as pltpu

IN_CHANNEL = 64
HIDDEN = 1024
OUT = 256
NEG_SLOPE = 0.01  # F.leaky_relu default

# v7x-safe per-step VMEM budget (default scoped VMEM there is ~32 MiB).
_VMEM_BUDGET_BYTES = 28 * 1024 * 1024


def _leaky_relu(v):
    # mul + max form (VPU-friendly, no cmp+select)
    return jnp.maximum(v, NEG_SLOPE * v)


def _round_up(a, m):
    return ((a + m - 1) // m) * m


def _vmem_bytes_per_step(tm, weight_buffers=2):
    """Rough per-grid-step VMEM working-set estimate (worst case)."""
    x_tile = 2 * tm * IN_CHANNEL * 2          # bf16 x tile, double-buffered
    out_tile = 2 * tm * OUT * 4               # f32 out tile, double-buffered
    weights = weight_buffers * (
        (IN_CHANNEL * HIDDEN + HIDDEN * OUT) * 2   # bf16 W1, W2
        + (HIDDEN + OUT) * 4                       # f32 biases
    )
    hidden = tm * HIDDEN * (4 + 2)            # f32 h + bf16 cast staging
    return x_tile + out_tile + weights + hidden


def _pick_tile(n_rows, tm_req):
    """Pick a row tile: multiple of 8, >=2 grid steps when possible, VMEM-capped."""
    tm_req = max(8, _round_up(tm_req, 8))
    if n_rows <= tm_req:
        # Small batch: split into (about) 2 grid steps so both TensorCores on
        # v7x get work instead of leaving half the chip idle.
        tm = max(8, _round_up(pl.cdiv(n_rows, 2), 8))
    else:
        tm = tm_req
    # Cap the per-step VMEM working set (v7x has 64 MiB physical / 32 MiB
    # default scoped VMEM; a tile tuned for v6e's 128 MiB could spill there).
    while tm > 8 and _vmem_bytes_per_step(tm) > _VMEM_BUDGET_BYTES:
        tm = max(8, _round_up(tm // 2, 8))
    return tm


def metricnet_kernel(x_ref, w1_ref, b1_ref, w2_ref, b2_ref, o_ref):
    # x_ref: (tm, 64) bf16     w1_ref: (64, 1024) bf16   b1_ref: (1, 1024) f32
    # w2_ref: (1024, 256) bf16 b2_ref: (1, 256) f32      o_ref: (tm, 256) f32
    x = x_ref[...]

    # Layer 1: bf16 @ bf16 -> f32 accumulate on the MXU.
    h = jnp.dot(x, w1_ref[...], preferred_element_type=jnp.float32)
    h = _leaky_relu(h + b1_ref[...])          # f32 epilogue on the accumulator

    # Layer 2 (80% of the FLOPs): feed bf16 activations back to the MXU.
    hb = h.astype(jnp.bfloat16)
    y = jnp.dot(hb, w2_ref[...], preferred_element_type=jnp.float32)
    y = _leaky_relu(y + b2_ref[...])

    o_ref[...] = y.astype(o_ref.dtype)


def _build_call(tm, n_pad, cost, single_buffer_weights):
    # Weights/biases have a constant index_map (resident across the grid);
    # request a single buffer for them to save VMEM when supported.
    res_kw = (
        {"pipeline_mode": pl.Buffered(1)} if single_buffer_weights else {}
    )
    in_specs = [
        pl.BlockSpec((tm, IN_CHANNEL), lambda i: (i, 0)),              # x tile
        pl.BlockSpec((IN_CHANNEL, HIDDEN), lambda i: (0, 0), **res_kw),  # W1
        pl.BlockSpec((1, HIDDEN), lambda i: (0, 0), **res_kw),           # b1
        pl.BlockSpec((HIDDEN, OUT), lambda i: (0, 0), **res_kw),         # W2
        pl.BlockSpec((1, OUT), lambda i: (0, 0), **res_kw),              # b2
    ]
    return pl.pallas_call(
        metricnet_kernel,
        out_shape=jax.ShapeDtypeStruct((n_pad, OUT), jnp.float32),
        grid_spec=pltpu.PrefetchScalarGridSpec(
            num_scalar_prefetch=0,
            grid=(n_pad // tm,),
            in_specs=in_specs,
            out_specs=pl.BlockSpec((tm, OUT), lambda i: (i, 0)),
        ),
        compiler_params=pltpu.CompilerParams(
            dimension_semantics=("parallel",),
        ),
        cost_estimate=cost,
    )


def metricnet_forward(x, w1, b1, w2, b2, *, tm=512, single_buffer_weights=True):
    """Fused MetricNet forward. x: (..., 64) f32. Returns (..., 256) f32.

    Weights: w1 (64,1024), w2 (1024,256) = PyTorch weight.T; biases (1, out).
    """
    orig_shape = x.shape
    assert orig_shape[-1] == IN_CHANNEL
    x2 = x.reshape(-1, IN_CHANNEL)
    n_rows = x2.shape[0]

    tm = _pick_tile(n_rows, tm)
    n_pad = _round_up(n_rows, tm)

    # One-time casts outside the kernel: bf16 operands, f32 biases.
    xb = x2.astype(jnp.bfloat16)
    if n_pad != n_rows:
        xb = jnp.pad(xb, ((0, n_pad - n_rows), (0, 0)))
    w1b = w1.astype(jnp.bfloat16)
    w2b = w2.astype(jnp.bfloat16)
    b1f = b1.astype(jnp.float32).reshape(1, HIDDEN)
    b2f = b2.astype(jnp.float32).reshape(1, OUT)

    cost = pl.CostEstimate(
        flops=2 * n_pad * (IN_CHANNEL * HIDDEN + HIDDEN * OUT),
        transcendentals=0,
        bytes_accessed=(
            n_pad * IN_CHANNEL * 2      # x (bf16)
            + (IN_CHANNEL * HIDDEN + HIDDEN * OUT) * 2  # W1, W2 (bf16)
            + (HIDDEN + OUT) * 4        # biases (f32)
            + n_pad * OUT * 4           # output (f32)
        ),
    )

    args = (xb, w1b, b1f, w2b, b2f)
    if single_buffer_weights:
        try:
            out = _build_call(tm, n_pad, cost, True)(*args)
        except Exception:
            # Fallback: default double-buffered resident weights (always valid).
            out = _build_call(tm, n_pad, cost, False)(*args)
    else:
        out = _build_call(tm, n_pad, cost, False)(*args)

    if n_pad != n_rows:
        out = out[:n_rows]
    return out.reshape(*orig_shape[:-1], OUT)


def metricnet_reference(x, w1, b1, w2, b2):
    """Pure-JAX reference mirroring the kernel's mixed precision
    (bf16 operands, f32 accumulation, f32 epilogue)."""
    h = jnp.dot(x.astype(jnp.bfloat16), w1.astype(jnp.bfloat16),
                preferred_element_type=jnp.float32) + b1
    h = _leaky_relu(h)
    y = jnp.dot(h.astype(jnp.bfloat16), w2.astype(jnp.bfloat16),
                preferred_element_type=jnp.float32) + b2
    return _leaky_relu(y)


if __name__ == "__main__":
    key = jax.random.PRNGKey(0)
    k_x, k_w1, k_b1, k_w2, k_b2 = jax.random.split(key, 5)

    N = 300  # deliberately ragged batch to exercise the padding path
    x = jax.random.normal(k_x, (N, IN_CHANNEL), dtype=jnp.float32)

    # Synthetic parameters, stored as (in_features, out_features) = PyTorch weight.T
    w1 = jax.random.normal(k_w1, (IN_CHANNEL, HIDDEN), dtype=jnp.float32) * 0.05
    b1 = jax.random.normal(k_b1, (1, HIDDEN), dtype=jnp.float32) * 0.05
    w2 = jax.random.normal(k_w2, (HIDDEN, OUT), dtype=jnp.float32) * 0.05
    b2 = jax.random.normal(k_b2, (1, OUT), dtype=jnp.float32) * 0.05

    out = metricnet_forward(x, w1, b1, w2, b2, tm=512)
    out = jax.block_until_ready(out)

    ref = metricnet_reference(x, w1, b1, w2, b2)
    assert out.shape == (N, OUT)
    assert jnp.allclose(out, ref, atol=2e-2, rtol=2e-2), "mismatch vs JAX reference"

    print("KERNEL_OK")
</pallas_src>

<mosaic_0001>
module attributes {stable_mosaic.version = 11 : i64} {
  func.func @metricnet_kernel(%arg0: i32, %arg1: memref<152x64xbf16, #tpu.memory_space<vmem>>, %arg2: memref<64x1024xbf16, #tpu.memory_space<vmem>>, %arg3: memref<1x1024xf32, #tpu.memory_space<vmem>>, %arg4: memref<1024x256xbf16, #tpu.memory_space<vmem>>, %arg5: memref<1x256xf32, #tpu.memory_space<vmem>>, %arg6: memref<152x256xf32, #tpu.memory_space<vmem>>) attributes {dimension_semantics = [#tpu.dimension_semantics<parallel>], iteration_bounds = array<i64: 2>, scalar_prefetch = 0 : i64, scratch_operands = 0 : i64, tpu.core_type = #tpu.core_type<tc>, window_params = [{transform_indices = @transform_0, window_bounds = array<i64: 152, 64>}, {pipeline_mode = #tpu.pipeline_mode<synchronous>, transform_indices = @transform_1, window_bounds = array<i64: 64, 1024>}, {pipeline_mode = #tpu.pipeline_mode<synchronous>, transform_indices = @transform_2, window_bounds = array<i64: 1, 1024>}, {pipeline_mode = #tpu.pipeline_mode<synchronous>, transform_indices = @transform_3, window_bounds = array<i64: 1024, 256>}, {pipeline_mode = #tpu.pipeline_mode<synchronous>, transform_indices = @transform_4, window_bounds = array<i64: 1, 256>}, {transform_indices = @transform_5, window_bounds = array<i64: 152, 256>}]} {
    %c0 = arith.constant 0 : index
    %c0_0 = arith.constant 0 : index
    %0 = vector.load %arg1[%c0, %c0_0] : memref<152x64xbf16, #tpu.memory_space<vmem>>, vector<152x64xbf16>
    %c0_1 = arith.constant 0 : index
    %c0_2 = arith.constant 0 : index
    %1 = vector.load %arg2[%c0_1, %c0_2] : memref<64x1024xbf16, #tpu.memory_space<vmem>>, vector<64x1024xbf16>
    %cst = arith.constant dense<0.000000e+00> : vector<152x1024xf32>
    %2 = tpu.matmul %0, %1, %cst {dimension_numbers = #tpu.dot_dimension_numbers<[1], [0], [0], [1], [0, 0, 1, 1], [], []>} : vector<152x64xbf16>, vector<64x1024xbf16>, vector<152x1024xf32> -> vector<152x1024xf32>
    %c0_3 = arith.constant 0 : index
    %c0_4 = arith.constant 0 : index
    %3 = vector.load %arg3[%c0_3, %c0_4] : memref<1x1024xf32, #tpu.memory_space<vmem>>, vector<1x1024xf32>
    %4 = vector.broadcast %3 : vector<1x1024xf32> to vector<152x1024xf32>
    %5 = arith.addf %2, %4 : vector<152x1024xf32>
    %cst_5 = arith.constant 0.00999999977 : f32
    %6 = vector.broadcast %cst_5 : f32 to vector<152x1024xf32>
    %7 = arith.mulf %6, %5 : vector<152x1024xf32>
    %8 = arith.maximumf %5, %7 : vector<152x1024xf32>
    %9 = arith.truncf %8 : vector<152x1024xf32> to vector<152x1024xbf16>
    %c0_6 = arith.constant 0 : index
    %c0_7 = arith.constant 0 : index
    %10 = vector.load %arg4[%c0_6, %c0_7] : memref<1024x256xbf16, #tpu.memory_space<vmem>>, vector<1024x256xbf16>
    %cst_8 = arith.constant dense<0.000000e+00> : vector<152x256xf32>
    %11 = tpu.matmul %9, %10, %cst_8 {dimension_numbers = #tpu.dot_dimension_numbers<[1], [0], [0], [1], [0, 0, 1, 1], [], []>} : vector<152x1024xbf16>, vector<1024x256xbf16>, vector<152x256xf32> -> vector<152x256xf32>
    %c0_9 = arith.constant 0 : index
    %c0_10 = arith.constant 0 : index
    %12 = vector.load %arg5[%c0_9, %c0_10] : memref<1x256xf32, #tpu.memory_space<vmem>>, vector<1x256xf32>
    %13 = vector.broadcast %12 : vector<1x256xf32> to vector<152x256xf32>
    %14 = arith.addf %11, %13 : vector<152x256xf32>
    %cst_11 = arith.constant 0.00999999977 : f32
    %15 = vector.broadcast %cst_11 : f32 to vector<152x256xf32>
    %16 = arith.mulf %15, %14 : vector<152x256xf32>
    %17 = arith.maximumf %14, %16 : vector<152x256xf32>
    %c0_12 = arith.constant 0 : index
    %c0_13 = arith.constant 0 : index
    %18 = vector.load %arg6[%c0_12, %c0_13] : memref<152x256xf32, #tpu.memory_space<vmem>>, vector<152x256xf32>
    tpu.vector_store %arg6[%c0_12, %c0_13], %17 {strides = array<i32>} : memref<152x256xf32, #tpu.memory_space<vmem>>, vector<152x256xf32>,
    return
  }
  func.func @transform_0(%arg0: i32) -> (i32, i32) {
    %c0_i32 = arith.constant 0 : i32
    %c0_i32_0 = arith.constant 0 : i32
    return %arg0, %c0_i32 : i32, i32
  }
  func.func @transform_1(%arg0: i32) -> (i32, i32) {
    %c0_i32 = arith.constant 0 : i32
    %c0_i32_0 = arith.constant 0 : i32
    %c0_i32_1 = arith.constant 0 : i32
    return %c0_i32, %c0_i32_0 : i32, i32
  }
  func.func @transform_2(%arg0: i32) -> (i32, i32) {
    %c0_i32 = arith.constant 0 : i32
    %c0_i32_0 = arith.constant 0 : i32
    %c0_i32_1 = arith.constant 0 : i32
    return %c0_i32, %c0_i32_0 : i32, i32
  }
  func.func @transform_3(%arg0: i32) -> (i32, i32) {
    %c0_i32 = arith.constant 0 : i32
    %c0_i32_0 = arith.constant 0 : i32
    %c0_i32_1 = arith.constant 0 : i32
    return %c0_i32, %c0_i32_0 : i32, i32
  }
  func.func @transform_4(%arg0: i32) -> (i32, i32) {
    %c0_i32 = arith.constant 0 : i32
    %c0_i32_0 = arith.constant 0 : i32
    %c0_i32_1 = arith.constant 0 : i32
    return %c0_i32, %c0_i32_0 : i32, i32
  }
  func.func @transform_5(%arg0: i32) -> (i32, i32) {
    %c0_i32 = arith.constant 0 : i32
    %c0_i32_0 = arith.constant 0 : i32
    return %arg0, %c0_i32 : i32, i32
  }
}

module attributes {stable_mosaic.version = 11 : i64} {
  func.func @metricnet_kernel(%arg0: i32, %arg1: memref<152x64xbf16, #tpu.memory_space<vmem>>, %arg2: memref<64x1024xbf16, #tpu.memory_space<vmem>>, %arg3: memref<1x1024xf32, #tpu.memory_space<vmem>>, %arg4: memref<1024x256xbf16, #tpu.memory_space<vmem>>, %arg5: memref<1x256xf32, #tpu.memory_space<vmem>>, %arg6: memref<152x256xf32, #tpu.memory_space<vmem>>) attributes {dimension_semantics = [#tpu.dimension_semantics<parallel>], iteration_bounds = array<i64: 2>, scalar_prefetch = 0 : i64, scratch_operands = 0 : i64, tpu.core_type = #tpu.core_type<tc>, window_params = [{transform_indices = @transform_0, window_bounds = array<i64: 152, 64>}, {pipeline_mode = #tpu.pipeline_mode<synchronous>, transform_indices = @transform_1, window_bounds = array<i64: 64, 1024>}, {pipeline_mode = #tpu.pipeline_mode<synchronous>, transform_indices = @transform_2, window_bounds = array<i64: 1, 1024>}, {pipeline_mode = #tpu.pipeline_mode<synchronous>, transform_indices = @transform_3, window_bounds = array<i64: 1024, 256>}, {pipeline_mode = #tpu.pipeline_mode<synchronous>, transform_indices = @transform_4, window_bounds = array<i64: 1, 256>}, {transform_indices = @transform_5, window_bounds = array<i64: 152, 256>}]} {
    %c0 = arith.constant 0 : index
    %c0_0 = arith.constant 0 : index
    %0 = vector.load %arg1[%c0, %c0_0] : memref<152x64xbf16, #tpu.memory_space<vmem>>, vector<152x64xbf16>
    %c0_1 = arith.constant 0 : index
    %c0_2 = arith.constant 0 : index
    %1 = vector.load %arg2[%c0_1, %c0_2] : memref<64x1024xbf16, #tpu.memory_space<vmem>>, vector<64x1024xbf16>
    %cst = arith.constant dense<0.000000e+00> : vector<152x1024xf32>
    %2 = tpu.matmul %0, %1, %cst {dimension_numbers = #tpu.dot_dimension_numbers<[1], [0], [0], [1], [0, 0, 1, 1], [], []>} : vector<152x64xbf16>, vector<64x1024xbf16>, vector<152x1024xf32> -> vector<152x1024xf32>
    %c0_3 = arith.constant 0 : index
    %c0_4 = arith.constant 0 : index
    %3 = vector.load %arg3[%c0_3, %c0_4] : memref<1x1024xf32, #tpu.memory_space<vmem>>, vector<1x1024xf32>
    %4 = vector.broadcast %3 : vector<1x1024xf32> to vector<152x1024xf32>
    %5 = arith.addf %2, %4 : vector<152x1024xf32>
    %cst_5 = arith.constant 0.00999999977 : f32
    %6 = vector.broadcast %cst_5 : f32 to vector<152x1024xf32>
    %7 = arith.mulf %6, %5 : vector<152x1024xf32>
    %8 = arith.maximumf %5, %7 : vector<152x1024xf32>
    %9 = arith.truncf %8 : vector<152x1024xf32> to vector<152x1024xbf16>
    %c0_6 = arith.constant 0 : index
    %c0_7 = arith.constant 0 : index
    %10 = vector.load %arg4[%c0_6, %c0_7] : memref<1024x256xbf16, #tpu.memory_space<vmem>>, vector<1024x256xbf16>
    %cst_8 = arith.constant dense<0.000000e+00> : vector<152x256xf32>
    %11 = tpu.matmul %9, %10, %cst_8 {dimension_numbers = #tpu.dot_dimension_numbers<[1], [0], [0], [1], [0, 0, 1, 1], [], []>} : vector<152x1024xbf16>, vector<1024x256xbf16>, vector<152x256xf32> -> vector<152x256xf32>
    %c0_9 = arith.constant 0 : index
    %c0_10 = arith.constant 0 : index
    %12 = vector.load %arg5[%c0_9, %c0_10] : memref<1x256xf32, #tpu.memory_space<vmem>>, vector<1x256xf32>
    %13 = vector.broadcast %12 : vector<1x256xf32> to vector<152x256xf32>
    %14 = arith.addf %11, %13 : vector<152x256xf32>
    %cst_11 = arith.constant 0.00999999977 : f32
    %15 = vector.broadcast %cst_11 : f32 to vector<152x256xf32>
    %16 = arith.mulf %15, %14 : vector<152x256xf32>
    %17 = arith.maximumf %14, %16 : vector<152x256xf32>
    %c0_12 = arith.constant 0 : index
    %c0_13 = arith.constant 0 : index
    %18 = vector.load %arg6[%c0_12, %c0_13] : memref<152x256xf32, #tpu.memory_space<vmem>>, vector<152x256xf32>
    tpu.vector_store %arg6[%c0_12, %c0_13], %17 {strides = array<i32>} : memref<152x256xf32, #tpu.memory_space<vmem>>, vector<152x256xf32>,
    return
  }
  func.func @transform_0(%arg0: i32) -> (i32, i32) {
    %c0_i32 = arith.constant 0 : i32
    %c0_i32_0 = arith.constant 0 : i32
    return %arg0, %c0_i32 : i32, i32
  }
  func.func @transform_1(%arg0: i32) -> (i32, i32) {
    %c0_i32 = arith.constant 0 : i32
    %c0_i32_0 = arith.constant 0 : i32
    %c0_i32_1 = arith.constant 0 : i32
    return %c0_i32, %c0_i32_0 : i32, i32
  }
  func.func @transform_2(%arg0: i32) -> (i32, i32) {
    %c0_i32 = arith.constant 0 : i32
    %c0_i32_0 = arith.constant 0 : i32
    %c0_i32_1 = arith.constant 0 : i32
    return %c0_i32, %c0_i32_0 : i32, i32
  }
  func.func @transform_3(%arg0: i32) -> (i32, i32) {
    %c0_i32 = arith.constant 0 : i32
    %c0_i32_0 = arith.constant 0 : i32
    %c0_i32_1 = arith.constant 0 : i32
    return %c0_i32, %c0_i32_0 : i32, i32
  }
  func.func @transform_4(%arg0: i32) -> (i32, i32) {
    %c0_i32 = arith.constant 0 : i32
    %c0_i32_0 = arith.constant 0 : i32
    %c0_i32_1 = arith.constant 0 : i32
    return %c0_i32, %c0_i32_0 : i32, i32
  }
  func.func @transform_5(%arg0: i32) -> (i32, i32) {
    %c0_i32 = arith.constant 0 : i32
    %c0_i32_0 = arith.constant 0 : i32
    return %arg0, %c0_i32 : i32, i32
  }
}

</mosaic_0001>

<bundles_post_ra>
// kernel: tpu_custom_call.1
= control target key start
LH: loop header
LB: loop body
LE: loop exit
PB: predicated region body
PF: predicated region fallthrough
CT: control target
= control target key end

     0   :  { %10 = vsyncpa [#allocation3], 0  ;;  %s5544_s0 = inlined_call_operand.vmem [shape: bf16[304,64], index: 0, kind: input, shape index: {}]   ;;  %s5545_s1 = inlined_call_operand.hbm [shape: bf16[64,1024], index: 1, kind: input, shape index: {}]   ;;  %s5546_s2 = inlined_call_operand.vmem [shape: f32[1,1024], index: 2, kind: input, shape index: {}]   ;;  %s5547_s3 = inlined_call_operand.hbm [shape: bf16[1024,256], index: 3, kind: input, shape index: {}]   ;;  %s5548_s4 = inlined_call_operand.vmem [shape: f32[1,256], index: 4, kind: input, shape index: {}]   ;;  %s5549_s5 = inlined_call_operand.hbm [shape: f32[304,256], index: 5, kind: output, shape index: {}]  }
   0x1   :  { %11 = vsyncpa [#allocation6], 0 }
   0x2   :  { %12 = vsyncpa [#allocation4], 0 }
   0x3   :  { %14 = vsyncpa [#allocation4 + $0x1], 0  ;;  %s4515_s18 = smov 0   ;;  %s4517_s19 = smov 0  }
   0x4   :  { %s4519_s20 = smov 0   ;;  %s4521_s21 = smov 0  }
   0x5 LB: > { %s4536_s22 = sadd.s32 4294967295, %s4475_s21   ;;  %s3334_s23 = sadd.s32 4294967294, %s4475_s21   ;;  %s4475_s21 = sphi %s4521_s21, %s5772_s21   ;;  %s4471_s20 = sphi %s4519_s20, %s5771_s20   ;;  %s4467_s19 = sphi %s4517_s19, %s5770_s19   ;;  %s4463_s18 = sphi %s4515_s18, %s5769_s18  }
   0x6   : > { %s4540_s24 = sadd.s32 1, %s4475_s21   ;;  %s137_s25 = sadd.s32 1, %s4471_s20 }
   0x7   : > { %s134_s26 = ssub.s32 %s4475_s21, %s4540_s24  ;;  %p147_p0 = scmp.ne.s32.totalorder %s4471_s20, %s4467_s19 }
   0x8   : > { %p135_p1 = scmp.eq.s32.totalorder %s134_s26, 0  ;;  %p148_p2 = scmp.eq.s32.totalorder %s4536_s22, 1 }
   0x9   : > { %p153_p3 = scmp.ne.s32.totalorder %s4467_s19, %s4463_s18  ;;  %p154_p4 = scmp.eq.s32.totalorder %s3334_s23, 1 }
   0xa   : > { %s4551_s27 = scalar_select %p135_p1, %s4471_s20, %s137_s25  }
   0xb   : > { %p4553_p5 = por %p148_p2, %p147_p0  ;;  %p4557_p6 = por %p154_p4, %p153_p3 }
   0xc   : > { %p3335_p7 = scmp.ge.s32.totalorder %s4475_s21, 1  ;;  %p161_p8 = scmp.lt.s32.totalorder %s4475_s21, 3 }
   0xd   : > { %p4297_p9 = scmp.eq.s32.totalorder %s4536_s22, 0  ;;  %s172_s8 = sshll.u32 %s5545_s1, 4  ;;  %s173_s8 = int_to_ptr.hbm [resolvable:$true] %s172_s8 }
   0xe   : > { %p4564_p10 = pnand %p3335_p7, %p161_p8  ;;  %s4477_s9 = smov [#allocation2]  }
   0xf   : > { %s174_s10 = sshll.u32 %s4477_s9, 4  ;;  %s189_s13 = sshll.u32 %s5547_s3, 4  ;;  %s175_s10 = int_to_ptr.vmem [resolvable:$true] %s174_s10  ;;  %s190_s13 = int_to_ptr.hbm [resolvable:$true] %s189_s13 }
  0x10   : > { %p4286_p11 = pneg %p4564_p10  ;;  %s4478_s14 = smov 512  }
  0x11   : > { %s4479_s15 = smov 32   ;;  %s4480_s16 = smov [#allocation5]  }
  0x12   : > { %p4287_p12 = pnand %p4297_p9, %p4286_p11  ;;  %s191_s17 = sshll.u32 %s4480_s16, 4  ;;  %s192_s17 = int_to_ptr.vmem [resolvable:$true] %s191_s17 }
  0x13   : > { %s4481_s23 = smov 128   ;;  %s4482_s25 = smov 8  }
  0x14   : > { %4289 = dma.hbm_to_vmem [thread:$0]  (!%p4287_p12), %s173_s8, 4096, %s175_s10, [#allocation3], %s4478_s14, %s4478_s14, %s4479_s15  }
  0x15   : > { %4292 = dma.hbm_to_vmem [thread:$0]  (!%p4287_p12), %s190_s13, 16384, %s192_s17, [#allocation6], %s4481_s23, %s4481_s23, %s4482_s25  }
  0x16   : > { %219 = sbr.rel (%p4564_p10) target bundleno = 1139 (0x473), region = 40 }
  0x1b   : > { %4450 = dma.done.wait (%p4297_p9), [#allocation3], 4096  }
  0x1c   : > { %4452 = vsyncadd (%p4297_p9), [#allocation3], 4294963200 }
  0x1d   : > { %4454 = dma.done.wait (%p4297_p9), [#allocation6], 16384  }
  0x1e   : > { %4456 = vsyncadd (%p4297_p9), [#allocation6], 4294950912  ;;  %s253_s26 = smul.u32 19, %s4536_s22  ;;  %v3477_v0 = vld [vmem:[#allocation2 + $0xc0] sm:$0xf]  ;;  %vm538_vm0 = vcmask 523264  }
  0x1f   : > { %v4140_v1 = vld [vmem:[#allocation2 + $0xdc] sm:$0xf0]  ;;  %v4136_v2 = vld [vmem:[#allocation2 + $0xc4] sm:$0xf]  ;;  %v3485_v5 = vld [vmem:[#allocation2 + $0xc8] sm:$0xf] }
  0x20   : > { %p254_p13 = scmp.lt.s32.totalorder %s253_s26, 37  ;;  %v3478_v3 = vor.u32 %v4140_v1, %v3477_v0  ;;  %v3479_v4 = vld [vmem:[#allocation2 + $0xe0] sm:$0xf0]  ;;  %v4141_v6 = vld [vmem:[#allocation2 + $0xe4] sm:$0xf0]  ;;  %s250_s15 = sand.u32 1, %s4467_s19  }
  0x21   : > { %v3482_v7 = vor.u32 %v4136_v2, %v3479_v4  ;;  %v3486_v8 = vor.u32 %v4141_v6, %v3485_v5  ;;  %v4137_v9 = vld [vmem:[#allocation2 + $0xcc] sm:$0xf]  ;;  %v3445_v11 = vld [vmem:[#allocation2 + $0x80] sm:$0xf]  ;;  %v4128_v14 = vld [vmem:[#allocation2 + $0x84] sm:$0xf] }
  0x22   : > { %s5774_s26 = smov (!%p254_p13, %s253_s26), 37  ;;  %v3487_v10 = vld [vmem:[#allocation2 + $0xe8] sm:$0xf0]  ;;  %573 = vmatpush.bf16.msra.mxu0 %v3478_v3  ;;  %v4132_v13 = vld [vmem:[#allocation2 + $0x9c] sm:$0xf0]  ;;  %s4275_s16 = smul.u32 304, %s250_s15 }
  0x23   : > { %s3342_s30 = sshll.u32 %s5774_s26, 2  ;;  %v3490_v12 = vor.u32 %v4137_v9, %v3487_v10  ;;  %v3447_v15 = vld [vmem:[#allocation2 + $0xa0] sm:$0xf0]  ;;  %631 = vmatpush.bf16.msra.mxu1 %v3482_v7  ;;  %689 = vmatpush.bf16.msra.mxu2 %v3486_v8  ;;  %v3446_v16 = vor.u32 %v4132_v13, %v3445_v11  ;;  %v3453_v18 = vld [vmem:[#allocation2 + $0x88] sm:$0xf]  ;;  %s4274_s26 = smul.u32 304, %s4536_s22 }
  0x24   : > { %v3450_v17 = vor.u32 %v4128_v14, %v3447_v15  ;;  %v4133_v19 = vld [vmem:[#allocation2 + $0xa4] sm:$0xf0]  ;;  %v4129_v20 = vld [vmem:[#allocation2 + $0x8c] sm:$0xf]  ;;  %v3413_v23 = vld [vmem:[#allocation2 + $0x40] sm:$0xf]  ;;  %s4597_s8 = scalar_lea.vmem %s5544_s0, %s3342_s30 }
  0x25   : > { %747 = vmatpush.bf16.msra.mxu3 %v3490_v12  ;;  %v3454_v21 = vor.u32 %v4133_v19, %v3453_v18  ;;  %v3455_v22 = vld [vmem:[#allocation2 + $0xa8] sm:$0xf0]  ;;  %v4124_v24 = vld [vmem:[#allocation2 + $0x5c] sm:$0xf0]  ;;  %v4120_v26 = vld [vmem:[#allocation2 + $0x44] sm:$0xf]  ;;  %s3246_s7 = scalar_lea.hbm %s5549_s5, %s4274_s26 }
  0x26   : > { %v3458_v25 = vor.u32 %v4129_v20, %v3455_v22  ;;  %v3415_v27 = vld [vmem:[#allocation2 + $0x60] sm:$0xf0]  ;;  %v3421_v28 = vld [vmem:[#allocation2 + $0x48] sm:$0xf]  ;;  %574 = vmatpush.bf16.msra.mxu0 %v3446_v16  ;;  %v3414_v29 = vor.u32 %v4124_v24, %v3413_v23  ;;  %v4121_v31 = vld [vmem:[#allocation2 + $0x4c] sm:$0xf] }
  0x27   : > { %v4125_v30 = vld [vmem:[#allocation2 + $0x64] sm:$0xf0]  ;;  %v3423_v32 = vld [vmem:[#allocation2 + $0x68] sm:$0xf0]  ;;  %632 = vmatpush.bf16.msra.mxu1 %v3450_v17  ;;  %690 = vmatpush.bf16.msra.mxu2 %v3454_v21  ;;  %v3418_v33 = vor.u32 %v4120_v26, %v3415_v27  ;;  %v3381_v35 = vld [vmem:[#allocation2] sm:$0xf] }
  0x28   : > { %v3422_v34 = vor.u32 %v4125_v30, %v3421_v28  ;;  %v4116_v36 = vld [vmem:[#allocation2 + $0x1c] sm:$0xf0]  ;;  %v4112_v37 = vld [vmem:[#allocation2 + $0x4] sm:$0xf]  ;;  %v3426_v38 = vor.u32 %v4121_v31, %v3423_v32  ;;  %v3389_v40 = vld [vmem:[#allocation2 + $0x8] sm:$0xf] }
  0x29   : > { %748 = vmatpush.bf16.msra.mxu3 %v3458_v25  ;;  %v3383_v39 = vld [vmem:[#allocation2 + $0x20] sm:$0xf0]  ;;  %v4117_v41 = vld [vmem:[#allocation2 + $0x24] sm:$0xf0]  ;;  %v4113_v42 = vld [vmem:[#allocation2 + $0xc] sm:$0xf]  ;;  %v3382_v44 = vor.u32 %v4116_v36, %v3381_v35 }
  0x2a   : > { %v3391_v43 = vld [vmem:[#allocation2 + $0x28] sm:$0xf0]  ;;  %575 = vmatpush.bf16.msra.mxu0 %v3414_v29  ;;  %v3501_v45 = vld [vmem:[#allocation2 + $0xd8] sm:$0xf]  ;;  %v3386_v47 = vor.u32 %v4112_v37, %v3383_v39  ;;  %v3390_v48 = vor.u32 %v4117_v41, %v3389_v40  ;;  %v4139_v49 = vld [vmem:[#allocation2 + $0xdc] sm:$0xf] }
  0x2b   : > { %v4143_v46 = vld [vmem:[#allocation2 + $0xf4] sm:$0xf0]  ;;  %633 = vmatpush.bf16.msra.mxu1 %v3418_v33  ;;  %691 = vmatpush.bf16.msra.mxu2 %v3422_v34  ;;  %v3503_v50 = vld [vmem:[#allocation2 + $0xf8] sm:$0xf0]  ;;  %v3394_v51 = vor.u32 %v4113_v42, %v3391_v43  ;;  %v3493_v53 = vld [vmem:[#allocation2 + $0xd0] sm:$0xf] }
  0x2c   : > { %v3502_v52 = vor.u32 %v4143_v46, %v3501_v45  ;;  %v4142_v54 = vld [vmem:[#allocation2 + $0xec] sm:$0xf0]  ;;  %v4600_v55 = vld [vmem:[%s4597_s8] sm:$0xff]  ;;  %v3506_v56 = vor.u32 %v4139_v49, %v3503_v50  ;;  %v4138_v57 = vld [vmem:[#allocation2 + $0xd4] sm:$0xf]  ;;  %s5280_s17 = scalar_lea.vmem [#allocation7], %s4275_s16 }
  0x2d   : > { %749 = vmatpush.bf16.msra.mxu3 %v3426_v38  ;;  %v3495_v58 = vld [vmem:[#allocation2 + $0xf0] sm:$0xf0]  ;;  %v3494_v59 = vor.u32 %v4142_v54, %v3493_v53  ;;  %v3469_v61 = vld [vmem:[#allocation2 + $0x98] sm:$0xf]  ;;  %v3461_v63 = vld [vmem:[#allocation2 + $0x90] sm:$0xf] }
  0x2e   : > { %576 = vmatpush.bf16.msra.mxu0 %v3382_v44  ;;  %v3498_v60 = vor.u32 %v4138_v57, %v3495_v58  ;;  %v4135_v62 = vld [vmem:[#allocation2 + $0xb4] sm:$0xf0]  ;;  %v4134_v1 = vld [vmem:[#allocation2 + $0xac] sm:$0xf0]  ;;  %v4131_v2 = vld [vmem:[#allocation2 + $0x9c] sm:$0xf] }
  0x2f   : > { %634 = vmatpush.bf16.msra.mxu1 %v3386_v47  ;;  %692 = vmatpush.bf16.msra.mxu2 %v3390_v48  ;;  %v3470_v0 = vor.u32 %v4135_v62, %v3469_v61  ;;  %v3471_v3 = vld [vmem:[#allocation2 + $0xb8] sm:$0xf0]  ;;  %v3462_v4 = vor.u32 %v4134_v1, %v3461_v63  ;;  %v4130_v6 = vld [vmem:[#allocation2 + $0x94] sm:$0xf]  ;;  %v4611_v9 = vld [vmem:[%s4597_s8 + $0x8] sm:$0xff]  ;;  %s3249_s9 = sshll.u32 %s3246_s7, 4  ;;  %s3250_s9 = int_to_ptr.hbm [resolvable:$true] %s3249_s9 }
  0x30   : > { %v3474_v5 = vor.u32 %v4131_v2, %v3471_v3  ;;  %v3463_v7 = vld [vmem:[#allocation2 + $0xb0] sm:$0xf0]  ;;  %v4633_v11 = vld [vmem:[%s4597_s8 + $0x18] sm:$0xff]  ;;  %v3429_v14 = vld [vmem:[#allocation2 + $0x50] sm:$0xf]  ;;  %s3234_s22 = scalar_lea.sflag [#allocation4], %s250_s15 }
  0x31   : > { %750 = vmatpush.bf16.msra.mxu3 %v3394_v51  ;;  %3507 = vmatmul.msk.bf16.vlgmr.msra.gmra.mxu0 %vm538_vm0, %v4600_v55  ;;  %v3466_v8 = vor.u32 %v4130_v6, %v3463_v7  ;;  %v4622_v10 = vld [vmem:[%s4597_s8 + $0x10] sm:$0xff]  ;;  %v3437_v12 = vld [vmem:[#allocation2 + $0x58] sm:$0xf]  ;;  %v4123_v17 = vld [vmem:[#allocation2 + $0x5c] sm:$0xf]  ;;  %s4419_s10 = sshra.s32 %s3250_s9, 4  ;;  %s4420_s10 = int_to_ptr.hbm [resolvable:$true] %s4419_s10 }
  0x32   : > { %3517 = vmatmul.msk.bf16.vlgmr.msra.gmra.mxu1 %vm538_vm0, %v4600_v55  ;;  %3527 = vmatmul.msk.bf16.vlgmr.msra.gmra.mxu2 %vm538_vm0, %v4600_v55  ;;  %v4127_v13 = vld [vmem:[#allocation2 + $0x74] sm:$0xf0]  ;;  %v4126_v16 = vld [vmem:[#allocation2 + $0x6c] sm:$0xf0]  ;;  %v3439_v18 = vld [vmem:[#allocation2 + $0x78] sm:$0xf0]  ;;  %p4426_p3 = scmp.lt.s32.totalorder %s4420_s10, %s5549_s5 }
  0x33   : > { %921 = vmatpush.bf16.msrb.mxu2 %v3502_v52  ;;  %805 = vmatpush.bf16.msrb.mxu0 %v3494_v59  ;;  %v3438_v15 = vor.u32 %v4127_v13, %v3437_v12  ;;  %v3430_v19 = vor.u32 %v4126_v16, %v3429_v14  ;;  %v3442_v20 = vor.u32 %v4123_v17, %v3439_v18  ;;  %v4122_v21 = vld [vmem:[#allocation2 + $0x54] sm:$0xf]  ;;  %v4644_v24 = vld [vmem:[%s4597_s8 + $0x20] sm:$0xff]  ;;  %v4655_v25 = vld [vmem:[%s4597_s8 + $0x28] sm:$0xff]  ;;  %s4421_s11 = scalar_lea.hbm %s4420_s10, 304  ;;  %s4425_s14 = scalar_lea.hbm %s5549_s5, 608 }
  0x34   : > { %3537 = vmatmul.msk.bf16.vlgmr.msra.gmra.mxu3 %vm538_vm0, %v4600_v55  ;;  %863 = vmatpush.bf16.msrb.mxu1 %v3498_v60  ;;  %v3431_v22 = vld [vmem:[#allocation2 + $0x70] sm:$0xf0]  ;;  %v3405_v26 = vld [vmem:[#allocation2 + $0x18] sm:$0xf]  ;;  %v3397_v28 = vld [vmem:[#allocation2 + $0x10] sm:$0xf]  ;;  %p4422_p0 = scmp.ne.s32.totalorder %s4420_s10, %s4421_s11  ;;  %p4427_p4 = scmp.lt.s32.totalorder %s4425_s14, %s4421_s11 }
  0x35   : > { %979 = vmatpush.bf16.msrb.mxu3 %v3506_v56  ;;  %v3434_v23 = vor.u32 %v4122_v21, %v3431_v22  ;;  %v4119_v27 = vld [vmem:[#allocation2 + $0x34] sm:$0xf0]  ;;  %v4118_v30 = vld [vmem:[#allocation2 + $0x2c] sm:$0xf0]  ;;  %v4115_v31 = vld [vmem:[#allocation2 + $0x1c] sm:$0xf] }
  0x36   : > { %v3406_v29 = vor.u32 %v4119_v27, %v3405_v26  ;;  %v3407_v32 = vld [vmem:[#allocation2 + $0x38] sm:$0xf0]  ;;  %v3398_v33 = vor.u32 %v4118_v30, %v3397_v28  ;;  %v4114_v35 = vld [vmem:[#allocation2 + $0x14] sm:$0xf]  ;;  %v4690_v40 = vld [vmem:[%s5546_s2] sm:$0xff]  ;;  %p4423_p1 = pnand %p4422_p0, %p4553_p5  ;;  %p4428_p7 = por %p4427_p4, %p4426_p3 }
  0x37   : > { %922 = vmatpush.bf16.msrb.mxu2 %v3470_v0  ;;  %806 = vmatpush.bf16.msrb.mxu0 %v3462_v4  ;;  %v3410_v34 = vor.u32 %v4115_v31, %v3407_v32  ;;  %v3399_v36 = vld [vmem:[#allocation2 + $0x30] sm:$0xf0]  ;;  %v4677_v39 = vld [vmem:[%s4597_s8 + $0x38] sm:$0xff]  ;;  %v4111_v41 = vld [vmem:[%s4597_s8 + $0x40] sm:$0xff]  ;;  %v4694_v43 = vperm.slane %v4690_v40, 0  ;;  %v4697_v45 = vperm.slane %v4690_v40, 1 }
  0x38   : > { %864 = vmatpush.bf16.msrb.mxu1 %v3466_v8  ;;  %v3402_v37 = vor.u32 %v4114_v35, %v3399_v36  ;;  %v4666_v38 = vld [vmem:[%s4597_s8 + $0x30] sm:$0xff]  ;;  %v4191_v49 = vld [vmem:[#allocation5 + $0x174] sm:$0xf0]  ;;  %v4706_v57 = vperm.slane %v4690_v40, 2  ;;  %v279_v60 = vld [vmem:[%s4597_s8 + $0x48] sm:$0xf]  ;;  %p4424_p2 = pneg %p4423_p1 }
  0x39   : > { %980 = vmatpush.bf16.msrb.mxu3 %v3474_v5  ;;  %5618 = vst [vmem:[#allocation11_spill] sm:$0xff] %v4694_v43  ;;  %v3773_v48 = vld [vmem:[#allocation5 + $0x170] sm:$0xf]  ;;  %v4159_v53 = vld [vmem:[#allocation5 + $0x74] sm:$0xf0]  ;;  %v4710_v0 = vperm.slane %v4690_v40, 3  ;;  %v367_v6 = vunpack.c.l.b16 %v279_v60 }
  0x3a   : > { %5619 = vst [vmem:[#allocation12_spill] sm:$0xff] %v4697_v45  ;;  %v3645_v50 = vld [vmem:[#allocation5 + $0x70] sm:$0xf]  ;;  %v3774_v52 = vor.u32 %v4191_v49, %v3773_v48  ;;  %v4207_v56 = vld [vmem:[#allocation5 + $0x1f4] sm:$0xf0]  ;;  %p4429_p8 = pnand %p4428_p7, %p4424_p2 }
  0x3b   : > { %923 = vmatpush.bf16.msrb.mxu2 %v3438_v15  ;;  %807 = vmatpush.bf16.msrb.mxu0 %v3430_v19  ;;  %v3837_v54 = vld [vmem:[#allocation5 + $0x1f0] sm:$0xf]  ;;  %5620 = vst [vmem:[#allocation13_spill] sm:$0xff] %v4706_v57  ;;  %v3646_v61 = vor.u32 %v4159_v53, %v3645_v50  ;;  %v4175_v16 = vld [vmem:[#allocation5 + $0xf4] sm:$0xf0]  ;;  %v4718_v22 = vpack.c.b16 %v367_v6, %v367_v6 }
  0x3c   : > { %865 = vmatpush.bf16.msrb.mxu1 %v3434_v23  ;;  %v3838_v62 = vor.u32 %v4207_v56, %v3837_v54  ;;  %5621 = vst [vmem:[#allocation14_spill] sm:$0xff] %v4710_v0  ;;  %v3709_v15 = vld [vmem:[#allocation5 + $0xf0] sm:$0xf] }
  0x3d   : > { %981 = vmatpush.bf16.msrb.mxu3 %v3442_v20  ;;  %v3710_v19 = vor.u32 %v4175_v16, %v3709_v15  ;;  %v4205_v15 = vld [vmem:[#allocation5 + $0x1e4] sm:$0xf0]  ;;  %v3701_v16 = vld [vmem:[#allocation5 + $0xe0] sm:$0xf] }
  0x3f   : > { %924 = vmatpush.bf16.msrb.mxu2 %v3406_v29  ;;  %808 = vmatpush.bf16.msrb.mxu0 %v3398_v33 }
  0x40   : > { %866 = vmatpush.bf16.msrb.mxu1 %v3402_v37 }
  0x41   : > { %3508 = vmatmul.msk.bf16.gmra.mxu0 %vm538_vm0, %v4611_v9  ;;  %982 = vmatpush.bf16.msrb.mxu3 %v3410_v34 }
  0x42   : > { %3518 = vmatmul.msk.bf16.gmra.mxu1 %vm538_vm0, %v4611_v9  ;;  %3528 = vmatmul.msk.bf16.gmra.mxu2 %vm538_vm0, %v4611_v9 }
  0x43   : > { %2307 = vmatpush.bf16.msra.mxu2 %v3774_v52  ;;  %2191 = vmatpush.bf16.msra.mxu0 %v3646_v61 }
  0x44   : > { %3538 = vmatmul.msk.bf16.gmra.mxu3 %vm538_vm0, %v4611_v9  ;;  %2249 = vmatpush.bf16.msra.mxu1 %v3710_v19 }
  0x45   : > { %2365 = vmatpush.bf16.msra.mxu3 %v3838_v62 }
  0x51   : > { %3509 = vmatmul.msk.bf16.gmra.mxu0 %vm538_vm0, %v4622_v10 }
  0x52   : > { %3519 = vmatmul.msk.bf16.gmra.mxu1 %vm538_vm0, %v4622_v10  ;;  %3529 = vmatmul.msk.bf16.gmra.mxu2 %vm538_vm0, %v4622_v10 }
  0x54   : > { %3539 = vmatmul.msk.bf16.gmra.mxu3 %vm538_vm0, %v4622_v10 }
  0x61   : > { %3510 = vmatmul.msk.bf16.gmra.mxu0 %vm538_vm0, %v4633_v11 }
  0x62   : > { %3520 = vmatmul.msk.bf16.gmra.mxu1 %vm538_vm0, %v4633_v11  ;;  %3530 = vmatmul.msk.bf16.gmra.mxu2 %vm538_vm0, %v4633_v11 }
  0x64   : > { %3540 = vmatmul.msk.bf16.gmra.mxu3 %vm538_vm0, %v4633_v11 }
  0x71   : > { %3511 = vmatmul.msk.bf16.gmra.mxu0 %vm538_vm0, %v4644_v24 }
  0x72   : > { %3521 = vmatmul.msk.bf16.gmra.mxu1 %vm538_vm0, %v4644_v24  ;;  %3531 = vmatmul.msk.bf16.gmra.mxu2 %vm538_vm0, %v4644_v24 }
  0x74   : > { %3541 = vmatmul.msk.bf16.gmra.mxu3 %vm538_vm0, %v4644_v24 }
  0x81   : > { %3512 = vmatmul.msk.bf16.gmra.mxu0 %vm538_vm0, %v4655_v25 }
  0x82   : > { %3522 = vmatmul.msk.bf16.gmra.mxu1 %vm538_vm0, %v4655_v25  ;;  %3532 = vmatmul.msk.bf16.gmra.mxu2 %vm538_vm0, %v4655_v25 }
  0x84   : > { %3542 = vmatmul.msk.bf16.gmra.mxu3 %vm538_vm0, %v4655_v25 }
  0x91   : > { %3513 = vmatmul.msk.bf16.gmra.mxu0 %vm538_vm0, %v4666_v38 }
  0x92   : > { %3523 = vmatmul.msk.bf16.gmra.mxu1 %vm538_vm0, %v4666_v38  ;;  %3533 = vmatmul.msk.bf16.gmra.mxu2 %vm538_vm0, %v4666_v38 }
  0x94   : > { %3543 = vmatmul.msk.bf16.gmra.mxu3 %vm538_vm0, %v4666_v38 }
  0xa1   : > { %3514 = vmatmul.msk.bf16.gmra.mxu0 %vm538_vm0, %v4677_v39 }
  0xa2   : > { %3524 = vmatmul.msk.bf16.gmra.mxu1 %vm538_vm0, %v4677_v39  ;;  %3534 = vmatmul.msk.bf16.gmra.mxu2 %vm538_vm0, %v4677_v39 }
  0xa4   : > { %3544 = vmatmul.msk.bf16.gmra.mxu3 %vm538_vm0, %v4677_v39 }
  0xae   : > { %v578_v42 = vpop.f32.mrf.mxu0 }
  0xaf   : > { %v636_v44 = vpop.f32.mrf.mxu1  ;;  %v579_v46 = vadd.f32 %v578_v42, %v4694_v43 }
  0xb0   : > { %v637_v47 = vadd.f32 %v636_v44, %v4697_v45 }
  0xb1   : > { %3515 = vmatmul.msk.bf16.gmra.mxu0 %vm538_vm0, %v4111_v41  ;;  %v1033_v63 = vmul.f32 0.01, %v579_v46 }
  0xb2   : > { %3525 = vmatmul.msk.bf16.gmra.mxu1 %vm538_vm0, %v4111_v41  ;;  %3535 = vmatmul.msk.bf16.gmra.mxu2 %vm538_vm0, %v4111_v41  ;;  %v1034_v3 = vmul.f32 0.01, %v637_v47 }
  0xb3   : > { %v1185_v12 = vmax.f32 %v579_v46, %v1033_v63 }
  0xb4   : > { %3545 = vmatmul.msk.bf16.gmra.mxu3 %vm538_vm0, %v4111_v41  ;;  %v1186_v17 = vmax.f32 %v637_v47, %v1034_v3  ;;  %v4189_v3 = vld [vmem:[#allocation5 + $0x164] sm:$0xf0] }
  0xb5   : > { %v694_v51 = vpop.f32.mrf.mxu2 }
  0xb6   : > { %v580_v59 = vpop.f32.mrf.mxu0  ;;  %v695_v7 = vadd.f32 %v694_v51, %v4706_v57 }
  0xb7   : > { %v752_v58 = vpop.f32.mrf.mxu3  ;;  %v581_v1 = vadd.f32 %v580_v59, %v4694_v43  ;;  %v638_v2 = vpop.f32.mrf.mxu1 }
  0xb8   : > { %v639_v4 = vadd.f32 %v638_v2, %v4697_v45  ;;  %v753_v13 = vadd.f32 %v752_v58, %v4710_v0  ;;  %v1035_v23 = vmul.f32 0.01, %v695_v7  ;;  %v3765_v2 = vld [vmem:[#allocation5 + $0x160] sm:$0xf] }
  0xb9   : > { %v1041_v5 = vmul.f32 0.01, %v581_v1  ;;  %v3766_v6 = vor.u32 %v4189_v3, %v3765_v2 }
  0xba   : > { %v1042_v8 = vmul.f32 0.01, %v639_v4  ;;  %v1036_v30 = vmul.f32 0.01, %v753_v13  ;;  %v1187_v35 = vmax.f32 %v695_v7, %v1035_v23  ;;  %v3637_v7 = vld [vmem:[#allocation5 + $0x60] sm:$0xf] }
  0xbb   : > { %v1193_v14 = vmax.f32 %v581_v1, %v1041_v5  ;;  %2308 = vmatpush.bf16.msra.mxu2 %v3766_v6  ;;  %v4187_v6 = vld [vmem:[#allocation5 + $0x154] sm:$0xf0] }
  0xbc   : > { %v1194_v18 = vmax.f32 %v639_v4, %v1042_v8  ;;  %v1188_v37 = vmax.f32 %v753_v13, %v1036_v30  ;;  %v4157_v8 = vld [vmem:[#allocation5 + $0x64] sm:$0xf0] }
  0xbd   : > { %v4716_v20 = vpack.c.bf16 %v1193_v14, %v1185_v12  ;;  %v696_v21 = vpop.f32.mrf.mxu2  ;;  %v3829_v12 = vld [vmem:[#allocation5 + $0x1e0] sm:$0xf]  ;;  %v3638_v14 = vor.u32 %v4157_v8, %v3637_v7  ;;  %v3629_v7 = vld [vmem:[#allocation5 + $0x50] sm:$0xf] }
  0xbe   : > { %v4720_v26 = vpack.c.bf16 %v1194_v18, %v1186_v17  ;;  %v697_v27 = vadd.f32 %v696_v21, %v4706_v57  ;;  %v583_v29 = vpop.f32.mrf.mxu0  ;;  %v4173_v17 = vld [vmem:[#allocation5 + $0xe4] sm:$0xf0] }
  0xbf   : > { %5622 = vst [vmem:[#allocation15_spill] sm:$0xff] %v4716_v20  ;;  %v754_v28 = vpop.f32.mrf.mxu3  ;;  %v641_v32 = vpop.f32.mrf.mxu1  ;;  %v584_v42 = vadd.f32 %v583_v29, %v4694_v43  ;;  %2192 = vmatpush.bf16.msra.mxu0 %v3638_v14  ;;  %v3821_v14 = vld [vmem:[#allocation5 + $0x1d0] sm:$0xf] }
  0xc0   : > { %5623 = vst [vmem:[#allocation16_spill] sm:$0xff] %v4720_v26  ;;  %v755_v31 = vadd.f32 %v754_v28, %v4710_v0  ;;  %v1043_v33 = vmul.f32 0.01, %v697_v27  ;;  %v642_v46 = vadd.f32 %v641_v32, %v4697_v45  ;;  %v3702_v28 = vor.u32 %v4173_v17, %v3701_v16 }
  0xc1   : > { %3516 = vmatmul.msk.bf16.gmra.mxu0 %vm538_vm0, %v4718_v22  ;;  %v1049_v51 = vmul.f32 0.01, %v584_v42 }
  0xc2   : > { %v1044_v34 = vmul.f32 0.01, %v755_v31  ;;  %v1195_v36 = vmax.f32 %v697_v27, %v1043_v33  ;;  %3526 = vmatmul.msk.bf16.gmra.mxu1 %vm538_vm0, %v4718_v22  ;;  %3536 = vmatmul.msk.bf16.gmra.mxu2 %vm538_vm0, %v4718_v22  ;;  %v1050_v56 = vmul.f32 0.01, %v642_v46  ;;  %v3830_v27 = vor.u32 %v4205_v15, %v3829_v12  ;;  %v4203_v15 = vld [vmem:[#allocation5 + $0x1d4] sm:$0xf0] }
  0xc3   : > { %v1201_v61 = vmax.f32 %v584_v42, %v1049_v51  ;;  %2250 = vmatpush.bf16.msra.mxu1 %v3702_v28 }
  0xc4   : > { %v1196_v41 = vmax.f32 %v755_v31, %v1044_v34  ;;  %3546 = vmatmul.msk.bf16.gmra.mxu3 %vm538_vm0, %v4718_v22  ;;  %v4733_v44 = vpack.c.bf16 %v1195_v36, %v1187_v35  ;;  %v1202_v4 = vmax.f32 %v642_v46, %v1050_v56 }
  0xc5   : > { %v699_v48 = vpop.f32.mrf.mxu2  ;;  %2366 = vmatpush.bf16.msra.mxu3 %v3830_v27  ;;  %v3822_v27 = vor.u32 %v4203_v15, %v3821_v14 }
  0xc6   : > { %5624 = vst [vmem:[#allocation17_spill] sm:$0xff] %v4733_v44  ;;  %v4736_v47 = vpack.c.bf16 %v1196_v41, %v1188_v37  ;;  %v585_v50 = vpop.f32.mrf.mxu0  ;;  %v700_v52 = vadd.f32 %v699_v48, %v4706_v57 }
  0xc7   : > { %v757_v49 = vpop.f32.mrf.mxu3  ;;  %v586_v53 = vadd.f32 %v585_v50, %v4694_v43  ;;  %v643_v54 = vpop.f32.mrf.mxu1 }
  0xc8   : > { %5625 = vst [vmem:[#allocation18_spill] sm:$0xff] %v4736_v47  ;;  %v644_v58 = vadd.f32 %v643_v54, %v4697_v45  ;;  %v1051_v62 = vmul.f32 0.01, %v700_v52  ;;  %v758_v63 = vadd.f32 %v757_v49, %v4710_v0 }
  0xc9   : > { %v1057_v59 = vmul.f32 0.01, %v586_v53  ;;  %2367 = vmatpush.bf16.msra.mxu3 %v3822_v27 }
  0xca   : > { %v1058_v60 = vmul.f32 0.01, %v644_v58  ;;  %v1052_v30 = vmul.f32 0.01, %v758_v63  ;;  %v1203_v35 = vmax.f32 %v700_v52, %v1051_v62 }
  0xcb   : > { %v1209_v1 = vmax.f32 %v586_v53, %v1057_v59 }
  0xcc   : > { %v1210_v5 = vmax.f32 %v644_v58, %v1058_v60  ;;  %v1204_v37 = vmax.f32 %v758_v63, %v1052_v30 }
  0xcd   : > { %v701_v13 = vpop.f32.mrf.mxu2  ;;  %v4742_v18 = vpack.c.bf16 %v1209_v1, %v1201_v61 }
  0xce   : > { %v702_v19 = vadd.f32 %v701_v13, %v4706_v57  ;;  %v588_v23 = vpop.f32.mrf.mxu0  ;;  %v4745_v29 = vpack.c.bf16 %v1210_v5, %v1202_v4  ;;  %v3757_v5 = vld [vmem:[#allocation5 + $0x150] sm:$0xf]  ;;  %v4155_v13 = vld [vmem:[#allocation5 + $0x54] sm:$0xf0] }
  0xcf   : > { %5626 = vst [vmem:[#allocation19_spill] sm:$0xff] %v4742_v18  ;;  %v759_v21 = vpop.f32.mrf.mxu3  ;;  %v646_v32 = vpop.f32.mrf.mxu1  ;;  %v589_v42 = vadd.f32 %v588_v23, %v4694_v43  ;;  %v3758_v12 = vor.u32 %v4187_v6, %v3757_v5  ;;  %v3630_v23 = vor.u32 %v4155_v13, %v3629_v7 }
  0xd0   : > { %5627 = vst [vmem:[#allocation20_spill] sm:$0xff] %v4745_v29  ;;  %v760_v31 = vadd.f32 %v759_v21, %v4710_v0  ;;  %v1059_v33 = vmul.f32 0.01, %v702_v19  ;;  %v647_v46 = vadd.f32 %v646_v32, %v4697_v45 }
  0xd1   : > { %3547 = vmatmul.msk.bf16.vlgmr.msrb.gmra.mxu0 %vm538_vm0, %v4600_v55  ;;  %v1065_v53 = vmul.f32 0.01, %v589_v42  ;;  %2309 = vmatpush.bf16.msra.mxu2 %v3758_v12 }
  0xd2   : > { %v1060_v34 = vmul.f32 0.01, %v760_v31  ;;  %v1211_v36 = vmax.f32 %v702_v19, %v1059_v33  ;;  %3557 = vmatmul.msk.bf16.vlgmr.msrb.gmra.mxu1 %vm538_vm0, %v4600_v55  ;;  %3567 = vmatmul.msk.bf16.vlgmr.msrb.gmra.mxu2 %vm538_vm0, %v4600_v55  ;;  %v1066_v59 = vmul.f32 0.01, %v647_v46 }
  0xd3   : > { %v1217_v62 = vmax.f32 %v589_v42, %v1065_v53  ;;  %2193 = vmatpush.bf16.msra.mxu0 %v3630_v23 }
  0xd4   : > { %v1212_v41 = vmax.f32 %v760_v31, %v1060_v34  ;;  %3577 = vmatmul.msk.bf16.vlgmr.msrb.gmra.mxu3 %vm538_vm0, %v4600_v55  ;;  %v4758_v48 = vpack.c.bf16 %v1211_v36, %v1203_v35  ;;  %v1218_v3 = vmax.f32 %v647_v46, %v1066_v59  ;;  %v3693_v46 = vld [vmem:[#allocation5 + $0xd0] sm:$0xf] }
  0xd5   : > { %v704_v49 = vpop.f32.mrf.mxu2 }
  0xd6   : > { %5628 = vst [vmem:[#allocation21_spill] sm:$0xff] %v4758_v48  ;;  %v4760_v50 = vpack.c.bf16 %v1212_v41, %v1204_v37  ;;  %v590_v52 = vpop.f32.mrf.mxu0  ;;  %v705_v54 = vadd.f32 %v704_v49, %v4706_v57  ;;  %v4171_v49 = vld [vmem:[#allocation5 + $0xd4] sm:$0xf0] }
  0xd7   : > { %v762_v51 = vpop.f32.mrf.mxu3  ;;  %v591_v56 = vadd.f32 %v590_v52, %v4694_v43  ;;  %v648_v58 = vpop.f32.mrf.mxu1  ;;  %v3694_v52 = vor.u32 %v4171_v49, %v3693_v46  ;;  %v3621_v49 = vld [vmem:[#allocation5 + $0x40] sm:$0xf] }
  0xd8   : > { %5629 = vst [vmem:[#allocation22_spill] sm:$0xff] %v4760_v50  ;;  %v649_v60 = vadd.f32 %v648_v58, %v4697_v45  ;;  %v1067_v63 = vmul.f32 0.01, %v705_v54  ;;  %v763_v1 = vadd.f32 %v762_v51, %v4710_v0 }
  0xd9   : > { %v1073_v61 = vmul.f32 0.01, %v591_v56  ;;  %2251 = vmatpush.bf16.msra.mxu1 %v3694_v52  ;;  %v3813_v52 = vld [vmem:[#allocation5 + $0x1c0] sm:$0xf] }
  0xda   : > { %v1074_v55 = vmul.f32 0.01, %v649_v60  ;;  %v1068_v30 = vmul.f32 0.01, %v763_v1  ;;  %v1219_v35 = vmax.f32 %v705_v54, %v1067_v63 }
  0xdb   : > { %v1225_v2 = vmax.f32 %v591_v56, %v1073_v61 }
  0xdc   : > { %v1226_v4 = vmax.f32 %v649_v60, %v1074_v55  ;;  %v1220_v37 = vmax.f32 %v763_v1, %v1068_v30 }
  0xdd   : > { %v706_v8 = vpop.f32.mrf.mxu2  ;;  %v4766_v16 = vpack.c.bf16 %v1225_v2, %v1217_v62 }
  0xde   : > { %v707_v17 = vadd.f32 %v706_v8, %v4706_v57  ;;  %v593_v21 = vpop.f32.mrf.mxu0  ;;  %v4769_v28 = vpack.c.bf16 %v1226_v4, %v1218_v3 }
  0xdf   : > { %5630 = vst [vmem:[#allocation23_spill] sm:$0xff] %v4766_v16  ;;  %v764_v19 = vpop.f32.mrf.mxu3  ;;  %v651_v32 = vpop.f32.mrf.mxu1  ;;  %v594_v42 = vadd.f32 %v593_v21, %v4694_v43 }
  0xe0   : > { %5631 = vst [vmem:[#allocation24_spill] sm:$0xff] %v4769_v28  ;;  %v765_v31 = vadd.f32 %v764_v19, %v4710_v0  ;;  %v1075_v33 = vmul.f32 0.01, %v707_v17  ;;  %v652_v51 = vadd.f32 %v651_v32, %v4697_v45 }
  0xe1   : > { %3548 = vmatmul.msk.bf16.gmra.mxu0 %vm538_vm0, %v4611_v9  ;;  %v1081_v60 = vmul.f32 0.01, %v594_v42 }
  0xe2   : > { %v1076_v34 = vmul.f32 0.01, %v765_v31  ;;  %v1227_v36 = vmax.f32 %v707_v17, %v1075_v33  ;;  %3558 = vmatmul.msk.bf16.gmra.mxu1 %vm538_vm0, %v4611_v9  ;;  %3568 = vmatmul.msk.bf16.gmra.mxu2 %vm538_vm0, %v4611_v9  ;;  %v1082_v62 = vmul.f32 0.01, %v652_v51 }
  0xe3   : > { %v1233_v3 = vmax.f32 %v594_v42, %v1081_v60  ;;  %v4201_v60 = vld [vmem:[#allocation5 + $0x1c4] sm:$0xf0] }
  0xe4   : > { %v1228_v41 = vmax.f32 %v765_v31, %v1076_v34  ;;  %3578 = vmatmul.msk.bf16.gmra.mxu3 %vm538_vm0, %v4611_v9  ;;  %v4782_v53 = vpack.c.bf16 %v1227_v36, %v1219_v35  ;;  %v1234_v6 = vmax.f32 %v652_v51, %v1082_v62  ;;  %v4153_v51 = vld [vmem:[#allocation5 + $0x44] sm:$0xf0] }
  0xe5   : > { %v709_v54 = vpop.f32.mrf.mxu2 }
  0xe6   : > { %5632 = vst [vmem:[#allocation25_spill] sm:$0xff] %v4782_v53  ;;  %v4784_v56 = vpack.c.bf16 %v1228_v41, %v1220_v37  ;;  %v595_v59 = vpop.f32.mrf.mxu0  ;;  %v710_v1 = vadd.f32 %v709_v54, %v4706_v57  ;;  %v3749_v37 = vld [vmem:[#allocation5 + $0x140] sm:$0xf]  ;;  %v4185_v41 = vld [vmem:[#allocation5 + $0x144] sm:$0xf0] }
  0xe7   : > { %v767_v58 = vpop.f32.mrf.mxu3  ;;  %v596_v61 = vadd.f32 %v595_v59, %v4694_v43  ;;  %v653_v55 = vpop.f32.mrf.mxu1  ;;  %v3750_v46 = vor.u32 %v4185_v41, %v3749_v37  ;;  %v3622_v59 = vor.u32 %v4153_v51, %v3621_v49 }
  0xe8   : > { %5633 = vst [vmem:[#allocation26_spill] sm:$0xff] %v4784_v56  ;;  %v654_v9 = vadd.f32 %v653_v55, %v4697_v45  ;;  %v768_v4 = vadd.f32 %v767_v58, %v4710_v0  ;;  %v1083_v13 = vmul.f32 0.01, %v710_v1  ;;  %v4169_v55 = vld [vmem:[#allocation5 + $0xc4] sm:$0xf0] }
  0xe9   : > { %v1089_v63 = vmul.f32 0.01, %v596_v61  ;;  %2310 = vmatpush.bf16.msra.mxu2 %v3750_v46  ;;  %2194 = vmatpush.bf16.msra.mxu0 %v3622_v59 }
  0xea   : > { %v1090_v2 = vmul.f32 0.01, %v654_v9  ;;  %v1084_v21 = vmul.f32 0.01, %v768_v4  ;;  %v1235_v32 = vmax.f32 %v710_v1, %v1083_v13 }
  0xeb   : > { %v1241_v5 = vmax.f32 %v596_v61, %v1089_v63  ;;  %v3685_v61 = vld [vmem:[#allocation5 + $0xc0] sm:$0xf] }
  0xec   : > { %v1242_v7 = vmax.f32 %v654_v9, %v1090_v2  ;;  %v1236_v34 = vmax.f32 %v768_v4, %v1084_v21  ;;  %v3686_v1 = vor.u32 %v4169_v55, %v3685_v61  ;;  %v3741_v61 = vld [vmem:[#allocation5 + $0x130] sm:$0xf]  ;;  %v4183_v55 = vld [vmem:[#allocation5 + $0x134] sm:$0xf0] }
  0xed   : > { %v711_v8 = vpop.f32.mrf.mxu2  ;;  %v4790_v12 = vpack.c.bf16 %v1241_v5, %v1233_v3 }
  0xee   : > { %v712_v14 = vadd.f32 %v711_v8, %v4706_v57  ;;  %v598_v17 = vpop.f32.mrf.mxu0  ;;  %v4793_v19 = vpack.c.bf16 %v1242_v7, %v1234_v6  ;;  %2252 = vmatpush.bf16.msra.mxu1 %v3686_v1  ;;  %v3742_v1 = vor.u32 %v4183_v55, %v3741_v61 }
  0xef   : > { %5634 = vst [vmem:[#allocation27_spill] sm:$0xff] %v4790_v12  ;;  %v769_v15 = vpop.f32.mrf.mxu3  ;;  %v656_v27 = vpop.f32.mrf.mxu1  ;;  %v599_v36 = vadd.f32 %v598_v17, %v4694_v43 }
  0xf0   : > { %5635 = vst [vmem:[#allocation28_spill] sm:$0xff] %v4793_v19  ;;  %v770_v23 = vadd.f32 %v769_v15, %v4710_v0  ;;  %v1091_v30 = vmul.f32 0.01, %v712_v14  ;;  %v657_v42 = vadd.f32 %v656_v27, %v4697_v45  ;;  %2311 = vmatpush.bf16.msra.mxu2 %v3742_v1 }
  0xf1   : > { %3549 = vmatmul.msk.bf16.gmra.mxu0 %vm538_vm0, %v4622_v10  ;;  %v1097_v2 = vmul.f32 0.01, %v599_v36 }
  0xf2   : > { %v1092_v31 = vmul.f32 0.01, %v770_v23  ;;  %v1243_v33 = vmax.f32 %v712_v14, %v1091_v30  ;;  %3559 = vmatmul.msk.bf16.gmra.mxu1 %vm538_vm0, %v4622_v10  ;;  %3569 = vmatmul.msk.bf16.gmra.mxu2 %vm538_vm0, %v4622_v10  ;;  %v1098_v5 = vmul.f32 0.01, %v657_v42 }
  0xf3   : > { %v1249_v14 = vmax.f32 %v599_v36, %v1097_v2  ;;  %v4151_v2 = vld [vmem:[#allocation5 + $0x34] sm:$0xf0] }
  0xf4   : > { %v1244_v35 = vmax.f32 %v770_v23, %v1092_v31  ;;  %3579 = vmatmul.msk.bf16.gmra.mxu3 %vm538_vm0, %v4622_v10  ;;  %v4806_v54 = vpack.c.bf16 %v1243_v33, %v1235_v32  ;;  %v3814_v10 = vor.u32 %v4201_v60, %v3813_v52  ;;  %v1250_v21 = vmax.f32 %v657_v42, %v1098_v5 }
  0xf5   : > { %v714_v58 = vpop.f32.mrf.mxu2 }
  0xf6   : > { %5636 = vst [vmem:[#allocation29_spill] sm:$0xff] %v4806_v54  ;;  %v4808_v62 = vpack.c.bf16 %v1244_v35, %v1236_v34  ;;  %v600_v63 = vpop.f32.mrf.mxu0  ;;  %2368 = vmatpush.bf16.msra.mxu3 %v3814_v10  ;;  %v715_v8 = vadd.f32 %v714_v58, %v4706_v57 }
  0xf7   : > { %v772_v9 = vpop.f32.mrf.mxu3  ;;  %v601_v3 = vadd.f32 %v600_v63, %v4694_v43  ;;  %v658_v4 = vpop.f32.mrf.mxu1 }
  0xf8   : > { %5637 = vst [vmem:[#allocation30_spill] sm:$0xff] %v4808_v62  ;;  %v659_v6 = vadd.f32 %v658_v4, %v4697_v45  ;;  %v773_v15 = vadd.f32 %v772_v9, %v4710_v0  ;;  %v1099_v31 = vmul.f32 0.01, %v715_v8  ;;  %v3613_v9 = vld [vmem:[#allocation5 + $0x30] sm:$0xf] }
  0xf9   : > { %v1105_v7 = vmul.f32 0.01, %v601_v3  ;;  %v4199_v4 = vld [vmem:[#allocation5 + $0x1b4] sm:$0xf0] }
  0xfa   : > { %v1106_v13 = vmul.f32 0.01, %v659_v6  ;;  %v1100_v37 = vmul.f32 0.01, %v773_v15  ;;  %v1251_v42 = vmax.f32 %v715_v8, %v1099_v31  ;;  %v3614_v8 = vor.u32 %v4151_v2, %v3613_v9 }
  0xfb   : > { %v1257_v17 = vmax.f32 %v601_v3, %v1105_v7  ;;  %v3805_v3 = vld [vmem:[#allocation5 + $0x1b0] sm:$0xf] }
  0xfc   : > { %v1258_v23 = vmax.f32 %v659_v6, %v1106_v13  ;;  %v1252_v52 = vmax.f32 %v773_v15, %v1100_v37  ;;  %v3806_v13 = vor.u32 %v4199_v4, %v3805_v3  ;;  %2195 = vmatpush.bf16.msra.mxu0 %v3614_v8  ;;  %v3677_v37 = vld [vmem:[#allocation5 + $0xb0] sm:$0xf] }
  0xfd   : > { %v716_v27 = vpop.f32.mrf.mxu2  ;;  %v4814_v30 = vpack.c.bf16 %v1257_v17, %v1249_v14 }
  0xfe   : > { %v717_v32 = vadd.f32 %v716_v27, %v4706_v57  ;;  %v603_v34 = vpop.f32.mrf.mxu0  ;;  %v4817_v35 = vpack.c.bf16 %v1258_v23, %v1250_v21  ;;  %2369 = vmatpush.bf16.msra.mxu3 %v3806_v13 }
  0xff   : > { %5638 = vst [vmem:[#allocation31_spill] sm:$0xff] %v4814_v30  ;;  %v774_v33 = vpop.f32.mrf.mxu3  ;;  %v661_v46 = vpop.f32.mrf.mxu1  ;;  %v604_v59 = vadd.f32 %v603_v34, %v4694_v43 }
 0x100   : > { %5639 = vst [vmem:[#allocation32_spill] sm:$0xff] %v4817_v35  ;;  %v775_v41 = vadd.f32 %v774_v33, %v4710_v0  ;;  %v1107_v36 = vmul.f32 0.01, %v717_v32  ;;  %v662_v60 = vadd.f32 %v661_v46, %v4697_v45 }
 0x101   : > { %3550 = vmatmul.msk.bf16.gmra.mxu0 %vm538_vm0, %v4633_v11  ;;  %v1113_v14 = vmul.f32 0.01, %v604_v59 }
 0x102   : > { %v1108_v49 = vmul.f32 0.01, %v775_v41  ;;  %v1259_v51 = vmax.f32 %v717_v32, %v1107_v36  ;;  %3560 = vmatmul.msk.bf16.gmra.mxu1 %vm538_vm0, %v4633_v11  ;;  %3570 = vmatmul.msk.bf16.gmra.mxu2 %vm538_vm0, %v4633_v11  ;;  %v1114_v17 = vmul.f32 0.01, %v662_v60 }
 0x103   : > { %v1265_v32 = vmax.f32 %v604_v59, %v1113_v14 }
 0x104   : > { %v1260_v58 = vmax.f32 %v775_v41, %v1108_v49  ;;  %3580 = vmatmul.msk.bf16.gmra.mxu3 %vm538_vm0, %v4633_v11  ;;  %v4830_v63 = vpack.c.bf16 %v1259_v51, %v1251_v42  ;;  %v4167_v41 = vld [vmem:[#allocation5 + $0xb4] sm:$0xf0]  ;;  %v1266_v46 = vmax.f32 %v662_v60, %v1114_v17 }
 0x105   : > { %v719_v10 = vpop.f32.mrf.mxu2  ;;  %v3678_v49 = vor.u32 %v4167_v41, %v3677_v37 }
 0x106   : > { %5640 = vst [vmem:[#allocation33_spill] sm:$0xff] %v4830_v63  ;;  %v4832_v5 = vpack.c.bf16 %v1260_v58, %v1252_v52  ;;  %v605_v7 = vpop.f32.mrf.mxu0  ;;  %v720_v27 = vadd.f32 %v719_v10, %v4706_v57 }
 0x107   : > { %v777_v6 = vpop.f32.mrf.mxu3  ;;  %v606_v11 = vadd.f32 %v605_v7, %v4694_v43  ;;  %v663_v15 = vpop.f32.mrf.mxu1  ;;  %2253 = vmatpush.bf16.msra.mxu1 %v3678_v49 }
 0x108   : > { %5641 = vst [vmem:[#allocation34_spill] sm:$0xff] %v4832_v5  ;;  %v664_v21 = vadd.f32 %v663_v15, %v4697_v45  ;;  %v778_v33 = vadd.f32 %v777_v6, %v4710_v0  ;;  %v1115_v52 = vmul.f32 0.01, %v720_v27 }
 0x109   : > { %v1121_v23 = vmul.f32 0.01, %v606_v11 }
 0x10a   : > { %v1122_v31 = vmul.f32 0.01, %v664_v21  ;;  %v1116_v59 = vmul.f32 0.01, %v778_v33  ;;  %v1267_v60 = vmax.f32 %v720_v27, %v1115_v52  ;;  %v4181_v52 = vld [vmem:[#allocation5 + $0x124] sm:$0xf0] }
 0x10b   : > { %v1273_v34 = vmax.f32 %v606_v11, %v1121_v23 }
 0x10c   : > { %v1274_v36 = vmax.f32 %v664_v21, %v1122_v31  ;;  %v1268_v6 = vmax.f32 %v778_v33, %v1116_v59  ;;  %v3605_v59 = vld [vmem:[#allocation5 + $0x20] sm:$0xf] }
 0x10d   : > { %v721_v42 = vpop.f32.mrf.mxu2  ;;  %v4838_v51 = vpack.c.bf16 %v1273_v34, %v1265_v32 }
 0x10e   : > { %v722_v58 = vadd.f32 %v721_v42, %v4706_v57  ;;  %v608_v55 = vpop.f32.mrf.mxu0  ;;  %v4841_v9 = vpack.c.bf16 %v1274_v36, %v1266_v46  ;;  %v3733_v42 = vld [vmem:[#allocation5 + $0x120] sm:$0xf] }
 0x10f   : > { %5642 = vst [vmem:[#allocation35_spill] sm:$0xff] %v4838_v51  ;;  %v779_v61 = vpop.f32.mrf.mxu3  ;;  %v666_v1 = vpop.f32.mrf.mxu1  ;;  %v609_v8 = vadd.f32 %v608_v55, %v4694_v43  ;;  %v3734_v55 = vor.u32 %v4181_v52, %v3733_v42 }
 0x110   : > { %5643 = vst [vmem:[#allocation36_spill] sm:$0xff] %v4841_v9  ;;  %v780_v10 = vadd.f32 %v779_v61, %v4710_v0  ;;  %v1123_v2 = vmul.f32 0.01, %v722_v58  ;;  %v667_v13 = vadd.f32 %v666_v1, %v4697_v45  ;;  %v3797_v1 = vld [vmem:[#allocation5 + $0x1a0] sm:$0xf] }
 0x111   : > { %3551 = vmatmul.msk.bf16.gmra.mxu0 %vm538_vm0, %v4644_v24  ;;  %v1129_v23 = vmul.f32 0.01, %v609_v8  ;;  %2312 = vmatpush.bf16.msra.mxu2 %v3734_v55 }
 0x112   : > { %v1124_v3 = vmul.f32 0.01, %v780_v10  ;;  %v1275_v4 = vmax.f32 %v722_v58, %v1123_v2  ;;  %3561 = vmatmul.msk.bf16.gmra.mxu1 %vm538_vm0, %v4644_v24  ;;  %3571 = vmatmul.msk.bf16.gmra.mxu2 %vm538_vm0, %v4644_v24  ;;  %v1130_v33 = vmul.f32 0.01, %v667_v13 }
 0x113   : > { %v1281_v41 = vmax.f32 %v609_v8, %v1129_v23 }
 0x114   : > { %v1276_v7 = vmax.f32 %v780_v10, %v1124_v3  ;;  %3581 = vmatmul.msk.bf16.gmra.mxu3 %vm538_vm0, %v4644_v24  ;;  %v4854_v14 = vpack.c.bf16 %v1275_v4, %v1267_v60  ;;  %v1282_v58 = vmax.f32 %v667_v13, %v1130_v33  ;;  %v4149_v10 = vld [vmem:[#allocation5 + $0x24] sm:$0xf0]  ;;  %v3669_v4 = vld [vmem:[#allocation5 + $0xa0] sm:$0xf] }
 0x115   : > { %v724_v11 = vpop.f32.mrf.mxu2  ;;  %v3606_v3 = vor.u32 %v4149_v10, %v3605_v59  ;;  %v4197_v60 = vld [vmem:[#allocation5 + $0x1a4] sm:$0xf0] }
 0x116   : > { %5644 = vst [vmem:[#allocation37_spill] sm:$0xff] %v4854_v14  ;;  %v4856_v15 = vpack.c.bf16 %v1276_v7, %v1268_v6  ;;  %v610_v21 = vpop.f32.mrf.mxu0  ;;  %v725_v27 = vadd.f32 %v724_v11, %v4706_v57  ;;  %v4165_v6 = vld [vmem:[#allocation5 + $0xa4] sm:$0xf0] }
 0x117   : > { %v782_v17 = vpop.f32.mrf.mxu3  ;;  %v611_v31 = vadd.f32 %v610_v21, %v4694_v43  ;;  %v668_v32 = vpop.f32.mrf.mxu1  ;;  %v3798_v21 = vor.u32 %v4197_v60, %v3797_v1  ;;  %v3670_v23 = vor.u32 %v4165_v6, %v3669_v4  ;;  %2196 = vmatpush.bf16.msra.mxu0 %v3606_v3 }
 0x118   : > { %5645 = vst [vmem:[#allocation38_spill] sm:$0xff] %v4856_v15  ;;  %v669_v34 = vadd.f32 %v668_v32, %v4697_v45  ;;  %v1131_v46 = vmul.f32 0.01, %v725_v27  ;;  %v783_v36 = vadd.f32 %v782_v17, %v4710_v0 }
 0x119   : > { %v1137_v37 = vmul.f32 0.01, %v611_v31  ;;  %2370 = vmatpush.bf16.msra.mxu3 %v3798_v21  ;;  %2254 = vmatpush.bf16.msra.mxu1 %v3670_v23 }
 0x11a   : > { %v1138_v24 = vmul.f32 0.01, %v669_v34 }
 0x11b   : > { %v1289_v49 = vmax.f32 %v611_v31, %v1137_v37  ;;  %v1132_v31 = vmul.f32 0.01, %v783_v36 }
 0x11c   : > { %v1290_v61 = vmax.f32 %v669_v34, %v1138_v24  ;;  %v1283_v24 = vmax.f32 %v725_v27, %v1131_v46 }
 0x11d   : > { %v726_v2 = vpop.f32.mrf.mxu2  ;;  %v4862_v7 = vpack.c.bf16 %v1289_v49, %v1281_v41  ;;  %v1284_v49 = vmax.f32 %v783_v36, %v1132_v31 }
 0x11e   : > { %v727_v8 = vadd.f32 %v726_v2, %v4706_v57  ;;  %v613_v17 = vpop.f32.mrf.mxu0  ;;  %v4865_v13 = vpack.c.bf16 %v1290_v61, %v1282_v58 }
 0x11f   : > { %5646 = vst [vmem:[#allocation39_spill] sm:$0xff] %v4862_v7  ;;  %v784_v11 = vpop.f32.mrf.mxu3  ;;  %v671_v33 = vpop.f32.mrf.mxu1  ;;  %v614_v52 = vadd.f32 %v613_v17, %v4694_v43 }
 0x120   : > { %5647 = vst [vmem:[#allocation40_spill] sm:$0xff] %v4865_v13  ;;  %v785_v32 = vadd.f32 %v784_v11, %v4710_v0  ;;  %v1139_v34 = vmul.f32 0.01, %v727_v8  ;;  %v672_v58 = vadd.f32 %v671_v33, %v4697_v45  ;;  %v4179_v33 = vld [vmem:[#allocation5 + $0x114] sm:$0xf0] }
 0x121   : > { %3552 = vmatmul.msk.bf16.gmra.mxu0 %vm538_vm0, %v4655_v25  ;;  %v1145_v10 = vmul.f32 0.01, %v614_v52 }
 0x122   : > { %v1140_v37 = vmul.f32 0.01, %v785_v32  ;;  %v1291_v41 = vmax.f32 %v727_v8, %v1139_v34  ;;  %3562 = vmatmul.msk.bf16.gmra.mxu1 %vm538_vm0, %v4655_v25  ;;  %3572 = vmatmul.msk.bf16.gmra.mxu2 %vm538_vm0, %v4655_v25  ;;  %v1146_v36 = vmul.f32 0.01, %v672_v58  ;;  %v3597_v34 = vld [vmem:[#allocation5 + $0x10] sm:$0xf] }
 0x123   : > { %v1297_v6 = vmax.f32 %v614_v52, %v1145_v10  ;;  %v4195_v52 = vld [vmem:[#allocation5 + $0x194] sm:$0xf0] }
 0x124   : > { %v1292_v42 = vmax.f32 %v785_v32, %v1140_v37  ;;  %3582 = vmatmul.msk.bf16.gmra.mxu3 %vm538_vm0, %v4655_v25  ;;  %v4878_v61 = vpack.c.bf16 %v1291_v41, %v1283_v24  ;;  %v1298_v17 = vmax.f32 %v672_v58, %v1146_v36  ;;  %v3725_v32 = vld [vmem:[#allocation5 + $0x110] sm:$0xf] }
 0x125   : > { %v729_v55 = vpop.f32.mrf.mxu2 }
 0x126   : > { %5648 = vst [vmem:[#allocation41_spill] sm:$0xff] %v4878_v61  ;;  %v4880_v27 = vpack.c.bf16 %v1292_v42, %v1284_v49  ;;  %v615_v59 = vpop.f32.mrf.mxu0  ;;  %v730_v3 = vadd.f32 %v729_v55, %v4706_v57  ;;  %v3726_v42 = vor.u32 %v4179_v33, %v3725_v32  ;;  %v4147_v55 = vld [vmem:[#allocation5 + $0x14] sm:$0xf0] }
 0x127   : > { %v787_v46 = vpop.f32.mrf.mxu3  ;;  %v616_v1 = vadd.f32 %v615_v59, %v4694_v43  ;;  %v673_v2 = vpop.f32.mrf.mxu1  ;;  %v3789_v59 = vld [vmem:[#allocation5 + $0x190] sm:$0xf] }
 0x128   : > { %5649 = vst [vmem:[#allocation42_spill] sm:$0xff] %v4880_v27  ;;  %v674_v60 = vadd.f32 %v673_v2, %v4697_v45  ;;  %v788_v8 = vadd.f32 %v787_v46, %v4710_v0  ;;  %v1147_v21 = vmul.f32 0.01, %v730_v3  ;;  %v3598_v2 = vor.u32 %v4147_v55, %v3597_v34  ;;  %2313 = vmatpush.bf16.msra.mxu2 %v3726_v42 }
 0x129   : > { %v1153_v4 = vmul.f32 0.01, %v616_v1  ;;  %v3790_v36 = vor.u32 %v4195_v52, %v3789_v59 }
 0x12a   : > { %v1154_v25 = vmul.f32 0.01, %v674_v60  ;;  %v1148_v46 = vmul.f32 0.01, %v788_v8  ;;  %2197 = vmatpush.bf16.msra.mxu0 %v3598_v2 }
 0x12b   : > { %v1305_v11 = vmax.f32 %v616_v1, %v1153_v4  ;;  %v4163_v4 = vld [vmem:[#allocation5 + $0x94] sm:$0xf0]  ;;  %2371 = vmatpush.bf16.msra.mxu3 %v3790_v36 }
 0x12c   : > { %v1306_v23 = vmax.f32 %v674_v60, %v1154_v25  ;;  %v3661_v60 = vld [vmem:[#allocation5 + $0x90] sm:$0xf] }
 0x12d   : > { %v731_v31 = vpop.f32.mrf.mxu2  ;;  %v4886_v37 = vpack.c.bf16 %v1305_v11, %v1297_v6  ;;  %v3662_v6 = vor.u32 %v4163_v4, %v3661_v60 }
 0x12e   : > { %v732_v24 = vadd.f32 %v731_v31, %v4706_v57  ;;  %v618_v49 = vpop.f32.mrf.mxu0  ;;  %v4889_v10 = vpack.c.bf16 %v1306_v23, %v1298_v17  ;;  %v1299_v31 = vmax.f32 %v730_v3, %v1147_v21  ;;  %v1300_v17 = vmax.f32 %v788_v8, %v1148_v46 }
 0x12f   : > { %5650 = vst [vmem:[#allocation43_spill] sm:$0xff] %v4886_v37  ;;  %v789_v41 = vpop.f32.mrf.mxu3  ;;  %v676_v1 = vpop.f32.mrf.mxu1  ;;  %v619_v33 = vadd.f32 %v618_v49, %v4694_v43  ;;  %2255 = vmatpush.bf16.msra.mxu1 %v3662_v6 }
 0x130   : > { %5651 = vst [vmem:[#allocation44_spill] sm:$0xff] %v4889_v10  ;;  %v790_v58 = vadd.f32 %v789_v41, %v4710_v0  ;;  %v1155_v25 = vmul.f32 0.01, %v732_v24  ;;  %v677_v34 = vadd.f32 %v676_v1, %v4697_v45 }
 0x131   : > { %3553 = vmatmul.msk.bf16.gmra.mxu0 %vm538_vm0, %v4666_v38  ;;  %v1161_v55 = vmul.f32 0.01, %v619_v33 }
 0x132   : > { %v1156_v11 = vmul.f32 0.01, %v790_v58  ;;  %v1307_v32 = vmax.f32 %v732_v24, %v1155_v25  ;;  %3563 = vmatmul.msk.bf16.gmra.mxu1 %vm538_vm0, %v4666_v38  ;;  %3573 = vmatmul.msk.bf16.gmra.mxu2 %vm538_vm0, %v4666_v38  ;;  %v1162_v52 = vmul.f32 0.01, %v677_v34 }
 0x133   : > { %v1313_v1 = vmax.f32 %v619_v33, %v1161_v55 }
 0x134   : > { %v1308_v23 = vmax.f32 %v790_v58, %v1156_v11  ;;  %3583 = vmatmul.msk.bf16.gmra.mxu3 %vm538_vm0, %v4666_v38  ;;  %v4902_v41 = vpack.c.bf16 %v1307_v32, %v1299_v31  ;;  %v1314_v60 = vmax.f32 %v677_v34, %v1162_v52 }
 0x135   : > { %v734_v3 = vpop.f32.mrf.mxu2 }
 0x136   : > { %5652 = vst [vmem:[#allocation45_spill] sm:$0xff] %v4902_v41  ;;  %v4904_v21 = vpack.c.bf16 %v1308_v23, %v1300_v17  ;;  %v620_v42 = vpop.f32.mrf.mxu0  ;;  %v735_v38 = vadd.f32 %v734_v3, %v4706_v57 }
 0x137   : > { %v792_v24 = vpop.f32.mrf.mxu3  ;;  %v621_v8 = vadd.f32 %v620_v42, %v4694_v43  ;;  %v678_v59 = vpop.f32.mrf.mxu1 }
 0x138   : > { %5653 = vst [vmem:[#allocation46_spill] sm:$0xff] %v4904_v21  ;;  %v679_v49 = vadd.f32 %v678_v59, %v4697_v45  ;;  %v793_v2 = vadd.f32 %v792_v24, %v4710_v0  ;;  %v1163_v11 = vmul.f32 0.01, %v735_v38 }
 0x139   : > { %v1169_v46 = vmul.f32 0.01, %v621_v8 }
 0x13a   : > { %v1170_v58 = vmul.f32 0.01, %v679_v49  ;;  %v1164_v42 = vmul.f32 0.01, %v793_v2  ;;  %v1315_v34 = vmax.f32 %v735_v38, %v1163_v11  ;;  %v4145_v11 = vld [vmem:[#allocation5 + $0x4] sm:$0xf0] }
 0x13b   : > { %v1321_v36 = vmax.f32 %v621_v8, %v1169_v46 }
 0x13c   : > { %v1322_v4 = vmax.f32 %v679_v49, %v1170_v58  ;;  %v1316_v59 = vmax.f32 %v793_v2, %v1164_v42  ;;  %v3717_v58 = vld [vmem:[#allocation5 + $0x100] sm:$0xf]  ;;  %v4193_v2 = vld [vmem:[#allocation5 + $0x184] sm:$0xf0] }
 0x13d   : > { %v736_v25 = vpop.f32.mrf.mxu2  ;;  %v4910_v6 = vpack.c.bf16 %v1321_v36, %v1313_v1  ;;  %v4177_v1 = vld [vmem:[#allocation5 + $0x104] sm:$0xf0]  ;;  %v3589_v36 = vld [vmem:[#allocation5] sm:$0xf] }
 0x13e   : > { %v737_v31 = vadd.f32 %v736_v25, %v4706_v57  ;;  %v4913_v17 = vpop.f32.mrf.mxu0  ;;  %v4915_v23 = vpack.c.bf16 %v1322_v4, %v1314_v60  ;;  %v3718_v25 = vor.u32 %v4177_v1, %v3717_v58  ;;  %v3590_v42 = vor.u32 %v4145_v11, %v3589_v36  ;;  %v4342_v1 = vld [vmem:[%s5546_s2] sm:$0xff]  ;;  %v4029_v11 = vld [vmem:[#allocation5 + $0x370] sm:$0xf] }
 0x13f   : > { %5654 = vst [vmem:[#allocation47_spill] sm:$0xff] %v4910_v6  ;;  %v794_v32 = vpop.f32.mrf.mxu3  ;;  %v4918_v33 = vpop.f32.mrf.mxu1  ;;  %v4942_v36 = vperm.slane %v4342_v1, 5 }
 0x140   : > { %5655 = vst [vmem:[#allocation48_spill] sm:$0xff] %v4913_v17  ;;  %v795_v3 = vadd.f32 %v794_v32, %v4710_v0  ;;  %v1171_v24 = vmul.f32 0.01, %v737_v31  ;;  %2314 = vmatpush.bf16.msra.mxu2 %v3718_v25  ;;  %2198 = vmatpush.bf16.msra.mxu0 %v3590_v42 }
 0x141   : > { %5656 = vst [vmem:[#allocation49_spill] sm:$0xff] %v4915_v23  ;;  %3554 = vmatmul.msk.bf16.gmra.mxu0 %vm538_vm0, %v4677_v39  ;;  %v3957_v23 = vld [vmem:[#allocation5 + $0x2e0] sm:$0xf] }
 0x142   : > { %5657 = vst [vmem:[#allocation50_spill] sm:$0xff] %v4918_v33  ;;  %v1172_v55 = vmul.f32 0.01, %v795_v3  ;;  %v1323_v8 = vmax.f32 %v737_v31, %v1171_v24  ;;  %3564 = vmatmul.msk.bf16.gmra.mxu1 %vm538_vm0, %v4677_v39  ;;  %3574 = vmatmul.msk.bf16.gmra.mxu2 %vm538_vm0, %v4677_v39  ;;  %v3781_v31 = vld [vmem:[#allocation5 + $0x180] sm:$0xf] }
 0x143   : > { %v4161_v24 = vld [vmem:[#allocation5 + $0x84] sm:$0xf0] }
 0x144   : > { %v1324_v52 = vmax.f32 %v795_v3, %v1172_v55  ;;  %3584 = vmatmul.msk.bf16.gmra.mxu3 %vm538_vm0, %v4677_v39  ;;  %v4928_v49 = vpack.c.bf16 %v1323_v8, %v1315_v34  ;;  %v3782_v39 = vor.u32 %v4193_v2, %v3781_v31  ;;  %v3653_v3 = vld [vmem:[#allocation5 + $0x80] sm:$0xf]  ;;  %v4255_v31 = vld [vmem:[#allocation5 + $0x374] sm:$0xf0]  ;;  %v3901_v2 = vld [vmem:[#allocation5 + $0x270] sm:$0xf] }
 0x145   : > { %v4930_v46 = vpop.f32.mrf.mxu2  ;;  %v3654_v55 = vor.u32 %v4161_v24, %v3653_v3  ;;  %v4030_v42 = vor.u32 %v4255_v31, %v4029_v11  ;;  %v4093_v3 = vld [vmem:[#allocation5 + $0x3f0] sm:$0xf]  ;;  %v4271_v24 = vld [vmem:[#allocation5 + $0x3f4] sm:$0xf0] }
 0x146   : > { %5658 = vst [vmem:[#allocation51_spill] sm:$0xff] %v4928_v49  ;;  %v4932_v38 = vpack.c.bf16 %v1324_v52, %v1316_v59  ;;  %v625_v4 = vpop.f32.mrf.mxu0  ;;  %2372 = vmatpush.bf16.msra.mxu3 %v3782_v39  ;;  %v4937_v52 = vperm.slane %v4690_v40, 4  ;;  %v4223_v39 = vld [vmem:[#allocation5 + $0x274] sm:$0xf0]  ;;  %v4094_v0 = vor.u32 %v4271_v24, %v4093_v3  ;;  %v3965_v3 = vld [vmem:[#allocation5 + $0x2f0] sm:$0xf] }
 0x147   : > { %5659 = vst [vmem:[#allocation52_spill] sm:$0xff] %v4930_v46  ;;  %v4934_v60 = vpop.f32.mrf.mxu3  ;;  %v683_v32 = vpop.f32.mrf.mxu1  ;;  %2256 = vmatpush.bf16.msra.mxu1 %v3654_v55  ;;  %v4343_v4 = vld [vmem:[%s4597_s8 + $0x40] sm:$0xff]  ;;  %v4951_v55 = vperm.slane %v4342_v1, 6  ;;  %2539 = vmatpush.bf16.msrb.mxu2 %v4030_v42  ;;  %s3247_s8 = sshll.u32 %s5280_s17, 4  ;;  %s3248_s8 = int_to_ptr.vmem [resolvable:$true] %s3247_s8 }
 0x148   : > { %5660 = vst [vmem:[#allocation53_spill] sm:$0xff] %v4932_v38 }
 0x149   : > { %5661 = vst [vmem:[#allocation54_spill] sm:$0xff] %v4934_v60  ;;  %v3902_v60 = vor.u32 %v4223_v39, %v3901_v2 }
 0x14a   : > { %2597 = vmatpush.bf16.msrb.mxu3 %v4094_v0 }
 0x14b   : > { %2423 = vmatpush.bf16.msrb.mxu0 %v3902_v60 }
 0x14d   : > { %v741_v34 = vpop.f32.mrf.mxu2 }
 0x14e   : > { %v810_v59 = vpop.f32.mrf.mxu0 }
 0x14f   : > { %v799_v8 = vpop.f32.mrf.mxu3  ;;  %v868_v58 = vpop.f32.mrf.mxu1  ;;  %v811_v25 = vadd.f32 %v810_v59, %v4937_v52  ;;  %v4953_v59 = vperm.slane %v4342_v1, 7  ;;  %v4239_v1 = vld [vmem:[#allocation5 + $0x2f4] sm:$0xf0] }
 0x150   : > { %v869_v40 = vadd.f32 %v868_v58, %v4942_v36 }
 0x151   : > { %3555 = vmatmul.msk.bf16.gmra.mxu0 %vm538_vm0, %v4343_v4  ;;  %v1037_v46 = vmul.f32 0.01, %v811_v25  ;;  %5662 = vst [vmem:[#allocation55_spill] sm:$0xff] %v4953_v59 }
 0x152   : > { %3565 = vmatmul.msk.bf16.gmra.mxu1 %vm538_vm0, %v4343_v4  ;;  %3575 = vmatmul.msk.bf16.gmra.mxu2 %vm538_vm0, %v4343_v4  ;;  %v1038_v57 = vmul.f32 0.01, %v869_v40 }
 0x153   : > { %v1189_v45 = vmax.f32 %v811_v25, %v1037_v46 }
 0x154   : > { %3585 = vmatmul.msk.bf16.gmra.mxu3 %vm538_vm0, %v4343_v4  ;;  %v1190_v24 = vmax.f32 %v869_v40, %v1038_v57 }
 0x155   : > { %v926_v32 = vpop.f32.mrf.mxu2 }
 0x156   : > { %v812_v8 = vpop.f32.mrf.mxu0  ;;  %v927_v31 = vadd.f32 %v926_v32, %v4951_v55 }
 0x157   : > { %v984_v34 = vpop.f32.mrf.mxu3  ;;  %v813_v4 = vadd.f32 %v812_v8, %v4937_v52  ;;  %v870_v58 = vpop.f32.mrf.mxu1  ;;  %v3966_v8 = vor.u32 %v4239_v1, %v3965_v3 }
 0x158   : > { %v871_v38 = vadd.f32 %v870_v58, %v4942_v36  ;;  %v985_v2 = vadd.f32 %v984_v34, %v4953_v59  ;;  %v1039_v49 = vmul.f32 0.01, %v927_v31 }
 0x159   : > { %v1045_v11 = vmul.f32 0.01, %v813_v4  ;;  %2481 = vmatpush.bf16.msrb.mxu1 %v3966_v8 }
 0x15a   : > { %v1046_v33 = vmul.f32 0.01, %v871_v38  ;;  %v1040_v46 = vmul.f32 0.01, %v985_v2 }
 0x15b   : > { %v1197_v39 = vmax.f32 %v813_v4, %v1045_v11 }
 0x15c   : > { %v1198_v17 = vmax.f32 %v871_v38, %v1046_v33 }
 0x15d   : > { %v4959_v43 = vpack.c.bf16 %v1197_v39, %v1189_v45  ;;  %v928_v42 = vpop.f32.mrf.mxu2  ;;  %v1191_v45 = vmax.f32 %v927_v31, %v1039_v49 }
 0x15e   : > { %v4961_v58 = vpack.c.bf16 %v1198_v17, %v1190_v24  ;;  %v929_v0 = vadd.f32 %v928_v42, %v4951_v55  ;;  %v815_v32 = vpop.f32.mrf.mxu0  ;;  %v1192_v17 = vmax.f32 %v985_v2, %v1040_v46 }
 0x15f   : > { %5663 = vst [vmem:[#allocation56_spill] sm:$0xff] %v4959_v43  ;;  %v986_v60 = vpop.f32.mrf.mxu3  ;;  %v873_v34 = vpop.f32.mrf.mxu1  ;;  %v816_v38 = vadd.f32 %v815_v32, %v4937_v52  ;;  %v4269_v43 = vld [vmem:[#allocation5 + $0x3e4] sm:$0xf0] }
 0x160   : > { %5664 = vst [vmem:[#allocation57_spill] sm:$0xff] %v4961_v58  ;;  %v987_v25 = vadd.f32 %v986_v60, %v4953_v59  ;;  %v1047_v4 = vmul.f32 0.01, %v929_v0  ;;  %v874_v39 = vadd.f32 %v873_v34, %v4942_v36 }
 0x161   : > { %3556 = vmatmul.msk.bf16.gmra.mxu0 %vm538_vm0, %v4718_v22  ;;  %v1053_v24 = vmul.f32 0.01, %v816_v38 }
 0x162   : > { %v1048_v11 = vmul.f32 0.01, %v987_v25  ;;  %v1199_v57 = vmax.f32 %v929_v0, %v1047_v4  ;;  %3566 = vmatmul.msk.bf16.gmra.mxu1 %vm538_vm0, %v4718_v22  ;;  %3576 = vmatmul.msk.bf16.gmra.mxu2 %vm538_vm0, %v4718_v22  ;;  %v1054_v0 = vmul.f32 0.01, %v874_v39 }
 0x163   : > { %v1205_v46 = vmax.f32 %v816_v38, %v1053_v24 }
 0x164   : > { %v1200_v33 = vmax.f32 %v987_v25, %v1048_v11  ;;  %3586 = vmatmul.msk.bf16.gmra.mxu3 %vm538_vm0, %v4718_v22  ;;  %v4974_v40 = vpack.c.bf16 %v1199_v57, %v1191_v45  ;;  %v4021_v11 = vld [vmem:[#allocation5 + $0x360] sm:$0xf]  ;;  %v4253_v45 = vld [vmem:[#allocation5 + $0x364] sm:$0xf0]  ;;  %v1206_v57 = vmax.f32 %v874_v39, %v1054_v0 }
 0x165   : > { %v931_v49 = vpop.f32.mrf.mxu2 }
 0x166   : > { %5665 = vst [vmem:[#allocation58_spill] sm:$0xff] %v4974_v40  ;;  %v4977_v3 = vpack.c.bf16 %v1200_v33, %v1192_v17  ;;  %v817_v1 = vpop.f32.mrf.mxu0  ;;  %v932_v8 = vadd.f32 %v931_v49, %v4951_v55  ;;  %v4022_v33 = vor.u32 %v4253_v45, %v4021_v11  ;;  %v4221_v49 = vld [vmem:[#allocation5 + $0x264] sm:$0xf0]  ;;  %v4085_v40 = vld [vmem:[#allocation5 + $0x3e0] sm:$0xf] }
 0x167   : > { %v989_v31 = vpop.f32.mrf.mxu3  ;;  %v818_v2 = vadd.f32 %v817_v1, %v4937_v52  ;;  %v875_v42 = vpop.f32.mrf.mxu1 }
 0x168   : > { %5666 = vst [vmem:[#allocation59_spill] sm:$0xff] %v4977_v3  ;;  %v876_v60 = vadd.f32 %v875_v42, %v4942_v36  ;;  %v1055_v25 = vmul.f32 0.01, %v932_v8  ;;  %v990_v34 = vadd.f32 %v989_v31, %v4953_v59  ;;  %v3893_v3 = vld [vmem:[#allocation5 + $0x260] sm:$0xf]  ;;  %2540 = vmatpush.bf16.msrb.mxu2 %v4022_v33 }
 0x169   : > { %v1061_v32 = vmul.f32 0.01, %v818_v2  ;;  %v3894_v58 = vor.u32 %v4221_v49, %v3893_v3  ;;  %v4237_v42 = vld [vmem:[#allocation5 + $0x2e4] sm:$0xf0] }
 0x16a   : > { %v1062_v22 = vmul.f32 0.01, %v876_v60  ;;  %v1056_v0 = vmul.f32 0.01, %v990_v34 }
 0x16b   : > { %v1213_v4 = vmax.f32 %v818_v2, %v1061_v32  ;;  %v4086_v2 = vor.u32 %v4269_v43, %v4085_v40  ;;  %v3958_v32 = vor.u32 %v4237_v42, %v3957_v23  ;;  %2424 = vmatpush.bf16.msrb.mxu0 %v3894_v58 }
 0x16c   : > { %v1214_v17 = vmax.f32 %v876_v60, %v1062_v22  ;;  %v1208_v43 = vmax.f32 %v990_v34, %v1056_v0 }
 0x16d   : > { %v933_v1 = vpop.f32.mrf.mxu2  ;;  %v4983_v6 = vpack.c.bf16 %v1213_v4, %v1205_v46  ;;  %2598 = vmatpush.bf16.msrb.mxu3 %v4086_v2  ;;  %2482 = vmatpush.bf16.msrb.mxu1 %v3958_v32  ;;  %v1207_v46 = vmax.f32 %v932_v8, %v1055_v25 }
 0x16e   : > { %v934_v38 = vadd.f32 %v933_v1, %v4951_v55  ;;  %v820_v31 = vpop.f32.mrf.mxu0  ;;  %v4986_v39 = vpack.c.bf16 %v1214_v17, %v1206_v57 }
 0x16f   : > { %v991_v24 = vpop.f32.mrf.mxu3  ;;  %v878_v22 = vpop.f32.mrf.mxu1  ;;  %v821_v40 = vadd.f32 %v820_v31, %v4937_v52 }
 0x170   : > { %v992_v60 = vadd.f32 %v991_v24, %v4953_v59  ;;  %v1063_v3 = vmul.f32 0.01, %v934_v38  ;;  %v879_v58 = vadd.f32 %v878_v22, %v4942_v36 }
 0x171   : > { %2199 = vmatmul.bf16.vlgmr.msra.gmra.mxu0 %v4716_v20  ;;  %v1069_v25 = vmul.f32 0.01, %v821_v40 }
 0x172   : > { %v1064_v11 = vmul.f32 0.01, %v992_v60  ;;  %v1215_v4 = vmax.f32 %v934_v38, %v1063_v3  ;;  %2257 = vmatmul.bf16.vlgmr.msra.gmra.mxu1 %v4720_v26  ;;  %2315 = vmatmul.bf16.vlgmr.msra.gmra.mxu2 %v4733_v44  ;;  %v1070_v42 = vmul.f32 0.01, %v879_v58 }
 0x173   : > { %v1221_v2 = vmax.f32 %v821_v40, %v1069_v25 }
 0x174   : > { %v1216_v23 = vmax.f32 %v992_v60, %v1064_v11  ;;  %2373 = vmatmul.bf16.vlgmr.msra.gmra.mxu3 %v4736_v47  ;;  %v4995_v45 = vpack.c.bf16 %v1215_v4, %v1207_v46  ;;  %v1222_v22 = vmax.f32 %v879_v58, %v1070_v42  ;;  %v4013_v11 = vld [vmem:[#allocation5 + $0x350] sm:$0xf]  ;;  %v4251_v46 = vld [vmem:[#allocation5 + $0x354] sm:$0xf0] }
 0x175   : > { %v936_v57 = vpop.f32.mrf.mxu2  ;;  %v3885_v4 = vld [vmem:[#allocation5 + $0x250] sm:$0xf]  ;;  %v4267_v47 = vld [vmem:[#allocation5 + $0x3d4] sm:$0xf0] }
 0x176   : > { %v4997_v17 = vpack.c.bf16 %v1216_v23, %v1208_v43  ;;  %v822_v8 = vpop.f32.mrf.mxu0  ;;  %v937_v49 = vadd.f32 %v936_v57, %v4951_v55  ;;  %v4014_v23 = vor.u32 %v4251_v46, %v4013_v11  ;;  %v4219_v57 = vld [vmem:[#allocation5 + $0x254] sm:$0xf0] }
 0x177   : > { %v994_v33 = vpop.f32.mrf.mxu3  ;;  %v823_v1 = vadd.f32 %v822_v8, %v4937_v52  ;;  %v880_v34 = vpop.f32.mrf.mxu1  ;;  %v4077_v8 = vld [vmem:[#allocation5 + $0x3d0] sm:$0xf]  ;;  %v3886_v25 = vor.u32 %v4219_v57, %v3885_v4 }
 0x178   : > { %5667 = vst [vmem:[#allocation60_spill] sm:$0xff] %v4997_v17  ;;  %v881_v38 = vadd.f32 %v880_v34, %v4942_v36  ;;  %v1071_v32 = vmul.f32 0.01, %v937_v49  ;;  %v995_v0 = vadd.f32 %v994_v33, %v4953_v59  ;;  %v4078_v20 = vor.u32 %v4267_v47, %v4077_v8  ;;  %2541 = vmatpush.bf16.msrb.mxu2 %v4014_v23 }
 0x179   : > { %v1077_v24 = vmul.f32 0.01, %v823_v1  ;;  %2425 = vmatpush.bf16.msrb.mxu0 %v3886_v25 }
 0x17a   : > { %v1078_v31 = vmul.f32 0.01, %v881_v38  ;;  %v1072_v58 = vmul.f32 0.01, %v995_v0  ;;  %2599 = vmatpush.bf16.msrb.mxu3 %v4078_v20 }
 0x17b   : > { %v1229_v60 = vmax.f32 %v823_v1, %v1077_v24 }
 0x17c   : > { %v1230_v3 = vmax.f32 %v881_v38, %v1078_v31  ;;  %v1223_v31 = vmax.f32 %v937_v49, %v1071_v32  ;;  %v1224_v47 = vmax.f32 %v995_v0, %v1072_v58 }
 0x17d   : > { %v938_v43 = vpop.f32.mrf.mxu2  ;;  %v5003_v44 = vpack.c.bf16 %v1229_v60, %v1221_v2 }
 0x17e   : > { %v939_v34 = vadd.f32 %v938_v43, %v4951_v55  ;;  %v825_v40 = vpop.f32.mrf.mxu0  ;;  %v5006_v33 = vpack.c.bf16 %v1230_v3, %v1222_v22  ;;  %v4235_v3 = vld [vmem:[#allocation5 + $0x2d4] sm:$0xf0] }
 0x17f   : > { %v996_v26 = vpop.f32.mrf.mxu3  ;;  %v883_v42 = vpop.f32.mrf.mxu1  ;;  %v826_v22 = vadd.f32 %v825_v40, %v4937_v52 }
 0x180   : > { %v997_v1 = vadd.f32 %v996_v26, %v4953_v59  ;;  %v1079_v38 = vmul.f32 0.01, %v939_v34  ;;  %v3949_v26 = vld [vmem:[#allocation5 + $0x2d0] sm:$0xf]  ;;  %v884_v11 = vadd.f32 %v883_v42, %v4942_v36 }
 0x181   : > { %2204 = vmatmul.bf16.gmra.mxu0 %v4742_v18  ;;  %v3950_v20 = vor.u32 %v4235_v3, %v3949_v26  ;;  %v1085_v23 = vmul.f32 0.01, %v826_v22 }
 0x182   : > { %v1080_v24 = vmul.f32 0.01, %v997_v1  ;;  %v1231_v2 = vmax.f32 %v939_v34, %v1079_v38  ;;  %2262 = vmatmul.bf16.gmra.mxu1 %v4745_v29  ;;  %2320 = vmatmul.bf16.gmra.mxu2 %v4758_v48  ;;  %v1086_v8 = vmul.f32 0.01, %v884_v11  ;;  %v4261_v48 = vld [vmem:[#allocation5 + $0x3a4] sm:$0xf0] }
 0x183   : > { %2483 = vmatpush.bf16.msrb.mxu1 %v3950_v20  ;;  %v3925_v29 = vld [vmem:[#allocation5 + $0x2a0] sm:$0xf] }
 0x184   : > { %v1232_v60 = vmax.f32 %v997_v1, %v1080_v24  ;;  %2378 = vmatmul.bf16.gmra.mxu3 %v4760_v50  ;;  %v5015_v46 = vpack.c.bf16 %v1231_v2, %v1223_v31  ;;  %v1237_v1 = vmax.f32 %v826_v22, %v1085_v23  ;;  %v1238_v24 = vmax.f32 %v884_v11, %v1086_v8 }
 0x185   : > { %v941_v4 = vpop.f32.mrf.mxu2 }
 0x186   : > { %5668 = vst [vmem:[#allocation61_spill] sm:$0xff] %v5015_v46  ;;  %v5017_v49 = vpack.c.bf16 %v1232_v60, %v1224_v47  ;;  %v827_v43 = vpop.f32.mrf.mxu0  ;;  %v942_v25 = vadd.f32 %v941_v4, %v4951_v55 }
 0x187   : > { %v999_v32 = vpop.f32.mrf.mxu3  ;;  %v828_v0 = vadd.f32 %v827_v43, %v4937_v52  ;;  %v885_v57 = vpop.f32.mrf.mxu1 }
 0x188   : > { %5669 = vst [vmem:[#allocation62_spill] sm:$0xff] %v5017_v49  ;;  %v886_v34 = vadd.f32 %v885_v57, %v4942_v36  ;;  %v1000_v42 = vadd.f32 %v999_v32, %v4953_v59  ;;  %v1087_v60 = vmul.f32 0.01, %v942_v25 }
 0x189   : > { %v1093_v40 = vmul.f32 0.01, %v828_v0 }
 0x18a   : > { %v1094_v58 = vmul.f32 0.01, %v886_v34  ;;  %v1088_v57 = vmul.f32 0.01, %v1000_v42  ;;  %v1239_v11 = vmax.f32 %v942_v25, %v1087_v60 }
 0x18b   : > { %v1245_v38 = vmax.f32 %v828_v0, %v1093_v40  ;;  %v4005_v40 = vld [vmem:[#allocation5 + $0x340] sm:$0xf] }
 0x18c   : > { %v1246_v31 = vmax.f32 %v886_v34, %v1094_v58  ;;  %v1240_v0 = vmax.f32 %v1000_v42, %v1088_v57  ;;  %v4249_v58 = vld [vmem:[#allocation5 + $0x344] sm:$0xf0] }
 0x18d   : > { %v943_v2 = vpop.f32.mrf.mxu2  ;;  %v5023_v47 = vpack.c.bf16 %v1245_v38, %v1237_v1  ;;  %v4006_v38 = vor.u32 %v4249_v58, %v4005_v40  ;;  %v4233_v42 = vld [vmem:[#allocation5 + $0x2c4] sm:$0xf0] }
 0x18e   : > { %v944_v26 = vadd.f32 %v943_v2, %v4951_v55  ;;  %v830_v20 = vpop.f32.mrf.mxu0  ;;  %v5026_v43 = vpack.c.bf16 %v1246_v31, %v1238_v24  ;;  %v3877_v24 = vld [vmem:[#allocation5 + $0x240] sm:$0xf]  ;;  %v4217_v31 = vld [vmem:[#allocation5 + $0x244] sm:$0xf0] }
 0x18f   : > { %5670 = vst [vmem:[#allocation63_spill] sm:$0xff] %v5023_v47  ;;  %v1001_v3 = vpop.f32.mrf.mxu3  ;;  %v888_v50 = vpop.f32.mrf.mxu1  ;;  %v831_v34 = vadd.f32 %v830_v20, %v4937_v52  ;;  %v4069_v2 = vld [vmem:[#allocation5 + $0x3c0] sm:$0xf]  ;;  %2542 = vmatpush.bf16.msrb.mxu2 %v4006_v38 }
 0x190   : > { %5671 = vst [vmem:[#allocation64_spill] sm:$0xff] %v5026_v43  ;;  %v1002_v4 = vadd.f32 %v1001_v3, %v4953_v59  ;;  %v1095_v22 = vmul.f32 0.01, %v944_v26  ;;  %v889_v1 = vadd.f32 %v888_v50, %v4942_v36  ;;  %v4265_v3 = vld [vmem:[#allocation5 + $0x3c4] sm:$0xf0] }
 0x191   : > { %2209 = vmatmul.bf16.gmra.mxu0 %v4766_v16 }
 0x192   : > { %v1096_v23 = vmul.f32 0.01, %v1002_v4  ;;  %v1247_v32 = vmax.f32 %v944_v26, %v1095_v22  ;;  %2267 = vmatmul.bf16.gmra.mxu1 %v4769_v28  ;;  %2325 = vmatmul.bf16.gmra.mxu2 %v4782_v53  ;;  %v3878_v26 = vor.u32 %v4217_v31, %v3877_v24  ;;  %v3941_v22 = vld [vmem:[#allocation5 + $0x2c0] sm:$0xf]  ;;  %v1101_v53 = vmul.f32 0.01, %v831_v34 }
 0x193   : > { %v1102_v58 = vmul.f32 0.01, %v889_v1 }
 0x194   : > { %v1248_v8 = vmax.f32 %v1002_v4, %v1096_v23  ;;  %2383 = vmatmul.bf16.gmra.mxu3 %v4784_v56  ;;  %v5035_v25 = vpack.c.bf16 %v1247_v32, %v1239_v11  ;;  %v4070_v23 = vor.u32 %v4265_v3, %v4069_v2  ;;  %v3942_v56 = vor.u32 %v4233_v42, %v3941_v22 }
 0x195   : > { %v946_v60 = vpop.f32.mrf.mxu2  ;;  %2426 = vmatpush.bf16.msrb.mxu0 %v3878_v26  ;;  %v1254_v2 = vmax.f32 %v889_v1, %v1102_v58 }
 0x196   : > { %5672 = vst [vmem:[#allocation65_spill] sm:$0xff] %v5035_v25  ;;  %v5037_v57 = vpack.c.bf16 %v1248_v8, %v1240_v0  ;;  %v832_v4 = vpop.f32.mrf.mxu0  ;;  %2600 = vmatpush.bf16.msrb.mxu3 %v4070_v23  ;;  %2484 = vmatpush.bf16.msrb.mxu1 %v3942_v56  ;;  %v947_v24 = vadd.f32 %v946_v60, %v4951_v55 }
 0x197   : > { %v1004_v20 = vpop.f32.mrf.mxu3  ;;  %v833_v50 = vadd.f32 %v832_v4, %v4937_v52  ;;  %v890_v40 = vpop.f32.mrf.mxu1  ;;  %v1253_v8 = vmax.f32 %v831_v34, %v1101_v53 }
 0x198   : > { %5673 = vst [vmem:[#allocation66_spill] sm:$0xff] %v5037_v57  ;;  %v891_v11 = vadd.f32 %v890_v40, %v4942_v36  ;;  %v1005_v31 = vadd.f32 %v1004_v20, %v4953_v59  ;;  %v1103_v4 = vmul.f32 0.01, %v947_v24 }
 0x199   : > { %v1109_v32 = vmul.f32 0.01, %v833_v50 }
 0x19a   : > { %v1110_v0 = vmul.f32 0.01, %v891_v11  ;;  %v1104_v56 = vmul.f32 0.01, %v1005_v31  ;;  %v1255_v1 = vmax.f32 %v947_v24, %v1103_v4  ;;  %v4263_v4 = vld [vmem:[#allocation5 + $0x3b4] sm:$0xf0] }
 0x19b   : > { %v1261_v38 = vmax.f32 %v833_v50, %v1109_v32 }
 0x19c   : > { %v1262_v3 = vmax.f32 %v891_v11, %v1110_v0  ;;  %v1256_v50 = vmax.f32 %v1005_v31, %v1104_v56  ;;  %v4247_v0 = vld [vmem:[#allocation5 + $0x334] sm:$0xf0] }
 0x19d   : > { %v948_v22 = vpop.f32.mrf.mxu2  ;;  %v5043_v42 = vpack.c.bf16 %v1261_v38, %v1253_v8  ;;  %v3869_v8 = vld [vmem:[#allocation5 + $0x230] sm:$0xf] }
 0x19e   : > { %v949_v26 = vadd.f32 %v948_v22, %v4951_v55  ;;  %v835_v40 = vpop.f32.mrf.mxu0  ;;  %v5046_v23 = vpack.c.bf16 %v1262_v3, %v1254_v2  ;;  %v4215_v3 = vld [vmem:[#allocation5 + $0x234] sm:$0xf0]  ;;  %v4061_v22 = vld [vmem:[#allocation5 + $0x3b0] sm:$0xf] }
 0x19f   : > { %v1006_v28 = vpop.f32.mrf.mxu3  ;;  %v893_v16 = vpop.f32.mrf.mxu1  ;;  %v836_v11 = vadd.f32 %v835_v40, %v4937_v52  ;;  %v4062_v40 = vor.u32 %v4263_v4, %v4061_v22 }
 0x1a0   : > { %v1007_v60 = vadd.f32 %v1006_v28, %v4953_v59  ;;  %v1111_v53 = vmul.f32 0.01, %v949_v26  ;;  %v894_v32 = vadd.f32 %v893_v16, %v4942_v36  ;;  %v3997_v28 = vld [vmem:[#allocation5 + $0x330] sm:$0xf] }
 0x1a1   : > { %2214 = vmatmul.bf16.gmra.mxu0 %v4790_v12  ;;  %v3998_v24 = vor.u32 %v4247_v0, %v3997_v28  ;;  %2601 = vmatpush.bf16.msrb.mxu3 %v4062_v40 }
 0x1a2   : > { %v1112_v34 = vmul.f32 0.01, %v1007_v60  ;;  %v1263_v20 = vmax.f32 %v949_v26, %v1111_v53  ;;  %2272 = vmatmul.bf16.gmra.mxu1 %v4793_v19  ;;  %2330 = vmatmul.bf16.gmra.mxu2 %v4806_v54  ;;  %v1117_v53 = vmul.f32 0.01, %v836_v11 }
 0x1a3   : > { %2543 = vmatpush.bf16.msrb.mxu2 %v3998_v24 }
 0x1a4   : > { %v1264_v58 = vmax.f32 %v1007_v60, %v1112_v34  ;;  %2388 = vmatmul.bf16.gmra.mxu3 %v4808_v62  ;;  %v5055_v38 = vpack.c.bf16 %v1263_v20, %v1255_v1  ;;  %v3870_v60 = vor.u32 %v4215_v3, %v3869_v8  ;;  %v1118_v62 = vmul.f32 0.01, %v894_v32  ;;  %v3933_v8 = vld [vmem:[#allocation5 + $0x2b0] sm:$0xf]  ;;  %v4231_v3 = vld [vmem:[#allocation5 + $0x2b4] sm:$0xf0] }
 0x1a5   : > { %v951_v2 = vpop.f32.mrf.mxu2 }
 0x1a6   : > { %v5057_v26 = vpack.c.bf16 %v1264_v58, %v1256_v50  ;;  %v837_v56 = vpop.f32.mrf.mxu0  ;;  %2427 = vmatpush.bf16.msrb.mxu0 %v3870_v60  ;;  %v952_v28 = vadd.f32 %v951_v2, %v4951_v55  ;;  %v1269_v50 = vmax.f32 %v836_v11, %v1117_v53  ;;  %v1270_v22 = vmax.f32 %v894_v32, %v1118_v62 }
 0x1a7   : > { %v1009_v31 = vpop.f32.mrf.mxu3  ;;  %v838_v34 = vadd.f32 %v837_v56, %v4937_v52  ;;  %v895_v16 = vpop.f32.mrf.mxu1  ;;  %v3934_v56 = vor.u32 %v4231_v3, %v3933_v8 }
 0x1a8   : > { %5674 = vst [vmem:[#allocation67_spill] sm:$0xff] %v5057_v26  ;;  %v896_v1 = vadd.f32 %v895_v16, %v4942_v36  ;;  %v1010_v58 = vadd.f32 %v1009_v31, %v4953_v59  ;;  %v1119_v12 = vmul.f32 0.01, %v952_v28 }
 0x1a9   : > { %v1125_v20 = vmul.f32 0.01, %v838_v34  ;;  %2485 = vmatpush.bf16.msrb.mxu1 %v3934_v56 }
 0x1aa   : > { %v1126_v0 = vmul.f32 0.01, %v896_v1  ;;  %v1120_v11 = vmul.f32 0.01, %v1010_v58  ;;  %v1271_v62 = vmax.f32 %v952_v28, %v1119_v12 }
 0x1ab   : > { %v1277_v54 = vmax.f32 %v838_v34, %v1125_v20 }
 0x1ac   : > { %v1278_v4 = vmax.f32 %v896_v1, %v1126_v0 }
 0x1ad   : > { %v953_v19 = vpop.f32.mrf.mxu2  ;;  %v5063_v24 = vpack.c.bf16 %v1277_v54, %v1269_v50 }
 0x1ae   : > { %v954_v60 = vadd.f32 %v953_v19, %v4951_v55  ;;  %v840_v16 = vpop.f32.mrf.mxu0  ;;  %v5066_v2 = vpack.c.bf16 %v1278_v4, %v1270_v22  ;;  %v1272_v19 = vmax.f32 %v1010_v58, %v1120_v11 }
 0x1af   : > { %5675 = vst [vmem:[#allocation68_spill] sm:$0xff] %v5063_v24  ;;  %v1011_v40 = vpop.f32.mrf.mxu3  ;;  %v898_v53 = vpop.f32.mrf.mxu1  ;;  %v841_v1 = vadd.f32 %v840_v16, %v4937_v52 }
 0x1b0   : > { %5676 = vst [vmem:[#allocation69_spill] sm:$0xff] %v5066_v2  ;;  %v1012_v31 = vadd.f32 %v1011_v40, %v4953_v59  ;;  %v1127_v34 = vmul.f32 0.01, %v954_v60  ;;  %v899_v0 = vadd.f32 %v898_v53, %v4942_v36 }
 0x1b1   : > { %2219 = vmatmul.bf16.gmra.mxu0 %v4814_v30  ;;  %v1133_v28 = vmul.f32 0.01, %v841_v1 }
 0x1b2   : > { %v1128_v20 = vmul.f32 0.01, %v1012_v31  ;;  %v1279_v32 = vmax.f32 %v954_v60, %v1127_v34  ;;  %2277 = vmatmul.bf16.gmra.mxu1 %v4817_v35  ;;  %2335 = vmatmul.bf16.gmra.mxu2 %v4830_v63  ;;  %v1134_v60 = vmul.f32 0.01, %v899_v0  ;;  %v3861_v63 = vld [vmem:[#allocation5 + $0x220] sm:$0xf] }
 0x1b3   : > { %v4053_v35 = vld [vmem:[#allocation5 + $0x3a0] sm:$0xf] }
 0x1b4   : > { %v1280_v54 = vmax.f32 %v1012_v31, %v1128_v20  ;;  %2393 = vmatmul.bf16.gmra.mxu3 %v4832_v5  ;;  %v5075_v50 = vpack.c.bf16 %v1279_v32, %v1271_v62  ;;  %v1285_v31 = vmax.f32 %v841_v1, %v1133_v28  ;;  %v3989_v62 = vld [vmem:[#allocation5 + $0x320] sm:$0xf]  ;;  %v4245_v32 = vld [vmem:[#allocation5 + $0x324] sm:$0xf0] }
 0x1b5   : > { %v956_v8 = vpop.f32.mrf.mxu2  ;;  %v3990_v5 = vor.u32 %v4245_v32, %v3989_v62 }
 0x1b6   : > { %5677 = vst [vmem:[#allocation70_spill] sm:$0xff] %v5075_v50  ;;  %v5077_v3 = vpack.c.bf16 %v1280_v54, %v1272_v19  ;;  %v842_v12 = vpop.f32.mrf.mxu0  ;;  %v957_v4 = vadd.f32 %v956_v8, %v4951_v55  ;;  %v1286_v19 = vmax.f32 %v899_v0, %v1134_v60  ;;  %v4213_v8 = vld [vmem:[#allocation5 + $0x224] sm:$0xf0] }
 0x1b7   : > { %v1014_v22 = vpop.f32.mrf.mxu3  ;;  %v843_v56 = vadd.f32 %v842_v12, %v4937_v52  ;;  %v900_v58 = vpop.f32.mrf.mxu1  ;;  %v3862_v30 = vor.u32 %v4213_v8, %v3861_v63  ;;  %2544 = vmatpush.bf16.msrb.mxu2 %v3990_v5 }
 0x1b8   : > { %5678 = vst [vmem:[#allocation71_spill] sm:$0xff] %v5077_v3  ;;  %v901_v40 = vadd.f32 %v900_v58, %v4942_v36  ;;  %v1135_v53 = vmul.f32 0.01, %v957_v4  ;;  %v1015_v34 = vadd.f32 %v1014_v22, %v4953_v59  ;;  %v4229_v58 = vld [vmem:[#allocation5 + $0x2a4] sm:$0xf0] }
 0x1b9   : > { %v1141_v16 = vmul.f32 0.01, %v843_v56  ;;  %2428 = vmatpush.bf16.msrb.mxu0 %v3862_v30 }
 0x1ba   : > { %v1142_v11 = vmul.f32 0.01, %v901_v40  ;;  %v1136_v60 = vmul.f32 0.01, %v1015_v34 }
 0x1bb   : > { %v1293_v20 = vmax.f32 %v843_v56, %v1141_v16  ;;  %v4054_v56 = vor.u32 %v4261_v48, %v4053_v35  ;;  %v3926_v16 = vor.u32 %v4229_v58, %v3925_v29 }
 0x1bc   : > { %v1294_v54 = vmax.f32 %v901_v40, %v1142_v11  ;;  %v1288_v29 = vmax.f32 %v1015_v34, %v1136_v60 }
 0x1bd   : > { %v958_v12 = vpop.f32.mrf.mxu2  ;;  %v5083_v18 = vpack.c.bf16 %v1293_v20, %v1285_v31  ;;  %2602 = vmatpush.bf16.msrb.mxu3 %v4054_v56  ;;  %2486 = vmatpush.bf16.msrb.mxu1 %v3926_v16  ;;  %v1287_v31 = vmax.f32 %v957_v4, %v1135_v53 }
 0x1be   : > { %v959_v1 = vadd.f32 %v958_v12, %v4951_v55  ;;  %v845_v22 = vpop.f32.mrf.mxu0  ;;  %v5086_v0 = vpack.c.bf16 %v1294_v54, %v1286_v19 }
 0x1bf   : > { %v1016_v28 = vpop.f32.mrf.mxu3  ;;  %v903_v11 = vpop.f32.mrf.mxu1  ;;  %v846_v35 = vadd.f32 %v845_v22, %v4937_v52 }
 0x1c0   : > { %v1017_v40 = vadd.f32 %v1016_v28, %v4953_v59  ;;  %v1143_v63 = vmul.f32 0.01, %v959_v1  ;;  %v904_v30 = vadd.f32 %v903_v11, %v4942_v36 }
 0x1c1   : > { %2224 = vmatmul.bf16.gmra.mxu0 %v4838_v51  ;;  %v1149_v53 = vmul.f32 0.01, %v846_v35 }
 0x1c2   : > { %v1144_v62 = vmul.f32 0.01, %v1017_v40  ;;  %v1295_v20 = vmax.f32 %v959_v1, %v1143_v63  ;;  %2282 = vmatmul.bf16.gmra.mxu1 %v4841_v9  ;;  %2340 = vmatmul.bf16.gmra.mxu2 %v4854_v14  ;;  %v1150_v58 = vmul.f32 0.01, %v904_v30  ;;  %v4211_v14 = vld [vmem:[#allocation5 + $0x214] sm:$0xf0] }
 0x1c3   : > { %v1301_v56 = vmax.f32 %v846_v35, %v1149_v53  ;;  %v4045_v9 = vld [vmem:[#allocation5 + $0x390] sm:$0xf]  ;;  %v4259_v35 = vld [vmem:[#allocation5 + $0x394] sm:$0xf0] }
 0x1c4   : > { %v1296_v48 = vmax.f32 %v1017_v40, %v1144_v62  ;;  %2398 = vmatmul.bf16.gmra.mxu3 %v4856_v15  ;;  %v5095_v5 = vpack.c.bf16 %v1295_v20, %v1287_v31  ;;  %v1302_v40 = vmax.f32 %v904_v30, %v1150_v58  ;;  %v3981_v31 = vld [vmem:[#allocation5 + $0x310] sm:$0xf]  ;;  %v4243_v20 = vld [vmem:[#allocation5 + $0x314] sm:$0xf0] }
 0x1c5   : > { %v961_v32 = vpop.f32.mrf.mxu2 }
 0x1c6   : > { %v5097_v19 = vpack.c.bf16 %v1296_v48, %v1288_v29  ;;  %v847_v4 = vpop.f32.mrf.mxu0  ;;  %v962_v34 = vadd.f32 %v961_v32, %v4951_v55  ;;  %v3853_v29 = vld [vmem:[#allocation5 + $0x210] sm:$0xf] }
 0x1c7   : > { %v1019_v54 = vpop.f32.mrf.mxu3  ;;  %v848_v8 = vadd.f32 %v847_v4, %v4937_v52  ;;  %v905_v12 = vpop.f32.mrf.mxu1  ;;  %v3854_v58 = vor.u32 %v4211_v14, %v3853_v29 }
 0x1c8   : > { %v906_v1 = vadd.f32 %v905_v12, %v4942_v36  ;;  %v1020_v16 = vadd.f32 %v1019_v54, %v4953_v59  ;;  %v1151_v11 = vmul.f32 0.01, %v962_v34  ;;  %v3982_v12 = vor.u32 %v4243_v20, %v3981_v31 }
 0x1c9   : > { %v1157_v28 = vmul.f32 0.01, %v848_v8  ;;  %2429 = vmatpush.bf16.msrb.mxu0 %v3854_v58 }
 0x1ca   : > { %v1158_v22 = vmul.f32 0.01, %v906_v1  ;;  %v1152_v54 = vmul.f32 0.01, %v1020_v16  ;;  %2545 = vmatpush.bf16.msrb.mxu2 %v3982_v12  ;;  %v1303_v31 = vmax.f32 %v962_v34, %v1151_v11 }
 0x1cb   : > { %v1309_v60 = vmax.f32 %v848_v8, %v1157_v28  ;;  %v3917_v28 = vld [vmem:[#allocation5 + $0x290] sm:$0xf] }
 0x1cc   : > { %v1310_v63 = vmax.f32 %v906_v1, %v1158_v22  ;;  %v4046_v1 = vor.u32 %v4259_v35, %v4045_v9  ;;  %v4227_v22 = vld [vmem:[#allocation5 + $0x294] sm:$0xf0] }
 0x1cd   : > { %v963_v62 = vpop.f32.mrf.mxu2  ;;  %v5103_v48 = vpack.c.bf16 %v1309_v60, %v1301_v56  ;;  %v3918_v60 = vor.u32 %v4227_v22, %v3917_v28 }
 0x1ce   : > { %v964_v4 = vadd.f32 %v963_v62, %v4951_v55  ;;  %v850_v15 = vpop.f32.mrf.mxu0  ;;  %v5106_v53 = vpack.c.bf16 %v1310_v63, %v1302_v40  ;;  %2603 = vmatpush.bf16.msrb.mxu3 %v4046_v1  ;;  %v1304_v40 = vmax.f32 %v1020_v16, %v1152_v54 }
 0x1cf   : > { %5679 = vst [vmem:[#allocation72_spill] sm:$0xff] %v5103_v48  ;;  %v1021_v32 = vpop.f32.mrf.mxu3  ;;  %v908_v8 = vpop.f32.mrf.mxu1  ;;  %v851_v14 = vadd.f32 %v850_v15, %v4937_v52  ;;  %2487 = vmatpush.bf16.msrb.mxu1 %v3918_v60 }
 0x1d0   : > { %5680 = vst [vmem:[#allocation73_spill] sm:$0xff] %v5106_v53  ;;  %v1022_v30 = vadd.f32 %v1021_v32, %v4953_v59  ;;  %v1159_v56 = vmul.f32 0.01, %v964_v4  ;;  %v909_v9 = vadd.f32 %v908_v8, %v4942_v36 }
 0x1d1   : > { %2229 = vmatmul.bf16.gmra.mxu0 %v4862_v7 }
 0x1d2   : > { %v1160_v62 = vmul.f32 0.01, %v1022_v30  ;;  %v1311_v20 = vmax.f32 %v964_v4, %v1159_v56  ;;  %2287 = vmatmul.bf16.gmra.mxu1 %v4865_v13  ;;  %2345 = vmatmul.bf16.gmra.mxu2 %v4878_v61  ;;  %v1165_v4 = vmul.f32 0.01, %v851_v14  ;;  %v1166_v54 = vmul.f32 0.01, %v909_v9 }
 0x1d3   : > { %v3909_v61 = vld [vmem:[#allocation5 + $0x280] sm:$0xf]  ;;  %v4225_v13 = vld [vmem:[#allocation5 + $0x284] sm:$0xf0] }
 0x1d4   : > { %v1312_v63 = vmax.f32 %v1022_v30, %v1160_v62  ;;  %2403 = vmatmul.bf16.gmra.mxu3 %v4880_v27  ;;  %v5115_v29 = vpack.c.bf16 %v1311_v20, %v1303_v31  ;;  %v1317_v8 = vmax.f32 %v851_v14, %v1165_v4  ;;  %v1318_v56 = vmax.f32 %v909_v9, %v1166_v54  ;;  %v3973_v4 = vld [vmem:[#allocation5 + $0x300] sm:$0xf]  ;;  %v4241_v9 = vld [vmem:[#allocation5 + $0x304] sm:$0xf0] }
 0x1d5   : > { %v966_v32 = vpop.f32.mrf.mxu2  ;;  %v3974_v54 = vor.u32 %v4241_v9, %v3973_v4  ;;  %v3910_v4 = vor.u32 %v4225_v13, %v3909_v61 }
 0x1d6   : > { %5681 = vst [vmem:[#allocation74_spill] sm:$0xff] %v5115_v29  ;;  %v5117_v12 = vpack.c.bf16 %v1312_v63, %v1304_v40  ;;  %v852_v11 = vpop.f32.mrf.mxu0  ;;  %v967_v58 = vadd.f32 %v966_v32, %v4951_v55 }
 0x1d7   : > { %v1024_v34 = vpop.f32.mrf.mxu3  ;;  %v853_v35 = vadd.f32 %v852_v11, %v4937_v52  ;;  %v910_v16 = vpop.f32.mrf.mxu1  ;;  %2546 = vmatpush.bf16.msrb.mxu2 %v3974_v54  ;;  %2488 = vmatpush.bf16.msrb.mxu1 %v3910_v4 }
 0x1d8   : > { %5682 = vst [vmem:[#allocation75_spill] sm:$0xff] %v5117_v12  ;;  %v911_v15 = vadd.f32 %v910_v16, %v4942_v36  ;;  %v1025_v28 = vadd.f32 %v1024_v34, %v4953_v59  ;;  %v1167_v20 = vmul.f32 0.01, %v967_v58 }
 0x1d9   : > { %v1173_v30 = vmul.f32 0.01, %v853_v35 }
 0x1da   : > { %v1174_v1 = vmul.f32 0.01, %v911_v15  ;;  %v1168_v27 = vmul.f32 0.01, %v1025_v28 }
 0x1db   : > { %v1325_v22 = vmax.f32 %v853_v35, %v1173_v30  ;;  %v1319_v30 = vmax.f32 %v967_v58, %v1167_v20 }
 0x1dc   : > { %v1326_v60 = vmax.f32 %v911_v15, %v1174_v1  ;;  %v3845_v15 = vld [vmem:[#allocation5 + $0x200] sm:$0xf] }
 0x1dd   : > { %v968_v62 = vpop.f32.mrf.mxu2  ;;  %v5123_v31 = vpack.c.bf16 %v1325_v22, %v1317_v8  ;;  %v4209_v8 = vld [vmem:[#allocation5 + $0x204] sm:$0xf0]  ;;  %v4037_v22 = vld [vmem:[#allocation5 + $0x380] sm:$0xf] }
 0x1de   : > { %v969_v40 = vadd.f32 %v968_v62, %v4951_v55  ;;  %v5126_v11 = vpop.f32.mrf.mxu0  ;;  %v5128_v16 = vpack.c.bf16 %v1326_v60, %v1318_v56  ;;  %v1320_v56 = vmax.f32 %v1025_v28, %v1168_v27  ;;  %v3846_v62 = vor.u32 %v4209_v8, %v3845_v15  ;;  %v5689_v8 = vld [vmem:[#allocation49_spill] sm:$0xff] }
 0x1df   : > { %5683 = vst [vmem:[#allocation76_spill] sm:$0xff] %v5123_v31  ;;  %v1026_v63 = vpop.f32.mrf.mxu3  ;;  %v5131_v14 = vpop.f32.mrf.mxu1 }
 0x1e0   : > { %5684 = vst [vmem:[#allocation77_spill] sm:$0xff] %v5128_v16  ;;  %v1027_v32 = vadd.f32 %v1026_v63, %v4953_v59  ;;  %v1175_v34 = vmul.f32 0.01, %v969_v40  ;;  %v4257_v63 = vld [vmem:[#allocation5 + $0x384] sm:$0xf0]  ;;  %2430 = vmatpush.bf16.msrb.mxu0 %v3846_v62 }
 0x1e1   : > { %2234 = vmatmul.bf16.gmra.mxu0 %v4886_v37  ;;  %v4038_v37 = vor.u32 %v4257_v63, %v4037_v22  ;;  %v5691_v22 = vld [vmem:[#allocation11_spill] sm:$0xff]  ;;  %v5693_v62 = vld [vmem:[#allocation12_spill] sm:$0xff]  ;;  %v5694_v63 = vld [vmem:[#allocation50_spill] sm:$0xff] }
 0x1e2   : > { %v1176_v35 = vmul.f32 0.01, %v1027_v32  ;;  %v1327_v1 = vmax.f32 %v969_v40, %v1175_v34  ;;  %2292 = vmatmul.bf16.gmra.mxu1 %v4889_v10  ;;  %2350 = vmatmul.bf16.gmra.mxu2 %v4902_v41  ;;  %v682_v4 = vadd.f32 %v5694_v63, %v5693_v62  ;;  %v5698_v41 = vld [vmem:[#allocation14_spill] sm:$0xff] }
 0x1e3   : > { %2604 = vmatpush.bf16.msrb.mxu3 %v4038_v37  ;;  %v5690_v37 = vld [vmem:[#allocation51_spill] sm:$0xff] }
 0x1e4   : > { %v1328_v60 = vmax.f32 %v1027_v32, %v1176_v35  ;;  %2408 = vmatmul.bf16.gmra.mxu3 %v4904_v21  ;;  %v5137_v9 = vpack.c.bf16 %v1327_v1, %v1319_v30  ;;  %v1545_v32 = vld [vmem:[%s5548_s4] sm:$0x3]  ;;  %v4206_v21 = vld [vmem:[#allocation5 + $0x1f4] sm:$0xf] }
 0x1e5   : > { %v5139_v58 = vpop.f32.mrf.mxu2  ;;  %v5148_v34 = vperm.slane %v1545_v32, 0  ;;  %v5688_v1 = vld [vmem:[#allocation47_spill] sm:$0xff]  ;;  %v3775_v32 = vld [vmem:[#allocation5 + $0x178] sm:$0xf0] }
 0x1e6   : > { %5685 = vst [vmem:[#allocation78_spill] sm:$0xff] %v5137_v9  ;;  %v5141_v20 = vpack.c.bf16 %v1328_v60, %v1320_v56  ;;  %v857_v27 = vpop.f32.mrf.mxu0  ;;  %v5692_v56 = vld [vmem:[#allocation48_spill] sm:$0xff] }
 0x1e7   : > { %v5143_v40 = vpop.f32.mrf.mxu3  ;;  %v915_v28 = vpop.f32.mrf.mxu1  ;;  %v624_v60 = vadd.f32 %v5692_v56, %v5691_v22  ;;  %v5695_v27 = vld [vmem:[#allocation53_spill] sm:$0xff] }
 0x1e8   : > { %5686 = vst [vmem:[#allocation79_spill] sm:$0xff] %v5141_v20  ;;  %v4190_v28 = vld [vmem:[#allocation5 + $0x174] sm:$0xf] }
 0x1e9   : > { %5687 = vst [vmem:[#allocation80_spill] sm:$0xff] %v5143_v40  ;;  %v1178_v40 = vmul.f32 0.01, %v682_v4 }
 0x1ed   : > { %v973_v13 = vpop.f32.mrf.mxu2 }
 0x1ee   : > { %v2200_v35 = vpop.f32.mrf.mxu0  ;;  %v4158_v13 = vld [vmem:[#allocation5 + $0x74] sm:$0xf] }
 0x1ef   : > { %v1031_v61 = vpop.f32.mrf.mxu3  ;;  %v2201_v54 = vadd.f32 %v2200_v35, %v5148_v34  ;;  %v2258_v15 = vpop.f32.mrf.mxu1  ;;  %v5697_v35 = vld [vmem:[#allocation52_spill] sm:$0xff] }
 0x1f0   : > { %v5696_v61 = vld [vmem:[#allocation13_spill] sm:$0xff] }
 0x1f1   : > { %v2259_v30 = vadd.f32 %v2258_v15, %v2201_v54  ;;  %2239 = vmatmul.bf16.gmra.mxu0 %v5688_v1  ;;  %v740_v54 = vadd.f32 %v5697_v35, %v5696_v61  ;;  %v3778_v15 = vor.u32 %v4190_v28, %v3775_v32  ;;  %v3647_v1 = vld [vmem:[#allocation5 + $0x78] sm:$0xf0]  ;;  %v4174_v61 = vld [vmem:[#allocation5 + $0xf4] sm:$0xf] }
 0x1f2   : > { %2297 = vmatmul.bf16.gmra.mxu1 %v5689_v8  ;;  %2355 = vmatmul.bf16.gmra.mxu2 %v5690_v37  ;;  %v3839_v8 = vld [vmem:[#allocation5 + $0x1f8] sm:$0xf0]  ;;  %v3650_v22 = vor.u32 %v4158_v13, %v3647_v1 }
 0x1f3   : > { %v5699_v37 = vld [vmem:[#allocation54_spill] sm:$0xff]  ;;  %v3842_v56 = vor.u32 %v4206_v21, %v3839_v8  ;;  %2771 = vmatpush.bf16.msra.mxu2 %v3778_v15  ;;  %v1179_v28 = vmul.f32 0.01, %v740_v54 }
 0x1f4   : > { %2413 = vmatmul.bf16.gmra.mxu3 %v5695_v27  ;;  %v798_v10 = vadd.f32 %v5699_v37, %v5698_v41  ;;  %v1177_v27 = vmul.f32 0.01, %v624_v60  ;;  %2655 = vmatpush.bf16.msra.mxu0 %v3650_v22  ;;  %v3711_v35 = vld [vmem:[#allocation5 + $0xf8] sm:$0xf0] }
 0x1f5   : > { %v2316_v7 = vpop.f32.mrf.mxu2  ;;  %2829 = vmatpush.bf16.msra.mxu3 %v3842_v56  ;;  %v3714_v1 = vor.u32 %v4174_v61, %v3711_v35  ;;  %v4188_v61 = vld [vmem:[#allocation5 + $0x164] sm:$0xf]  ;;  %v3767_v35 = vld [vmem:[#allocation5 + $0x168] sm:$0xf0] }
 0x1f6   : > { %v2317_v51 = vadd.f32 %v2316_v7, %v2259_v30  ;;  %v2202_v63 = vpop.f32.mrf.mxu0  ;;  %v1180_v41 = vmul.f32 0.01, %v798_v10  ;;  %v1329_v21 = vmax.f32 %v624_v60, %v1177_v27  ;;  %v1330_v7 = vmax.f32 %v682_v4, %v1178_v40 }
 0x1f7   : > { %v2374_v62 = vpop.f32.mrf.mxu3  ;;  %v2203_v59 = vadd.f32 %v2202_v63, %v5148_v34  ;;  %v2260_v20 = vpop.f32.mrf.mxu1  ;;  %2713 = vmatpush.bf16.msra.mxu1 %v3714_v1  ;;  %v1331_v30 = vmax.f32 %v740_v54, %v1179_v28  ;;  %v4156_v1 = vld [vmem:[#allocation5 + $0x64] sm:$0xf] }
 0x1f8   : > { %v5164_v32 = vadd.f32 %v2374_v62, %v2317_v51  ;;  %v1332_v8 = vmax.f32 %v798_v10, %v1180_v41  ;;  %v5166_v16 = vpack.c.bf16 %v1329_v21, %v1329_v21  ;;  %v5169_v56 = vpack.c.bf16 %v1330_v7, %v1330_v7  ;;  %v3639_v21 = vld [vmem:[#allocation5 + $0x68] sm:$0xf0]  ;;  %v4204_v7 = vld [vmem:[#allocation5 + $0x1e4] sm:$0xf] }
 0x1f9   : > { %v2261_v37 = vadd.f32 %v2260_v20, %v2203_v59  ;;  %v5171_v62 = vpack.c.bf16 %v1331_v30, %v1331_v30  ;;  %v3642_v30 = vor.u32 %v4156_v1, %v3639_v21  ;;  %v5703_v1 = vld [vmem:[#allocation59_spill] sm:$0xff] }
 0x1fa   : > { %v5175_v20 = vpack.c.bf16 %v1332_v8, %v1332_v8  ;;  %v3831_v8 = vld [vmem:[#allocation5 + $0x1e8] sm:$0xf0] }
 0x1fb   : > { %2656 = vmatpush.bf16.msra.mxu0 %v3642_v30 }
 0x1fd   : > { %v2318_v13 = vpop.f32.mrf.mxu2 }
 0x1fe   : > { %v2319_v15 = vadd.f32 %v2318_v13, %v2261_v37  ;;  %v2205_v63 = vpop.f32.mrf.mxu0  ;;  %v3770_v37 = vor.u32 %v4188_v61, %v3767_v35  ;;  %v4172_v13 = vld [vmem:[#allocation5 + $0xe4] sm:$0xf]  ;;  %v5700_v61 = vld [vmem:[#allocation56_spill] sm:$0xff]  ;;  %v5701_v35 = vld [vmem:[#allocation57_spill] sm:$0xff] }
 0x1ff   : > { %v2376_v9 = vpop.f32.mrf.mxu3  ;;  %v2206_v22 = vadd.f32 %v2205_v63, %v5148_v34  ;;  %v2263_v51 = vpop.f32.mrf.mxu1  ;;  %v3834_v63 = vor.u32 %v4204_v7, %v3831_v8 }
 0x200   : > { %v5173_v59 = vadd.f32 %v2376_v9, %v2319_v15  ;;  %v3703_v15 = vld [vmem:[#allocation5 + $0xe8] sm:$0xf0]  ;;  %2772 = vmatpush.bf16.msra.mxu2 %v3770_v37  ;;  %v5702_v37 = vld [vmem:[#allocation58_spill] sm:$0xff] }
 0x201   : > { %v2264_v40 = vadd.f32 %v2263_v51, %v2206_v22  ;;  %2244 = vmatmul.bf16.gmra.mxu0 %v5166_v16  ;;  %v3706_v22 = vor.u32 %v4172_v13, %v3703_v15  ;;  %2830 = vmatpush.bf16.msra.mxu3 %v3834_v63 }
 0x202   : > { %2302 = vmatmul.bf16.gmra.mxu1 %v5169_v56  ;;  %2360 = vmatmul.bf16.gmra.mxu2 %v5171_v62 }
 0x203   : > { %2714 = vmatpush.bf16.msra.mxu1 %v3706_v22  ;;  %v4186_v22 = vld [vmem:[#allocation5 + $0x154] sm:$0xf] }
 0x204   : > { %2418 = vmatmul.bf16.gmra.mxu3 %v5175_v20 }
 0x205   : > { %v2321_v10 = vpop.f32.mrf.mxu2 }
 0x206   : > { %v2322_v60 = vadd.f32 %v2321_v10, %v2264_v40  ;;  %v2207_v27 = vpop.f32.mrf.mxu0 }
 0x207   : > { %v2379_v4 = vpop.f32.mrf.mxu3  ;;  %v2208_v54 = vadd.f32 %v2207_v27, %v5148_v34  ;;  %v2265_v28 = vpop.f32.mrf.mxu1 }
 0x208   : > { %v5182_v9 = vadd.f32 %v2379_v4, %v2322_v60 }
 0x209   : > { %v2266_v41 = vadd.f32 %v2265_v28, %v2208_v54 }
 0x20d   : > { %v2323_v51 = vpop.f32.mrf.mxu2 }
 0x20e   : > { %v2324_v40 = vadd.f32 %v2323_v51, %v2266_v41  ;;  %v2210_v60 = vpop.f32.mrf.mxu0  ;;  %v3759_v51 = vld [vmem:[#allocation5 + $0x158] sm:$0xf0] }
 0x20f   : > { %v2381_v10 = vpop.f32.mrf.mxu3  ;;  %v2211_v4 = vadd.f32 %v2210_v60, %v5148_v34  ;;  %v2268_v27 = vpop.f32.mrf.mxu1  ;;  %v3631_v60 = vld [vmem:[#allocation5 + $0x58] sm:$0xf0] }
 0x210   : > { %v5185_v54 = vadd.f32 %v2381_v10, %v2324_v40  ;;  %v4154_v40 = vld [vmem:[#allocation5 + $0x54] sm:$0xf]  ;;  %v3762_v10 = vor.u32 %v4186_v22, %v3759_v51 }
 0x211   : > { %v2269_v28 = vadd.f32 %v2268_v27, %v2211_v4  ;;  %2431 = vmatmul.bf16.vlgmr.msrb.gmra.mxu0 %v5700_v61  ;;  %v4202_v4 = vld [vmem:[#allocation5 + $0x1d4] sm:$0xf]  ;;  %v3823_v27 = vld [vmem:[#allocation5 + $0x1d8] sm:$0xf0] }
 0x212   : > { %2489 = vmatmul.bf16.vlgmr.msrb.gmra.mxu1 %v5701_v35  ;;  %2547 = vmatmul.bf16.vlgmr.msrb.gmra.mxu2 %v5702_v37  ;;  %v3634_v37 = vor.u32 %v4154_v40, %v3631_v60  ;;  %v3826_v35 = vor.u32 %v4202_v4, %v3823_v27  ;;  %v3695_v61 = vld [vmem:[#allocation5 + $0xd8] sm:$0xf0] }
 0x213   : > { %2773 = vmatpush.bf16.msra.mxu2 %v3762_v10 }
 0x214   : > { %2605 = vmatmul.bf16.vlgmr.msrb.gmra.mxu3 %v5703_v1  ;;  %2657 = vmatpush.bf16.msra.mxu0 %v3634_v37 }
 0x215   : > { %v2326_v21 = vpop.f32.mrf.mxu2  ;;  %2831 = vmatpush.bf16.msra.mxu3 %v3826_v35 }
 0x216   : > { %v2327_v7 = vadd.f32 %v2326_v21, %v2269_v28  ;;  %v2212_v41 = vpop.f32.mrf.mxu0 }
 0x217   : > { %v2384_v30 = vpop.f32.mrf.mxu3  ;;  %v2213_v8 = vadd.f32 %v2212_v41, %v5148_v34  ;;  %v2270_v13 = vpop.f32.mrf.mxu1 }
 0x218   : > { %v5192_v15 = vadd.f32 %v2384_v30, %v2327_v7 }
 0x219   : > { %v2271_v63 = vadd.f32 %v2270_v13, %v2213_v8  ;;  %v4170_v13 = vld [vmem:[#allocation5 + $0xd4] sm:$0xf] }
 0x21a   : > { %v3698_v51 = vor.u32 %v4170_v13, %v3695_v61  ;;  %v4184_v13 = vld [vmem:[#allocation5 + $0x144] sm:$0xf] }
 0x21c   : > { %2715 = vmatpush.bf16.msra.mxu1 %v3698_v51  ;;  %v3751_v51 = vld [vmem:[#allocation5 + $0x148] sm:$0xf0] }
 0x21d   : > { %v2328_v1 = vpop.f32.mrf.mxu2 }
 0x21e   : > { %v2329_v28 = vadd.f32 %v2328_v1, %v2271_v63  ;;  %v2215_v41 = vpop.f32.mrf.mxu0 }
 0x21f   : > { %v2386_v21 = vpop.f32.mrf.mxu3  ;;  %v2216_v7 = vadd.f32 %v2215_v41, %v5148_v34  ;;  %v2273_v30 = vpop.f32.mrf.mxu1 }
 0x220   : > { %v5195_v8 = vadd.f32 %v2386_v21, %v2329_v28 }
 0x221   : > { %v2274_v22 = vadd.f32 %v2273_v30, %v2216_v7  ;;  %2436 = vmatmul.bf16.gmra.mxu0 %v4983_v6 }
 0x222   : > { %2494 = vmatmul.bf16.gmra.mxu1 %v4986_v39  ;;  %2552 = vmatmul.bf16.gmra.mxu2 %v4995_v45 }
 0x224   : > { %2610 = vmatmul.bf16.gmra.mxu3 %v4997_v17  ;;  %v3623_v17 = vld [vmem:[#allocation5 + $0x48] sm:$0xf0] }
 0x225   : > { %v2331_v35 = vpop.f32.mrf.mxu2 }
 0x226   : > { %v2332_v37 = vadd.f32 %v2331_v35, %v2274_v22  ;;  %v2217_v63 = vpop.f32.mrf.mxu0  ;;  %v3754_v35 = vor.u32 %v4184_v13, %v3751_v51 }
 0x227   : > { %v2389_v1 = vpop.f32.mrf.mxu3  ;;  %v2218_v40 = vadd.f32 %v2217_v63, %v5148_v34  ;;  %v2275_v10 = vpop.f32.mrf.mxu1  ;;  %v4152_v63 = vld [vmem:[#allocation5 + $0x44] sm:$0xf] }
 0x228   : > { %v5202_v60 = vadd.f32 %v2389_v1, %v2332_v37  ;;  %v4200_v37 = vld [vmem:[#allocation5 + $0x1c4] sm:$0xf]  ;;  %v3626_v1 = vor.u32 %v4152_v63, %v3623_v17  ;;  %2774 = vmatpush.bf16.msra.mxu2 %v3754_v35 }
 0x229   : > { %v2276_v4 = vadd.f32 %v2275_v10, %v2218_v40  ;;  %v3815_v40 = vld [vmem:[#allocation5 + $0x1c8] sm:$0xf0] }
 0x22a   : > { %v3818_v10 = vor.u32 %v4200_v37, %v3815_v40  ;;  %2658 = vmatpush.bf16.msra.mxu0 %v3626_v1 }
 0x22c   : > { %2832 = vmatpush.bf16.msra.mxu3 %v3818_v10 }
 0x22d   : > { %v2333_v27 = vpop.f32.mrf.mxu2 }
 0x22e   : > { %v2334_v28 = vadd.f32 %v2333_v27, %v2276_v4  ;;  %v2220_v21 = vpop.f32.mrf.mxu0  ;;  %v4168_v4 = vld [vmem:[#allocation5 + $0xc4] sm:$0xf]  ;;  %v3687_v27 = vld [vmem:[#allocation5 + $0xc8] sm:$0xf0] }
 0x22f   : > { %v2391_v61 = vpop.f32.mrf.mxu3  ;;  %v2221_v41 = vadd.f32 %v2220_v21, %v5148_v34  ;;  %v2278_v7 = vpop.f32.mrf.mxu1 }
 0x230   : > { %v5205_v30 = vadd.f32 %v2391_v61, %v2334_v28  ;;  %v3690_v28 = vor.u32 %v4168_v4, %v3687_v27  ;;  %v3743_v27 = vld [vmem:[#allocation5 + $0x138] sm:$0xf0] }
 0x231   : > { %v2279_v22 = vadd.f32 %v2278_v7, %v2221_v41  ;;  %2441 = vmatmul.bf16.gmra.mxu0 %v5003_v44 }
 0x232   : > { %2499 = vmatmul.bf16.gmra.mxu1 %v5006_v33  ;;  %2557 = vmatmul.bf16.gmra.mxu2 %v5015_v46 }
 0x233   : > { %2716 = vmatpush.bf16.msra.mxu1 %v3690_v28  ;;  %v4150_v28 = vld [vmem:[#allocation5 + $0x34] sm:$0xf] }
 0x234   : > { %2615 = vmatmul.bf16.gmra.mxu3 %v5017_v49 }
 0x235   : > { %v2336_v61 = vpop.f32.mrf.mxu2 }
 0x236   : > { %v2337_v21 = vadd.f32 %v2336_v61, %v2279_v22  ;;  %v2222_v7 = vpop.f32.mrf.mxu0  ;;  %v4182_v22 = vld [vmem:[#allocation5 + $0x134] sm:$0xf] }
 0x237   : > { %v2394_v41 = vpop.f32.mrf.mxu3  ;;  %v2223_v13 = vadd.f32 %v2222_v7, %v5148_v34  ;;  %v2280_v51 = vpop.f32.mrf.mxu1  ;;  %v3746_v61 = vor.u32 %v4182_v22, %v3743_v27  ;;  %v3807_v7 = vld [vmem:[#allocation5 + $0x1b8] sm:$0xf0] }
 0x238   : > { %v5212_v46 = vadd.f32 %v2394_v41, %v2337_v21  ;;  %v3615_v21 = vld [vmem:[#allocation5 + $0x38] sm:$0xf0]  ;;  %v4198_v41 = vld [vmem:[#allocation5 + $0x1b4] sm:$0xf] }
 0x239   : > { %v2281_v17 = vadd.f32 %v2280_v51, %v2223_v13  ;;  %v3618_v51 = vor.u32 %v4150_v28, %v3615_v21  ;;  %2775 = vmatpush.bf16.msra.mxu2 %v3746_v61 }
 0x23b   : > { %2659 = vmatpush.bf16.msra.mxu0 %v3618_v51 }
 0x23d   : > { %v2338_v63 = vpop.f32.mrf.mxu2 }
 0x23e   : > { %v2339_v49 = vadd.f32 %v2338_v63, %v2281_v17  ;;  %v2225_v37 = vpop.f32.mrf.mxu0 }
 0x23f   : > { %v2396_v35 = vpop.f32.mrf.mxu3  ;;  %v2226_v40 = vadd.f32 %v2225_v37, %v5148_v34  ;;  %v2283_v1 = vpop.f32.mrf.mxu1 }
 0x240   : > { %v5215_v4 = vadd.f32 %v2396_v35, %v2339_v49  ;;  %v3810_v49 = vor.u32 %v4198_v41, %v3807_v7 }
 0x241   : > { %v2284_v10 = vadd.f32 %v2283_v1, %v2226_v40  ;;  %2446 = vmatmul.bf16.gmra.mxu0 %v5023_v47 }
 0x242   : > { %2504 = vmatmul.bf16.gmra.mxu1 %v5026_v43  ;;  %2562 = vmatmul.bf16.gmra.mxu2 %v5035_v25  ;;  %v3679_v25 = vld [vmem:[#allocation5 + $0xb8] sm:$0xf0] }
 0x243   : > { %2833 = vmatpush.bf16.msra.mxu3 %v3810_v49 }
 0x244   : > { %2620 = vmatmul.bf16.gmra.mxu3 %v5037_v57  ;;  %v4166_v57 = vld [vmem:[#allocation5 + $0xb4] sm:$0xf] }
 0x245   : > { %v2341_v13 = vpop.f32.mrf.mxu2  ;;  %v3682_v27 = vor.u32 %v4166_v57, %v3679_v25 }
 0x246   : > { %v2342_v17 = vadd.f32 %v2341_v13, %v2284_v10  ;;  %v2227_v35 = vpop.f32.mrf.mxu0 }
 0x247   : > { %v2399_v63 = vpop.f32.mrf.mxu3  ;;  %v2228_v37 = vadd.f32 %v2227_v35, %v5148_v34  ;;  %v2285_v40 = vpop.f32.mrf.mxu1  ;;  %2717 = vmatpush.bf16.msra.mxu1 %v3682_v27  ;;  %v4196_v27 = vld [vmem:[#allocation5 + $0x1a4] sm:$0xf] }
 0x248   : > { %v5222_v1 = vadd.f32 %v2399_v63, %v2342_v17  ;;  %v3735_v63 = vld [vmem:[#allocation5 + $0x128] sm:$0xf0] }
 0x249   : > { %v2286_v22 = vadd.f32 %v2285_v40, %v2228_v37  ;;  %v4148_v40 = vld [vmem:[#allocation5 + $0x24] sm:$0xf] }
 0x24d   : > { %v2343_v43 = vpop.f32.mrf.mxu2 }
 0x24e   : > { %v2344_v47 = vadd.f32 %v2343_v43, %v2286_v22  ;;  %v2230_v21 = vpop.f32.mrf.mxu0  ;;  %v3607_v22 = vld [vmem:[#allocation5 + $0x28] sm:$0xf0] }
 0x24f   : > { %v2401_v28 = vpop.f32.mrf.mxu3  ;;  %v2231_v10 = vadd.f32 %v2230_v21, %v5148_v34  ;;  %v2288_v41 = vpop.f32.mrf.mxu1  ;;  %v3799_v21 = vld [vmem:[#allocation5 + $0x1a8] sm:$0xf0] }
 0x250   : > { %v5225_v61 = vadd.f32 %v2401_v28, %v2344_v47  ;;  %v4180_v47 = vld [vmem:[#allocation5 + $0x124] sm:$0xf]  ;;  %v3610_v28 = vor.u32 %v4148_v40, %v3607_v22 }
 0x251   : > { %v2289_v7 = vadd.f32 %v2288_v41, %v2231_v10  ;;  %2451 = vmatmul.bf16.gmra.mxu0 %v5043_v42  ;;  %v3738_v37 = vor.u32 %v4180_v47, %v3735_v63  ;;  %v4164_v10 = vld [vmem:[#allocation5 + $0xa4] sm:$0xf]  ;;  %v3671_v41 = vld [vmem:[#allocation5 + $0xa8] sm:$0xf0] }
 0x252   : > { %2509 = vmatmul.bf16.gmra.mxu1 %v5046_v23  ;;  %2567 = vmatmul.bf16.gmra.mxu2 %v5055_v38 }
 0x253   : > { %2776 = vmatpush.bf16.msra.mxu2 %v3738_v37  ;;  %2660 = vmatpush.bf16.msra.mxu0 %v3610_v28 }
 0x254   : > { %2625 = vmatmul.bf16.gmra.mxu3 %v5057_v26 }
 0x255   : > { %v2346_v25 = vpop.f32.mrf.mxu2 }
 0x256   : > { %v2347_v57 = vadd.f32 %v2346_v25, %v2289_v7  ;;  %v2232_v43 = vpop.f32.mrf.mxu0  ;;  %v3802_v7 = vor.u32 %v4196_v27, %v3799_v21  ;;  %v3674_v25 = vor.u32 %v4164_v10, %v3671_v41  ;;  %v4178_v21 = vld [vmem:[#allocation5 + $0x114] sm:$0xf]  ;;  %v3727_v10 = vld [vmem:[#allocation5 + $0x118] sm:$0xf0] }
 0x257   : > { %v2404_v13 = vpop.f32.mrf.mxu3  ;;  %v2233_v51 = vadd.f32 %v2232_v43, %v5148_v34  ;;  %v2290_v49 = vpop.f32.mrf.mxu1  ;;  %v4146_v41 = vld [vmem:[#allocation5 + $0x14] sm:$0xf] }
 0x258   : > { %v5232_v17 = vadd.f32 %v2404_v13, %v2347_v57  ;;  %2834 = vmatpush.bf16.msra.mxu3 %v3802_v7  ;;  %2718 = vmatpush.bf16.msra.mxu1 %v3674_v25  ;;  %v3730_v25 = vor.u32 %v4178_v21, %v3727_v10 }
 0x259   : > { %v2291_v35 = vadd.f32 %v2290_v49, %v2233_v51 }
 0x25a   : > { %2777 = vmatpush.bf16.msra.mxu2 %v3730_v25 }
 0x25d   : > { %v2348_v26 = vpop.f32.mrf.mxu2 }
 0x25e   : > { %v2349_v57 = vadd.f32 %v2348_v26, %v2291_v35  ;;  %v2235_v43 = vpop.f32.mrf.mxu0 }
 0x25f   : > { %v2406_v13 = vpop.f32.mrf.mxu3  ;;  %v2236_v51 = vadd.f32 %v2235_v43, %v5148_v34  ;;  %v2293_v49 = vpop.f32.mrf.mxu1  ;;  %v3791_v43 = vld [vmem:[#allocation5 + $0x198] sm:$0xf0] }
 0x260   : > { %v5235_v47 = vadd.f32 %v2406_v13, %v2349_v57  ;;  %v3599_v57 = vld [vmem:[#allocation5 + $0x18] sm:$0xf0]  ;;  %v4194_v13 = vld [vmem:[#allocation5 + $0x194] sm:$0xf] }
 0x261   : > { %v2294_v63 = vadd.f32 %v2293_v49, %v2236_v51  ;;  %2456 = vmatmul.bf16.gmra.mxu0 %v5063_v24  ;;  %v3602_v51 = vor.u32 %v4146_v41, %v3599_v57  ;;  %v3794_v49 = vor.u32 %v4194_v13, %v3791_v43 }
 0x262   : > { %2514 = vmatmul.bf16.gmra.mxu1 %v5066_v2  ;;  %2572 = vmatmul.bf16.gmra.mxu2 %v5075_v50  ;;  %v4162_v50 = vld [vmem:[#allocation5 + $0x94] sm:$0xf] }
 0x263   : > { %2661 = vmatpush.bf16.msra.mxu0 %v3602_v51  ;;  %2835 = vmatpush.bf16.msra.mxu3 %v3794_v49 }
 0x264   : > { %2630 = vmatmul.bf16.gmra.mxu3 %v5077_v3 }
 0x265   : > { %v2351_v37 = vpop.f32.mrf.mxu2 }
 0x266   : > { %v2352_v40 = vadd.f32 %v2351_v37, %v2294_v63  ;;  %v2237_v26 = vpop.f32.mrf.mxu0 }
 0x267   : > { %v2409_v22 = vpop.f32.mrf.mxu3  ;;  %v2238_v35 = vadd.f32 %v2237_v26, %v5148_v34  ;;  %v2295_v27 = vpop.f32.mrf.mxu1 }
 0x268   : > { %v5242_v28 = vadd.f32 %v2409_v22, %v2352_v40  ;;  %v3663_v40 = vld [vmem:[#allocation5 + $0x98] sm:$0xf0] }
 0x269   : > { %v2296_v7 = vadd.f32 %v2295_v27, %v2238_v35  ;;  %v3666_v24 = vor.u32 %v4162_v50, %v3663_v40 }
 0x26b   : > { %2719 = vmatpush.bf16.msra.mxu1 %v3666_v24 }
 0x26d   : > { %v2353_v63 = vpop.f32.mrf.mxu2 }
 0x26e   : > { %v2354_v37 = vadd.f32 %v2353_v63, %v2296_v7  ;;  %v2240_v26 = vpop.f32.mrf.mxu0 }
 0x26f   : > { %v2411_v3 = vpop.f32.mrf.mxu3  ;;  %v2241_v22 = vadd.f32 %v2240_v26, %v5148_v34  ;;  %v2298_v2 = vpop.f32.mrf.mxu1 }
 0x270   : > { %v5245_v35 = vadd.f32 %v2411_v3, %v2354_v37 }
 0x271   : > { %v2299_v27 = vadd.f32 %v2298_v2, %v2241_v22  ;;  %2461 = vmatmul.bf16.gmra.mxu0 %v5083_v18 }
 0x272   : > { %2519 = vmatmul.bf16.gmra.mxu1 %v5086_v0  ;;  %2577 = vmatmul.bf16.gmra.mxu2 %v5095_v5 }
 0x274   : > { %2635 = vmatmul.bf16.gmra.mxu3 %v5097_v19 }
 0x275   : > { %v2356_v21 = vpop.f32.mrf.mxu2 }
 0x276   : > { %v2357_v10 = vadd.f32 %v2356_v21, %v2299_v27  ;;  %v2242_v7 = vpop.f32.mrf.mxu0  ;;  %v4176_v21 = vld [vmem:[#allocation5 + $0x104] sm:$0xf] }
 0x277   : > { %v2414_v41 = vpop.f32.mrf.mxu3  ;;  %v2243_v25 = vadd.f32 %v2242_v7, %v5148_v34  ;;  %v2300_v57 = vpop.f32.mrf.mxu1 }
 0x278   : > { %v5252_v50 = vadd.f32 %v2414_v41, %v2357_v10  ;;  %v3719_v10 = vld [vmem:[#allocation5 + $0x108] sm:$0xf0]  ;;  %v4144_v41 = vld [vmem:[#allocation5 + $0x4] sm:$0xf] }
 0x279   : > { %v2301_v3 = vadd.f32 %v2300_v57, %v2243_v25  ;;  %v3722_v7 = vor.u32 %v4176_v21, %v3719_v10  ;;  %v3591_v25 = vld [vmem:[#allocation5 + $0x8] sm:$0xf0]  ;;  %v4192_v57 = vld [vmem:[#allocation5 + $0x184] sm:$0xf]  ;;  %v856_v21 = vadd.f32 %v5126_v11, %v4937_v52  ;;  %v972_v10 = vadd.f32 %v5139_v58, %v4951_v55 }
 0x27b   : > { %2778 = vmatpush.bf16.msra.mxu2 %v3722_v7  ;;  %v5705_v7 = vld [vmem:[#allocation78_spill] sm:$0xff]  ;;  %v1183_v11 = vmul.f32 0.01, %v972_v10 }
 0x27d   : > { %v2358_v2 = vpop.f32.mrf.mxu2 }
 0x27e   : > { %v2359_v13 = vadd.f32 %v2358_v2, %v2301_v3  ;;  %v2245_v24 = vpop.f32.mrf.mxu0  ;;  %v3783_v3 = vld [vmem:[#allocation5 + $0x188] sm:$0xf0] }
 0x27f   : > { %v2416_v43 = vpop.f32.mrf.mxu3  ;;  %v2246_v51 = vadd.f32 %v2245_v24, %v5148_v34  ;;  %v2303_v49 = vpop.f32.mrf.mxu1  ;;  %v4160_v24 = vld [vmem:[#allocation5 + $0x84] sm:$0xf] }
 0x280   : > { %v5255_v63 = vadd.f32 %v2416_v43, %v2359_v13  ;;  %v3594_v13 = vor.u32 %v4144_v41, %v3591_v25  ;;  %v3786_v43 = vor.u32 %v4192_v57, %v3783_v3  ;;  %v5704_v41 = vld [vmem:[#allocation77_spill] sm:$0xff]  ;;  %v5706_v25 = vld [vmem:[#allocation79_spill] sm:$0xff]  ;;  %v1181_v57 = vmul.f32 0.01, %v856_v21 }
 0x281   : > { %v2304_v37 = vadd.f32 %v2303_v49, %v2246_v51  ;;  %2466 = vmatmul.bf16.gmra.mxu0 %v5103_v48  ;;  %v3655_v51 = vld [vmem:[#allocation5 + $0x88] sm:$0xf0] }
 0x282   : > { %2524 = vmatmul.bf16.gmra.mxu1 %v5106_v53  ;;  %2582 = vmatmul.bf16.gmra.mxu2 %v5115_v29  ;;  %v3658_v49 = vor.u32 %v4160_v24, %v3655_v51  ;;  %v4254_v24 = vld [vmem:[#allocation5 + $0x374] sm:$0xf]  ;;  %v4031_v51 = vld [vmem:[#allocation5 + $0x378] sm:$0xf0] }
 0x283   : > { %2662 = vmatpush.bf16.msra.mxu0 %v3594_v13  ;;  %2836 = vmatpush.bf16.msra.mxu3 %v3786_v43  ;;  %v5708_v13 = vld [vmem:[#allocation80_spill] sm:$0xff] }
 0x284   : > { %2640 = vmatmul.bf16.gmra.mxu3 %v5117_v12  ;;  %2720 = vmatpush.bf16.msra.mxu1 %v3658_v49  ;;  %v4222_v49 = vld [vmem:[#allocation5 + $0x274] sm:$0xf]  ;;  %v1335_v12 = vmax.f32 %v972_v10, %v1183_v11 }
 0x285   : > { %v2361_v26 = vpop.f32.mrf.mxu2 }
 0x286   : > { %v2362_v40 = vadd.f32 %v2361_v26, %v2304_v37  ;;  %v2247_v27 = vpop.f32.mrf.mxu0 }
 0x287   : > { %v2419_v22 = vpop.f32.mrf.mxu3  ;;  %v2305_v34 = vpop.f32.mrf.mxu1 }
 0x288   : > { %v5261_v2 = vadd.f32 %v2419_v22, %v2362_v40  ;;  %v914_v22 = vadd.f32 %v5131_v14, %v4942_v36 }
 0x28a   : > { %v1182_v52 = vmul.f32 0.01, %v914_v22 }
 0x28d   : > { %v2363_v37 = vpop.f32.mrf.mxu2 }
 0x28e   : > { %v2432_v27 = vpop.f32.mrf.mxu0 }
 0x28f   : > { %v2421_v26 = vpop.f32.mrf.mxu3  ;;  %v2490_v34 = vpop.f32.mrf.mxu1  ;;  %v2433_v40 = vadd.f32 %v2432_v27, %v5164_v32  ;;  %v5707_v32 = vld [vmem:[#allocation55_spill] sm:$0xff]  ;;  %v3903_v27 = vld [vmem:[#allocation5 + $0x278] sm:$0xf0] }
 0x290   : > { %v1030_v43 = vadd.f32 %v5708_v13, %v5707_v32  ;;  %v4034_v26 = vor.u32 %v4254_v24, %v4031_v51 }
 0x291   : > { %2471 = vmatmul.bf16.gmra.mxu0 %v5123_v31  ;;  %v2491_v3 = vadd.f32 %v2490_v34, %v2433_v40 }
 0x292   : > { %2529 = vmatmul.bf16.gmra.mxu1 %v5704_v41  ;;  %2587 = vmatmul.bf16.gmra.mxu2 %v5705_v7  ;;  %v4095_v7 = vld [vmem:[#allocation5 + $0x3f8] sm:$0xf0]  ;;  %v3906_v41 = vor.u32 %v4222_v49, %v3903_v27  ;;  %v1184_v32 = vmul.f32 0.01, %v1030_v43 }
 0x293   : > { %3003 = vmatpush.bf16.msrb.mxu2 %v4034_v26 }
 0x294   : > { %2645 = vmatmul.bf16.gmra.mxu3 %v5706_v25  ;;  %v4270_v25 = vld [vmem:[#allocation5 + $0x3f4] sm:$0xf]  ;;  %2887 = vmatpush.bf16.msrb.mxu0 %v3906_v41  ;;  %v1336_v48 = vmax.f32 %v1030_v43, %v1184_v32 }
 0x295   : > { %v2548_v36 = vpop.f32.mrf.mxu2  ;;  %v4098_v31 = vor.u32 %v4270_v25, %v4095_v7  ;;  %v4238_v7 = vld [vmem:[#allocation5 + $0x2f4] sm:$0xf]  ;;  %v3967_v25 = vld [vmem:[#allocation5 + $0x2f8] sm:$0xf0] }
 0x296   : > { %v2549_v55 = vadd.f32 %v2548_v36, %v2491_v3  ;;  %v2434_v58 = vpop.f32.mrf.mxu0  ;;  %v1333_v3 = vmax.f32 %v856_v21, %v1181_v57  ;;  %v1334_v36 = vmax.f32 %v914_v22, %v1182_v52  ;;  %v5287_v22 = vpack.c.bf16 %v1335_v12, %v1335_v12 }
 0x297   : > { %v2606_v14 = vpop.f32.mrf.mxu3  ;;  %v2492_v37 = vpop.f32.mrf.mxu1  ;;  %v2435_v40 = vadd.f32 %v2434_v58, %v5173_v59  ;;  %3061 = vmatpush.bf16.msrb.mxu3 %v4098_v31  ;;  %v3970_v31 = vor.u32 %v4238_v7, %v3967_v25  ;;  %v5290_v52 = vpack.c.bf16 %v1336_v48, %v1336_v48  ;;  %v3895_v7 = vld [vmem:[#allocation5 + $0x268] sm:$0xf0]  ;;  %v4268_v25 = vld [vmem:[#allocation5 + $0x3e4] sm:$0xf] }
 0x298   : > { %v2607_v34 = vadd.f32 %v2606_v14, %v2549_v55  ;;  %v5283_v58 = vpack.c.bf16 %v1333_v3, %v1333_v3  ;;  %v5285_v21 = vpack.c.bf16 %v1334_v36, %v1334_v36  ;;  %v4252_v36 = vld [vmem:[#allocation5 + $0x364] sm:$0xf] }
 0x299   : > { %v2493_v53 = vadd.f32 %v2492_v37, %v2435_v40  ;;  %2945 = vmatpush.bf16.msrb.mxu1 %v3970_v31 }
 0x29a   : > { %v3119_v13 = vmul.f32 0.01, %v2607_v34 }
 0x29c   : > { %v3157_v29 = vmax.f32 %v2607_v34, %v3119_v13 }
 0x29d   : > { %v2550_v24 = vpop.f32.mrf.mxu2 }
 0x29e   : > { %3195 = vst [vmem:[%s5280_s17] sm:$0xff] %v3157_v29  ;;  %v2551_v55 = vadd.f32 %v2550_v24, %v2493_v53  ;;  %v2437_v14 = vpop.f32.mrf.mxu0  ;;  %v4023_v24 = vld [vmem:[#allocation5 + $0x368] sm:$0xf0] }
 0x29f   : > { %v2608_v59 = vpop.f32.mrf.mxu3  ;;  %v2495_v41 = vpop.f32.mrf.mxu1  ;;  %v2438_v57 = vadd.f32 %v2437_v14, %v5182_v9  ;;  %v4220_v14 = vld [vmem:[#allocation5 + $0x264] sm:$0xf] }
 0x2a0   : > { %v2609_v10 = vadd.f32 %v2608_v59, %v2551_v55  ;;  %v4026_v59 = vor.u32 %v4252_v36, %v4023_v24 }
 0x2a1   : > { %2476 = vmatmul.bf16.gmra.mxu0 %v5283_v58  ;;  %v2496_v11 = vadd.f32 %v2495_v41, %v2438_v57  ;;  %v4236_v57 = vld [vmem:[#allocation5 + $0x2e4] sm:$0xf] }
 0x2a2   : > { %v3121_v53 = vmul.f32 0.01, %v2609_v10  ;;  %2534 = vmatmul.bf16.gmra.mxu1 %v5285_v21  ;;  %2592 = vmatmul.bf16.gmra.mxu2 %v5287_v22 }
 0x2a3   : > { %3004 = vmatpush.bf16.msrb.mxu2 %v4026_v59 }
 0x2a4   : > { %2650 = vmatmul.bf16.gmra.mxu3 %v5290_v52  ;;  %v3159_v29 = vmax.f32 %v2609_v10, %v3121_v53  ;;  %v3898_v10 = vor.u32 %v4220_v14, %v3895_v7  ;;  %v3959_v53 = vld [vmem:[#allocation5 + $0x2e8] sm:$0xf0] }
 0x2a5   : > { %v2553_v12 = vpop.f32.mrf.mxu2 }
 0x2a6   : > { %3197 = vst [vmem:[%s5280_s17 + $0x10] sm:$0xff] %v3159_v29  ;;  %v2554_v43 = vadd.f32 %v2553_v12, %v2496_v11  ;;  %v2439_v9 = vpop.f32.mrf.mxu0  ;;  %v5709_v29 = vld [vmem:[#allocation15_spill] sm:$0xff]  ;;  %v3962_v12 = vor.u32 %v4236_v57, %v3959_v53  ;;  %2888 = vmatpush.bf16.msrb.mxu0 %v3898_v10  ;;  %v3887_v57 = vld [vmem:[#allocation5 + $0x258] sm:$0xf0]  ;;  %v4266_v53 = vld [vmem:[#allocation5 + $0x3d4] sm:$0xf] }
 0x2a7   : > { %v2611_v51 = vpop.f32.mrf.mxu3  ;;  %v2497_v48 = vpop.f32.mrf.mxu1  ;;  %v2440_v37 = vadd.f32 %v2439_v9, %v5185_v54  ;;  %v4087_v54 = vld [vmem:[#allocation5 + $0x3e8] sm:$0xf0]  ;;  %v5711_v9 = vld [vmem:[#allocation17_spill] sm:$0xff] }
 0x2a8   : > { %v2612_v49 = vadd.f32 %v2611_v51, %v2554_v43  ;;  %v4090_v11 = vor.u32 %v4268_v25, %v4087_v54  ;;  %v5710_v51 = vld [vmem:[#allocation16_spill] sm:$0xff]  ;;  %2946 = vmatpush.bf16.msrb.mxu1 %v3962_v12  ;;  %v4218_v54 = vld [vmem:[#allocation5 + $0x254] sm:$0xf]  ;;  %v4079_v12 = vld [vmem:[#allocation5 + $0x3d8] sm:$0xf0] }
 0x2a9   : > { %v2498_v34 = vadd.f32 %v2497_v48, %v2440_v37  ;;  %v5712_v48 = vld [vmem:[#allocation18_spill] sm:$0xff] }
 0x2aa   : > { %v3123_v26 = vmul.f32 0.01, %v2612_v49  ;;  %3062 = vmatpush.bf16.msrb.mxu3 %v4090_v11 }
 0x2ac   : > { %v3161_v27 = vmax.f32 %v2612_v49, %v3123_v26 }
 0x2ad   : > { %v2555_v40 = vpop.f32.mrf.mxu2 }
 0x2ae   : > { %3199 = vst [vmem:[%s5280_s17 + $0x20] sm:$0xff] %v3161_v27  ;;  %v2556_v32 = vadd.f32 %v2555_v40, %v2498_v34  ;;  %v2442_v3 = vpop.f32.mrf.mxu0 }
 0x2af   : > { %v2613_v13 = vpop.f32.mrf.mxu3  ;;  %v2500_v55 = vpop.f32.mrf.mxu1  ;;  %v2443_v31 = vadd.f32 %v2442_v3, %v5192_v15 }
 0x2b0   : > { %v2614_v41 = vadd.f32 %v2613_v13, %v2556_v32 }
 0x2b1   : > { %2663 = vmatmul.bf16.vlgmr.msra.gmra.mxu0 %v5709_v29  ;;  %v2501_v15 = vadd.f32 %v2500_v55, %v2443_v31  ;;  %v4250_v55 = vld [vmem:[#allocation5 + $0x354] sm:$0xf] }
 0x2b2   : > { %v3125_v43 = vmul.f32 0.01, %v2614_v41  ;;  %2721 = vmatmul.bf16.vlgmr.msra.gmra.mxu1 %v5710_v51  ;;  %2779 = vmatmul.bf16.vlgmr.msra.gmra.mxu2 %v5711_v9  ;;  %v4082_v51 = vor.u32 %v4266_v53, %v4079_v12  ;;  %v5720_v12 = vld [vmem:[#allocation26_spill] sm:$0xff] }
 0x2b4   : > { %2837 = vmatmul.bf16.vlgmr.msra.gmra.mxu3 %v5712_v48  ;;  %v3163_v49 = vmax.f32 %v2614_v41, %v3125_v43  ;;  %v4015_v41 = vld [vmem:[#allocation5 + $0x358] sm:$0xf0]  ;;  %v5713_v43 = vld [vmem:[#allocation19_spill] sm:$0xff]  ;;  %v5714_v48 = vld [vmem:[#allocation20_spill] sm:$0xff] }
 0x2b5   : > { %v2558_v37 = vpop.f32.mrf.mxu2  ;;  %v4018_v10 = vor.u32 %v4250_v55, %v4015_v41  ;;  %3063 = vmatpush.bf16.msrb.mxu3 %v4082_v51 }
 0x2b6   : > { %3201 = vst [vmem:[%s5280_s17 + $0x30] sm:$0xff] %v3163_v49  ;;  %v2559_v26 = vadd.f32 %v2558_v37, %v2501_v15  ;;  %v2444_v34 = vpop.f32.mrf.mxu0  ;;  %v5715_v49 = vld [vmem:[#allocation21_spill] sm:$0xff]  ;;  %v5716_v15 = vld [vmem:[#allocation22_spill] sm:$0xff] }
 0x2b7   : > { %v2616_v27 = vpop.f32.mrf.mxu3  ;;  %v2502_v40 = vpop.f32.mrf.mxu1  ;;  %v2445_v13 = vadd.f32 %v2444_v34, %v5195_v8  ;;  %v3890_v8 = vor.u32 %v4218_v54, %v3887_v57  ;;  %3005 = vmatpush.bf16.msrb.mxu2 %v4018_v10 }
 0x2b8   : > { %v2617_v32 = vadd.f32 %v2616_v27, %v2559_v26 }
 0x2b9   : > { %v2503_v24 = vadd.f32 %v2502_v40, %v2445_v13  ;;  %2889 = vmatpush.bf16.msrb.mxu0 %v3890_v8  ;;  %v3951_v13 = vld [vmem:[#allocation5 + $0x2d8] sm:$0xf0]  ;;  %v5718_v8 = vld [vmem:[#allocation24_spill] sm:$0xff] }
 0x2ba   : > { %v3127_v3 = vmul.f32 0.01, %v2617_v32 }
 0x2bc   : > { %v3165_v36 = vmax.f32 %v2617_v32, %v3127_v3  ;;  %v4234_v32 = vld [vmem:[#allocation5 + $0x2d4] sm:$0xf] }
 0x2bd   : > { %v2560_v59 = vpop.f32.mrf.mxu2 }
 0x2be   : > { %3203 = vst [vmem:[%s5280_s17 + $0x40] sm:$0xff] %v3165_v36  ;;  %v2561_v14 = vadd.f32 %v2560_v59, %v2503_v24  ;;  %v2447_v25 = vpop.f32.mrf.mxu0  ;;  %v3954_v36 = vor.u32 %v4234_v32, %v3951_v13 }
 0x2bf   : > { %v2618_v7 = vpop.f32.mrf.mxu3  ;;  %v2505_v31 = vpop.f32.mrf.mxu1  ;;  %v2448_v11 = vadd.f32 %v2447_v25, %v5202_v60 }
 0x2c0   : > { %v2619_v29 = vadd.f32 %v2618_v7, %v2561_v14  ;;  %2947 = vmatpush.bf16.msrb.mxu1 %v3954_v36  ;;  %v4071_v36 = vld [vmem:[#allocation5 + $0x3c8] sm:$0xf0] }
 0x2c1   : > { %2668 = vmatmul.bf16.gmra.mxu0 %v5713_v43  ;;  %v2506_v26 = vadd.f32 %v2505_v31, %v2448_v11 }
 0x2c2   : > { %v3129_v9 = vmul.f32 0.01, %v2619_v29  ;;  %2726 = vmatmul.bf16.gmra.mxu1 %v5714_v48  ;;  %2784 = vmatmul.bf16.gmra.mxu2 %v5715_v49 }
 0x2c4   : > { %2842 = vmatmul.bf16.gmra.mxu3 %v5716_v15  ;;  %v3167_v37 = vmax.f32 %v2619_v29, %v3129_v9  ;;  %v5717_v29 = vld [vmem:[#allocation23_spill] sm:$0xff] }
 0x2c5   : > { %v2563_v27 = vpop.f32.mrf.mxu2 }
 0x2c6   : > { %3205 = vst [vmem:[%s5280_s17 + $0x50] sm:$0xff] %v3167_v37  ;;  %v2564_v60 = vadd.f32 %v2563_v27, %v2506_v26  ;;  %v2449_v40 = vpop.f32.mrf.mxu0  ;;  %v4248_v37 = vld [vmem:[#allocation5 + $0x344] sm:$0xf]  ;;  %v4007_v26 = vld [vmem:[#allocation5 + $0x348] sm:$0xf0] }
 0x2c7   : > { %v2621_v34 = vpop.f32.mrf.mxu3  ;;  %v2507_v3 = vpop.f32.mrf.mxu1  ;;  %v2450_v59 = vadd.f32 %v2449_v40, %v5205_v30  ;;  %v5719_v30 = vld [vmem:[#allocation25_spill] sm:$0xff]  ;;  %v4264_v40 = vld [vmem:[#allocation5 + $0x3c4] sm:$0xf] }
 0x2c8   : > { %v2622_v24 = vadd.f32 %v2621_v34, %v2564_v60  ;;  %v4216_v60 = vld [vmem:[#allocation5 + $0x244] sm:$0xf]  ;;  %v3879_v34 = vld [vmem:[#allocation5 + $0x248] sm:$0xf0] }
 0x2c9   : > { %v2508_v25 = vadd.f32 %v2507_v3, %v2450_v59  ;;  %v3882_v3 = vor.u32 %v4216_v60, %v3879_v34  ;;  %v3943_v59 = vld [vmem:[#allocation5 + $0x2c8] sm:$0xf0]  ;;  %v4214_v60 = vld [vmem:[#allocation5 + $0x234] sm:$0xf]  ;;  %v3871_v34 = vld [vmem:[#allocation5 + $0x238] sm:$0xf0] }
 0x2ca   : > { %v3131_v14 = vmul.f32 0.01, %v2622_v24 }
 0x2cb   : > { %2890 = vmatpush.bf16.msrb.mxu0 %v3882_v3  ;;  %v3874_v3 = vor.u32 %v4214_v60, %v3871_v34 }
 0x2cc   : > { %v3169_v7 = vmax.f32 %v2622_v24, %v3131_v14  ;;  %v4232_v24 = vld [vmem:[#allocation5 + $0x2c4] sm:$0xf]  ;;  %v4074_v14 = vor.u32 %v4264_v40, %v4071_v36  ;;  %v4262_v40 = vld [vmem:[#allocation5 + $0x3b4] sm:$0xf]  ;;  %v4063_v36 = vld [vmem:[#allocation5 + $0x3b8] sm:$0xf0] }
 0x2cd   : > { %v2565_v55 = vpop.f32.mrf.mxu2 }
 0x2ce   : > { %3207 = vst [vmem:[%s5280_s17 + $0x60] sm:$0xff] %v3169_v7  ;;  %v2566_v41 = vadd.f32 %v2565_v55, %v2508_v25  ;;  %v2452_v10 = vpop.f32.mrf.mxu0  ;;  %v3946_v7 = vor.u32 %v4232_v24, %v3943_v59  ;;  %3064 = vmatpush.bf16.msrb.mxu3 %v4074_v14  ;;  %v4066_v24 = vor.u32 %v4262_v40, %v4063_v36 }
 0x2cf   : > { %v2623_v31 = vpop.f32.mrf.mxu3  ;;  %v2510_v54 = vpop.f32.mrf.mxu1  ;;  %v2453_v53 = vadd.f32 %v2452_v10, %v5212_v46  ;;  %v4010_v46 = vor.u32 %v4248_v37, %v4007_v26  ;;  %v4246_v26 = vld [vmem:[#allocation5 + $0x334] sm:$0xf]  ;;  %2891 = vmatpush.bf16.msrb.mxu0 %v3874_v3  ;;  %v3991_v3 = vld [vmem:[#allocation5 + $0x328] sm:$0xf0] }
 0x2d0   : > { %v2624_v57 = vadd.f32 %v2623_v31, %v2566_v41  ;;  %2948 = vmatpush.bf16.msrb.mxu1 %v3946_v7 }
 0x2d1   : > { %2673 = vmatmul.bf16.gmra.mxu0 %v5717_v29  ;;  %v2511_v51 = vadd.f32 %v2510_v54, %v2453_v53  ;;  %3006 = vmatpush.bf16.msrb.mxu2 %v4010_v46 }
 0x2d2   : > { %v3133_v11 = vmul.f32 0.01, %v2624_v57  ;;  %2731 = vmatmul.bf16.gmra.mxu1 %v5718_v8  ;;  %2789 = vmatmul.bf16.gmra.mxu2 %v5719_v30  ;;  %v5722_v30 = vld [vmem:[#allocation28_spill] sm:$0xff] }
 0x2d3   : > { %3065 = vmatpush.bf16.msrb.mxu3 %v4066_v24 }
 0x2d4   : > { %2847 = vmatmul.bf16.gmra.mxu3 %v5720_v12  ;;  %v3171_v43 = vmax.f32 %v2624_v57, %v3133_v11  ;;  %v5721_v11 = vld [vmem:[#allocation27_spill] sm:$0xff]  ;;  %v5723_v12 = vld [vmem:[#allocation29_spill] sm:$0xff] }
 0x2d5   : > { %v2568_v9 = vpop.f32.mrf.mxu2 }
 0x2d6   : > { %3209 = vst [vmem:[%s5280_s17 + $0x70] sm:$0xff] %v3171_v43  ;;  %v2569_v48 = vadd.f32 %v2568_v9, %v2511_v51  ;;  %v2454_v15 = vpop.f32.mrf.mxu0  ;;  %v5724_v43 = vld [vmem:[#allocation30_spill] sm:$0xff] }
 0x2d7   : > { %v2626_v49 = vpop.f32.mrf.mxu3  ;;  %v2512_v27 = vpop.f32.mrf.mxu1  ;;  %v2455_v13 = vadd.f32 %v2454_v15, %v5215_v4 }
 0x2d8   : > { %v2627_v32 = vadd.f32 %v2626_v49, %v2569_v48 }
 0x2d9   : > { %v2513_v41 = vadd.f32 %v2512_v27, %v2455_v13  ;;  %v3999_v27 = vld [vmem:[#allocation5 + $0x338] sm:$0xf0] }
 0x2da   : > { %v3135_v25 = vmul.f32 0.01, %v2627_v32 }
 0x2dc   : > { %v3173_v55 = vmax.f32 %v2627_v32, %v3135_v25 }
 0x2dd   : > { %v2570_v31 = vpop.f32.mrf.mxu2 }
 0x2de   : > { %3211 = vst [vmem:[%s5280_s17 + $0x80] sm:$0xff] %v3173_v55  ;;  %v2571_v10 = vadd.f32 %v2570_v31, %v2513_v41  ;;  %v2457_v57 = vpop.f32.mrf.mxu0 }
 0x2df   : > { %v2628_v54 = vpop.f32.mrf.mxu3  ;;  %v2515_v4 = vpop.f32.mrf.mxu1  ;;  %v2458_v29 = vadd.f32 %v2457_v57, %v5222_v1  ;;  %v4002_v1 = vor.u32 %v4246_v26, %v3999_v27 }
 0x2e0   : > { %v2629_v53 = vadd.f32 %v2628_v54, %v2571_v10  ;;  %v4230_v10 = vld [vmem:[#allocation5 + $0x2b4] sm:$0xf]  ;;  %v3935_v54 = vld [vmem:[#allocation5 + $0x2b8] sm:$0xf0] }
 0x2e1   : > { %2678 = vmatmul.bf16.gmra.mxu0 %v5721_v11  ;;  %v2516_v9 = vadd.f32 %v2515_v4, %v2458_v29  ;;  %3007 = vmatpush.bf16.msrb.mxu2 %v4002_v1  ;;  %v3938_v4 = vor.u32 %v4230_v10, %v3935_v54  ;;  %v5725_v29 = vld [vmem:[#allocation31_spill] sm:$0xff]  ;;  %v3927_v10 = vld [vmem:[#allocation5 + $0x2a8] sm:$0xf0] }
 0x2e2   : > { %v3137_v8 = vmul.f32 0.01, %v2629_v53  ;;  %2736 = vmatmul.bf16.gmra.mxu1 %v5722_v30  ;;  %2794 = vmatmul.bf16.gmra.mxu2 %v5723_v12  ;;  %v5727_v30 = vld [vmem:[#allocation33_spill] sm:$0xff]  ;;  %v5728_v12 = vld [vmem:[#allocation34_spill] sm:$0xff]  ;;  %v5729_v54 = vld [vmem:[#allocation35_spill] sm:$0xff] }
 0x2e3   : > { %2949 = vmatpush.bf16.msrb.mxu1 %v3938_v4 }
 0x2e4   : > { %2852 = vmatmul.bf16.gmra.mxu3 %v5724_v43  ;;  %v3175_v51 = vmax.f32 %v2629_v53, %v3137_v8  ;;  %v5726_v8 = vld [vmem:[#allocation32_spill] sm:$0xff] }
 0x2e5   : > { %v2573_v48 = vpop.f32.mrf.mxu2 }
 0x2e6   : > { %3213 = vst [vmem:[%s5280_s17 + $0x90] sm:$0xff] %v3175_v51  ;;  %v2574_v49 = vadd.f32 %v2573_v48, %v2516_v9  ;;  %v2459_v37 = vpop.f32.mrf.mxu0 }
 0x2e7   : > { %v2631_v15 = vpop.f32.mrf.mxu3  ;;  %v2517_v46 = vpop.f32.mrf.mxu1  ;;  %v2460_v13 = vadd.f32 %v2459_v37, %v5225_v61 }
 0x2e8   : > { %v2632_v32 = vadd.f32 %v2631_v15, %v2574_v49 }
 0x2e9   : > { %v2518_v7 = vadd.f32 %v2517_v46, %v2460_v13  ;;  %v4244_v13 = vld [vmem:[#allocation5 + $0x324] sm:$0xf] }
 0x2ea   : > { %v3139_v59 = vmul.f32 0.01, %v2632_v32  ;;  %v3994_v24 = vor.u32 %v4244_v13, %v3991_v3  ;;  %v4210_v13 = vld [vmem:[#allocation5 + $0x214] sm:$0xf]  ;;  %v3855_v3 = vld [vmem:[#allocation5 + $0x218] sm:$0xf0] }
 0x2ec   : > { %v3177_v14 = vmax.f32 %v2632_v32, %v3139_v59  ;;  %v4212_v59 = vld [vmem:[#allocation5 + $0x224] sm:$0xf]  ;;  %3008 = vmatpush.bf16.msrb.mxu2 %v3994_v24 }
 0x2ed   : > { %v2575_v25 = vpop.f32.mrf.mxu2 }
 0x2ee   : > { %3215 = vst [vmem:[%s5280_s17 + $0xa0] sm:$0xff] %v3177_v14  ;;  %v2576_v55 = vadd.f32 %v2575_v25, %v2518_v7  ;;  %v2462_v31 = vpop.f32.mrf.mxu0  ;;  %v3863_v14 = vld [vmem:[#allocation5 + $0x228] sm:$0xf0]  ;;  %v4260_v7 = vld [vmem:[#allocation5 + $0x3a4] sm:$0xf] }
 0x2ef   : > { %v2633_v41 = vpop.f32.mrf.mxu3  ;;  %v2520_v57 = vpop.f32.mrf.mxu1  ;;  %v2463_v53 = vadd.f32 %v2462_v31, %v5232_v17  ;;  %v4228_v31 = vld [vmem:[#allocation5 + $0x2a4] sm:$0xf] }
 0x2f0   : > { %v2634_v61 = vadd.f32 %v2633_v41, %v2576_v55  ;;  %v3866_v41 = vor.u32 %v4212_v59, %v3863_v14  ;;  %v3930_v4 = vor.u32 %v4228_v31, %v3927_v10  ;;  %v3858_v14 = vor.u32 %v4210_v13, %v3855_v3  ;;  %v5734_v10 = vld [vmem:[#allocation40_spill] sm:$0xff]  ;;  %v5739_v3 = vld [vmem:[#allocation45_spill] sm:$0xff] }
 0x2f1   : > { %2683 = vmatmul.bf16.gmra.mxu0 %v5725_v29  ;;  %v2521_v51 = vadd.f32 %v2520_v57, %v2463_v53  ;;  %v5730_v53 = vld [vmem:[#allocation36_spill] sm:$0xff]  ;;  %v5731_v29 = vld [vmem:[#allocation37_spill] sm:$0xff] }
 0x2f2   : > { %v3141_v11 = vmul.f32 0.01, %v2634_v61  ;;  %2741 = vmatmul.bf16.gmra.mxu1 %v5726_v8  ;;  %2799 = vmatmul.bf16.gmra.mxu2 %v5727_v30  ;;  %v5738_v13 = vld [vmem:[#allocation44_spill] sm:$0xff] }
 0x2f3   : > { %2892 = vmatpush.bf16.msrb.mxu0 %v3866_v41  ;;  %2950 = vmatpush.bf16.msrb.mxu1 %v3930_v4 }
 0x2f4   : > { %2857 = vmatmul.bf16.gmra.mxu3 %v5728_v12  ;;  %v3179_v43 = vmax.f32 %v2634_v61, %v3141_v11  ;;  %v5732_v11 = vld [vmem:[#allocation38_spill] sm:$0xff] }
 0x2f5   : > { %v2578_v9 = vpop.f32.mrf.mxu2 }
 0x2f6   : > { %3217 = vst [vmem:[%s5280_s17 + $0xb0] sm:$0xff] %v3179_v43  ;;  %v2579_v48 = vadd.f32 %v2578_v9, %v2521_v51  ;;  %v2464_v15 = vpop.f32.mrf.mxu0 }
 0x2f7   : > { %v2636_v49 = vpop.f32.mrf.mxu3  ;;  %v2522_v37 = vpop.f32.mrf.mxu1  ;;  %v2465_v26 = vadd.f32 %v2464_v15, %v5235_v47  ;;  %v4055_v47 = vld [vmem:[#allocation5 + $0x3a8] sm:$0xf0]  ;;  %2893 = vmatpush.bf16.msrb.mxu0 %v3858_v14  ;;  %v4224_v14 = vld [vmem:[#allocation5 + $0x284] sm:$0xf] }
 0x2f8   : > { %v2637_v17 = vadd.f32 %v2636_v49, %v2579_v48  ;;  %v4058_v57 = vor.u32 %v4260_v7, %v4055_v47  ;;  %v4226_v7 = vld [vmem:[#allocation5 + $0x294] sm:$0xf] }
 0x2f9   : > { %v2523_v1 = vadd.f32 %v2522_v37, %v2465_v26 }
 0x2fa   : > { %v3143_v27 = vmul.f32 0.01, %v2637_v17  ;;  %3066 = vmatpush.bf16.msrb.mxu3 %v4058_v57  ;;  %v5736_v57 = vld [vmem:[#allocation42_spill] sm:$0xff] }
 0x2fc   : > { %v3181_v46 = vmax.f32 %v2637_v17, %v3143_v27 }
 0x2fd   : > { %v2580_v60 = vpop.f32.mrf.mxu2 }
 0x2fe   : > { %3219 = vst [vmem:[%s5280_s17 + $0xc0] sm:$0xff] %v3181_v46  ;;  %v2581_v34 = vadd.f32 %v2580_v60, %v2523_v1  ;;  %v2467_v32 = vpop.f32.mrf.mxu0  ;;  %v4242_v60 = vld [vmem:[#allocation5 + $0x314] sm:$0xf] }
 0x2ff   : > { %v2638_v40 = vpop.f32.mrf.mxu3  ;;  %v2525_v36 = vpop.f32.mrf.mxu1  ;;  %v2468_v55 = vadd.f32 %v2467_v32, %v5242_v28 }
 0x300   : > { %v2639_v25 = vadd.f32 %v2638_v40, %v2581_v34  ;;  %v3983_v34 = vld [vmem:[#allocation5 + $0x318] sm:$0xf0] }
 0x301   : > { %2688 = vmatmul.bf16.gmra.mxu0 %v5729_v54  ;;  %v2526_v28 = vadd.f32 %v2525_v36, %v2468_v55  ;;  %v3986_v32 = vor.u32 %v4242_v60, %v3983_v34  ;;  %v4258_v36 = vld [vmem:[#allocation5 + $0x394] sm:$0xf]  ;;  %v5733_v55 = vld [vmem:[#allocation39_spill] sm:$0xff] }
 0x302   : > { %v3145_v61 = vmul.f32 0.01, %v2639_v25  ;;  %2746 = vmatmul.bf16.gmra.mxu1 %v5730_v53  ;;  %2804 = vmatmul.bf16.gmra.mxu2 %v5731_v29  ;;  %v5735_v54 = vld [vmem:[#allocation41_spill] sm:$0xff]  ;;  %v4208_v34 = vld [vmem:[#allocation5 + $0x204] sm:$0xf] }
 0x303   : > { %3009 = vmatpush.bf16.msrb.mxu2 %v3986_v32 }
 0x304   : > { %2862 = vmatmul.bf16.gmra.mxu3 %v5732_v11  ;;  %v3183_v8 = vmax.f32 %v2639_v25, %v3145_v61  ;;  %v3919_v25 = vld [vmem:[#allocation5 + $0x298] sm:$0xf0] }
 0x305   : > { %v2583_v30 = vpop.f32.mrf.mxu2  ;;  %v3922_v47 = vor.u32 %v4226_v7, %v3919_v25 }
 0x306   : > { %3221 = vst [vmem:[%s5280_s17 + $0xd0] sm:$0xff] %v3183_v8  ;;  %v2584_v12 = vadd.f32 %v2583_v30, %v2526_v28  ;;  %v2469_v51 = vpop.f32.mrf.mxu0 }
 0x307   : > { %v2641_v43 = vpop.f32.mrf.mxu3  ;;  %v2527_v9 = vpop.f32.mrf.mxu1  ;;  %v2470_v49 = vadd.f32 %v2469_v51, %v5245_v35  ;;  %v4047_v35 = vld [vmem:[#allocation5 + $0x398] sm:$0xf0]  ;;  %2951 = vmatpush.bf16.msrb.mxu1 %v3922_v47 }
 0x308   : > { %v2642_v48 = vadd.f32 %v2641_v43, %v2584_v12  ;;  %v4050_v41 = vor.u32 %v4258_v36, %v4047_v35  ;;  %v3911_v35 = vld [vmem:[#allocation5 + $0x288] sm:$0xf0] }
 0x309   : > { %v2528_v17 = vadd.f32 %v2527_v9, %v2470_v49 }
 0x30a   : > { %v3147_v15 = vmul.f32 0.01, %v2642_v48  ;;  %3067 = vmatpush.bf16.msrb.mxu3 %v4050_v41 }
 0x30c   : > { %v3185_v37 = vmax.f32 %v2642_v48, %v3147_v15 }
 0x30d   : > { %v2585_v26 = vpop.f32.mrf.mxu2 }
 0x30e   : > { %3223 = vst [vmem:[%s5280_s17 + $0xe0] sm:$0xff] %v3185_v37  ;;  %v2586_v27 = vadd.f32 %v2585_v26, %v2528_v17  ;;  %v2472_v1 = vpop.f32.mrf.mxu0 }
 0x30f   : > { %v2643_v46 = vpop.f32.mrf.mxu3  ;;  %v2530_v40 = vpop.f32.mrf.mxu1  ;;  %v2473_v59 = vadd.f32 %v2472_v1, %v5252_v50  ;;  %v5737_v1 = vld [vmem:[#allocation43_spill] sm:$0xff] }
 0x310   : > { %v2644_v24 = vadd.f32 %v2643_v46, %v2586_v27  ;;  %v4240_v27 = vld [vmem:[#allocation5 + $0x304] sm:$0xf]  ;;  %v3975_v46 = vld [vmem:[#allocation5 + $0x308] sm:$0xf0] }
 0x311   : > { %2693 = vmatmul.bf16.gmra.mxu0 %v5733_v55  ;;  %v2531_v50 = vadd.f32 %v2530_v40, %v2473_v59  ;;  %v3978_v60 = vor.u32 %v4240_v27, %v3975_v46  ;;  %v3847_v40 = vld [vmem:[#allocation5 + $0x208] sm:$0xf0]  ;;  %v5740_v59 = vld [vmem:[#allocation46_spill] sm:$0xff]  ;;  %v3914_v55 = vor.u32 %v4224_v14, %v3911_v35 }
 0x312   : > { %v3149_v31 = vmul.f32 0.01, %v2644_v24  ;;  %2751 = vmatmul.bf16.gmra.mxu1 %v5734_v10  ;;  %2809 = vmatmul.bf16.gmra.mxu2 %v5735_v54  ;;  %v3850_v36 = vor.u32 %v4208_v34, %v3847_v40 }
 0x313   : > { %3010 = vmatpush.bf16.msrb.mxu2 %v3978_v60  ;;  %2952 = vmatpush.bf16.msrb.mxu1 %v3914_v55 }
 0x314   : > { %2867 = vmatmul.bf16.gmra.mxu3 %v5736_v57  ;;  %v3187_v4 = vmax.f32 %v2644_v24, %v3149_v31  ;;  %v4039_v24 = vld [vmem:[#allocation5 + $0x388] sm:$0xf0]  ;;  %2894 = vmatpush.bf16.msrb.mxu0 %v3850_v36 }
 0x315   : > { %v2588_v61 = vpop.f32.mrf.mxu2 }
 0x316   : > { %3225 = vst [vmem:[%s5280_s17 + $0xf0] sm:$0xff] %v3187_v4  ;;  %v2589_v53 = vadd.f32 %v2588_v61, %v2531_v50  ;;  %v2474_v11 = vpop.f32.mrf.mxu0  ;;  %v4344_v50 = vld [vmem:[%s5548_s4] sm:$0x3] }
 0x317   : > { %v2646_v29 = vpop.f32.mrf.mxu3  ;;  %v2532_v8 = vpop.f32.mrf.mxu1  ;;  %v2475_v30 = vadd.f32 %v2474_v11, %v5255_v63  ;;  %v4256_v63 = vld [vmem:[#allocation5 + $0x384] sm:$0xf]  ;;  %v5364_v61 = vperm.slane %v4344_v50, 1 }
 0x318   : > { %v2647_v28 = vadd.f32 %v2646_v29, %v2589_v53  ;;  %v5748_v50 = vld [vmem:[#allocation59_spill] sm:$0xff] }
 0x319   : > { %v2533_v51 = vadd.f32 %v2532_v8, %v2475_v30 }
 0x31a   : > { %v3151_v12 = vmul.f32 0.01, %v2647_v28 }
 0x31c   : > { %v3189_v43 = vmax.f32 %v2647_v28, %v3151_v12 }
 0x31d   : > { %v2590_v9 = vpop.f32.mrf.mxu2 }
 0x31e   : > { %3227 = vst [vmem:[%s5280_s17 + $0x100] sm:$0xff] %v3189_v43  ;;  %v2591_v48 = vadd.f32 %v2590_v9, %v2533_v51  ;;  %v2477_v15 = vpop.f32.mrf.mxu0  ;;  %v5741_v43 = vld [vmem:[#allocation47_spill] sm:$0xff]  ;;  %v5742_v51 = vld [vmem:[#allocation49_spill] sm:$0xff] }
 0x31f   : > { %v2648_v49 = vpop.f32.mrf.mxu3  ;;  %v2535_v37 = vpop.f32.mrf.mxu1  ;;  %v2478_v26 = vadd.f32 %v2477_v15, %v5261_v2  ;;  %v4042_v2 = vor.u32 %v4256_v63, %v4039_v24  ;;  %v5743_v9 = vld [vmem:[#allocation51_spill] sm:$0xff] }
 0x320   : > { %v2649_v17 = vadd.f32 %v2648_v49, %v2591_v48  ;;  %v5744_v48 = vld [vmem:[#allocation53_spill] sm:$0xff] }
 0x321   : > { %2698 = vmatmul.bf16.gmra.mxu0 %v5737_v1  ;;  %v2536_v25 = vadd.f32 %v2535_v37, %v2478_v26  ;;  %3068 = vmatpush.bf16.msrb.mxu3 %v4042_v2 }
 0x322   : > { %v3153_v32 = vmul.f32 0.01, %v2649_v17  ;;  %2756 = vmatmul.bf16.gmra.mxu1 %v5738_v13  ;;  %2814 = vmatmul.bf16.gmra.mxu2 %v5739_v3 }
 0x324   : > { %2872 = vmatmul.bf16.gmra.mxu3 %v5740_v59  ;;  %v3191_v7 = vmax.f32 %v2649_v17, %v3153_v32 }
 0x325   : > { %v2593_v41 = vpop.f32.mrf.mxu2 }
 0x326   : > { %3229 = vst [vmem:[%s5280_s17 + $0x110] sm:$0xff] %v3191_v7  ;;  %v2594_v47 = vadd.f32 %v2593_v41, %v2536_v25  ;;  %v2479_v10 = vpop.f32.mrf.mxu0 }
 0x327   : > { %v2651_v31 = vpop.f32.mrf.mxu3  ;;  %v2537_v54 = vpop.f32.mrf.mxu1 }
 0x328   : > { %v2652_v57 = vadd.f32 %v2651_v31, %v2594_v47  ;;  %v5745_v54 = vld [vmem:[#allocation56_spill] sm:$0xff] }
 0x32a   : > { %v3155_v4 = vmul.f32 0.01, %v2652_v57 }
 0x32c   : > { %v3193_v53 = vmax.f32 %v2652_v57, %v3155_v4  ;;  %v5746_v57 = vld [vmem:[#allocation57_spill] sm:$0xff]  ;;  %v5747_v4 = vld [vmem:[#allocation58_spill] sm:$0xff] }
 0x32d   : > { %v2595_v29 = vpop.f32.mrf.mxu2 }
 0x32e   : > { %3231 = vst [vmem:[%s5280_s17 + $0x120] sm:$0xff] %v3193_v53  ;;  %v2664_v8 = vpop.f32.mrf.mxu0 }
 0x32f   : > { %v2653_v11 = vpop.f32.mrf.mxu3  ;;  %v2665_v28 = vadd.f32 %v2664_v8, %v5364_v61  ;;  %v2722_v30 = vpop.f32.mrf.mxu1 }
 0x331   : > { %v2723_v12 = vadd.f32 %v2722_v30, %v2665_v28  ;;  %2703 = vmatmul.bf16.gmra.mxu0 %v5741_v43 }
 0x332   : > { %2761 = vmatmul.bf16.gmra.mxu1 %v5742_v51  ;;  %2819 = vmatmul.bf16.gmra.mxu2 %v5743_v9 }
 0x334   : > { %2877 = vmatmul.bf16.gmra.mxu3 %v5744_v48 }
 0x335   : > { %v2780_v49 = vpop.f32.mrf.mxu2 }
 0x336   : > { %v2781_v15 = vadd.f32 %v2780_v49, %v2723_v12  ;;  %v2666_v17 = vpop.f32.mrf.mxu0 }
 0x337   : > { %v2838_v37 = vpop.f32.mrf.mxu3  ;;  %v2667_v26 = vadd.f32 %v2666_v17, %v5364_v61  ;;  %v2724_v27 = vpop.f32.mrf.mxu1 }
 0x338   : > { %v5373_v46 = vadd.f32 %v2838_v37, %v2781_v15 }
 0x339   : > { %v2725_v1 = vadd.f32 %v2724_v27, %v2667_v26  ;;  %v5749_v27 = vld [vmem:[#allocation60_spill] sm:$0xff] }
 0x33d   : > { %v2782_v60 = vpop.f32.mrf.mxu2 }
 0x33e   : > { %v2783_v34 = vadd.f32 %v2782_v60, %v2725_v1  ;;  %v2669_v63 = vpop.f32.mrf.mxu0 }
 0x33f   : > { %v2840_v40 = vpop.f32.mrf.mxu3  ;;  %v2670_v32 = vadd.f32 %v2669_v63, %v5364_v61  ;;  %v2727_v13 = vpop.f32.mrf.mxu1 }
 0x340   : > { %v5376_v3 = vadd.f32 %v2840_v40, %v2783_v34 }
 0x341   : > { %v2728_v36 = vadd.f32 %v2727_v13, %v2670_v32  ;;  %2708 = vmatmul.bf16.gmra.mxu0 %v5166_v16 }
 0x342   : > { %2766 = vmatmul.bf16.gmra.mxu1 %v5169_v56  ;;  %2824 = vmatmul.bf16.gmra.mxu2 %v5171_v62 }
 0x344   : > { %2882 = vmatmul.bf16.gmra.mxu3 %v5175_v20 }
 0x345   : > { %v2785_v24 = vpop.f32.mrf.mxu2 }
 0x346   : > { %v2786_v59 = vadd.f32 %v2785_v24, %v2728_v36  ;;  %v2671_v14 = vpop.f32.mrf.mxu0 }
 0x347   : > { %v2843_v2 = vpop.f32.mrf.mxu3  ;;  %v2672_v35 = vadd.f32 %v2671_v14, %v5364_v61  ;;  %v2729_v7 = vpop.f32.mrf.mxu1 }
 0x348   : > { %v5383_v25 = vadd.f32 %v2843_v2, %v2786_v59 }
 0x349   : > { %v2730_v55 = vadd.f32 %v2729_v7, %v2672_v35  ;;  %v5750_v7 = vld [vmem:[#allocation61_spill] sm:$0xff] }
 0x34d   : > { %v2787_v41 = vpop.f32.mrf.mxu2 }
 0x34e   : > { %v2788_v47 = vadd.f32 %v2787_v41, %v2730_v55  ;;  %v2674_v16 = vpop.f32.mrf.mxu0  ;;  %v5751_v55 = vld [vmem:[#allocation62_spill] sm:$0xff] }
 0x34f   : > { %v2845_v31 = vpop.f32.mrf.mxu3  ;;  %v2675_v56 = vadd.f32 %v2674_v16, %v5364_v61  ;;  %v2732_v10 = vpop.f32.mrf.mxu1 }
 0x350   : > { %v5386_v62 = vadd.f32 %v2845_v31, %v2788_v47 }
 0x351   : > { %v2733_v20 = vadd.f32 %v2732_v10, %v2675_v56  ;;  %2895 = vmatmul.bf16.vlgmr.msrb.gmra.mxu0 %v5745_v54 }
 0x352   : > { %2953 = vmatmul.bf16.vlgmr.msrb.gmra.mxu1 %v5746_v57  ;;  %3011 = vmatmul.bf16.vlgmr.msrb.gmra.mxu2 %v5747_v4 }
 0x354   : > { %3069 = vmatmul.bf16.vlgmr.msrb.gmra.mxu3 %v5748_v50 }
 0x355   : > { %v2790_v53 = vpop.f32.mrf.mxu2 }
 0x356   : > { %v2791_v29 = vadd.f32 %v2790_v53, %v2733_v20  ;;  %v2676_v8 = vpop.f32.mrf.mxu0 }
 0x357   : > { %v2848_v11 = vpop.f32.mrf.mxu3  ;;  %v2677_v28 = vadd.f32 %v2676_v8, %v5364_v61  ;;  %v2734_v30 = vpop.f32.mrf.mxu1  ;;  %v5752_v8 = vld [vmem:[#allocation63_spill] sm:$0xff] }
 0x358   : > { %v5393_v12 = vadd.f32 %v2848_v11, %v2791_v29 }
 0x359   : > { %v2735_v43 = vadd.f32 %v2734_v30, %v2677_v28  ;;  %v5753_v28 = vld [vmem:[#allocation64_spill] sm:$0xff]  ;;  %v5754_v30 = vld [vmem:[#allocation65_spill] sm:$0xff] }
 0x35d   : > { %v2792_v51 = vpop.f32.mrf.mxu2 }
 0x35e   : > { %v2793_v9 = vadd.f32 %v2792_v51, %v2735_v43  ;;  %v2679_v49 = vpop.f32.mrf.mxu0  ;;  %v5755_v43 = vld [vmem:[#allocation66_spill] sm:$0xff] }
 0x35f   : > { %v2850_v48 = vpop.f32.mrf.mxu3  ;;  %v2680_v15 = vadd.f32 %v2679_v49, %v5364_v61  ;;  %v2737_v37 = vpop.f32.mrf.mxu1 }
 0x360   : > { %v5396_v17 = vadd.f32 %v2850_v48, %v2793_v9 }
 0x361   : > { %v2738_v26 = vadd.f32 %v2737_v37, %v2680_v15  ;;  %2900 = vmatmul.bf16.gmra.mxu0 %v4983_v6 }
 0x362   : > { %2958 = vmatmul.bf16.gmra.mxu1 %v4986_v39  ;;  %3016 = vmatmul.bf16.gmra.mxu2 %v4995_v45 }
 0x364   : > { %3074 = vmatmul.bf16.gmra.mxu3 %v5749_v27 }
 0x365   : > { %v2795_v1 = vpop.f32.mrf.mxu2 }
 0x366   : > { %v2796_v60 = vadd.f32 %v2795_v1, %v2738_v26  ;;  %v2681_v40 = vpop.f32.mrf.mxu0 }
 0x367   : > { %v2853_v34 = vpop.f32.mrf.mxu3  ;;  %v2682_v63 = vadd.f32 %v2681_v40, %v5364_v61  ;;  %v2739_v32 = vpop.f32.mrf.mxu1 }
 0x368   : > { %v5403_v13 = vadd.f32 %v2853_v34, %v2796_v60 }
 0x369   : > { %v2740_v36 = vadd.f32 %v2739_v32, %v2682_v63 }
 0x36d   : > { %v2797_v24 = vpop.f32.mrf.mxu2 }
 0x36e   : > { %v2798_v59 = vadd.f32 %v2797_v24, %v2740_v36  ;;  %v2684_v6 = vpop.f32.mrf.mxu0 }
 0x36f   : > { %v2855_v2 = vpop.f32.mrf.mxu3  ;;  %v2685_v39 = vadd.f32 %v2684_v6, %v5364_v61  ;;  %v2742_v14 = vpop.f32.mrf.mxu1 }
 0x370   : > { %v5406_v45 = vadd.f32 %v2855_v2, %v2798_v59  ;;  %v5756_v59 = vld [vmem:[#allocation67_spill] sm:$0xff] }
 0x371   : > { %v2743_v35 = vadd.f32 %v2742_v14, %v2685_v39  ;;  %2905 = vmatmul.bf16.gmra.mxu0 %v5003_v44 }
 0x372   : > { %2963 = vmatmul.bf16.gmra.mxu1 %v5006_v33  ;;  %3021 = vmatmul.bf16.gmra.mxu2 %v5750_v7 }
 0x374   : > { %3079 = vmatmul.bf16.gmra.mxu3 %v5751_v55 }
 0x375   : > { %v2800_v41 = vpop.f32.mrf.mxu2 }
 0x376   : > { %v2801_v47 = vadd.f32 %v2800_v41, %v2743_v35  ;;  %v2686_v16 = vpop.f32.mrf.mxu0 }
 0x377   : > { %v2858_v31 = vpop.f32.mrf.mxu3  ;;  %v2687_v56 = vadd.f32 %v2686_v16, %v5364_v61  ;;  %v2744_v10 = vpop.f32.mrf.mxu1 }
 0x378   : > { %v5413_v20 = vadd.f32 %v2858_v31, %v2801_v47 }
 0x379   : > { %v2745_v54 = vadd.f32 %v2744_v10, %v2687_v56 }
 0x37d   : > { %v2802_v57 = vpop.f32.mrf.mxu2 }
 0x37e   : > { %v2803_v4 = vadd.f32 %v2802_v57, %v2745_v54  ;;  %v2689_v44 = vpop.f32.mrf.mxu0  ;;  %v5757_v54 = vld [vmem:[#allocation68_spill] sm:$0xff]  ;;  %v5758_v57 = vld [vmem:[#allocation69_spill] sm:$0xff] }
 0x37f   : > { %v2860_v50 = vpop.f32.mrf.mxu3  ;;  %v2690_v33 = vadd.f32 %v2689_v44, %v5364_v61  ;;  %v2747_v53 = vpop.f32.mrf.mxu1 }
 0x380   : > { %v5416_v29 = vadd.f32 %v2860_v50, %v2803_v4  ;;  %v5759_v4 = vld [vmem:[#allocation70_spill] sm:$0xff]  ;;  %v5760_v50 = vld [vmem:[#allocation71_spill] sm:$0xff] }
 0x381   : > { %v2748_v11 = vadd.f32 %v2747_v53, %v2690_v33  ;;  %2910 = vmatmul.bf16.gmra.mxu0 %v5752_v8 }
 0x382   : > { %2968 = vmatmul.bf16.gmra.mxu1 %v5753_v28  ;;  %3026 = vmatmul.bf16.gmra.mxu2 %v5754_v30 }
 0x384   : > { %3084 = vmatmul.bf16.gmra.mxu3 %v5755_v43 }
 0x385   : > { %v2805_v51 = vpop.f32.mrf.mxu2 }
 0x386   : > { %v2806_v9 = vadd.f32 %v2805_v51, %v2748_v11  ;;  %v2691_v49 = vpop.f32.mrf.mxu0 }
 0x387   : > { %v2863_v48 = vpop.f32.mrf.mxu3  ;;  %v2692_v15 = vadd.f32 %v2691_v49, %v5364_v61  ;;  %v2749_v37 = vpop.f32.mrf.mxu1 }
 0x388   : > { %v5423_v26 = vadd.f32 %v2863_v48, %v2806_v9 }
 0x389   : > { %v2750_v27 = vadd.f32 %v2749_v37, %v2692_v15 }
 0x38d   : > { %v2807_v1 = vpop.f32.mrf.mxu2 }
 0x38e   : > { %v2808_v60 = vadd.f32 %v2807_v1, %v2750_v27  ;;  %v2694_v40 = vpop.f32.mrf.mxu0 }
 0x38f   : > { %v2865_v34 = vpop.f32.mrf.mxu3  ;;  %v2695_v63 = vadd.f32 %v2694_v40, %v5364_v61  ;;  %v2752_v32 = vpop.f32.mrf.mxu1 }
 0x390   : > { %v5426_v36 = vadd.f32 %v2865_v34, %v2808_v60 }
 0x391   : > { %v2753_v24 = vadd.f32 %v2752_v32, %v2695_v63  ;;  %2915 = vmatmul.bf16.gmra.mxu0 %v5043_v42 }
 0x392   : > { %2973 = vmatmul.bf16.gmra.mxu1 %v5046_v23  ;;  %3031 = vmatmul.bf16.gmra.mxu2 %v5055_v38 }
 0x394   : > { %3089 = vmatmul.bf16.gmra.mxu3 %v5756_v59 }
 0x395   : > { %v2810_v2 = vpop.f32.mrf.mxu2 }
 0x396   : > { %v2811_v6 = vadd.f32 %v2810_v2, %v2753_v24  ;;  %v2696_v14 = vpop.f32.mrf.mxu0 }
 0x397   : > { %v2868_v39 = vpop.f32.mrf.mxu3  ;;  %v2697_v35 = vadd.f32 %v2696_v14, %v5364_v61  ;;  %v2754_v7 = vpop.f32.mrf.mxu1 }
 0x398   : > { %v5433_v55 = vadd.f32 %v2868_v39, %v2811_v6 }
 0x399   : > { %v2755_v41 = vadd.f32 %v2754_v7, %v2697_v35  ;;  %v5761_v7 = vld [vmem:[#allocation72_spill] sm:$0xff] }
 0x39d   : > { %v2812_v47 = vpop.f32.mrf.mxu2 }
 0x39e   : > { %v2813_v31 = vadd.f32 %v2812_v47, %v2755_v41  ;;  %v2699_v42 = vpop.f32.mrf.mxu0  ;;  %v5762_v41 = vld [vmem:[#allocation73_spill] sm:$0xff]  ;;  %v5763_v47 = vld [vmem:[#allocation74_spill] sm:$0xff] }
 0x39f   : > { %v2870_v16 = vpop.f32.mrf.mxu3  ;;  %v2700_v23 = vadd.f32 %v2699_v42, %v5364_v61  ;;  %v2757_v56 = vpop.f32.mrf.mxu1 }
 0x3a0   : > { %v5436_v38 = vadd.f32 %v2870_v16, %v2813_v31  ;;  %v5764_v31 = vld [vmem:[#allocation75_spill] sm:$0xff] }
 0x3a1   : > { %v2758_v10 = vadd.f32 %v2757_v56, %v2700_v23  ;;  %2920 = vmatmul.bf16.gmra.mxu0 %v5757_v54 }
 0x3a2   : > { %2978 = vmatmul.bf16.gmra.mxu1 %v5758_v57  ;;  %3036 = vmatmul.bf16.gmra.mxu2 %v5759_v4 }
 0x3a4   : > { %3094 = vmatmul.bf16.gmra.mxu3 %v5760_v50 }
 0x3a5   : > { %v2815_v44 = vpop.f32.mrf.mxu2 }
 0x3a6   : > { %v2816_v33 = vadd.f32 %v2815_v44, %v2758_v10  ;;  %v2701_v11 = vpop.f32.mrf.mxu0 }
 0x3a7   : > { %v2873_v53 = vpop.f32.mrf.mxu3  ;;  %v2702_v8 = vadd.f32 %v2701_v11, %v5364_v61  ;;  %v2759_v28 = vpop.f32.mrf.mxu1  ;;  %v5767_v11 = vld [vmem:[#allocation78_spill] sm:$0xff] }
 0x3a8   : > { %v5443_v30 = vadd.f32 %v2873_v53, %v2816_v33  ;;  %v5765_v33 = vld [vmem:[#allocation76_spill] sm:$0xff]  ;;  %v5766_v53 = vld [vmem:[#allocation77_spill] sm:$0xff] }
 0x3a9   : > { %v2760_v43 = vadd.f32 %v2759_v28, %v2702_v8  ;;  %v5768_v8 = vld [vmem:[#allocation79_spill] sm:$0xff] }
 0x3ad   : > { %v2817_v51 = vpop.f32.mrf.mxu2 }
 0x3ae   : > { %v2818_v9 = vadd.f32 %v2817_v51, %v2760_v43  ;;  %v2704_v49 = vpop.f32.mrf.mxu0 }
 0x3af   : > { %v2875_v48 = vpop.f32.mrf.mxu3  ;;  %v2705_v15 = vadd.f32 %v2704_v49, %v5364_v61  ;;  %v2762_v37 = vpop.f32.mrf.mxu1 }
 0x3b0   : > { %v5446_v27 = vadd.f32 %v2875_v48, %v2818_v9 }
 0x3b1   : > { %v2763_v1 = vadd.f32 %v2762_v37, %v2705_v15  ;;  %2925 = vmatmul.bf16.gmra.mxu0 %v5083_v18 }
 0x3b2   : > { %2983 = vmatmul.bf16.gmra.mxu1 %v5086_v0  ;;  %3041 = vmatmul.bf16.gmra.mxu2 %v5095_v5 }
 0x3b4   : > { %3099 = vmatmul.bf16.gmra.mxu3 %v5097_v19 }
 0x3b5   : > { %v2820_v60 = vpop.f32.mrf.mxu2 }
 0x3b6   : > { %v2821_v34 = vadd.f32 %v2820_v60, %v2763_v1  ;;  %v2706_v63 = vpop.f32.mrf.mxu0 }
 0x3b7   : > { %v2878_v40 = vpop.f32.mrf.mxu3  ;;  %v2707_v32 = vadd.f32 %v2706_v63, %v5364_v61  ;;  %v2764_v24 = vpop.f32.mrf.mxu1 }
 0x3b8   : > { %v5453_v59 = vadd.f32 %v2878_v40, %v2821_v34 }
 0x3b9   : > { %v2765_v2 = vadd.f32 %v2764_v24, %v2707_v32 }
 0x3bd   : > { %v2822_v6 = vpop.f32.mrf.mxu2 }
 0x3be   : > { %v2823_v39 = vadd.f32 %v2822_v6, %v2765_v2  ;;  %v2709_v18 = vpop.f32.mrf.mxu0 }
 0x3bf   : > { %v2880_v14 = vpop.f32.mrf.mxu3  ;;  %v2710_v0 = vadd.f32 %v2709_v18, %v5364_v61  ;;  %v2767_v35 = vpop.f32.mrf.mxu1 }
 0x3c0   : > { %v5456_v5 = vadd.f32 %v2880_v14, %v2823_v39 }
 0x3c1   : > { %v2768_v19 = vadd.f32 %v2767_v35, %v2710_v0  ;;  %2930 = vmatmul.bf16.gmra.mxu0 %v5761_v7 }
 0x3c2   : > { %2988 = vmatmul.bf16.gmra.mxu1 %v5762_v41  ;;  %3046 = vmatmul.bf16.gmra.mxu2 %v5763_v47 }
 0x3c4   : > { %3104 = vmatmul.bf16.gmra.mxu3 %v5764_v31 }
 0x3c5   : > { %v2825_v16 = vpop.f32.mrf.mxu2 }
 0x3c6   : > { %v2826_v42 = vadd.f32 %v2825_v16, %v2768_v19  ;;  %v2711_v56 = vpop.f32.mrf.mxu0 }
 0x3c7   : > { %v2883_v23 = vpop.f32.mrf.mxu3  ;;  %v2769_v10 = vpop.f32.mrf.mxu1 }
 0x3c8   : > { %v5462_v54 = vadd.f32 %v2883_v23, %v2826_v42 }
 0x3cd   : > { %v2827_v61 = vpop.f32.mrf.mxu2 }
 0x3ce   : > { %v2896_v4 = vpop.f32.mrf.mxu0 }
 0x3cf   : > { %v2885_v57 = vpop.f32.mrf.mxu3  ;;  %v2954_v50 = vpop.f32.mrf.mxu1  ;;  %v2897_v44 = vadd.f32 %v2896_v4, %v5373_v46 }
 0x3d1   : > { %2935 = vmatmul.bf16.gmra.mxu0 %v5765_v33  ;;  %v2955_v28 = vadd.f32 %v2954_v50, %v2897_v44 }
 0x3d2   : > { %2993 = vmatmul.bf16.gmra.mxu1 %v5766_v53  ;;  %3051 = vmatmul.bf16.gmra.mxu2 %v5767_v11 }
 0x3d4   : > { %3109 = vmatmul.bf16.gmra.mxu3 %v5768_v8 }
 0x3d5   : > { %v3012_v43 = vpop.f32.mrf.mxu2 }
 0x3d6   : > { %v3013_v51 = vadd.f32 %v3012_v43, %v2955_v28  ;;  %v2898_v48 = vpop.f32.mrf.mxu0 }
 0x3d7   : > { %v3070_v9 = vpop.f32.mrf.mxu3  ;;  %v2956_v49 = vpop.f32.mrf.mxu1  ;;  %v2899_v37 = vadd.f32 %v2898_v48, %v5376_v3 }
 0x3d8   : > { %v3071_v15 = vadd.f32 %v3070_v9, %v3013_v51 }
 0x3d9   : > { %v2957_v60 = vadd.f32 %v2956_v49, %v2899_v37 }
 0x3da   : > { %v3120_v1 = vmul.f32 0.01, %v3071_v15 }
 0x3dc   : > { %v3158_v46 = vmax.f32 %v3071_v15, %v3120_v1 }
 0x3dd   : > { %v3014_v34 = vpop.f32.mrf.mxu2 }
 0x3de   : > { %3196 = vst [vmem:[%s5280_s17 + $0x8] sm:$0xff] %v3158_v46  ;;  %v3015_v40 = vadd.f32 %v3014_v34, %v2957_v60  ;;  %v2901_v32 = vpop.f32.mrf.mxu0 }
 0x3df   : > { %v3072_v63 = vpop.f32.mrf.mxu3  ;;  %v2959_v24 = vpop.f32.mrf.mxu1  ;;  %v2902_v6 = vadd.f32 %v2901_v32, %v5383_v25 }
 0x3e0   : > { %v3073_v2 = vadd.f32 %v3072_v63, %v3015_v40 }
 0x3e1   : > { %2940 = vmatmul.bf16.gmra.mxu0 %v5283_v58  ;;  %v2960_v14 = vadd.f32 %v2959_v24, %v2902_v6 }
 0x3e2   : > { %v3122_v39 = vmul.f32 0.01, %v3073_v2  ;;  %2998 = vmatmul.bf16.gmra.mxu1 %v5285_v21  ;;  %3056 = vmatmul.bf16.gmra.mxu2 %v5287_v22 }
 0x3e4   : > { %3114 = vmatmul.bf16.gmra.mxu3 %v5290_v52  ;;  %v3160_v3 = vmax.f32 %v3073_v2, %v3122_v39 }
 0x3e5   : > { %v3017_v18 = vpop.f32.mrf.mxu2 }
 0x3e6   : > { %3198 = vst [vmem:[%s5280_s17 + $0x18] sm:$0xff] %v3160_v3  ;;  %v3018_v0 = vadd.f32 %v3017_v18, %v2960_v14  ;;  %v2903_v19 = vpop.f32.mrf.mxu0 }
 0x3e7   : > { %v3075_v35 = vpop.f32.mrf.mxu3  ;;  %v2961_v7 = vpop.f32.mrf.mxu1  ;;  %v2904_v25 = vadd.f32 %v2903_v19, %v5386_v62 }
 0x3e8   : > { %v3076_v41 = vadd.f32 %v3075_v35, %v3018_v0 }
 0x3e9   : > { %v2962_v21 = vadd.f32 %v2961_v7, %v2904_v25 }
 0x3ea   : > { %v3124_v58 = vmul.f32 0.01, %v3076_v41 }
 0x3ec   : > { %v3162_v47 = vmax.f32 %v3076_v41, %v3124_v58 }
 0x3ed   : > { %v3019_v31 = vpop.f32.mrf.mxu2 }
 0x3ee   : > { %3200 = vst [vmem:[%s5280_s17 + $0x28] sm:$0xff] %v3162_v47  ;;  %v3020_v22 = vadd.f32 %v3019_v31, %v2962_v21  ;;  %v2906_v52 = vpop.f32.mrf.mxu0 }
 0x3ef   : > { %v3077_v16 = vpop.f32.mrf.mxu3  ;;  %v2964_v42 = vpop.f32.mrf.mxu1  ;;  %v2907_v56 = vadd.f32 %v2906_v52, %v5393_v12 }
 0x3f0   : > { %v3078_v23 = vadd.f32 %v3077_v16, %v3020_v22 }
 0x3f1   : > { %v2965_v57 = vadd.f32 %v2964_v42, %v2907_v56 }
 0x3f2   : > { %v3126_v10 = vmul.f32 0.01, %v3078_v23 }
 0x3f4   : > { %v3164_v61 = vmax.f32 %v3078_v23, %v3126_v10 }
 0x3f5   : > { %v3022_v4 = vpop.f32.mrf.mxu2 }
 0x3f6   : > { %3202 = vst [vmem:[%s5280_s17 + $0x38] sm:$0xff] %v3164_v61  ;;  %v3023_v62 = vadd.f32 %v3022_v4, %v2965_v57  ;;  %v2908_v44 = vpop.f32.mrf.mxu0 }
 0x3f7   : > { %v3080_v50 = vpop.f32.mrf.mxu3  ;;  %v2966_v33 = vpop.f32.mrf.mxu1  ;;  %v2909_v11 = vadd.f32 %v2908_v44, %v5396_v17 }
 0x3f8   : > { %v3081_v53 = vadd.f32 %v3080_v50, %v3023_v62 }
 0x3f9   : > { %v2967_v43 = vadd.f32 %v2966_v33, %v2909_v11 }
 0x3fa   : > { %v3128_v8 = vmul.f32 0.01, %v3081_v53 }
 0x3fc   : > { %v3166_v28 = vmax.f32 %v3081_v53, %v3128_v8 }
 0x3fd   : > { %v3024_v51 = vpop.f32.mrf.mxu2 }
 0x3fe   : > { %3204 = vst [vmem:[%s5280_s17 + $0x48] sm:$0xff] %v3166_v28  ;;  %v3025_v12 = vadd.f32 %v3024_v51, %v2967_v43  ;;  %v2911_v48 = vpop.f32.mrf.mxu0 }
 0x3ff   : > { %v3082_v9 = vpop.f32.mrf.mxu3  ;;  %v2969_v49 = vpop.f32.mrf.mxu1  ;;  %v2912_v37 = vadd.f32 %v2911_v48, %v5403_v13 }
 0x400   : > { %v3083_v15 = vadd.f32 %v3082_v9, %v3025_v12 }
 0x401   : > { %v2970_v60 = vadd.f32 %v2969_v49, %v2912_v37 }
 0x402   : > { %v3130_v1 = vmul.f32 0.01, %v3083_v15 }
 0x404   : > { %v3168_v46 = vmax.f32 %v3083_v15, %v3130_v1 }
 0x405   : > { %v3027_v34 = vpop.f32.mrf.mxu2 }
 0x406   : > { %3206 = vst [vmem:[%s5280_s17 + $0x58] sm:$0xff] %v3168_v46  ;;  %v3028_v17 = vadd.f32 %v3027_v34, %v2970_v60  ;;  %v2913_v63 = vpop.f32.mrf.mxu0 }
 0x407   : > { %v3085_v40 = vpop.f32.mrf.mxu3  ;;  %v2971_v32 = vpop.f32.mrf.mxu1  ;;  %v2914_v2 = vadd.f32 %v2913_v63, %v5406_v45 }
 0x408   : > { %v3086_v24 = vadd.f32 %v3085_v40, %v3028_v17 }
 0x409   : > { %v2972_v3 = vadd.f32 %v2971_v32, %v2914_v2 }
 0x40a   : > { %v3132_v6 = vmul.f32 0.01, %v3086_v24 }
 0x40c   : > { %v3170_v39 = vmax.f32 %v3086_v24, %v3132_v6 }
 0x40d   : > { %v3029_v14 = vpop.f32.mrf.mxu2 }
 0x40e   : > { %3208 = vst [vmem:[%s5280_s17 + $0x68] sm:$0xff] %v3170_v39  ;;  %v3030_v13 = vadd.f32 %v3029_v14, %v2972_v3  ;;  %v2916_v0 = vpop.f32.mrf.mxu0 }
 0x40f   : > { %v3087_v18 = vpop.f32.mrf.mxu3  ;;  %v2974_v35 = vpop.f32.mrf.mxu1  ;;  %v2917_v7 = vadd.f32 %v2916_v0, %v5413_v20 }
 0x410   : > { %v3088_v19 = vadd.f32 %v3087_v18, %v3030_v13 }
 0x411   : > { %v2975_v58 = vadd.f32 %v2974_v35, %v2917_v7 }
 0x412   : > { %v3134_v41 = vmul.f32 0.01, %v3088_v19 }
 0x414   : > { %v3172_v25 = vmax.f32 %v3088_v19, %v3134_v41 }
 0x415   : > { %v3032_v47 = vpop.f32.mrf.mxu2 }
 0x416   : > { %3210 = vst [vmem:[%s5280_s17 + $0x78] sm:$0xff] %v3172_v25  ;;  %v3033_v45 = vadd.f32 %v3032_v47, %v2975_v58  ;;  %v2918_v31 = vpop.f32.mrf.mxu0 }
 0x417   : > { %v3090_v21 = vpop.f32.mrf.mxu3  ;;  %v2976_v22 = vpop.f32.mrf.mxu1  ;;  %v2919_v52 = vadd.f32 %v2918_v31, %v5416_v29 }
 0x418   : > { %v3091_v16 = vadd.f32 %v3090_v21, %v3033_v45 }
 0x419   : > { %v2977_v56 = vadd.f32 %v2976_v22, %v2919_v52 }
 0x41a   : > { %v3136_v42 = vmul.f32 0.01, %v3091_v16 }
 0x41c   : > { %v3174_v23 = vmax.f32 %v3091_v16, %v3136_v42 }
 0x41d   : > { %v3034_v10 = vpop.f32.mrf.mxu2 }
 0x41e   : > { %3212 = vst [vmem:[%s5280_s17 + $0x88] sm:$0xff] %v3174_v23  ;;  %v3035_v20 = vadd.f32 %v3034_v10, %v2977_v56  ;;  %v2921_v57 = vpop.f32.mrf.mxu0 }
 0x41f   : > { %v3092_v61 = vpop.f32.mrf.mxu3  ;;  %v2979_v4 = vpop.f32.mrf.mxu1  ;;  %v2922_v50 = vadd.f32 %v2921_v57, %v5423_v26 }
 0x420   : > { %v3093_v62 = vadd.f32 %v3092_v61, %v3035_v20 }
 0x421   : > { %v2980_v53 = vadd.f32 %v2979_v4, %v2922_v50 }
 0x422   : > { %v3138_v44 = vmul.f32 0.01, %v3093_v62 }
 0x424   : > { %v3176_v33 = vmax.f32 %v3093_v62, %v3138_v44 }
 0x425   : > { %v3037_v11 = vpop.f32.mrf.mxu2 }
 0x426   : > { %3214 = vst [vmem:[%s5280_s17 + $0x98] sm:$0xff] %v3176_v33  ;;  %v3038_v29 = vadd.f32 %v3037_v11, %v2980_v53  ;;  %v2923_v28 = vpop.f32.mrf.mxu0 }
 0x427   : > { %v3095_v8 = vpop.f32.mrf.mxu3  ;;  %v2981_v43 = vpop.f32.mrf.mxu1  ;;  %v2924_v12 = vadd.f32 %v2923_v28, %v5426_v36 }
 0x428   : > { %v3096_v51 = vadd.f32 %v3095_v8, %v3038_v29 }
 0x429   : > { %v2982_v49 = vadd.f32 %v2981_v43, %v2924_v12 }
 0x42a   : > { %v3140_v9 = vmul.f32 0.01, %v3096_v51 }
 0x42c   : > { %v3178_v48 = vmax.f32 %v3096_v51, %v3140_v9 }
 0x42d   : > { %v3039_v15 = vpop.f32.mrf.mxu2 }
 0x42e   : > { %3216 = vst [vmem:[%s5280_s17 + $0xa8] sm:$0xff] %v3178_v48  ;;  %v3040_v26 = vadd.f32 %v3039_v15, %v2982_v49  ;;  %v2926_v1 = vpop.f32.mrf.mxu0 }
 0x42f   : > { %v3097_v37 = vpop.f32.mrf.mxu3  ;;  %v2984_v46 = vpop.f32.mrf.mxu1  ;;  %v2927_v34 = vadd.f32 %v2926_v1, %v5433_v55 }
 0x430   : > { %v3098_v60 = vadd.f32 %v3097_v37, %v3040_v26 }
 0x431   : > { %v2985_v63 = vadd.f32 %v2984_v46, %v2927_v34 }
 0x432   : > { %v3142_v17 = vmul.f32 0.01, %v3098_v60 }
 0x434   : > { %v3180_v40 = vmax.f32 %v3098_v60, %v3142_v17 }
 0x435   : > { %v3042_v32 = vpop.f32.mrf.mxu2 }
 0x436   : > { %3218 = vst [vmem:[%s5280_s17 + $0xb8] sm:$0xff] %v3180_v40  ;;  %v3043_v36 = vadd.f32 %v3042_v32, %v2985_v63  ;;  %v2928_v2 = vpop.f32.mrf.mxu0 }
 0x437   : > { %v3100_v24 = vpop.f32.mrf.mxu3  ;;  %v2986_v6 = vpop.f32.mrf.mxu1  ;;  %v2929_v3 = vadd.f32 %v2928_v2, %v5436_v38 }
 0x438   : > { %v3101_v39 = vadd.f32 %v3100_v24, %v3043_v36 }
 0x439   : > { %v2987_v18 = vadd.f32 %v2986_v6, %v2929_v3 }
 0x43a   : > { %v3144_v14 = vmul.f32 0.01, %v3101_v39 }
 0x43c   : > { %v3182_v13 = vmax.f32 %v3101_v39, %v3144_v14 }
 0x43d   : > { %v3044_v0 = vpop.f32.mrf.mxu2 }
 0x43e   : > { %3220 = vst [vmem:[%s5280_s17 + $0xc8] sm:$0xff] %v3182_v13  ;;  %v3045_v55 = vadd.f32 %v3044_v0, %v2987_v18  ;;  %v2931_v19 = vpop.f32.mrf.mxu0 }
 0x43f   : > { %v3102_v35 = vpop.f32.mrf.mxu3  ;;  %v2989_v7 = vpop.f32.mrf.mxu1  ;;  %v2932_v25 = vadd.f32 %v2931_v19, %v5443_v30 }
 0x440   : > { %v3103_v41 = vadd.f32 %v3102_v35, %v3045_v55 }
 0x441   : > { %v2990_v45 = vadd.f32 %v2989_v7, %v2932_v25 }
 0x442   : > { %v3146_v58 = vmul.f32 0.01, %v3103_v41 }
 0x444   : > { %v3184_v47 = vmax.f32 %v3103_v41, %v3146_v58 }
 0x445   : > { %v3047_v21 = vpop.f32.mrf.mxu2 }
 0x446   : > { %3222 = vst [vmem:[%s5280_s17 + $0xd8] sm:$0xff] %v3184_v47  ;;  %v3048_v38 = vadd.f32 %v3047_v21, %v2990_v45  ;;  %v2933_v22 = vpop.f32.mrf.mxu0 }
 0x447   : > { %v3105_v31 = vpop.f32.mrf.mxu3  ;;  %v2991_v16 = vpop.f32.mrf.mxu1  ;;  %v2934_v42 = vadd.f32 %v2933_v22, %v5446_v27 }
 0x448   : > { %v3106_v52 = vadd.f32 %v3105_v31, %v3048_v38 }
 0x449   : > { %v2992_v10 = vadd.f32 %v2991_v16, %v2934_v42 }
 0x44a   : > { %v3148_v23 = vmul.f32 0.01, %v3106_v52 }
 0x44c   : > { %v3186_v56 = vmax.f32 %v3106_v52, %v3148_v23 }
 0x44d   : > { %v3049_v20 = vpop.f32.mrf.mxu2 }
 0x44e   : > { %3224 = vst [vmem:[%s5280_s17 + $0xe8] sm:$0xff] %v3186_v56  ;;  %v3050_v30 = vadd.f32 %v3049_v20, %v2992_v10  ;;  %v2936_v57 = vpop.f32.mrf.mxu0 }
 0x44f   : > { %v3107_v61 = vpop.f32.mrf.mxu3  ;;  %v2994_v4 = vpop.f32.mrf.mxu1  ;;  %v2937_v50 = vadd.f32 %v2936_v57, %v5453_v59 }
 0x450   : > { %v3108_v62 = vadd.f32 %v3107_v61, %v3050_v30 }
 0x451   : > { %v2995_v53 = vadd.f32 %v2994_v4, %v2937_v50 }
 0x452   : > { %v3150_v44 = vmul.f32 0.01, %v3108_v62 }
 0x454   : > { %v3188_v33 = vmax.f32 %v3108_v62, %v3150_v44 }
 0x455   : > { %v3052_v11 = vpop.f32.mrf.mxu2 }
 0x456   : > { %3226 = vst [vmem:[%s5280_s17 + $0xf8] sm:$0xff] %v3188_v33  ;;  %v3053_v27 = vadd.f32 %v3052_v11, %v2995_v53  ;;  %v2938_v8 = vpop.f32.mrf.mxu0 }
 0x457   : > { %v3110_v29 = vpop.f32.mrf.mxu3  ;;  %v2996_v28 = vpop.f32.mrf.mxu1  ;;  %v2939_v51 = vadd.f32 %v2938_v8, %v5456_v5 }
 0x458   : > { %v3111_v43 = vadd.f32 %v3110_v29, %v3053_v27 }
 0x459   : > { %v2997_v48 = vadd.f32 %v2996_v28, %v2939_v51 }
 0x45a   : > { %v3152_v12 = vmul.f32 0.01, %v3111_v43 }
 0x45c   : > { %v3190_v9 = vmax.f32 %v3111_v43, %v3152_v12 }
 0x45d   : > { %v3054_v49 = vpop.f32.mrf.mxu2 }
 0x45e   : > { %3228 = vst [vmem:[%s5280_s17 + $0x108] sm:$0xff] %v3190_v9  ;;  %v3055_v59 = vadd.f32 %v3054_v49, %v2997_v48  ;;  %v2941_v26 = vpop.f32.mrf.mxu0 }
 0x45f   : > { %v3112_v15 = vpop.f32.mrf.mxu3  ;;  %v2999_v37 = vpop.f32.mrf.mxu1  ;;  %v2942_v46 = vadd.f32 %v2941_v26, %v5462_v54 }
 0x460   : > { %v3113_v1 = vadd.f32 %v3112_v15, %v3055_v59 }
 0x461   : > { %v3000_v17 = vadd.f32 %v2999_v37, %v2942_v46 }
 0x462   : > { %v3154_v60 = vmul.f32 0.01, %v3113_v1 }
 0x464   : > { %v3192_v34 = vmax.f32 %v3113_v1, %v3154_v60 }
 0x465   : > { %v3057_v5 = vpop.f32.mrf.mxu2 }
 0x466   : > { %3230 = vst [vmem:[%s5280_s17 + $0x118] sm:$0xff] %v3192_v34  ;;  %v3058_v40 = vadd.f32 %v3057_v5, %v3000_v17  ;;  %v2943_v32 = vpop.f32.mrf.mxu0 }
 0x467   : > { %v3115_v63 = vpop.f32.mrf.mxu3  ;;  %v3001_v36 = vpop.f32.mrf.mxu1 }
 0x468   : > { %v3116_v24 = vadd.f32 %v3115_v63, %v3058_v40 }
 0x46a   : > { %v3156_v54 = vmul.f32 0.01, %v3116_v24 }
 0x46c   : > { %v3194_v2 = vmax.f32 %v3116_v24, %v3156_v54 }
 0x46d   : > { %v3059_v6 = vpop.f32.mrf.mxu2 }
 0x46e   : > { %3232 = vst [vmem:[%s5280_s17 + $0x128] sm:$0xff] %v3194_v2 }
 0x46f   : > { %v3117_v39 = vpop.f32.mrf.mxu3 }
 0x470   : > { %4432 = shalt.err (!%p4429_p8)
}
 0x471   : > { %s4483_s15 = smov 256   ;;  %s4484_s17 = smov 16  }
 0x472   : > { %4284 = dma.vmem_to_hbm [thread:$0]  (%p4553_p5), %s3248_s8, 4864, %s3250_s9, %s3234_s22, %s4483_s15, %s4483_s15, %s4484_s17  }
 0x473 PF: > { %p4301_p9 = scmp.ge.s32.totalorder %s4475_s21, 2  ;;  %s3264_s25 = sand.u32 1, %s4463_s18  }
 0x474   : > { %s3265_s26 = scalar_lea.sflag [#allocation4], %s3264_s25 }
 0x475   : > { %p4294_p10 = pnand %p4301_p9, %p4557_p6 }
 0x477   : > { %p4295_p11 = pneg %p4294_p10 }
 0x479   : > { %4458 = dma.done.wait (%p4295_p11), %s3265_s26, 4864  }
 0x47a   : > { %4460 = vsyncadd (%p4295_p11), %s3265_s26, 4294962432  ;;  %p17_p12 = scmp.ge.s32.totalorder %s4540_s24, 4   ;;  %s5769_s18 = smov %s4467_s19 }
 0x47b   : > { %s5770_s19 = smov %s4471_s20  ;;  %s5771_s20 = smov %s4551_s27 }
 0x47c   : > { %s5772_s21 = smov %s4540_s24  ;;  %19 = sbr.rel (!%p17_p12) target bundleno = 5 (0x5), region = 84 }
 0x481   :  { %3271 = vsyncpa [#allocation3], 1 }
 0x482   :  { %3273 = vsyncpa [#allocation3 + $0x1], 1 }
 0x483   :  { %3274 = vsyncpa [#allocation6], 1 }
 0x484   :  { %3275 = vsyncpa [#allocation4], 1 }
 0x485   :  { %3277 = vsyncpa [#allocation4 + $0x1], 1 }

// kernel: tpu_custom_call.1
= control target key start
LH: loop header
LB: loop body
LE: loop exit
PB: predicated region body
PF: predicated region fallthrough
CT: control target
= control target key end

     0   :  { %10 = vsyncpa [#allocation3], 0  ;;  %s5544_s0 = inlined_call_operand.vmem [shape: bf16[304,64], index: 0, kind: input, shape index: {}]   ;;  %s5545_s1 = inlined_call_operand.hbm [shape: bf16[64,1024], index: 1, kind: input, shape index: {}]   ;;  %s5546_s2 = inlined_call_operand.vmem [shape: f32[1,1024], index: 2, kind: input, shape index: {}]   ;;  %s5547_s3 = inlined_call_operand.hbm [shape: bf16[1024,256], index: 3, kind: input, shape index: {}]   ;;  %s5548_s4 = inlined_call_operand.vmem [shape: f32[1,256], index: 4, kind: input, shape index: {}]   ;;  %s5549_s5 = inlined_call_operand.hbm [shape: f32[304,256], index: 5, kind: output, shape index: {}]  }
   0x1   :  { %11 = vsyncpa [#allocation6], 0 }
   0x2   :  { %12 = vsyncpa [#allocation4], 0 }
   0x3   :  { %14 = vsyncpa [#allocation4 + $0x1], 0  ;;  %s4515_s18 = smov 0   ;;  %s4517_s19 = smov 0  }
   0x4   :  { %s4519_s20 = smov 0   ;;  %s4521_s21 = smov 0  }
   0x5 LB: > { %s4536_s22 = sadd.s32 4294967295, %s4475_s21   ;;  %s3334_s23 = sadd.s32 4294967294, %s4475_s21   ;;  %s4475_s21 = sphi %s4521_s21, %s5772_s21   ;;  %s4471_s20 = sphi %s4519_s20, %s5771_s20   ;;  %s4467_s19 = sphi %s4517_s19, %s5770_s19   ;;  %s4463_s18 = sphi %s4515_s18, %s5769_s18  }
   0x6   : > { %s4540_s24 = sadd.s32 1, %s4475_s21   ;;  %s137_s25 = sadd.s32 1, %s4471_s20 }
   0x7   : > { %s134_s26 = ssub.s32 %s4475_s21, %s4540_s24  ;;  %p147_p0 = scmp.ne.s32.totalorder %s4471_s20, %s4467_s19 }
   0x8   : > { %p135_p1 = scmp.eq.s32.totalorder %s134_s26, 0  ;;  %p148_p2 = scmp.eq.s32.totalorder %s4536_s22, 1 }
   0x9   : > { %p153_p3 = scmp.ne.s32.totalorder %s4467_s19, %s4463_s18  ;;  %p154_p4 = scmp.eq.s32.totalorder %s3334_s23, 1 }
   0xa   : > { %s4551_s27 = scalar_select %p135_p1, %s4471_s20, %s137_s25  }
   0xb   : > { %p4553_p5 = por %p148_p2, %p147_p0  ;;  %p4557_p6 = por %p154_p4, %p153_p3 }
   0xc   : > { %p3335_p7 = scmp.ge.s32.totalorder %s4475_s21, 1  ;;  %p161_p8 = scmp.lt.s32.totalorder %s4475_s21, 3 }
   0xd   : > { %p4297_p9 = scmp.eq.s32.totalorder %s4536_s22, 0  ;;  %s172_s8 = sshll.u32 %s5545_s1, 4  ;;  %s173_s8 = int_to_ptr.hbm [resolvable:$true] %s172_s8 }
   0xe   : > { %p4564_p10 = pnand %p3335_p7, %p161_p8  ;;  %s4477_s9 = smov [#allocation2]  }
   0xf   : > { %s174_s10 = sshll.u32 %s4477_s9, 4  ;;  %s189_s13 = sshll.u32 %s5547_s3, 4  ;;  %s175_s10 = int_to_ptr.vmem [resolvable:$true] %s174_s10  ;;  %s190_s13 = int_to_ptr.hbm [resolvable:$true] %s189_s13 }
  0x10   : > { %p4286_p11 = pneg %p4564_p10  ;;  %s4478_s14 = smov 512  }
  0x11   : > { %s4479_s15 = smov 32   ;;  %s4480_s16 = smov [#allocation5]  }
  0x12   : > { %p4287_p12 = pnand %p4297_p9, %p4286_p11  ;;  %s191_s17 = sshll.u32 %s4480_s16, 4  ;;  %s192_s17 = int_to_ptr.vmem [resolvable:$true] %s191_s17 }
  0x13   : > { %s4481_s23 = smov 128   ;;  %s4482_s25 = smov 8  }
  0x14   : > { %4289 = dma.hbm_to_vmem [thread:$0]  (!%p4287_p12), %s173_s8, 4096, %s175_s10, [#allocation3], %s4478_s14, %s4478_s14, %s4479_s15  }
  0x15   : > { %4292 = dma.hbm_to_vmem [thread:$0]  (!%p4287_p12), %s190_s13, 16384, %s192_s17, [#allocation6], %s4481_s23, %s4481_s23, %s4482_s25  }
  0x16   : > { %219 = sbr.rel (%p4564_p10) target bundleno = 1139 (0x473), region = 40 }
  0x1b   : > { %4450 = dma.done.wait (%p4297_p9), [#allocation3], 4096  }
  0x1c   : > { %4452 = vsyncadd (%p4297_p9), [#allocation3], 4294963200 }
  0x1d   : > { %4454 = dma.done.wait (%p4297_p9), [#allocation6], 16384  }
  0x1e   : > { %4456 = vsyncadd (%p4297_p9), [#allocation6], 4294950912  ;;  %s253_s26 = smul.u32 19, %s4536_s22  ;;  %v3477_v0 = vld [vmem:[#allocation2 + $0xc0] sm:$0xf]  ;;  %vm538_vm0 = vcmask 523264  }
  0x1f   : > { %v4140_v1 = vld [vmem:[#allocation2 + $0xdc] sm:$0xf0]  ;;  %v4136_v2 = vld [vmem:[#allocation2 + $0xc4] sm:$0xf]  ;;  %v3485_v5 = vld [vmem:[#allocation2 + $0xc8] sm:$0xf] }
  0x20   : > { %p254_p13 = scmp.lt.s32.totalorder %s253_s26, 37  ;;  %v3478_v3 = vor.u32 %v4140_v1, %v3477_v0  ;;  %v3479_v4 = vld [vmem:[#allocation2 + $0xe0] sm:$0xf0]  ;;  %v4141_v6 = vld [vmem:[#allocation2 + $0xe4] sm:$0xf0]  ;;  %s250_s15 = sand.u32 1, %s4467_s19  }
  0x21   : > { %v3482_v7 = vor.u32 %v4136_v2, %v3479_v4  ;;  %v3486_v8 = vor.u32 %v4141_v6, %v3485_v5  ;;  %v4137_v9 = vld [vmem:[#allocation2 + $0xcc] sm:$0xf]  ;;  %v3445_v11 = vld [vmem:[#allocation2 + $0x80] sm:$0xf]  ;;  %v4128_v14 = vld [vmem:[#allocation2 + $0x84] sm:$0xf] }
  0x22   : > { %s5774_s26 = smov (!%p254_p13, %s253_s26), 37  ;;  %v3487_v10 = vld [vmem:[#allocation2 + $0xe8] sm:$0xf0]  ;;  %573 = vmatpush.bf16.msra.mxu0 %v3478_v3  ;;  %v4132_v13 = vld [vmem:[#allocation2 + $0x9c] sm:$0xf0]  ;;  %s4275_s16 = smul.u32 304, %s250_s15 }
  0x23   : > { %s3342_s30 = sshll.u32 %s5774_s26, 2  ;;  %v3490_v12 = vor.u32 %v4137_v9, %v3487_v10  ;;  %v3447_v15 = vld [vmem:[#allocation2 + $0xa0] sm:$0xf0]  ;;  %631 = vmatpush.bf16.msra.mxu1 %v3482_v7  ;;  %689 = vmatpush.bf16.msra.mxu2 %v3486_v8  ;;  %v3446_v16 = vor.u32 %v4132_v13, %v3445_v11  ;;  %v3453_v18 = vld [vmem:[#allocation2 + $0x88] sm:$0xf]  ;;  %s4274_s26 = smul.u32 304, %s4536_s22 }
  0x24   : > { %v3450_v17 = vor.u32 %v4128_v14, %v3447_v15  ;;  %v4133_v19 = vld [vmem:[#allocation2 + $0xa4] sm:$0xf0]  ;;  %v4129_v20 = vld [vmem:[#allocation2 + $0x8c] sm:$0xf]  ;;  %v3413_v23 = vld [vmem:[#allocation2 + $0x40] sm:$0xf]  ;;  %s4597_s8 = scalar_lea.vmem %s5544_s0, %s3342_s30 }
  0x25   : > { %747 = vmatpush.bf16.msra.mxu3 %v3490_v12  ;;  %v3454_v21 = vor.u32 %v4133_v19, %v3453_v18  ;;  %v3455_v22 = vld [vmem:[#allocation2 + $0xa8] sm:$0xf0]  ;;  %v4124_v24 = vld [vmem:[#allocation2 + $0x5c] sm:$0xf0]  ;;  %v4120_v26 = vld [vmem:[#allocation2 + $0x44] sm:$0xf]  ;;  %s3246_s7 = scalar_lea.hbm %s5549_s5, %s4274_s26 }
  0x26   : > { %v3458_v25 = vor.u32 %v4129_v20, %v3455_v22  ;;  %v3415_v27 = vld [vmem:[#allocation2 + $0x60] sm:$0xf0]  ;;  %v3421_v28 = vld [vmem:[#allocation2 + $0x48] sm:$0xf]  ;;  %574 = vmatpush.bf16.msra.mxu0 %v3446_v16  ;;  %v3414_v29 = vor.u32 %v4124_v24, %v3413_v23  ;;  %v4121_v31 = vld [vmem:[#allocation2 + $0x4c] sm:$0xf] }
  0x27   : > { %v4125_v30 = vld [vmem:[#allocation2 + $0x64] sm:$0xf0]  ;;  %v3423_v32 = vld [vmem:[#allocation2 + $0x68] sm:$0xf0]  ;;  %632 = vmatpush.bf16.msra.mxu1 %v3450_v17  ;;  %690 = vmatpush.bf16.msra.mxu2 %v3454_v21  ;;  %v3418_v33 = vor.u32 %v4120_v26, %v3415_v27  ;;  %v3381_v35 = vld [vmem:[#allocation2] sm:$0xf] }
  0x28   : > { %v3422_v34 = vor.u32 %v4125_v30, %v3421_v28  ;;  %v4116_v36 = vld [vmem:[#allocation2 + $0x1c] sm:$0xf0]  ;;  %v4112_v37 = vld [vmem:[#allocation2 + $0x4] sm:$0xf]  ;;  %v3426_v38 = vor.u32 %v4121_v31, %v3423_v32  ;;  %v3389_v40 = vld [vmem:[#allocation2 + $0x8] sm:$0xf] }
  0x29   : > { %748 = vmatpush.bf16.msra.mxu3 %v3458_v25  ;;  %v3383_v39 = vld [vmem:[#allocation2 + $0x20] sm:$0xf0]  ;;  %v4117_v41 = vld [vmem:[#allocation2 + $0x24] sm:$0xf0]  ;;  %v4113_v42 = vld [vmem:[#allocation2 + $0xc] sm:$0xf]  ;;  %v3382_v44 = vor.u32 %v4116_v36, %v3381_v35 }
  0x2a   : > { %v3391_v43 = vld [vmem:[#allocation2 + $0x28] sm:$0xf0]  ;;  %575 = vmatpush.bf16.msra.mxu0 %v3414_v29  ;;  %v3501_v45 = vld [vmem:[#allocation2 + $0xd8] sm:$0xf]  ;;  %v3386_v47 = vor.u32 %v4112_v37, %v3383_v39  ;;  %v3390_v48 = vor.u32 %v4117_v41, %v3389_v40  ;;  %v4139_v49 = vld [vmem:[#allocation2 + $0xdc] sm:$0xf] }
  0x2b   : > { %v4143_v46 = vld [vmem:[#allocation2 + $0xf4] sm:$0xf0]  ;;  %633 = vmatpush.bf16.msra.mxu1 %v3418_v33  ;;  %691 = vmatpush.bf16.msra.mxu2 %v3422_v34  ;;  %v3503_v50 = vld [vmem:[#allocation2 + $0xf8] sm:$0xf0]  ;;  %v3394_v51 = vor.u32 %v4113_v42, %v3391_v43  ;;  %v3493_v53 = vld [vmem:[#allocation2 + $0xd0] sm:$0xf] }
  0x2c   : > { %v3502_v52 = vor.u32 %v4143_v46, %v3501_v45  ;;  %v4142_v54 = vld [vmem:[#allocation2 + $0xec] sm:$0xf0]  ;;  %v4600_v55 = vld [vmem:[%s4597_s8] sm:$0xff]  ;;  %v3506_v56 = vor.u32 %v4139_v49, %v3503_v50  ;;  %v4138_v57 = vld [vmem:[#allocation2 + $0xd4] sm:$0xf]  ;;  %s5280_s17 = scalar_lea.vmem [#allocation7], %s4275_s16 }
  0x2d   : > { %749 = vmatpush.bf16.msra.mxu3 %v3426_v38  ;;  %v3495_v58 = vld [vmem:[#allocation2 + $0xf0] sm:$0xf0]  ;;  %v3494_v59 = vor.u32 %v4142_v54, %v3493_v53  ;;  %v3469_v61 = vld [vmem:[#allocation2 + $0x98] sm:$0xf]  ;;  %v3461_v63 = vld [vmem:[#allocation2 + $0x90] sm:$0xf] }
  0x2e   : > { %576 = vmatpush.bf16.msra.mxu0 %v3382_v44  ;;  %v3498_v60 = vor.u32 %v4138_v57, %v3495_v58  ;;  %v4135_v62 = vld [vmem:[#allocation2 + $0xb4] sm:$0xf0]  ;;  %v4134_v1 = vld [vmem:[#allocation2 + $0xac] sm:$0xf0]  ;;  %v4131_v2 = vld [vmem:[#allocation2 + $0x9c] sm:$0xf] }
  0x2f   : > { %634 = vmatpush.bf16.msra.mxu1 %v3386_v47  ;;  %692 = vmatpush.bf16.msra.mxu2 %v3390_v48  ;;  %v3470_v0 = vor.u32 %v4135_v62, %v3469_v61  ;;  %v3471_v3 = vld [vmem:[#allocation2 + $0xb8] sm:$0xf0]  ;;  %v3462_v4 = vor.u32 %v4134_v1, %v3461_v63  ;;  %v4130_v6 = vld [vmem:[#allocation2 + $0x94] sm:$0xf]  ;;  %v4611_v9 = vld [vmem:[%s4597_s8 + $0x8] sm:$0xff]  ;;  %s3249_s9 = sshll.u32 %s3246_s7, 4  ;;  %s3250_s9 = int_to_ptr.hbm [resolvable:$true] %s3249_s9 }
  0x30   : > { %v3474_v5 = vor.u32 %v4131_v2, %v3471_v3  ;;  %v3463_v7 = vld [vmem:[#allocation2 + $0xb0] sm:$0xf0]  ;;  %v4633_v11 = vld [vmem:[%s4597_s8 + $0x18] sm:$0xff]  ;;  %v3429_v14 = vld [vmem:[#allocation2 + $0x50] sm:$0xf]  ;;  %s3234_s22 = scalar_lea.sflag [#allocation4], %s250_s15 }
  0x31   : > { %750 = vmatpush.bf16.msra.mxu3 %v3394_v51  ;;  %3507 = vmatmul.msk.bf16.vlgmr.msra.gmra.mxu0 %vm538_vm0, %v4600_v55  ;;  %v3466_v8 = vor.u32 %v4130_v6, %v3463_v7  ;;  %v4622_v10 = vld [vmem:[%s4597_s8 + $0x10] sm:$0xff]  ;;  %v3437_v12 = vld [vmem:[#allocation2 + $0x58] sm:$0xf]  ;;  %v4123_v17 = vld [vmem:[#allocation2 + $0x5c] sm:$0xf]  ;;  %s4419_s10 = sshra.s32 %s3250_s9, 4  ;;  %s4420_s10 = int_to_ptr.hbm [resolvable:$true] %s4419_s10 }
  0x32   : > { %3517 = vmatmul.msk.bf16.vlgmr.msra.gmra.mxu1 %vm538_vm0, %v4600_v55  ;;  %3527 = vmatmul.msk.bf16.vlgmr.msra.gmra.mxu2 %vm538_vm0, %v4600_v55  ;;  %v4127_v13 = vld [vmem:[#allocation2 + $0x74] sm:$0xf0]  ;;  %v4126_v16 = vld [vmem:[#allocation2 + $0x6c] sm:$0xf0]  ;;  %v3439_v18 = vld [vmem:[#allocation2 + $0x78] sm:$0xf0]  ;;  %p4426_p3 = scmp.lt.s32.totalorder %s4420_s10, %s5549_s5 }
  0x33   : > { %921 = vmatpush.bf16.msrb.mxu2 %v3502_v52  ;;  %805 = vmatpush.bf16.msrb.mxu0 %v3494_v59  ;;  %v3438_v15 = vor.u32 %v4127_v13, %v3437_v12  ;;  %v3430_v19 = vor.u32 %v4126_v16, %v3429_v14  ;;  %v3442_v20 = vor.u32 %v4123_v17, %v3439_v18  ;;  %v4122_v21 = vld [vmem:[#allocation2 + $0x54] sm:$0xf]  ;;  %v4644_v24 = vld [vmem:[%s4597_s8 + $0x20] sm:$0xff]  ;;  %v4655_v25 = vld [vmem:[%s4597_s8 + $0x28] sm:$0xff]  ;;  %s4421_s11 = scalar_lea.hbm %s4420_s10, 304  ;;  %s4425_s14 = scalar_lea.hbm %s5549_s5, 608 }
  0x34   : > { %3537 = vmatmul.msk.bf16.vlgmr.msra.gmra.mxu3 %vm538_vm0, %v4600_v55  ;;  %863 = vmatpush.bf16.msrb.mxu1 %v3498_v60  ;;  %v3431_v22 = vld [vmem:[#allocation2 + $0x70] sm:$0xf0]  ;;  %v3405_v26 = vld [vmem:[#allocation2 + $0x18] sm:$0xf]  ;;  %v3397_v28 = vld [vmem:[#allocation2 + $0x10] sm:$0xf]  ;;  %p4422_p0 = scmp.ne.s32.totalorder %s4420_s10, %s4421_s11  ;;  %p4427_p4 = scmp.lt.s32.totalorder %s4425_s14, %s4421_s11 }
  0x35   : > { %979 = vmatpush.bf16.msrb.mxu3 %v3506_v56  ;;  %v3434_v23 = vor.u32 %v4122_v21, %v3431_v22  ;;  %v4119_v27 = vld [vmem:[#allocation2 + $0x34] sm:$0xf0]  ;;  %v4118_v30 = vld [vmem:[#allocation2 + $0x2c] sm:$0xf0]  ;;  %v4115_v31 = vld [vmem:[#allocation2 + $0x1c] sm:$0xf] }
  0x36   : > { %v3406_v29 = vor.u32 %v4119_v27, %v3405_v26  ;;  %v3407_v32 = vld [vmem:[#allocation2 + $0x38] sm:$0xf0]  ;;  %v3398_v33 = vor.u32 %v4118_v30, %v3397_v28  ;;  %v4114_v35 = vld [vmem:[#allocation2 + $0x14] sm:$0xf]  ;;  %v4690_v40 = vld [vmem:[%s5546_s2] sm:$0xff]  ;;  %p4423_p1 = pnand %p4422_p0, %p4553_p5  ;;  %p4428_p7 = por %p4427_p4, %p4426_p3 }
  0x37   : > { %922 = vmatpush.bf16.msrb.mxu2 %v3470_v0  ;;  %806 = vmatpush.bf16.msrb.mxu0 %v3462_v4  ;;  %v3410_v34 = vor.u32 %v4115_v31, %v3407_v32  ;;  %v3399_v36 = vld [vmem:[#allocation2 + $0x30] sm:$0xf0]  ;;  %v4677_v39 = vld [vmem:[%s4597_s8 + $0x38] sm:$0xff]  ;;  %v4111_v41 = vld [vmem:[%s4597_s8 + $0x40] sm:$0xff]  ;;  %v4694_v43 = vperm.slane %v4690_v40, 0  ;;  %v4697_v45 = vperm.slane %v4690_v40, 1 }
  0x38   : > { %864 = vmatpush.bf16.msrb.mxu1 %v3466_v8  ;;  %v3402_v37 = vor.u32 %v4114_v35, %v3399_v36  ;;  %v4666_v38 = vld [vmem:[%s4597_s8 + $0x30] sm:$0xff]  ;;  %v4191_v49 = vld [vmem:[#allocation5 + $0x174] sm:$0xf0]  ;;  %v4706_v57 = vperm.slane %v4690_v40, 2  ;;  %v279_v60 = vld [vmem:[%s4597_s8 + $0x48] sm:$0xf]  ;;  %p4424_p2 = pneg %p4423_p1 }
  0x39   : > { %980 = vmatpush.bf16.msrb.mxu3 %v3474_v5  ;;  %5618 = vst [vmem:[#allocation11_spill] sm:$0xff] %v4694_v43  ;;  %v3773_v48 = vld [vmem:[#allocation5 + $0x170] sm:$0xf]  ;;  %v4159_v53 = vld [vmem:[#allocation5 + $0x74] sm:$0xf0]  ;;  %v4710_v0 = vperm.slane %v4690_v40, 3  ;;  %v367_v6 = vunpack.c.l.b16 %v279_v60 }
  0x3a   : > { %5619 = vst [vmem:[#allocation12_spill] sm:$0xff] %v4697_v45  ;;  %v3645_v50 = vld [vmem:[#allocation5 + $0x70] sm:$0xf]  ;;  %v3774_v52 = vor.u32 %v4191_v49, %v3773_v48  ;;  %v4207_v56 = vld [vmem:[#allocation5 + $0x1f4] sm:$0xf0]  ;;  %p4429_p8 = pnand %p4428_p7, %p4424_p2 }
  0x3b   : > { %923 = vmatpush.bf16.msrb.mxu2 %v3438_v15  ;;  %807 = vmatpush.bf16.msrb.mxu0 %v3430_v19  ;;  %v3837_v54 = vld [vmem:[#allocation5 + $0x1f0] sm:$0xf]  ;;  %5620 = vst [vmem:[#allocation13_spill] sm:$0xff] %v4706_v57  ;;  %v3646_v61 = vor.u32 %v4159_v53, %v3645_v50  ;;  %v4175_v16 = vld [vmem:[#allocation5 + $0xf4] sm:$0xf0]  ;;  %v4718_v22 = vpack.c.b16 %v367_v6, %v367_v6 }
  0x3c   : > { %865 = vmatpush.bf16.msrb.mxu1 %v3434_v23  ;;  %v3838_v62 = vor.u32 %v4207_v56, %v3837_v54  ;;  %5621 = vst [vmem:[#allocation14_spill] sm:$0xff] %v4710_v0  ;;  %v3709_v15 = vld [vmem:[#allocation5 + $0xf0] sm:$0xf] }
  0x3d   : > { %981 = vmatpush.bf16.msrb.mxu3 %v3442_v20  ;;  %v3710_v19 = vor.u32 %v4175_v16, %v3709_v15  ;;  %v4205_v15 = vld [vmem:[#allocation5 + $0x1e4] sm:$0xf0]  ;;  %v3701_v16 = vld [vmem:[#allocation5 + $0xe0] sm:$0xf] }
  0x3f   : > { %924 = vmatpush.bf16.msrb.mxu2 %v3406_v29  ;;  %808 = vmatpush.bf16.msrb.mxu0 %v3398_v33 }
  0x40   : > { %866 = vmatpush.bf16.msrb.mxu1 %v3402_v37 }
  0x41   : > { %3508 = vmatmul.msk.bf16.gmra.mxu0 %vm538_vm0, %v4611_v9  ;;  %982 = vmatpush.bf16.msrb.mxu3 %v3410_v34 }
  0x42   : > { %3518 = vmatmul.msk.bf16.gmra.mxu1 %vm538_vm0, %v4611_v9  ;;  %3528 = vmatmul.msk.bf16.gmra.mxu2 %vm538_vm0, %v4611_v9 }
  0x43   : > { %2307 = vmatpush.bf16.msra.mxu2 %v3774_v52  ;;  %2191 = vmatpush.bf16.msra.mxu0 %v3646_v61 }
  0x44   : > { %3538 = vmatmul.msk.bf16.gmra.mxu3 %vm538_vm0, %v4611_v9  ;;  %2249 = vmatpush.bf16.msra.mxu1 %v3710_v19 }
  0x45   : > { %2365 = vmatpush.bf16.msra.mxu3 %v3838_v62 }
  0x51   : > { %3509 = vmatmul.msk.bf16.gmra.mxu0 %vm538_vm0, %v4622_v10 }
  0x52   : > { %3519 = vmatmul.msk.bf16.gmra.mxu1 %vm538_vm0, %v4622_v10  ;;  %3529 = vmatmul.msk.bf16.gmra.mxu2 %vm538_vm0, %v4622_v10 }
  0x54   : > { %3539 = vmatmul.msk.bf16.gmra.mxu3 %vm538_vm0, %v4622_v10 }
  0x61   : > { %3510 = vmatmul.msk.bf16.gmra.mxu0 %vm538_vm0, %v4633_v11 }
  0x62   : > { %3520 = vmatmul.msk.bf16.gmra.mxu1 %vm538_vm0, %v4633_v11  ;;  %3530 = vmatmul.msk.bf16.gmra.mxu2 %vm538_vm0, %v4633_v11 }
  0x64   : > { %3540 = vmatmul.msk.bf16.gmra.mxu3 %vm538_vm0, %v4633_v11 }
  0x71   : > { %3511 = vmatmul.msk.bf16.gmra.mxu0 %vm538_vm0, %v4644_v24 }
  0x72   : > { %3521 = vmatmul.msk.bf16.gmra.mxu1 %vm538_vm0, %v4644_v24  ;;  %3531 = vmatmul.msk.bf16.gmra.mxu2 %vm538_vm0, %v4644_v24 }
  0x74   : > { %3541 = vmatmul.msk.bf16.gmra.mxu3 %vm538_vm0, %v4644_v24 }
  0x81   : > { %3512 = vmatmul.msk.bf16.gmra.mxu0 %vm538_vm0, %v4655_v25 }
  0x82   : > { %3522 = vmatmul.msk.bf16.gmra.mxu1 %vm538_vm0, %v4655_v25  ;;  %3532 = vmatmul.msk.bf16.gmra.mxu2 %vm538_vm0, %v4655_v25 }
  0x84   : > { %3542 = vmatmul.msk.bf16.gmra.mxu3 %vm538_vm0, %v4655_v25 }
  0x91   : > { %3513 = vmatmul.msk.bf16.gmra.mxu0 %vm538_vm0, %v4666_v38 }
  0x92   : > { %3523 = vmatmul.msk.bf16.gmra.mxu1 %vm538_vm0, %v4666_v38  ;;  %3533 = vmatmul.msk.bf16.gmra.mxu2 %vm538_vm0, %v4666_v38 }
  0x94   : > { %3543 = vmatmul.msk.bf16.gmra.mxu3 %vm538_vm0, %v4666_v38 }
  0xa1   : > { %3514 = vmatmul.msk.bf16.gmra.mxu0 %vm538_vm0, %v4677_v39 }
  0xa2   : > { %3524 = vmatmul.msk.bf16.gmra.mxu1 %vm538_vm0, %v4677_v39  ;;  %3534 = vmatmul.msk.bf16.gmra.mxu2 %vm538_vm0, %v4677_v39 }
  0xa4   : > { %3544 = vmatmul.msk.bf16.gmra.mxu3 %vm538_vm0, %v4677_v39 }
  0xae   : > { %v578_v42 = vpop.f32.mrf.mxu0 }
  0xaf   : > { %v636_v44 = vpop.f32.mrf.mxu1  ;;  %v579_v46 = vadd.f32 %v578_v42, %v4694_v43 }
  0xb0   : > { %v637_v47 = vadd.f32 %v636_v44, %v4697_v45 }
  0xb1   : > { %3515 = vmatmul.msk.bf16.gmra.mxu0 %vm538_vm0, %v4111_v41  ;;  %v1033_v63 = vmul.f32 0.01, %v579_v46 }
  0xb2   : > { %3525 = vmatmul.msk.bf16.gmra.mxu1 %vm538_vm0, %v4111_v41  ;;  %3535 = vmatmul.msk.bf16.gmra.mxu2 %vm538_vm0, %v4111_v41  ;;  %v1034_v3 = vmul.f32 0.01, %v637_v47 }
  0xb3   : > { %v1185_v12 = vmax.f32 %v579_v46, %v1033_v63 }
  0xb4   : > { %3545 = vmatmul.msk.bf16.gmra.mxu3 %vm538_vm0, %v4111_v41  ;;  %v1186_v17 = vmax.f32 %v637_v47, %v1034_v3  ;;  %v4189_v3 = vld [vmem:[#allocation5 + $0x164] sm:$0xf0] }
  0xb5   : > { %v694_v51 = vpop.f32.mrf.mxu2 }
  0xb6   : > { %v580_v59 = vpop.f32.mrf.mxu0  ;;  %v695_v7 = vadd.f32 %v694_v51, %v4706_v57 }
  0xb7   : > { %v752_v58 = vpop.f32.mrf.mxu3  ;;  %v581_v1 = vadd.f32 %v580_v59, %v4694_v43  ;;  %v638_v2 = vpop.f32.mrf.mxu1 }
  0xb8   : > { %v639_v4 = vadd.f32 %v638_v2, %v4697_v45  ;;  %v753_v13 = vadd.f32 %v752_v58, %v4710_v0  ;;  %v1035_v23 = vmul.f32 0.01, %v695_v7  ;;  %v3765_v2 = vld [vmem:[#allocation5 + $0x160] sm:$0xf] }
  0xb9   : > { %v1041_v5 = vmul.f32 0.01, %v581_v1  ;;  %v3766_v6 = vor.u32 %v4189_v3, %v3765_v2 }
  0xba   : > { %v1042_v8 = vmul.f32 0.01, %v639_v4  ;;  %v1036_v30 = vmul.f32 0.01, %v753_v13  ;;  %v1187_v35 = vmax.f32 %v695_v7, %v1035_v23  ;;  %v3637_v7 = vld [vmem:[#allocation5 + $0x60] sm:$0xf] }
  0xbb   : > { %v1193_v14 = vmax.f32 %v581_v1, %v1041_v5  ;;  %2308 = vmatpush.bf16.msra.mxu2 %v3766_v6  ;;  %v4187_v6 = vld [vmem:[#allocation5 + $0x154] sm:$0xf0] }
  0xbc   : > { %v1194_v18 = vmax.f32 %v639_v4, %v1042_v8  ;;  %v1188_v37 = vmax.f32 %v753_v13, %v1036_v30  ;;  %v4157_v8 = vld [vmem:[#allocation5 + $0x64] sm:$0xf0] }
  0xbd   : > { %v4716_v20 = vpack.c.bf16 %v1193_v14, %v1185_v12  ;;  %v696_v21 = vpop.f32.mrf.mxu2  ;;  %v3829_v12 = vld [vmem:[#allocation5 + $0x1e0] sm:$0xf]  ;;  %v3638_v14 = vor.u32 %v4157_v8, %v3637_v7  ;;  %v3629_v7 = vld [vmem:[#allocation5 + $0x50] sm:$0xf] }
  0xbe   : > { %v4720_v26 = vpack.c.bf16 %v1194_v18, %v1186_v17  ;;  %v697_v27 = vadd.f32 %v696_v21, %v4706_v57  ;;  %v583_v29 = vpop.f32.mrf.mxu0  ;;  %v4173_v17 = vld [vmem:[#allocation5 + $0xe4] sm:$0xf0] }
  0xbf   : > { %5622 = vst [vmem:[#allocation15_spill] sm:$0xff] %v4716_v20  ;;  %v754_v28 = vpop.f32.mrf.mxu3  ;;  %v641_v32 = vpop.f32.mrf.mxu1  ;;  %v584_v42 = vadd.f32 %v583_v29, %v4694_v43  ;;  %2192 = vmatpush.bf16.msra.mxu0 %v3638_v14  ;;  %v3821_v14 = vld [vmem:[#allocation5 + $0x1d0] sm:$0xf] }
  0xc0   : > { %5623 = vst [vmem:[#allocation16_spill] sm:$0xff] %v4720_v26  ;;  %v755_v31 = vadd.f32 %v754_v28, %v4710_v0  ;;  %v1043_v33 = vmul.f32 0.01, %v697_v27  ;;  %v642_v46 = vadd.f32 %v641_v32, %v4697_v45  ;;  %v3702_v28 = vor.u32 %v4173_v17, %v3701_v16 }
  0xc1   : > { %3516 = vmatmul.msk.bf16.gmra.mxu0 %vm538_vm0, %v4718_v22  ;;  %v1049_v51 = vmul.f32 0.01, %v584_v42 }
  0xc2   : > { %v1044_v34 = vmul.f32 0.01, %v755_v31  ;;  %v1195_v36 = vmax.f32 %v697_v27, %v1043_v33  ;;  %3526 = vmatmul.msk.bf16.gmra.mxu1 %vm538_vm0, %v4718_v22  ;;  %3536 = vmatmul.msk.bf16.gmra.mxu2 %vm538_vm0, %v4718_v22  ;;  %v1050_v56 = vmul.f32 0.01, %v642_v46  ;;  %v3830_v27 = vor.u32 %v4205_v15, %v3829_v12  ;;  %v4203_v15 = vld [vmem:[#allocation5 + $0x1d4] sm:$0xf0] }
  0xc3   : > { %v1201_v61 = vmax.f32 %v584_v42, %v1049_v51  ;;  %2250 = vmatpush.bf16.msra.mxu1 %v3702_v28 }
  0xc4   : > { %v1196_v41 = vmax.f32 %v755_v31, %v1044_v34  ;;  %3546 = vmatmul.msk.bf16.gmra.mxu3 %vm538_vm0, %v4718_v22  ;;  %v4733_v44 = vpack.c.bf16 %v1195_v36, %v1187_v35  ;;  %v1202_v4 = vmax.f32 %v642_v46, %v1050_v56 }
  0xc5   : > { %v699_v48 = vpop.f32.mrf.mxu2  ;;  %2366 = vmatpush.bf16.msra.mxu3 %v3830_v27  ;;  %v3822_v27 = vor.u32 %v4203_v15, %v3821_v14 }
  0xc6   : > { %5624 = vst [vmem:[#allocation17_spill] sm:$0xff] %v4733_v44  ;;  %v4736_v47 = vpack.c.bf16 %v1196_v41, %v1188_v37  ;;  %v585_v50 = vpop.f32.mrf.mxu0  ;;  %v700_v52 = vadd.f32 %v699_v48, %v4706_v57 }
  0xc7   : > { %v757_v49 = vpop.f32.mrf.mxu3  ;;  %v586_v53 = vadd.f32 %v585_v50, %v4694_v43  ;;  %v643_v54 = vpop.f32.mrf.mxu1 }
  0xc8   : > { %5625 = vst [vmem:[#allocation18_spill] sm:$0xff] %v4736_v47  ;;  %v644_v58 = vadd.f32 %v643_v54, %v4697_v45  ;;  %v1051_v62 = vmul.f32 0.01, %v700_v52  ;;  %v758_v63 = vadd.f32 %v757_v49, %v4710_v0 }
  0xc9   : > { %v1057_v59 = vmul.f32 0.01, %v586_v53  ;;  %2367 = vmatpush.bf16.msra.mxu3 %v3822_v27 }
  0xca   : > { %v1058_v60 = vmul.f32 0.01, %v644_v58  ;;  %v1052_v30 = vmul.f32 0.01, %v758_v63  ;;  %v1203_v35 = vmax.f32 %v700_v52, %v1051_v62 }
  0xcb   : > { %v1209_v1 = vmax.f32 %v586_v53, %v1057_v59 }
  0xcc   : > { %v1210_v5 = vmax.f32 %v644_v58, %v1058_v60  ;;  %v1204_v37 = vmax.f32 %v758_v63, %v1052_v30 }
  0xcd   : > { %v701_v13 = vpop.f32.mrf.mxu2  ;;  %v4742_v18 = vpack.c.bf16 %v1209_v1, %v1201_v61 }
  0xce   : > { %v702_v19 = vadd.f32 %v701_v13, %v4706_v57  ;;  %v588_v23 = vpop.f32.mrf.mxu0  ;;  %v4745_v29 = vpack.c.bf16 %v1210_v5, %v1202_v4  ;;  %v3757_v5 = vld [vmem:[#allocation5 + $0x150] sm:$0xf]  ;;  %v4155_v13 = vld [vmem:[#allocation5 + $0x54] sm:$0xf0] }
  0xcf   : > { %5626 = vst [vmem:[#allocation19_spill] sm:$0xff] %v4742_v18  ;;  %v759_v21 = vpop.f32.mrf.mxu3  ;;  %v646_v32 = vpop.f32.mrf.mxu1  ;;  %v589_v42 = vadd.f32 %v588_v23, %v4694_v43  ;;  %v3758_v12 = vor.u32 %v4187_v6, %v3757_v5  ;;  %v3630_v23 = vor.u32 %v4155_v13, %v3629_v7 }
  0xd0   : > { %5627 = vst [vmem:[#allocation20_spill] sm:$0xff] %v4745_v29  ;;  %v760_v31 = vadd.f32 %v759_v21, %v4710_v0  ;;  %v1059_v33 = vmul.f32 0.01, %v702_v19  ;;  %v647_v46 = vadd.f32 %v646_v32, %v4697_v45 }
  0xd1   : > { %3547 = vmatmul.msk.bf16.vlgmr.msrb.gmra.mxu0 %vm538_vm0, %v4600_v55  ;;  %v1065_v53 = vmul.f32 0.01, %v589_v42  ;;  %2309 = vmatpush.bf16.msra.mxu2 %v3758_v12 }
  0xd2   : > { %v1060_v34 = vmul.f32 0.01, %v760_v31  ;;  %v1211_v36 = vmax.f32 %v702_v19, %v1059_v33  ;;  %3557 = vmatmul.msk.bf16.vlgmr.msrb.gmra.mxu1 %vm538_vm0, %v4600_v55  ;;  %3567 = vmatmul.msk.bf16.vlgmr.msrb.gmra.mxu2 %vm538_vm0, %v4600_v55  ;;  %v1066_v59 = vmul.f32 0.01, %v647_v46 }
  0xd3   : > { %v1217_v62 = vmax.f32 %v589_v42, %v1065_v53  ;;  %2193 = vmatpush.bf16.msra.mxu0 %v3630_v23 }
  0xd4   : > { %v1212_v41 = vmax.f32 %v760_v31, %v1060_v34  ;;  %3577 = vmatmul.msk.bf16.vlgmr.msrb.gmra.mxu3 %vm538_vm0, %v4600_v55  ;;  %v4758_v48 = vpack.c.bf16 %v1211_v36, %v1203_v35  ;;  %v1218_v3 = vmax.f32 %v647_v46, %v1066_v59  ;;  %v3693_v46 = vld [vmem:[#allocation5 + $0xd0] sm:$0xf] }
  0xd5   : > { %v704_v49 = vpop.f32.mrf.mxu2 }
  0xd6   : > { %5628 = vst [vmem:[#allocation21_spill] sm:$0xff] %v4758_v48  ;;  %v4760_v50 = vpack.c.bf16 %v1212_v41, %v1204_v37  ;;  %v590_v52 = vpop.f32.mrf.mxu0  ;;  %v705_v54 = vadd.f32 %v704_v49, %v4706_v57  ;;  %v4171_v49 = vld [vmem:[#allocation5 + $0xd4] sm:$0xf0] }
  0xd7   : > { %v762_v51 = vpop.f32.mrf.mxu3  ;;  %v591_v56 = vadd.f32 %v590_v52, %v4694_v43  ;;  %v648_v58 = vpop.f32.mrf.mxu1  ;;  %v3694_v52 = vor.u32 %v4171_v49, %v3693_v46  ;;  %v3621_v49 = vld [vmem:[#allocation5 + $0x40] sm:$0xf] }
  0xd8   : > { %5629 = vst [vmem:[#allocation22_spill] sm:$0xff] %v4760_v50  ;;  %v649_v60 = vadd.f32 %v648_v58, %v4697_v45  ;;  %v1067_v63 = vmul.f32 0.01, %v705_v54  ;;  %v763_v1 = vadd.f32 %v762_v51, %v4710_v0 }
  0xd9   : > { %v1073_v61 = vmul.f32 0.01, %v591_v56  ;;  %2251 = vmatpush.bf16.msra.mxu1 %v3694_v52  ;;  %v3813_v52 = vld [vmem:[#allocation5 + $0x1c0] sm:$0xf] }
  0xda   : > { %v1074_v55 = vmul.f32 0.01, %v649_v60  ;;  %v1068_v30 = vmul.f32 0.01, %v763_v1  ;;  %v1219_v35 = vmax.f32 %v705_v54, %v1067_v63 }
  0xdb   : > { %v1225_v2 = vmax.f32 %v591_v56, %v1073_v61 }
  0xdc   : > { %v1226_v4 = vmax.f32 %v649_v60, %v1074_v55  ;;  %v1220_v37 = vmax.f32 %v763_v1, %v1068_v30 }
  0xdd   : > { %v706_v8 = vpop.f32.mrf.mxu2  ;;  %v4766_v16 = vpack.c.bf16 %v1225_v2, %v1217_v62 }
  0xde   : > { %v707_v17 = vadd.f32 %v706_v8, %v4706_v57  ;;  %v593_v21 = vpop.f32.mrf.mxu0  ;;  %v4769_v28 = vpack.c.bf16 %v1226_v4, %v1218_v3 }
  0xdf   : > { %5630 = vst [vmem:[#allocation23_spill] sm:$0xff] %v4766_v16  ;;  %v764_v19 = vpop.f32.mrf.mxu3  ;;  %v651_v32 = vpop.f32.mrf.mxu1  ;;  %v594_v42 = vadd.f32 %v593_v21, %v4694_v43 }
  0xe0   : > { %5631 = vst [vmem:[#allocation24_spill] sm:$0xff] %v4769_v28  ;;  %v765_v31 = vadd.f32 %v764_v19, %v4710_v0  ;;  %v1075_v33 = vmul.f32 0.01, %v707_v17  ;;  %v652_v51 = vadd.f32 %v651_v32, %v4697_v45 }
  0xe1   : > { %3548 = vmatmul.msk.bf16.gmra.mxu0 %vm538_vm0, %v4611_v9  ;;  %v1081_v60 = vmul.f32 0.01, %v594_v42 }
  0xe2   : > { %v1076_v34 = vmul.f32 0.01, %v765_v31  ;;  %v1227_v36 = vmax.f32 %v707_v17, %v1075_v33  ;;  %3558 = vmatmul.msk.bf16.gmra.mxu1 %vm538_vm0, %v4611_v9  ;;  %3568 = vmatmul.msk.bf16.gmra.mxu2 %vm538_vm0, %v4611_v9  ;;  %v1082_v62 = vmul.f32 0.01, %v652_v51 }
  0xe3   : > { %v1233_v3 = vmax.f32 %v594_v42, %v1081_v60  ;;  %v4201_v60 = vld [vmem:[#allocation5 + $0x1c4] sm:$0xf0] }
  0xe4   : > { %v1228_v41 = vmax.f32 %v765_v31, %v1076_v34  ;;  %3578 = vmatmul.msk.bf16.gmra.mxu3 %vm538_vm0, %v4611_v9  ;;  %v4782_v53 = vpack.c.bf16 %v1227_v36, %v1219_v35  ;;  %v1234_v6 = vmax.f32 %v652_v51, %v1082_v62  ;;  %v4153_v51 = vld [vmem:[#allocation5 + $0x44] sm:$0xf0] }
  0xe5   : > { %v709_v54 = vpop.f32.mrf.mxu2 }
  0xe6   : > { %5632 = vst [vmem:[#allocation25_spill] sm:$0xff] %v4782_v53  ;;  %v4784_v56 = vpack.c.bf16 %v1228_v41, %v1220_v37  ;;  %v595_v59 = vpop.f32.mrf.mxu0  ;;  %v710_v1 = vadd.f32 %v709_v54, %v4706_v57  ;;  %v3749_v37 = vld [vmem:[#allocation5 + $0x140] sm:$0xf]  ;;  %v4185_v41 = vld [vmem:[#allocation5 + $0x144] sm:$0xf0] }
  0xe7   : > { %v767_v58 = vpop.f32.mrf.mxu3  ;;  %v596_v61 = vadd.f32 %v595_v59, %v4694_v43  ;;  %v653_v55 = vpop.f32.mrf.mxu1  ;;  %v3750_v46 = vor.u32 %v4185_v41, %v3749_v37  ;;  %v3622_v59 = vor.u32 %v4153_v51, %v3621_v49 }
  0xe8   : > { %5633 = vst [vmem:[#allocation26_spill] sm:$0xff] %v4784_v56  ;;  %v654_v9 = vadd.f32 %v653_v55, %v4697_v45  ;;  %v768_v4 = vadd.f32 %v767_v58, %v4710_v0  ;;  %v1083_v13 = vmul.f32 0.01, %v710_v1  ;;  %v4169_v55 = vld [vmem:[#allocation5 + $0xc4] sm:$0xf0] }
  0xe9   : > { %v1089_v63 = vmul.f32 0.01, %v596_v61  ;;  %2310 = vmatpush.bf16.msra.mxu2 %v3750_v46  ;;  %2194 = vmatpush.bf16.msra.mxu0 %v3622_v59 }
  0xea   : > { %v1090_v2 = vmul.f32 0.01, %v654_v9  ;;  %v1084_v21 = vmul.f32 0.01, %v768_v4  ;;  %v1235_v32 = vmax.f32 %v710_v1, %v1083_v13 }
  0xeb   : > { %v1241_v5 = vmax.f32 %v596_v61, %v1089_v63  ;;  %v3685_v61 = vld [vmem:[#allocation5 + $0xc0] sm:$0xf] }
  0xec   : > { %v1242_v7 = vmax.f32 %v654_v9, %v1090_v2  ;;  %v1236_v34 = vmax.f32 %v768_v4, %v1084_v21  ;;  %v3686_v1 = vor.u32 %v4169_v55, %v3685_v61  ;;  %v3741_v61 = vld [vmem:[#allocation5 + $0x130] sm:$0xf]  ;;  %v4183_v55 = vld [vmem:[#allocation5 + $0x134] sm:$0xf0] }
  0xed   : > { %v711_v8 = vpop.f32.mrf.mxu2  ;;  %v4790_v12 = vpack.c.bf16 %v1241_v5, %v1233_v3 }
  0xee   : > { %v712_v14 = vadd.f32 %v711_v8, %v4706_v57  ;;  %v598_v17 = vpop.f32.mrf.mxu0  ;;  %v4793_v19 = vpack.c.bf16 %v1242_v7, %v1234_v6  ;;  %2252 = vmatpush.bf16.msra.mxu1 %v3686_v1  ;;  %v3742_v1 = vor.u32 %v4183_v55, %v3741_v61 }
  0xef   : > { %5634 = vst [vmem:[#allocation27_spill] sm:$0xff] %v4790_v12  ;;  %v769_v15 = vpop.f32.mrf.mxu3  ;;  %v656_v27 = vpop.f32.mrf.mxu1  ;;  %v599_v36 = vadd.f32 %v598_v17, %v4694_v43 }
  0xf0   : > { %5635 = vst [vmem:[#allocation28_spill] sm:$0xff] %v4793_v19  ;;  %v770_v23 = vadd.f32 %v769_v15, %v4710_v0  ;;  %v1091_v30 = vmul.f32 0.01, %v712_v14  ;;  %v657_v42 = vadd.f32 %v656_v27, %v4697_v45  ;;  %2311 = vmatpush.bf16.msra.mxu2 %v3742_v1 }
  0xf1   : > { %3549 = vmatmul.msk.bf16.gmra.mxu0 %vm538_vm0, %v4622_v10  ;;  %v1097_v2 = vmul.f32 0.01, %v599_v36 }
  0xf2   : > { %v1092_v31 = vmul.f32 0.01, %v770_v23  ;;  %v1243_v33 = vmax.f32 %v712_v14, %v1091_v30  ;;  %3559 = vmatmul.msk.bf16.gmra.mxu1 %vm538_vm0, %v4622_v10  ;;  %3569 = vmatmul.msk.bf16.gmra.mxu2 %vm538_vm0, %v4622_v10  ;;  %v1098_v5 = vmul.f32 0.01, %v657_v42 }
  0xf3   : > { %v1249_v14 = vmax.f32 %v599_v36, %v1097_v2  ;;  %v4151_v2 = vld [vmem:[#allocation5 + $0x34] sm:$0xf0] }
  0xf4   : > { %v1244_v35 = vmax.f32 %v770_v23, %v1092_v31  ;;  %3579 = vmatmul.msk.bf16.gmra.mxu3 %vm538_vm0, %v4622_v10  ;;  %v4806_v54 = vpack.c.bf16 %v1243_v33, %v1235_v32  ;;  %v3814_v10 = vor.u32 %v4201_v60, %v3813_v52  ;;  %v1250_v21 = vmax.f32 %v657_v42, %v1098_v5 }
  0xf5   : > { %v714_v58 = vpop.f32.mrf.mxu2 }
  0xf6   : > { %5636 = vst [vmem:[#allocation29_spill] sm:$0xff] %v4806_v54  ;;  %v4808_v62 = vpack.c.bf16 %v1244_v35, %v1236_v34  ;;  %v600_v63 = vpop.f32.mrf.mxu0  ;;  %2368 = vmatpush.bf16.msra.mxu3 %v3814_v10  ;;  %v715_v8 = vadd.f32 %v714_v58, %v4706_v57 }
  0xf7   : > { %v772_v9 = vpop.f32.mrf.mxu3  ;;  %v601_v3 = vadd.f32 %v600_v63, %v4694_v43  ;;  %v658_v4 = vpop.f32.mrf.mxu1 }
  0xf8   : > { %5637 = vst [vmem:[#allocation30_spill] sm:$0xff] %v4808_v62  ;;  %v659_v6 = vadd.f32 %v658_v4, %v4697_v45  ;;  %v773_v15 = vadd.f32 %v772_v9, %v4710_v0  ;;  %v1099_v31 = vmul.f32 0.01, %v715_v8  ;;  %v3613_v9 = vld [vmem:[#allocation5 + $0x30] sm:$0xf] }
  0xf9   : > { %v1105_v7 = vmul.f32 0.01, %v601_v3  ;;  %v4199_v4 = vld [vmem:[#allocation5 + $0x1b4] sm:$0xf0] }
  0xfa   : > { %v1106_v13 = vmul.f32 0.01, %v659_v6  ;;  %v1100_v37 = vmul.f32 0.01, %v773_v15  ;;  %v1251_v42 = vmax.f32 %v715_v8, %v1099_v31  ;;  %v3614_v8 = vor.u32 %v4151_v2, %v3613_v9 }
  0xfb   : > { %v1257_v17 = vmax.f32 %v601_v3, %v1105_v7  ;;  %v3805_v3 = vld [vmem:[#allocation5 + $0x1b0] sm:$0xf] }
  0xfc   : > { %v1258_v23 = vmax.f32 %v659_v6, %v1106_v13  ;;  %v1252_v52 = vmax.f32 %v773_v15, %v1100_v37  ;;  %v3806_v13 = vor.u32 %v4199_v4, %v3805_v3  ;;  %2195 = vmatpush.bf16.msra.mxu0 %v3614_v8  ;;  %v3677_v37 = vld [vmem:[#allocation5 + $0xb0] sm:$0xf] }
  0xfd   : > { %v716_v27 = vpop.f32.mrf.mxu2  ;;  %v4814_v30 = vpack.c.bf16 %v1257_v17, %v1249_v14 }
  0xfe   : > { %v717_v32 = vadd.f32 %v716_v27, %v4706_v57  ;;  %v603_v34 = vpop.f32.mrf.mxu0  ;;  %v4817_v35 = vpack.c.bf16 %v1258_v23, %v1250_v21  ;;  %2369 = vmatpush.bf16.msra.mxu3 %v3806_v13 }
  0xff   : > { %5638 = vst [vmem:[#allocation31_spill] sm:$0xff] %v4814_v30  ;;  %v774_v33 = vpop.f32.mrf.mxu3  ;;  %v661_v46 = vpop.f32.mrf.mxu1  ;;  %v604_v59 = vadd.f32 %v603_v34, %v4694_v43 }
 0x100   : > { %5639 = vst [vmem:[#allocation32_spill] sm:$0xff] %v4817_v35  ;;  %v775_v41 = vadd.f32 %v774_v33, %v4710_v0  ;;  %v1107_v36 = vmul.f32 0.01, %v717_v32  ;;  %v662_v60 = vadd.f32 %v661_v46, %v4697_v45 }
 0x101   : > { %3550 = vmatmul.msk.bf16.gmra.mxu0 %vm538_vm0, %v4633_v11  ;;  %v1113_v14 = vmul.f32 0.01, %v604_v59 }
 0x102   : > { %v1108_v49 = vmul.f32 0.01, %v775_v41  ;;  %v1259_v51 = vmax.f32 %v717_v32, %v1107_v36  ;;  %3560 = vmatmul.msk.bf16.gmra.mxu1 %vm538_vm0, %v4633_v11  ;;  %3570 = vmatmul.msk.bf16.gmra.mxu2 %vm538_vm0, %v4633_v11  ;;  %v1114_v17 = vmul.f32 0.01, %v662_v60 }
 0x103   : > { %v1265_v32 = vmax.f32 %v604_v59, %v1113_v14 }
 0x104   : > { %v1260_v58 = vmax.f32 %v775_v41, %v1108_v49  ;;  %3580 = vmatmul.msk.bf16.gmra.mxu3 %vm538_vm0, %v4633_v11  ;;  %v4830_v63 = vpack.c.bf16 %v1259_v51, %v1251_v42  ;;  %v4167_v41 = vld [vmem:[#allocation5 + $0xb4] sm:$0xf0]  ;;  %v1266_v46 = vmax.f32 %v662_v60, %v1114_v17 }
 0x105   : > { %v719_v10 = vpop.f32.mrf.mxu2  ;;  %v3678_v49 = vor.u32 %v4167_v41, %v3677_v37 }
 0x106   : > { %5640 = vst [vmem:[#allocation33_spill] sm:$0xff] %v4830_v63  ;;  %v4832_v5 = vpack.c.bf16 %v1260_v58, %v1252_v52  ;;  %v605_v7 = vpop.f32.mrf.mxu0  ;;  %v720_v27 = vadd.f32 %v719_v10, %v4706_v57 }
 0x107   : > { %v777_v6 = vpop.f32.mrf.mxu3  ;;  %v606_v11 = vadd.f32 %v605_v7, %v4694_v43  ;;  %v663_v15 = vpop.f32.mrf.mxu1  ;;  %2253 = vmatpush.bf16.msra.mxu1 %v3678_v49 }
 0x108   : > { %5641 = vst [vmem:[#allocation34_spill] sm:$0xff] %v4832_v5  ;;  %v664_v21 = vadd.f32 %v663_v15, %v4697_v45  ;;  %v778_v33 = vadd.f32 %v777_v6, %v4710_v0  ;;  %v1115_v52 = vmul.f32 0.01, %v720_v27 }
 0x109   : > { %v1121_v23 = vmul.f32 0.01, %v606_v11 }
 0x10a   : > { %v1122_v31 = vmul.f32 0.01, %v664_v21  ;;  %v1116_v59 = vmul.f32 0.01, %v778_v33  ;;  %v1267_v60 = vmax.f32 %v720_v27, %v1115_v52  ;;  %v4181_v52 = vld [vmem:[#allocation5 + $0x124] sm:$0xf0] }
 0x10b   : > { %v1273_v34 = vmax.f32 %v606_v11, %v1121_v23 }
 0x10c   : > { %v1274_v36 = vmax.f32 %v664_v21, %v1122_v31  ;;  %v1268_v6 = vmax.f32 %v778_v33, %v1116_v59  ;;  %v3605_v59 = vld [vmem:[#allocation5 + $0x20] sm:$0xf] }
 0x10d   : > { %v721_v42 = vpop.f32.mrf.mxu2  ;;  %v4838_v51 = vpack.c.bf16 %v1273_v34, %v1265_v32 }
 0x10e   : > { %v722_v58 = vadd.f32 %v721_v42, %v4706_v57  ;;  %v608_v55 = vpop.f32.mrf.mxu0  ;;  %v4841_v9 = vpack.c.bf16 %v1274_v36, %v1266_v46  ;;  %v3733_v42 = vld [vmem:[#allocation5 + $0x120] sm:$0xf] }
 0x10f   : > { %5642 = vst [vmem:[#allocation35_spill] sm:$0xff] %v4838_v51  ;;  %v779_v61 = vpop.f32.mrf.mxu3  ;;  %v666_v1 = vpop.f32.mrf.mxu1  ;;  %v609_v8 = vadd.f32 %v608_v55, %v4694_v43  ;;  %v3734_v55 = vor.u32 %v4181_v52, %v3733_v42 }
 0x110   : > { %5643 = vst [vmem:[#allocation36_spill] sm:$0xff] %v4841_v9  ;;  %v780_v10 = vadd.f32 %v779_v61, %v4710_v0  ;;  %v1123_v2 = vmul.f32 0.01, %v722_v58  ;;  %v667_v13 = vadd.f32 %v666_v1, %v4697_v45  ;;  %v3797_v1 = vld [vmem:[#allocation5 + $0x1a0] sm:$0xf] }
 0x111   : > { %3551 = vmatmul.msk.bf16.gmra.mxu0 %vm538_vm0, %v4644_v24  ;;  %v1129_v23 = vmul.f32 0.01, %v609_v8  ;;  %2312 = vmatpush.bf16.msra.mxu2 %v3734_v55 }
 0x112   : > { %v1124_v3 = vmul.f32 0.01, %v780_v10  ;;  %v1275_v4 = vmax.f32 %v722_v58, %v1123_v2  ;;  %3561 = vmatmul.msk.bf16.gmra.mxu1 %vm538_vm0, %v4644_v24  ;;  %3571 = vmatmul.msk.bf16.gmra.mxu2 %vm538_vm0, %v4644_v24  ;;  %v1130_v33 = vmul.f32 0.01, %v667_v13 }
 0x113   : > { %v1281_v41 = vmax.f32 %v609_v8, %v1129_v23 }
 0x114   : > { %v1276_v7 = vmax.f32 %v780_v10, %v1124_v3  ;;  %3581 = vmatmul.msk.bf16.gmra.mxu3 %vm538_vm0, %v4644_v24  ;;  %v4854_v14 = vpack.c.bf16 %v1275_v4, %v1267_v60  ;;  %v1282_v58 = vmax.f32 %v667_v13, %v1130_v33  ;;  %v4149_v10 = vld [vmem:[#allocation5 + $0x24] sm:$0xf0]  ;;  %v3669_v4 = vld [vmem:[#allocation5 + $0xa0] sm:$0xf] }
 0x115   : > { %v724_v11 = vpop.f32.mrf.mxu2  ;;  %v3606_v3 = vor.u32 %v4149_v10, %v3605_v59  ;;  %v4197_v60 = vld [vmem:[#allocation5 + $0x1a4] sm:$0xf0] }
 0x116   : > { %5644 = vst [vmem:[#allocation37_spill] sm:$0xff] %v4854_v14  ;;  %v4856_v15 = vpack.c.bf16 %v1276_v7, %v1268_v6  ;;  %v610_v21 = vpop.f32.mrf.mxu0  ;;  %v725_v27 = vadd.f32 %v724_v11, %v4706_v57  ;;  %v4165_v6 = vld [vmem:[#allocation5 + $0xa4] sm:$0xf0] }
 0x117   : > { %v782_v17 = vpop.f32.mrf.mxu3  ;;  %v611_v31 = vadd.f32 %v610_v21, %v4694_v43  ;;  %v668_v32 = vpop.f32.mrf.mxu1  ;;  %v3798_v21 = vor.u32 %v4197_v60, %v3797_v1  ;;  %v3670_v23 = vor.u32 %v4165_v6, %v3669_v4  ;;  %2196 = vmatpush.bf16.msra.mxu0 %v3606_v3 }
 0x118   : > { %5645 = vst [vmem:[#allocation38_spill] sm:$0xff] %v4856_v15  ;;  %v669_v34 = vadd.f32 %v668_v32, %v4697_v45  ;;  %v1131_v46 = vmul.f32 0.01, %v725_v27  ;;  %v783_v36 = vadd.f32 %v782_v17, %v4710_v0 }
 0x119   : > { %v1137_v37 = vmul.f32 0.01, %v611_v31  ;;  %2370 = vmatpush.bf16.msra.mxu3 %v3798_v21  ;;  %2254 = vmatpush.bf16.msra.mxu1 %v3670_v23 }
 0x11a   : > { %v1138_v24 = vmul.f32 0.01, %v669_v34 }
 0x11b   : > { %v1289_v49 = vmax.f32 %v611_v31, %v1137_v37  ;;  %v1132_v31 = vmul.f32 0.01, %v783_v36 }
 0x11c   : > { %v1290_v61 = vmax.f32 %v669_v34, %v1138_v24  ;;  %v1283_v24 = vmax.f32 %v725_v27, %v1131_v46 }
 0x11d   : > { %v726_v2 = vpop.f32.mrf.mxu2  ;;  %v4862_v7 = vpack.c.bf16 %v1289_v49, %v1281_v41  ;;  %v1284_v49 = vmax.f32 %v783_v36, %v1132_v31 }
 0x11e   : > { %v727_v8 = vadd.f32 %v726_v2, %v4706_v57  ;;  %v613_v17 = vpop.f32.mrf.mxu0  ;;  %v4865_v13 = vpack.c.bf16 %v1290_v61, %v1282_v58 }
 0x11f   : > { %5646 = vst [vmem:[#allocation39_spill] sm:$0xff] %v4862_v7  ;;  %v784_v11 = vpop.f32.mrf.mxu3  ;;  %v671_v33 = vpop.f32.mrf.mxu1  ;;  %v614_v52 = vadd.f32 %v613_v17, %v4694_v43 }
 0x120   : > { %5647 = vst [vmem:[#allocation40_spill] sm:$0xff] %v4865_v13  ;;  %v785_v32 = vadd.f32 %v784_v11, %v4710_v0  ;;  %v1139_v34 = vmul.f32 0.01, %v727_v8  ;;  %v672_v58 = vadd.f32 %v671_v33, %v4697_v45  ;;  %v4179_v33 = vld [vmem:[#allocation5 + $0x114] sm:$0xf0] }
 0x121   : > { %3552 = vmatmul.msk.bf16.gmra.mxu0 %vm538_vm0, %v4655_v25  ;;  %v1145_v10 = vmul.f32 0.01, %v614_v52 }
 0x122   : > { %v1140_v37 = vmul.f32 0.01, %v785_v32  ;;  %v1291_v41 = vmax.f32 %v727_v8, %v1139_v34  ;;  %3562 = vmatmul.msk.bf16.gmra.mxu1 %vm538_vm0, %v4655_v25  ;;  %3572 = vmatmul.msk.bf16.gmra.mxu2 %vm538_vm0, %v4655_v25  ;;  %v1146_v36 = vmul.f32 0.01, %v672_v58  ;;  %v3597_v34 = vld [vmem:[#allocation5 + $0x10] sm:$0xf] }
 0x123   : > { %v1297_v6 = vmax.f32 %v614_v52, %v1145_v10  ;;  %v4195_v52 = vld [vmem:[#allocation5 + $0x194] sm:$0xf0] }
 0x124   : > { %v1292_v42 = vmax.f32 %v785_v32, %v1140_v37  ;;  %3582 = vmatmul.msk.bf16.gmra.mxu3 %vm538_vm0, %v4655_v25  ;;  %v4878_v61 = vpack.c.bf16 %v1291_v41, %v1283_v24  ;;  %v1298_v17 = vmax.f32 %v672_v58, %v1146_v36  ;;  %v3725_v32 = vld [vmem:[#allocation5 + $0x110] sm:$0xf] }
 0x125   : > { %v729_v55 = vpop.f32.mrf.mxu2 }
 0x126   : > { %5648 = vst [vmem:[#allocation41_spill] sm:$0xff] %v4878_v61  ;;  %v4880_v27 = vpack.c.bf16 %v1292_v42, %v1284_v49  ;;  %v615_v59 = vpop.f32.mrf.mxu0  ;;  %v730_v3 = vadd.f32 %v729_v55, %v4706_v57  ;;  %v3726_v42 = vor.u32 %v4179_v33, %v3725_v32  ;;  %v4147_v55 = vld [vmem:[#allocation5 + $0x14] sm:$0xf0] }
 0x127   : > { %v787_v46 = vpop.f32.mrf.mxu3  ;;  %v616_v1 = vadd.f32 %v615_v59, %v4694_v43  ;;  %v673_v2 = vpop.f32.mrf.mxu1  ;;  %v3789_v59 = vld [vmem:[#allocation5 + $0x190] sm:$0xf] }
 0x128   : > { %5649 = vst [vmem:[#allocation42_spill] sm:$0xff] %v4880_v27  ;;  %v674_v60 = vadd.f32 %v673_v2, %v4697_v45  ;;  %v788_v8 = vadd.f32 %v787_v46, %v4710_v0  ;;  %v1147_v21 = vmul.f32 0.01, %v730_v3  ;;  %v3598_v2 = vor.u32 %v4147_v55, %v3597_v34  ;;  %2313 = vmatpush.bf16.msra.mxu2 %v3726_v42 }
 0x129   : > { %v1153_v4 = vmul.f32 0.01, %v616_v1  ;;  %v3790_v36 = vor.u32 %v4195_v52, %v3789_v59 }
 0x12a   : > { %v1154_v25 = vmul.f32 0.01, %v674_v60  ;;  %v1148_v46 = vmul.f32 0.01, %v788_v8  ;;  %2197 = vmatpush.bf16.msra.mxu0 %v3598_v2 }
 0x12b   : > { %v1305_v11 = vmax.f32 %v616_v1, %v1153_v4  ;;  %v4163_v4 = vld [vmem:[#allocation5 + $0x94] sm:$0xf0]  ;;  %2371 = vmatpush.bf16.msra.mxu3 %v3790_v36 }
 0x12c   : > { %v1306_v23 = vmax.f32 %v674_v60, %v1154_v25  ;;  %v3661_v60 = vld [vmem:[#allocation5 + $0x90] sm:$0xf] }
 0x12d   : > { %v731_v31 = vpop.f32.mrf.mxu2  ;;  %v4886_v37 = vpack.c.bf16 %v1305_v11, %v1297_v6  ;;  %v3662_v6 = vor.u32 %v4163_v4, %v3661_v60 }
 0x12e   : > { %v732_v24 = vadd.f32 %v731_v31, %v4706_v57  ;;  %v618_v49 = vpop.f32.mrf.mxu0  ;;  %v4889_v10 = vpack.c.bf16 %v1306_v23, %v1298_v17  ;;  %v1299_v31 = vmax.f32 %v730_v3, %v1147_v21  ;;  %v1300_v17 = vmax.f32 %v788_v8, %v1148_v46 }
 0x12f   : > { %5650 = vst [vmem:[#allocation43_spill] sm:$0xff] %v4886_v37  ;;  %v789_v41 = vpop.f32.mrf.mxu3  ;;  %v676_v1 = vpop.f32.mrf.mxu1  ;;  %v619_v33 = vadd.f32 %v618_v49, %v4694_v43  ;;  %2255 = vmatpush.bf16.msra.mxu1 %v3662_v6 }
 0x130   : > { %5651 = vst [vmem:[#allocation44_spill] sm:$0xff] %v4889_v10  ;;  %v790_v58 = vadd.f32 %v789_v41, %v4710_v0  ;;  %v1155_v25 = vmul.f32 0.01, %v732_v24  ;;  %v677_v34 = vadd.f32 %v676_v1, %v4697_v45 }
 0x131   : > { %3553 = vmatmul.msk.bf16.gmra.mxu0 %vm538_vm0, %v4666_v38  ;;  %v1161_v55 = vmul.f32 0.01, %v619_v33 }
 0x132   : > { %v1156_v11 = vmul.f32 0.01, %v790_v58  ;;  %v1307_v32 = vmax.f32 %v732_v24, %v1155_v25  ;;  %3563 = vmatmul.msk.bf16.gmra.mxu1 %vm538_vm0, %v4666_v38  ;;  %3573 = vmatmul.msk.bf16.gmra.mxu2 %vm538_vm0, %v4666_v38  ;;  %v1162_v52 = vmul.f32 0.01, %v677_v34 }
 0x133   : > { %v1313_v1 = vmax.f32 %v619_v33, %v1161_v55 }
 0x134   : > { %v1308_v23 = vmax.f32 %v790_v58, %v1156_v11  ;;  %3583 = vmatmul.msk.bf16.gmra.mxu3 %vm538_vm0, %v4666_v38  ;;  %v4902_v41 = vpack.c.bf16 %v1307_v32, %v1299_v31  ;;  %v1314_v60 = vmax.f32 %v677_v34, %v1162_v52 }
 0x135   : > { %v734_v3 = vpop.f32.mrf.mxu2 }
 0x136   : > { %5652 = vst [vmem:[#allocation45_spill] sm:$0xff] %v4902_v41  ;;  %v4904_v21 = vpack.c.bf16 %v1308_v23, %v1300_v17  ;;  %v620_v42 = vpop.f32.mrf.mxu0  ;;  %v735_v38 = vadd.f32 %v734_v3, %v4706_v57 }
 0x137   : > { %v792_v24 = vpop.f32.mrf.mxu3  ;;  %v621_v8 = vadd.f32 %v620_v42, %v4694_v43  ;;  %v678_v59 = vpop.f32.mrf.mxu1 }
 0x138   : > { %5653 = vst [vmem:[#allocation46_spill] sm:$0xff] %v4904_v21  ;;  %v679_v49 = vadd.f32 %v678_v59, %v4697_v45  ;;  %v793_v2 = vadd.f32 %v792_v24, %v4710_v0  ;;  %v1163_v11 = vmul.f32 0.01, %v735_v38 }
 0x139   : > { %v1169_v46 = vmul.f32 0.01, %v621_v8 }
 0x13a   : > { %v1170_v58 = vmul.f32 0.01, %v679_v49  ;;  %v1164_v42 = vmul.f32 0.01, %v793_v2  ;;  %v1315_v34 = vmax.f32 %v735_v38, %v1163_v11  ;;  %v4145_v11 = vld [vmem:[#allocation5 + $0x4] sm:$0xf0] }
 0x13b   : > { %v1321_v36 = vmax.f32 %v621_v8, %v1169_v46 }
 0x13c   : > { %v1322_v4 = vmax.f32 %v679_v49, %v1170_v58  ;;  %v1316_v59 = vmax.f32 %v793_v2, %v1164_v42  ;;  %v3717_v58 = vld [vmem:[#allocation5 + $0x100] sm:$0xf]  ;;  %v4193_v2 = vld [vmem:[#allocation5 + $0x184] sm:$0xf0] }
 0x13d   : > { %v736_v25 = vpop.f32.mrf.mxu2  ;;  %v4910_v6 = vpack.c.bf16 %v1321_v36, %v1313_v1  ;;  %v4177_v1 = vld [vmem:[#allocation5 + $0x104] sm:$0xf0]  ;;  %v3589_v36 = vld [vmem:[#allocation5] sm:$0xf] }
 0x13e   : > { %v737_v31 = vadd.f32 %v736_v25, %v4706_v57  ;;  %v4913_v17 = vpop.f32.mrf.mxu0  ;;  %v4915_v23 = vpack.c.bf16 %v1322_v4, %v1314_v60  ;;  %v3718_v25 = vor.u32 %v4177_v1, %v3717_v58  ;;  %v3590_v42 = vor.u32 %v4145_v11, %v3589_v36  ;;  %v4342_v1 = vld [vmem:[%s5546_s2] sm:$0xff]  ;;  %v4029_v11 = vld [vmem:[#allocation5 + $0x370] sm:$0xf] }
 0x13f   : > { %5654 = vst [vmem:[#allocation47_spill] sm:$0xff] %v4910_v6  ;;  %v794_v32 = vpop.f32.mrf.mxu3  ;;  %v4918_v33 = vpop.f32.mrf.mxu1  ;;  %v4942_v36 = vperm.slane %v4342_v1, 5 }
 0x140   : > { %5655 = vst [vmem:[#allocation48_spill] sm:$0xff] %v4913_v17  ;;  %v795_v3 = vadd.f32 %v794_v32, %v4710_v0  ;;  %v1171_v24 = vmul.f32 0.01, %v737_v31  ;;  %2314 = vmatpush.bf16.msra.mxu2 %v3718_v25  ;;  %2198 = vmatpush.bf16.msra.mxu0 %v3590_v42 }
 0x141   : > { %5656 = vst [vmem:[#allocation49_spill] sm:$0xff] %v4915_v23  ;;  %3554 = vmatmul.msk.bf16.gmra.mxu0 %vm538_vm0, %v4677_v39  ;;  %v3957_v23 = vld [vmem:[#allocation5 + $0x2e0] sm:$0xf] }
 0x142   : > { %5657 = vst [vmem:[#allocation50_spill] sm:$0xff] %v4918_v33  ;;  %v1172_v55 = vmul.f32 0.01, %v795_v3  ;;  %v1323_v8 = vmax.f32 %v737_v31, %v1171_v24  ;;  %3564 = vmatmul.msk.bf16.gmra.mxu1 %vm538_vm0, %v4677_v39  ;;  %3574 = vmatmul.msk.bf16.gmra.mxu2 %vm538_vm0, %v4677_v39  ;;  %v3781_v31 = vld [vmem:[#allocation5 + $0x180] sm:$0xf] }
 0x143   : > { %v4161_v24 = vld [vmem:[#allocation5 + $0x84] sm:$0xf0] }
 0x144   : > { %v1324_v52 = vmax.f32 %v795_v3, %v1172_v55  ;;  %3584 = vmatmul.msk.bf16.gmra.mxu3 %vm538_vm0, %v4677_v39  ;;  %v4928_v49 = vpack.c.bf16 %v1323_v8, %v1315_v34  ;;  %v3782_v39 = vor.u32 %v4193_v2, %v3781_v31  ;;  %v3653_v3 = vld [vmem:[#allocation5 + $0x80] sm:$0xf]  ;;  %v4255_v31 = vld [vmem:[#allocation5 + $0x374] sm:$0xf0]  ;;  %v3901_v2 = vld [vmem:[#allocation5 + $0x270] sm:$0xf] }
 0x145   : > { %v4930_v46 = vpop.f32.mrf.mxu2  ;;  %v3654_v55 = vor.u32 %v4161_v24, %v3653_v3  ;;  %v4030_v42 = vor.u32 %v4255_v31, %v4029_v11  ;;  %v4093_v3 = vld [vmem:[#allocation5 + $0x3f0] sm:$0xf]  ;;  %v4271_v24 = vld [vmem:[#allocation5 + $0x3f4] sm:$0xf0] }
 0x146   : > { %5658 = vst [vmem:[#allocation51_spill] sm:$0xff] %v4928_v49  ;;  %v4932_v38 = vpack.c.bf16 %v1324_v52, %v1316_v59  ;;  %v625_v4 = vpop.f32.mrf.mxu0  ;;  %2372 = vmatpush.bf16.msra.mxu3 %v3782_v39  ;;  %v4937_v52 = vperm.slane %v4690_v40, 4  ;;  %v4223_v39 = vld [vmem:[#allocation5 + $0x274] sm:$0xf0]  ;;  %v4094_v0 = vor.u32 %v4271_v24, %v4093_v3  ;;  %v3965_v3 = vld [vmem:[#allocation5 + $0x2f0] sm:$0xf] }
 0x147   : > { %5659 = vst [vmem:[#allocation52_spill] sm:$0xff] %v4930_v46  ;;  %v4934_v60 = vpop.f32.mrf.mxu3  ;;  %v683_v32 = vpop.f32.mrf.mxu1  ;;  %2256 = vmatpush.bf16.msra.mxu1 %v3654_v55  ;;  %v4343_v4 = vld [vmem:[%s4597_s8 + $0x40] sm:$0xff]  ;;  %v4951_v55 = vperm.slane %v4342_v1, 6  ;;  %2539 = vmatpush.bf16.msrb.mxu2 %v4030_v42  ;;  %s3247_s8 = sshll.u32 %s5280_s17, 4  ;;  %s3248_s8 = int_to_ptr.vmem [resolvable:$true] %s3247_s8 }
 0x148   : > { %5660 = vst [vmem:[#allocation53_spill] sm:$0xff] %v4932_v38 }
 0x149   : > { %5661 = vst [vmem:[#allocation54_spill] sm:$0xff] %v4934_v60  ;;  %v3902_v60 = vor.u32 %v4223_v39, %v3901_v2 }
 0x14a   : > { %2597 = vmatpush.bf16.msrb.mxu3 %v4094_v0 }
 0x14b   : > { %2423 = vmatpush.bf16.msrb.mxu0 %v3902_v60 }
 0x14d   : > { %v741_v34 = vpop.f32.mrf.mxu2 }
 0x14e   : > { %v810_v59 = vpop.f32.mrf.mxu0 }
 0x14f   : > { %v799_v8 = vpop.f32.mrf.mxu3  ;;  %v868_v58 = vpop.f32.mrf.mxu1  ;;  %v811_v25 = vadd.f32 %v810_v59, %v4937_v52  ;;  %v4953_v59 = vperm.slane %v4342_v1, 7  ;;  %v4239_v1 = vld [vmem:[#allocation5 + $0x2f4] sm:$0xf0] }
 0x150   : > { %v869_v40 = vadd.f32 %v868_v58, %v4942_v36 }
 0x151   : > { %3555 = vmatmul.msk.bf16.gmra.mxu0 %vm538_vm0, %v4343_v4  ;;  %v1037_v46 = vmul.f32 0.01, %v811_v25  ;;  %5662 = vst [vmem:[#allocation55_spill] sm:$0xff] %v4953_v59 }
 0x152   : > { %3565 = vmatmul.msk.bf16.gmra.mxu1 %vm538_vm0, %v4343_v4  ;;  %3575 = vmatmul.msk.bf16.gmra.mxu2 %vm538_vm0, %v4343_v4  ;;  %v1038_v57 = vmul.f32 0.01, %v869_v40 }
 0x153   : > { %v1189_v45 = vmax.f32 %v811_v25, %v1037_v46 }
 0x154   : > { %3585 = vmatmul.msk.bf16.gmra.mxu3 %vm538_vm0, %v4343_v4  ;;  %v1190_v24 = vmax.f32 %v869_v40, %v1038_v57 }
 0x155   : > { %v926_v32 = vpop.f32.mrf.mxu2 }
 0x156   : > { %v812_v8 = vpop.f32.mrf.mxu0  ;;  %v927_v31 = vadd.f32 %v926_v32, %v4951_v55 }
 0x157   : > { %v984_v34 = vpop.f32.mrf.mxu3  ;;  %v813_v4 = vadd.f32 %v812_v8, %v4937_v52  ;;  %v870_v58 = vpop.f32.mrf.mxu1  ;;  %v3966_v8 = vor.u32 %v4239_v1, %v3965_v3 }
 0x158   : > { %v871_v38 = vadd.f32 %v870_v58, %v4942_v36  ;;  %v985_v2 = vadd.f32 %v984_v34, %v4953_v59  ;;  %v1039_v49 = vmul.f32 0.01, %v927_v31 }
 0x159   : > { %v1045_v11 = vmul.f32 0.01, %v813_v4  ;;  %2481 = vmatpush.bf16.msrb.mxu1 %v3966_v8 }
 0x15a   : > { %v1046_v33 = vmul.f32 0.01, %v871_v38  ;;  %v1040_v46 = vmul.f32 0.01, %v985_v2 }
 0x15b   : > { %v1197_v39 = vmax.f32 %v813_v4, %v1045_v11 }
 0x15c   : > { %v1198_v17 = vmax.f32 %v871_v38, %v1046_v33 }
 0x15d   : > { %v4959_v43 = vpack.c.bf16 %v1197_v39, %v1189_v45  ;;  %v928_v42 = vpop.f32.mrf.mxu2  ;;  %v1191_v45 = vmax.f32 %v927_v31, %v1039_v49 }
 0x15e   : > { %v4961_v58 = vpack.c.bf16 %v1198_v17, %v1190_v24  ;;  %v929_v0 = vadd.f32 %v928_v42, %v4951_v55  ;;  %v815_v32 = vpop.f32.mrf.mxu0  ;;  %v1192_v17 = vmax.f32 %v985_v2, %v1040_v46 }
 0x15f   : > { %5663 = vst [vmem:[#allocation56_spill] sm:$0xff] %v4959_v43  ;;  %v986_v60 = vpop.f32.mrf.mxu3  ;;  %v873_v34 = vpop.f32.mrf.mxu1  ;;  %v816_v38 = vadd.f32 %v815_v32, %v4937_v52  ;;  %v4269_v43 = vld [vmem:[#allocation5 + $0x3e4] sm:$0xf0] }
 0x160   : > { %5664 = vst [vmem:[#allocation57_spill] sm:$0xff] %v4961_v58  ;;  %v987_v25 = vadd.f32 %v986_v60, %v4953_v59  ;;  %v1047_v4 = vmul.f32 0.01, %v929_v0  ;;  %v874_v39 = vadd.f32 %v873_v34, %v4942_v36 }
 0x161   : > { %3556 = vmatmul.msk.bf16.gmra.mxu0 %vm538_vm0, %v4718_v22  ;;  %v1053_v24 = vmul.f32 0.01, %v816_v38 }
 0x162   : > { %v1048_v11 = vmul.f32 0.01, %v987_v25  ;;  %v1199_v57 = vmax.f32 %v929_v0, %v1047_v4  ;;  %3566 = vmatmul.msk.bf16.gmra.mxu1 %vm538_vm0, %v4718_v22  ;;  %3576 = vmatmul.msk.bf16.gmra.mxu2 %vm538_vm0, %v4718_v22  ;;  %v1054_v0 = vmul.f32 0.01, %v874_v39 }
 0x163   : > { %v1205_v46 = vmax.f32 %v816_v38, %v1053_v24 }
 0x164   : > { %v1200_v33 = vmax.f32 %v987_v25, %v1048_v11  ;;  %3586 = vmatmul.msk.bf16.gmra.mxu3 %vm538_vm0, %v4718_v22  ;;  %v4974_v40 = vpack.c.bf16 %v1199_v57, %v1191_v45  ;;  %v4021_v11 = vld [vmem:[#allocation5 + $0x360] sm:$0xf]  ;;  %v4253_v45 = vld [vmem:[#allocation5 + $0x364] sm:$0xf0]  ;;  %v1206_v57 = vmax.f32 %v874_v39, %v1054_v0 }
 0x165   : > { %v931_v49 = vpop.f32.mrf.mxu2 }
 0x166   : > { %5665 = vst [vmem:[#allocation58_spill] sm:$0xff] %v4974_v40  ;;  %v4977_v3 = vpack.c.bf16 %v1200_v33, %v1192_v17  ;;  %v817_v1 = vpop.f32.mrf.mxu0  ;;  %v932_v8 = vadd.f32 %v931_v49, %v4951_v55  ;;  %v4022_v33 = vor.u32 %v4253_v45, %v4021_v11  ;;  %v4221_v49 = vld [vmem:[#allocation5 + $0x264] sm:$0xf0]  ;;  %v4085_v40 = vld [vmem:[#allocation5 + $0x3e0] sm:$0xf] }
 0x167   : > { %v989_v31 = vpop.f32.mrf.mxu3  ;;  %v818_v2 = vadd.f32 %v817_v1, %v4937_v52  ;;  %v875_v42 = vpop.f32.mrf.mxu1 }
 0x168   : > { %5666 = vst [vmem:[#allocation59_spill] sm:$0xff] %v4977_v3  ;;  %v876_v60 = vadd.f32 %v875_v42, %v4942_v36  ;;  %v1055_v25 = vmul.f32 0.01, %v932_v8  ;;  %v990_v34 = vadd.f32 %v989_v31, %v4953_v59  ;;  %v3893_v3 = vld [vmem:[#allocation5 + $0x260] sm:$0xf]  ;;  %2540 = vmatpush.bf16.msrb.mxu2 %v4022_v33 }
 0x169   : > { %v1061_v32 = vmul.f32 0.01, %v818_v2  ;;  %v3894_v58 = vor.u32 %v4221_v49, %v3893_v3  ;;  %v4237_v42 = vld [vmem:[#allocation5 + $0x2e4] sm:$0xf0] }
 0x16a   : > { %v1062_v22 = vmul.f32 0.01, %v876_v60  ;;  %v1056_v0 = vmul.f32 0.01, %v990_v34 }
 0x16b   : > { %v1213_v4 = vmax.f32 %v818_v2, %v1061_v32  ;;  %v4086_v2 = vor.u32 %v4269_v43, %v4085_v40  ;;  %v3958_v32 = vor.u32 %v4237_v42, %v3957_v23  ;;  %2424 = vmatpush.bf16.msrb.mxu0 %v3894_v58 }
 0x16c   : > { %v1214_v17 = vmax.f32 %v876_v60, %v1062_v22  ;;  %v1208_v43 = vmax.f32 %v990_v34, %v1056_v0 }
 0x16d   : > { %v933_v1 = vpop.f32.mrf.mxu2  ;;  %v4983_v6 = vpack.c.bf16 %v1213_v4, %v1205_v46  ;;  %2598 = vmatpush.bf16.msrb.mxu3 %v4086_v2  ;;  %2482 = vmatpush.bf16.msrb.mxu1 %v3958_v32  ;;  %v1207_v46 = vmax.f32 %v932_v8, %v1055_v25 }
 0x16e   : > { %v934_v38 = vadd.f32 %v933_v1, %v4951_v55  ;;  %v820_v31 = vpop.f32.mrf.mxu0  ;;  %v4986_v39 = vpack.c.bf16 %v1214_v17, %v1206_v57 }
 0x16f   : > { %v991_v24 = vpop.f32.mrf.mxu3  ;;  %v878_v22 = vpop.f32.mrf.mxu1  ;;  %v821_v40 = vadd.f32 %v820_v31, %v4937_v52 }
 0x170   : > { %v992_v60 = vadd.f32 %v991_v24, %v4953_v59  ;;  %v1063_v3 = vmul.f32 0.01, %v934_v38  ;;  %v879_v58 = vadd.f32 %v878_v22, %v4942_v36 }
 0x171   : > { %2199 = vmatmul.bf16.vlgmr.msra.gmra.mxu0 %v4716_v20  ;;  %v1069_v25 = vmul.f32 0.01, %v821_v40 }
 0x172   : > { %v1064_v11 = vmul.f32 0.01, %v992_v60  ;;  %v1215_v4 = vmax.f32 %v934_v38, %v1063_v3  ;;  %2257 = vmatmul.bf16.vlgmr.msra.gmra.mxu1 %v4720_v26  ;;  %2315 = vmatmul.bf16.vlgmr.msra.gmra.mxu2 %v4733_v44  ;;  %v1070_v42 = vmul.f32 0.01, %v879_v58 }
 0x173   : > { %v1221_v2 = vmax.f32 %v821_v40, %v1069_v25 }
 0x174   : > { %v1216_v23 = vmax.f32 %v992_v60, %v1064_v11  ;;  %2373 = vmatmul.bf16.vlgmr.msra.gmra.mxu3 %v4736_v47  ;;  %v4995_v45 = vpack.c.bf16 %v1215_v4, %v1207_v46  ;;  %v1222_v22 = vmax.f32 %v879_v58, %v1070_v42  ;;  %v4013_v11 = vld [vmem:[#allocation5 + $0x350] sm:$0xf]  ;;  %v4251_v46 = vld [vmem:[#allocation5 + $0x354] sm:$0xf0] }
 0x175   : > { %v936_v57 = vpop.f32.mrf.mxu2  ;;  %v3885_v4 = vld [vmem:[#allocation5 + $0x250] sm:$0xf]  ;;  %v4267_v47 = vld [vmem:[#allocation5 + $0x3d4] sm:$0xf0] }
 0x176   : > { %v4997_v17 = vpack.c.bf16 %v1216_v23, %v1208_v43  ;;  %v822_v8 = vpop.f32.mrf.mxu0  ;;  %v937_v49 = vadd.f32 %v936_v57, %v4951_v55  ;;  %v4014_v23 = vor.u32 %v4251_v46, %v4013_v11  ;;  %v4219_v57 = vld [vmem:[#allocation5 + $0x254] sm:$0xf0] }
 0x177   : > { %v994_v33 = vpop.f32.mrf.mxu3  ;;  %v823_v1 = vadd.f32 %v822_v8, %v4937_v52  ;;  %v880_v34 = vpop.f32.mrf.mxu1  ;;  %v4077_v8 = vld [vmem:[#allocation5 + $0x3d0] sm:$0xf]  ;;  %v3886_v25 = vor.u32 %v4219_v57, %v3885_v4 }
 0x178   : > { %5667 = vst [vmem:[#allocation60_spill] sm:$0xff] %v4997_v17  ;;  %v881_v38 = vadd.f32 %v880_v34, %v4942_v36  ;;  %v1071_v32 = vmul.f32 0.01, %v937_v49  ;;  %v995_v0 = vadd.f32 %v994_v33, %v4953_v59  ;;  %v4078_v20 = vor.u32 %v4267_v47, %v4077_v8  ;;  %2541 = vmatpush.bf16.msrb.mxu2 %v4014_v23 }
 0x179   : > { %v1077_v24 = vmul.f32 0.01, %v823_v1  ;;  %2425 = vmatpush.bf16.msrb.mxu0 %v3886_v25 }
 0x17a   : > { %v1078_v31 = vmul.f32 0.01, %v881_v38  ;;  %v1072_v58 = vmul.f32 0.01, %v995_v0  ;;  %2599 = vmatpush.bf16.msrb.mxu3 %v4078_v20 }
 0x17b   : > { %v1229_v60 = vmax.f32 %v823_v1, %v1077_v24 }
 0x17c   : > { %v1230_v3 = vmax.f32 %v881_v38, %v1078_v31  ;;  %v1223_v31 = vmax.f32 %v937_v49, %v1071_v32  ;;  %v1224_v47 = vmax.f32 %v995_v0, %v1072_v58 }
 0x17d   : > { %v938_v43 = vpop.f32.mrf.mxu2  ;;  %v5003_v44 = vpack.c.bf16 %v1229_v60, %v1221_v2 }
 0x17e   : > { %v939_v34 = vadd.f32 %v938_v43, %v4951_v55  ;;  %v825_v40 = vpop.f32.mrf.mxu0  ;;  %v5006_v33 = vpack.c.bf16 %v1230_v3, %v1222_v22  ;;  %v4235_v3 = vld [vmem:[#allocation5 + $0x2d4] sm:$0xf0] }
 0x17f   : > { %v996_v26 = vpop.f32.mrf.mxu3  ;;  %v883_v42 = vpop.f32.mrf.mxu1  ;;  %v826_v22 = vadd.f32 %v825_v40, %v4937_v52 }
 0x180   : > { %v997_v1 = vadd.f32 %v996_v26, %v4953_v59  ;;  %v1079_v38 = vmul.f32 0.01, %v939_v34  ;;  %v3949_v26 = vld [vmem:[#allocation5 + $0x2d0] sm:$0xf]  ;;  %v884_v11 = vadd.f32 %v883_v42, %v4942_v36 }
 0x181   : > { %2204 = vmatmul.bf16.gmra.mxu0 %v4742_v18  ;;  %v3950_v20 = vor.u32 %v4235_v3, %v3949_v26  ;;  %v1085_v23 = vmul.f32 0.01, %v826_v22 }
 0x182   : > { %v1080_v24 = vmul.f32 0.01, %v997_v1  ;;  %v1231_v2 = vmax.f32 %v939_v34, %v1079_v38  ;;  %2262 = vmatmul.bf16.gmra.mxu1 %v4745_v29  ;;  %2320 = vmatmul.bf16.gmra.mxu2 %v4758_v48  ;;  %v1086_v8 = vmul.f32 0.01, %v884_v11  ;;  %v4261_v48 = vld [vmem:[#allocation5 + $0x3a4] sm:$0xf0] }
 0x183   : > { %2483 = vmatpush.bf16.msrb.mxu1 %v3950_v20  ;;  %v3925_v29 = vld [vmem:[#allocation5 + $0x2a0] sm:$0xf] }
 0x184   : > { %v1232_v60 = vmax.f32 %v997_v1, %v1080_v24  ;;  %2378 = vmatmul.bf16.gmra.mxu3 %v4760_v50  ;;  %v5015_v46 = vpack.c.bf16 %v1231_v2, %v1223_v31  ;;  %v1237_v1 = vmax.f32 %v826_v22, %v1085_v23  ;;  %v1238_v24 = vmax.f32 %v884_v11, %v1086_v8 }
 0x185   : > { %v941_v4 = vpop.f32.mrf.mxu2 }
 0x186   : > { %5668 = vst [vmem:[#allocation61_spill] sm:$0xff] %v5015_v46  ;;  %v5017_v49 = vpack.c.bf16 %v1232_v60, %v1224_v47  ;;  %v827_v43 = vpop.f32.mrf.mxu0  ;;  %v942_v25 = vadd.f32 %v941_v4, %v4951_v55 }
 0x187   : > { %v999_v32 = vpop.f32.mrf.mxu3  ;;  %v828_v0 = vadd.f32 %v827_v43, %v4937_v52  ;;  %v885_v57 = vpop.f32.mrf.mxu1 }
 0x188   : > { %5669 = vst [vmem:[#allocation62_spill] sm:$0xff] %v5017_v49  ;;  %v886_v34 = vadd.f32 %v885_v57, %v4942_v36  ;;  %v1000_v42 = vadd.f32 %v999_v32, %v4953_v59  ;;  %v1087_v60 = vmul.f32 0.01, %v942_v25 }
 0x189   : > { %v1093_v40 = vmul.f32 0.01, %v828_v0 }
 0x18a   : > { %v1094_v58 = vmul.f32 0.01, %v886_v34  ;;  %v1088_v57 = vmul.f32 0.01, %v1000_v42  ;;  %v1239_v11 = vmax.f32 %v942_v25, %v1087_v60 }
 0x18b   : > { %v1245_v38 = vmax.f32 %v828_v0, %v1093_v40  ;;  %v4005_v40 = vld [vmem:[#allocation5 + $0x340] sm:$0xf] }
 0x18c   : > { %v1246_v31 = vmax.f32 %v886_v34, %v1094_v58  ;;  %v1240_v0 = vmax.f32 %v1000_v42, %v1088_v57  ;;  %v4249_v58 = vld [vmem:[#allocation5 + $0x344] sm:$0xf0] }
 0x18d   : > { %v943_v2 = vpop.f32.mrf.mxu2  ;;  %v5023_v47 = vpack.c.bf16 %v1245_v38, %v1237_v1  ;;  %v4006_v38 = vor.u32 %v4249_v58, %v4005_v40  ;;  %v4233_v42 = vld [vmem:[#allocation5 + $0x2c4] sm:$0xf0] }
 0x18e   : > { %v944_v26 = vadd.f32 %v943_v2, %v4951_v55  ;;  %v830_v20 = vpop.f32.mrf.mxu0  ;;  %v5026_v43 = vpack.c.bf16 %v1246_v31, %v1238_v24  ;;  %v3877_v24 = vld [vmem:[#allocation5 + $0x240] sm:$0xf]  ;;  %v4217_v31 = vld [vmem:[#allocation5 + $0x244] sm:$0xf0] }
 0x18f   : > { %5670 = vst [vmem:[#allocation63_spill] sm:$0xff] %v5023_v47  ;;  %v1001_v3 = vpop.f32.mrf.mxu3  ;;  %v888_v50 = vpop.f32.mrf.mxu1  ;;  %v831_v34 = vadd.f32 %v830_v20, %v4937_v52  ;;  %v4069_v2 = vld [vmem:[#allocation5 + $0x3c0] sm:$0xf]  ;;  %2542 = vmatpush.bf16.msrb.mxu2 %v4006_v38 }
 0x190   : > { %5671 = vst [vmem:[#allocation64_spill] sm:$0xff] %v5026_v43  ;;  %v1002_v4 = vadd.f32 %v1001_v3, %v4953_v59  ;;  %v1095_v22 = vmul.f32 0.01, %v944_v26  ;;  %v889_v1 = vadd.f32 %v888_v50, %v4942_v36  ;;  %v4265_v3 = vld [vmem:[#allocation5 + $0x3c4] sm:$0xf0] }
 0x191   : > { %2209 = vmatmul.bf16.gmra.mxu0 %v4766_v16 }
 0x192   : > { %v1096_v23 = vmul.f32 0.01, %v1002_v4  ;;  %v1247_v32 = vmax.f32 %v944_v26, %v1095_v22  ;;  %2267 = vmatmul.bf16.gmra.mxu1 %v4769_v28  ;;  %2325 = vmatmul.bf16.gmra.mxu2 %v4782_v53  ;;  %v3878_v26 = vor.u32 %v4217_v31, %v3877_v24  ;;  %v3941_v22 = vld [vmem:[#allocation5 + $0x2c0] sm:$0xf]  ;;  %v1101_v53 = vmul.f32 0.01, %v831_v34 }
 0x193   : > { %v1102_v58 = vmul.f32 0.01, %v889_v1 }
 0x194   : > { %v1248_v8 = vmax.f32 %v1002_v4, %v1096_v23  ;;  %2383 = vmatmul.bf16.gmra.mxu3 %v4784_v56  ;;  %v5035_v25 = vpack.c.bf16 %v1247_v32, %v1239_v11  ;;  %v4070_v23 = vor.u32 %v4265_v3, %v4069_v2  ;;  %v3942_v56 = vor.u32 %v4233_v42, %v3941_v22 }
 0x195   : > { %v946_v60 = vpop.f32.mrf.mxu2  ;;  %2426 = vmatpush.bf16.msrb.mxu0 %v3878_v26  ;;  %v1254_v2 = vmax.f32 %v889_v1, %v1102_v58 }
 0x196   : > { %5672 = vst [vmem:[#allocation65_spill] sm:$0xff] %v5035_v25  ;;  %v5037_v57 = vpack.c.bf16 %v1248_v8, %v1240_v0  ;;  %v832_v4 = vpop.f32.mrf.mxu0  ;;  %2600 = vmatpush.bf16.msrb.mxu3 %v4070_v23  ;;  %2484 = vmatpush.bf16.msrb.mxu1 %v3942_v56  ;;  %v947_v24 = vadd.f32 %v946_v60, %v4951_v55 }
 0x197   : > { %v1004_v20 = vpop.f32.mrf.mxu3  ;;  %v833_v50 = vadd.f32 %v832_v4, %v4937_v52  ;;  %v890_v40 = vpop.f32.mrf.mxu1  ;;  %v1253_v8 = vmax.f32 %v831_v34, %v1101_v53 }
 0x198   : > { %5673 = vst [vmem:[#allocation66_spill] sm:$0xff] %v5037_v57  ;;  %v891_v11 = vadd.f32 %v890_v40, %v4942_v36  ;;  %v1005_v31 = vadd.f32 %v1004_v20, %v4953_v59  ;;  %v1103_v4 = vmul.f32 0.01, %v947_v24 }
 0x199   : > { %v1109_v32 = vmul.f32 0.01, %v833_v50 }
 0x19a   : > { %v1110_v0 = vmul.f32 0.01, %v891_v11  ;;  %v1104_v56 = vmul.f32 0.01, %v1005_v31  ;;  %v1255_v1 = vmax.f32 %v947_v24, %v1103_v4  ;;  %v4263_v4 = vld [vmem:[#allocation5 + $0x3b4] sm:$0xf0] }
 0x19b   : > { %v1261_v38 = vmax.f32 %v833_v50, %v1109_v32 }
 0x19c   : > { %v1262_v3 = vmax.f32 %v891_v11, %v1110_v0  ;;  %v1256_v50 = vmax.f32 %v1005_v31, %v1104_v56  ;;  %v4247_v0 = vld [vmem:[#allocation5 + $0x334] sm:$0xf0] }
 0x19d   : > { %v948_v22 = vpop.f32.mrf.mxu2  ;;  %v5043_v42 = vpack.c.bf16 %v1261_v38, %v1253_v8  ;;  %v3869_v8 = vld [vmem:[#allocation5 + $0x230] sm:$0xf] }
 0x19e   : > { %v949_v26 = vadd.f32 %v948_v22, %v4951_v55  ;;  %v835_v40 = vpop.f32.mrf.mxu0  ;;  %v5046_v23 = vpack.c.bf16 %v1262_v3, %v1254_v2  ;;  %v4215_v3 = vld [vmem:[#allocation5 + $0x234] sm:$0xf0]  ;;  %v4061_v22 = vld [vmem:[#allocation5 + $0x3b0] sm:$0xf] }
 0x19f   : > { %v1006_v28 = vpop.f32.mrf.mxu3  ;;  %v893_v16 = vpop.f32.mrf.mxu1  ;;  %v836_v11 = vadd.f32 %v835_v40, %v4937_v52  ;;  %v4062_v40 = vor.u32 %v4263_v4, %v4061_v22 }
 0x1a0   : > { %v1007_v60 = vadd.f32 %v1006_v28, %v4953_v59  ;;  %v1111_v53 = vmul.f32 0.01, %v949_v26  ;;  %v894_v32 = vadd.f32 %v893_v16, %v4942_v36  ;;  %v3997_v28 = vld [vmem:[#allocation5 + $0x330] sm:$0xf] }
 0x1a1   : > { %2214 = vmatmul.bf16.gmra.mxu0 %v4790_v12  ;;  %v3998_v24 = vor.u32 %v4247_v0, %v3997_v28  ;;  %2601 = vmatpush.bf16.msrb.mxu3 %v4062_v40 }
 0x1a2   : > { %v1112_v34 = vmul.f32 0.01, %v1007_v60  ;;  %v1263_v20 = vmax.f32 %v949_v26, %v1111_v53  ;;  %2272 = vmatmul.bf16.gmra.mxu1 %v4793_v19  ;;  %2330 = vmatmul.bf16.gmra.mxu2 %v4806_v54  ;;  %v1117_v53 = vmul.f32 0.01, %v836_v11 }
 0x1a3   : > { %2543 = vmatpush.bf16.msrb.mxu2 %v3998_v24 }
 0x1a4   : > { %v1264_v58 = vmax.f32 %v1007_v60, %v1112_v34  ;;  %2388 = vmatmul.bf16.gmra.mxu3 %v4808_v62  ;;  %v5055_v38 = vpack.c.bf16 %v1263_v20, %v1255_v1  ;;  %v3870_v60 = vor.u32 %v4215_v3, %v3869_v8  ;;  %v1118_v62 = vmul.f32 0.01, %v894_v32  ;;  %v3933_v8 = vld [vmem:[#allocation5 + $0x2b0] sm:$0xf]  ;;  %v4231_v3 = vld [vmem:[#allocation5 + $0x2b4] sm:$0xf0] }
 0x1a5   : > { %v951_v2 = vpop.f32.mrf.mxu2 }
 0x1a6   : > { %v5057_v26 = vpack.c.bf16 %v1264_v58, %v1256_v50  ;;  %v837_v56 = vpop.f32.mrf.mxu0  ;;  %2427 = vmatpush.bf16.msrb.mxu0 %v3870_v60  ;;  %v952_v28 = vadd.f32 %v951_v2, %v4951_v55  ;;  %v1269_v50 = vmax.f32 %v836_v11, %v1117_v53  ;;  %v1270_v22 = vmax.f32 %v894_v32, %v1118_v62 }
 0x1a7   : > { %v1009_v31 = vpop.f32.mrf.mxu3  ;;  %v838_v34 = vadd.f32 %v837_v56, %v4937_v52  ;;  %v895_v16 = vpop.f32.mrf.mxu1  ;;  %v3934_v56 = vor.u32 %v4231_v3, %v3933_v8 }
 0x1a8   : > { %5674 = vst [vmem:[#allocation67_spill] sm:$0xff] %v5057_v26  ;;  %v896_v1 = vadd.f32 %v895_v16, %v4942_v36  ;;  %v1010_v58 = vadd.f32 %v1009_v31, %v4953_v59  ;;  %v1119_v12 = vmul.f32 0.01, %v952_v28 }
 0x1a9   : > { %v1125_v20 = vmul.f32 0.01, %v838_v34  ;;  %2485 = vmatpush.bf16.msrb.mxu1 %v3934_v56 }
 0x1aa   : > { %v1126_v0 = vmul.f32 0.01, %v896_v1  ;;  %v1120_v11 = vmul.f32 0.01, %v1010_v58  ;;  %v1271_v62 = vmax.f32 %v952_v28, %v1119_v12 }
 0x1ab   : > { %v1277_v54 = vmax.f32 %v838_v34, %v1125_v20 }
 0x1ac   : > { %v1278_v4 = vmax.f32 %v896_v1, %v1126_v0 }
 0x1ad   : > { %v953_v19 = vpop.f32.mrf.mxu2  ;;  %v5063_v24 = vpack.c.bf16 %v1277_v54, %v1269_v50 }
 0x1ae   : > { %v954_v60 = vadd.f32 %v953_v19, %v4951_v55  ;;  %v840_v16 = vpop.f32.mrf.mxu0  ;;  %v5066_v2 = vpack.c.bf16 %v1278_v4, %v1270_v22  ;;  %v1272_v19 = vmax.f32 %v1010_v58, %v1120_v11 }
 0x1af   : > { %5675 = vst [vmem:[#allocation68_spill] sm:$0xff] %v5063_v24  ;;  %v1011_v40 = vpop.f32.mrf.mxu3  ;;  %v898_v53 = vpop.f32.mrf.mxu1  ;;  %v841_v1 = vadd.f32 %v840_v16, %v4937_v52 }
 0x1b0   : > { %5676 = vst [vmem:[#allocation69_spill] sm:$0xff] %v5066_v2  ;;  %v1012_v31 = vadd.f32 %v1011_v40, %v4953_v59  ;;  %v1127_v34 = vmul.f32 0.01, %v954_v60  ;;  %v899_v0 = vadd.f32 %v898_v53, %v4942_v36 }
 0x1b1   : > { %2219 = vmatmul.bf16.gmra.mxu0 %v4814_v30  ;;  %v1133_v28 = vmul.f32 0.01, %v841_v1 }
 0x1b2   : > { %v1128_v20 = vmul.f32 0.01, %v1012_v31  ;;  %v1279_v32 = vmax.f32 %v954_v60, %v1127_v34  ;;  %2277 = vmatmul.bf16.gmra.mxu1 %v4817_v35  ;;  %2335 = vmatmul.bf16.gmra.mxu2 %v4830_v63  ;;  %v1134_v60 = vmul.f32 0.01, %v899_v0  ;;  %v3861_v63 = vld [vmem:[#allocation5 + $0x220] sm:$0xf] }
 0x1b3   : > { %v4053_v35 = vld [vmem:[#allocation5 + $0x3a0] sm:$0xf] }
 0x1b4   : > { %v1280_v54 = vmax.f32 %v1012_v31, %v1128_v20  ;;  %2393 = vmatmul.bf16.gmra.mxu3 %v4832_v5  ;;  %v5075_v50 = vpack.c.bf16 %v1279_v32, %v1271_v62  ;;  %v1285_v31 = vmax.f32 %v841_v1, %v1133_v28  ;;  %v3989_v62 = vld [vmem:[#allocation5 + $0x320] sm:$0xf]  ;;  %v4245_v32 = vld [vmem:[#allocation5 + $0x324] sm:$0xf0] }
 0x1b5   : > { %v956_v8 = vpop.f32.mrf.mxu2  ;;  %v3990_v5 = vor.u32 %v4245_v32, %v3989_v62 }
 0x1b6   : > { %5677 = vst [vmem:[#allocation70_spill] sm:$0xff] %v5075_v50  ;;  %v5077_v3 = vpack.c.bf16 %v1280_v54, %v1272_v19  ;;  %v842_v12 = vpop.f32.mrf.mxu0  ;;  %v957_v4 = vadd.f32 %v956_v8, %v4951_v55  ;;  %v1286_v19 = vmax.f32 %v899_v0, %v1134_v60  ;;  %v4213_v8 = vld [vmem:[#allocation5 + $0x224] sm:$0xf0] }
 0x1b7   : > { %v1014_v22 = vpop.f32.mrf.mxu3  ;;  %v843_v56 = vadd.f32 %v842_v12, %v4937_v52  ;;  %v900_v58 = vpop.f32.mrf.mxu1  ;;  %v3862_v30 = vor.u32 %v4213_v8, %v3861_v63  ;;  %2544 = vmatpush.bf16.msrb.mxu2 %v3990_v5 }
 0x1b8   : > { %5678 = vst [vmem:[#allocation71_spill] sm:$0xff] %v5077_v3  ;;  %v901_v40 = vadd.f32 %v900_v58, %v4942_v36  ;;  %v1135_v53 = vmul.f32 0.01, %v957_v4  ;;  %v1015_v34 = vadd.f32 %v1014_v22, %v4953_v59  ;;  %v4229_v58 = vld [vmem:[#allocation5 + $0x2a4] sm:$0xf0] }
 0x1b9   : > { %v1141_v16 = vmul.f32 0.01, %v843_v56  ;;  %2428 = vmatpush.bf16.msrb.mxu0 %v3862_v30 }
 0x1ba   : > { %v1142_v11 = vmul.f32 0.01, %v901_v40  ;;  %v1136_v60 = vmul.f32 0.01, %v1015_v34 }
 0x1bb   : > { %v1293_v20 = vmax.f32 %v843_v56, %v1141_v16  ;;  %v4054_v56 = vor.u32 %v4261_v48, %v4053_v35  ;;  %v3926_v16 = vor.u32 %v4229_v58, %v3925_v29 }
 0x1bc   : > { %v1294_v54 = vmax.f32 %v901_v40, %v1142_v11  ;;  %v1288_v29 = vmax.f32 %v1015_v34, %v1136_v60 }
 0x1bd   : > { %v958_v12 = vpop.f32.mrf.mxu2  ;;  %v5083_v18 = vpack.c.bf16 %v1293_v20, %v1285_v31  ;;  %2602 = vmatpush.bf16.msrb.mxu3 %v4054_v56  ;;  %2486 = vmatpush.bf16.msrb.mxu1 %v3926_v16  ;;  %v1287_v31 = vmax.f32 %v957_v4, %v1135_v53 }
 0x1be   : > { %v959_v1 = vadd.f32 %v958_v12, %v4951_v55  ;;  %v845_v22 = vpop.f32.mrf.mxu0  ;;  %v5086_v0 = vpack.c.bf16 %v1294_v54, %v1286_v19 }
 0x1bf   : > { %v1016_v28 = vpop.f32.mrf.mxu3  ;;  %v903_v11 = vpop.f32.mrf.mxu1  ;;  %v846_v35 = vadd.f32 %v845_v22, %v4937_v52 }
 0x1c0   : > { %v1017_v40 = vadd.f32 %v1016_v28, %v4953_v59  ;;  %v1143_v63 = vmul.f32 0.01, %v959_v1  ;;  %v904_v30 = vadd.f32 %v903_v11, %v4942_v36 }
 0x1c1   : > { %2224 = vmatmul.bf16.gmra.mxu0 %v4838_v51  ;;  %v1149_v53 = vmul.f32 0.01, %v846_v35 }
 0x1c2   : > { %v1144_v62 = vmul.f32 0.01, %v1017_v40  ;;  %v1295_v20 = vmax.f32 %v959_v1, %v1143_v63  ;;  %2282 = vmatmul.bf16.gmra.mxu1 %v4841_v9  ;;  %2340 = vmatmul.bf16.gmra.mxu2 %v4854_v14  ;;  %v1150_v58 = vmul.f32 0.01, %v904_v30  ;;  %v4211_v14 = vld [vmem:[#allocation5 + $0x214] sm:$0xf0] }
 0x1c3   : > { %v1301_v56 = vmax.f32 %v846_v35, %v1149_v53  ;;  %v4045_v9 = vld [vmem:[#allocation5 + $0x390] sm:$0xf]  ;;  %v4259_v35 = vld [vmem:[#allocation5 + $0x394] sm:$0xf0] }
 0x1c4   : > { %v1296_v48 = vmax.f32 %v1017_v40, %v1144_v62  ;;  %2398 = vmatmul.bf16.gmra.mxu3 %v4856_v15  ;;  %v5095_v5 = vpack.c.bf16 %v1295_v20, %v1287_v31  ;;  %v1302_v40 = vmax.f32 %v904_v30, %v1150_v58  ;;  %v3981_v31 = vld [vmem:[#allocation5 + $0x310] sm:$0xf]  ;;  %v4243_v20 = vld [vmem:[#allocation5 + $0x314] sm:$0xf0] }
 0x1c5   : > { %v961_v32 = vpop.f32.mrf.mxu2 }
 0x1c6   : > { %v5097_v19 = vpack.c.bf16 %v1296_v48, %v1288_v29  ;;  %v847_v4 = vpop.f32.mrf.mxu0  ;;  %v962_v34 = vadd.f32 %v961_v32, %v4951_v55  ;;  %v3853_v29 = vld [vmem:[#allocation5 + $0x210] sm:$0xf] }
 0x1c7   : > { %v1019_v54 = vpop.f32.mrf.mxu3  ;;  %v848_v8 = vadd.f32 %v847_v4, %v4937_v52  ;;  %v905_v12 = vpop.f32.mrf.mxu1  ;;  %v3854_v58 = vor.u32 %v4211_v14, %v3853_v29 }
 0x1c8   : > { %v906_v1 = vadd.f32 %v905_v12, %v4942_v36  ;;  %v1020_v16 = vadd.f32 %v1019_v54, %v4953_v59  ;;  %v1151_v11 = vmul.f32 0.01, %v962_v34  ;;  %v3982_v12 = vor.u32 %v4243_v20, %v3981_v31 }
 0x1c9   : > { %v1157_v28 = vmul.f32 0.01, %v848_v8  ;;  %2429 = vmatpush.bf16.msrb.mxu0 %v3854_v58 }
 0x1ca   : > { %v1158_v22 = vmul.f32 0.01, %v906_v1  ;;  %v1152_v54 = vmul.f32 0.01, %v1020_v16  ;;  %2545 = vmatpush.bf16.msrb.mxu2 %v3982_v12  ;;  %v1303_v31 = vmax.f32 %v962_v34, %v1151_v11 }
 0x1cb   : > { %v1309_v60 = vmax.f32 %v848_v8, %v1157_v28  ;;  %v3917_v28 = vld [vmem:[#allocation5 + $0x290] sm:$0xf] }
 0x1cc   : > { %v1310_v63 = vmax.f32 %v906_v1, %v1158_v22  ;;  %v4046_v1 = vor.u32 %v4259_v35, %v4045_v9  ;;  %v4227_v22 = vld [vmem:[#allocation5 + $0x294] sm:$0xf0] }
 0x1cd   : > { %v963_v62 = vpop.f32.mrf.mxu2  ;;  %v5103_v48 = vpack.c.bf16 %v1309_v60, %v1301_v56  ;;  %v3918_v60 = vor.u32 %v4227_v22, %v3917_v28 }
 0x1ce   : > { %v964_v4 = vadd.f32 %v963_v62, %v4951_v55  ;;  %v850_v15 = vpop.f32.mrf.mxu0  ;;  %v5106_v53 = vpack.c.bf16 %v1310_v63, %v1302_v40  ;;  %2603 = vmatpush.bf16.msrb.mxu3 %v4046_v1  ;;  %v1304_v40 = vmax.f32 %v1020_v16, %v1152_v54 }
 0x1cf   : > { %5679 = vst [vmem:[#allocation72_spill] sm:$0xff] %v5103_v48  ;;  %v1021_v32 = vpop.f32.mrf.mxu3  ;;  %v908_v8 = vpop.f32.mrf.mxu1  ;;  %v851_v14 = vadd.f32 %v850_v15, %v4937_v52  ;;  %2487 = vmatpush.bf16.msrb.mxu1 %v3918_v60 }
 0x1d0   : > { %5680 = vst [vmem:[#allocation73_spill] sm:$0xff] %v5106_v53  ;;  %v1022_v30 = vadd.f32 %v1021_v32, %v4953_v59  ;;  %v1159_v56 = vmul.f32 0.01, %v964_v4  ;;  %v909_v9 = vadd.f32 %v908_v8, %v4942_v36 }
 0x1d1   : > { %2229 = vmatmul.bf16.gmra.mxu0 %v4862_v7 }
 0x1d2   : > { %v1160_v62 = vmul.f32 0.01, %v1022_v30  ;;  %v1311_v20 = vmax.f32 %v964_v4, %v1159_v56  ;;  %2287 = vmatmul.bf16.gmra.mxu1 %v4865_v13  ;;  %2345 = vmatmul.bf16.gmra.mxu2 %v4878_v61  ;;  %v1165_v4 = vmul.f32 0.01, %v851_v14  ;;  %v1166_v54 = vmul.f32 0.01, %v909_v9 }
 0x1d3   : > { %v3909_v61 = vld [vmem:[#allocation5 + $0x280] sm:$0xf]  ;;  %v4225_v13 = vld [vmem:[#allocation5 + $0x284] sm:$0xf0] }
 0x1d4   : > { %v1312_v63 = vmax.f32 %v1022_v30, %v1160_v62  ;;  %2403 = vmatmul.bf16.gmra.mxu3 %v4880_v27  ;;  %v5115_v29 = vpack.c.bf16 %v1311_v20, %v1303_v31  ;;  %v1317_v8 = vmax.f32 %v851_v14, %v1165_v4  ;;  %v1318_v56 = vmax.f32 %v909_v9, %v1166_v54  ;;  %v3973_v4 = vld [vmem:[#allocation5 + $0x300] sm:$0xf]  ;;  %v4241_v9 = vld [vmem:[#allocation5 + $0x304] sm:$0xf0] }
 0x1d5   : > { %v966_v32 = vpop.f32.mrf.mxu2  ;;  %v3974_v54 = vor.u32 %v4241_v9, %v3973_v4  ;;  %v3910_v4 = vor.u32 %v4225_v13, %v3909_v61 }
 0x1d6   : > { %5681 = vst [vmem:[#allocation74_spill] sm:$0xff] %v5115_v29  ;;  %v5117_v12 = vpack.c.bf16 %v1312_v63, %v1304_v40  ;;  %v852_v11 = vpop.f32.mrf.mxu0  ;;  %v967_v58 = vadd.f32 %v966_v32, %v4951_v55 }
 0x1d7   : > { %v1024_v34 = vpop.f32.mrf.mxu3  ;;  %v853_v35 = vadd.f32 %v852_v11, %v4937_v52  ;;  %v910_v16 = vpop.f32.mrf.mxu1  ;;  %2546 = vmatpush.bf16.msrb.mxu2 %v3974_v54  ;;  %2488 = vmatpush.bf16.msrb.mxu1 %v3910_v4 }
 0x1d8   : > { %5682 = vst [vmem:[#allocation75_spill] sm:$0xff] %v5117_v12  ;;  %v911_v15 = vadd.f32 %v910_v16, %v4942_v36  ;;  %v1025_v28 = vadd.f32 %v1024_v34, %v4953_v59  ;;  %v1167_v20 = vmul.f32 0.01, %v967_v58 }
 0x1d9   : > { %v1173_v30 = vmul.f32 0.01, %v853_v35 }
 0x1da   : > { %v1174_v1 = vmul.f32 0.01, %v911_v15  ;;  %v1168_v27 = vmul.f32 0.01, %v1025_v28 }
 0x1db   : > { %v1325_v22 = vmax.f32 %v853_v35, %v1173_v30  ;;  %v1319_v30 = vmax.f32 %v967_v58, %v1167_v20 }
 0x1dc   : > { %v1326_v60 = vmax.f32 %v911_v15, %v1174_v1  ;;  %v3845_v15 = vld [vmem:[#allocation5 + $0x200] sm:$0xf] }
 0x1dd   : > { %v968_v62 = vpop.f32.mrf.mxu2  ;;  %v5123_v31 = vpack.c.bf16 %v1325_v22, %v1317_v8  ;;  %v4209_v8 = vld [vmem:[#allocation5 + $0x204] sm:$0xf0]  ;;  %v4037_v22 = vld [vmem:[#allocation5 + $0x380] sm:$0xf] }
 0x1de   : > { %v969_v40 = vadd.f32 %v968_v62, %v4951_v55  ;;  %v5126_v11 = vpop.f32.mrf.mxu0  ;;  %v5128_v16 = vpack.c.bf16 %v1326_v60, %v1318_v56  ;;  %v1320_v56 = vmax.f32 %v1025_v28, %v1168_v27  ;;  %v3846_v62 = vor.u32 %v4209_v8, %v3845_v15  ;;  %v5689_v8 = vld [vmem:[#allocation49_spill] sm:$0xff] }
 0x1df   : > { %5683 = vst [vmem:[#allocation76_spill] sm:$0xff] %v5123_v31  ;;  %v1026_v63 = vpop.f32.mrf.mxu3  ;;  %v5131_v14 = vpop.f32.mrf.mxu1 }
 0x1e0   : > { %5684 = vst [vmem:[#allocation77_spill] sm:$0xff] %v5128_v16  ;;  %v1027_v32 = vadd.f32 %v1026_v63, %v4953_v59  ;;  %v1175_v34 = vmul.f32 0.01, %v969_v40  ;;  %v4257_v63 = vld [vmem:[#allocation5 + $0x384] sm:$0xf0]  ;;  %2430 = vmatpush.bf16.msrb.mxu0 %v3846_v62 }
 0x1e1   : > { %2234 = vmatmul.bf16.gmra.mxu0 %v4886_v37  ;;  %v4038_v37 = vor.u32 %v4257_v63, %v4037_v22  ;;  %v5691_v22 = vld [vmem:[#allocation11_spill] sm:$0xff]  ;;  %v5693_v62 = vld [vmem:[#allocation12_spill] sm:$0xff]  ;;  %v5694_v63 = vld [vmem:[#allocation50_spill] sm:$0xff] }
 0x1e2   : > { %v1176_v35 = vmul.f32 0.01, %v1027_v32  ;;  %v1327_v1 = vmax.f32 %v969_v40, %v1175_v34  ;;  %2292 = vmatmul.bf16.gmra.mxu1 %v4889_v10  ;;  %2350 = vmatmul.bf16.gmra.mxu2 %v4902_v41  ;;  %v682_v4 = vadd.f32 %v5694_v63, %v5693_v62  ;;  %v5698_v41 = vld [vmem:[#allocation14_spill] sm:$0xff] }
 0x1e3   : > { %2604 = vmatpush.bf16.msrb.mxu3 %v4038_v37  ;;  %v5690_v37 = vld [vmem:[#allocation51_spill] sm:$0xff] }
 0x1e4   : > { %v1328_v60 = vmax.f32 %v1027_v32, %v1176_v35  ;;  %2408 = vmatmul.bf16.gmra.mxu3 %v4904_v21  ;;  %v5137_v9 = vpack.c.bf16 %v1327_v1, %v1319_v30  ;;  %v1545_v32 = vld [vmem:[%s5548_s4] sm:$0x3]  ;;  %v4206_v21 = vld [vmem:[#allocation5 + $0x1f4] sm:$0xf] }
 0x1e5   : > { %v5139_v58 = vpop.f32.mrf.mxu2  ;;  %v5148_v34 = vperm.slane %v1545_v32, 0  ;;  %v5688_v1 = vld [vmem:[#allocation47_spill] sm:$0xff]  ;;  %v3775_v32 = vld [vmem:[#allocation5 + $0x178] sm:$0xf0] }
 0x1e6   : > { %5685 = vst [vmem:[#allocation78_spill] sm:$0xff] %v5137_v9  ;;  %v5141_v20 = vpack.c.bf16 %v1328_v60, %v1320_v56  ;;  %v857_v27 = vpop.f32.mrf.mxu0  ;;  %v5692_v56 = vld [vmem:[#allocation48_spill] sm:$0xff] }
 0x1e7   : > { %v5143_v40 = vpop.f32.mrf.mxu3  ;;  %v915_v28 = vpop.f32.mrf.mxu1  ;;  %v624_v60 = vadd.f32 %v5692_v56, %v5691_v22  ;;  %v5695_v27 = vld [vmem:[#allocation53_spill] sm:$0xff] }
 0x1e8   : > { %5686 = vst [vmem:[#allocation79_spill] sm:$0xff] %v5141_v20  ;;  %v4190_v28 = vld [vmem:[#allocation5 + $0x174] sm:$0xf] }
 0x1e9   : > { %5687 = vst [vmem:[#allocation80_spill] sm:$0xff] %v5143_v40  ;;  %v1178_v40 = vmul.f32 0.01, %v682_v4 }
 0x1ed   : > { %v973_v13 = vpop.f32.mrf.mxu2 }
 0x1ee   : > { %v2200_v35 = vpop.f32.mrf.mxu0  ;;  %v4158_v13 = vld [vmem:[#allocation5 + $0x74] sm:$0xf] }
 0x1ef   : > { %v1031_v61 = vpop.f32.mrf.mxu3  ;;  %v2201_v54 = vadd.f32 %v2200_v35, %v5148_v34  ;;  %v2258_v15 = vpop.f32.mrf.mxu1  ;;  %v5697_v35 = vld [vmem:[#allocation52_spill] sm:$0xff] }
 0x1f0   : > { %v5696_v61 = vld [vmem:[#allocation13_spill] sm:$0xff] }
 0x1f1   : > { %v2259_v30 = vadd.f32 %v2258_v15, %v2201_v54  ;;  %2239 = vmatmul.bf16.gmra.mxu0 %v5688_v1  ;;  %v740_v54 = vadd.f32 %v5697_v35, %v5696_v61  ;;  %v3778_v15 = vor.u32 %v4190_v28, %v3775_v32  ;;  %v3647_v1 = vld [vmem:[#allocation5 + $0x78] sm:$0xf0]  ;;  %v4174_v61 = vld [vmem:[#allocation5 + $0xf4] sm:$0xf] }
 0x1f2   : > { %2297 = vmatmul.bf16.gmra.mxu1 %v5689_v8  ;;  %2355 = vmatmul.bf16.gmra.mxu2 %v5690_v37  ;;  %v3839_v8 = vld [vmem:[#allocation5 + $0x1f8] sm:$0xf0]  ;;  %v3650_v22 = vor.u32 %v4158_v13, %v3647_v1 }
 0x1f3   : > { %v5699_v37 = vld [vmem:[#allocation54_spill] sm:$0xff]  ;;  %v3842_v56 = vor.u32 %v4206_v21, %v3839_v8  ;;  %2771 = vmatpush.bf16.msra.mxu2 %v3778_v15  ;;  %v1179_v28 = vmul.f32 0.01, %v740_v54 }
 0x1f4   : > { %2413 = vmatmul.bf16.gmra.mxu3 %v5695_v27  ;;  %v798_v10 = vadd.f32 %v5699_v37, %v5698_v41  ;;  %v1177_v27 = vmul.f32 0.01, %v624_v60  ;;  %2655 = vmatpush.bf16.msra.mxu0 %v3650_v22  ;;  %v3711_v35 = vld [vmem:[#allocation5 + $0xf8] sm:$0xf0] }
 0x1f5   : > { %v2316_v7 = vpop.f32.mrf.mxu2  ;;  %2829 = vmatpush.bf16.msra.mxu3 %v3842_v56  ;;  %v3714_v1 = vor.u32 %v4174_v61, %v3711_v35  ;;  %v4188_v61 = vld [vmem:[#allocation5 + $0x164] sm:$0xf]  ;;  %v3767_v35 = vld [vmem:[#allocation5 + $0x168] sm:$0xf0] }
 0x1f6   : > { %v2317_v51 = vadd.f32 %v2316_v7, %v2259_v30  ;;  %v2202_v63 = vpop.f32.mrf.mxu0  ;;  %v1180_v41 = vmul.f32 0.01, %v798_v10  ;;  %v1329_v21 = vmax.f32 %v624_v60, %v1177_v27  ;;  %v1330_v7 = vmax.f32 %v682_v4, %v1178_v40 }
 0x1f7   : > { %v2374_v62 = vpop.f32.mrf.mxu3  ;;  %v2203_v59 = vadd.f32 %v2202_v63, %v5148_v34  ;;  %v2260_v20 = vpop.f32.mrf.mxu1  ;;  %2713 = vmatpush.bf16.msra.mxu1 %v3714_v1  ;;  %v1331_v30 = vmax.f32 %v740_v54, %v1179_v28  ;;  %v4156_v1 = vld [vmem:[#allocation5 + $0x64] sm:$0xf] }
 0x1f8   : > { %v5164_v32 = vadd.f32 %v2374_v62, %v2317_v51  ;;  %v1332_v8 = vmax.f32 %v798_v10, %v1180_v41  ;;  %v5166_v16 = vpack.c.bf16 %v1329_v21, %v1329_v21  ;;  %v5169_v56 = vpack.c.bf16 %v1330_v7, %v1330_v7  ;;  %v3639_v21 = vld [vmem:[#allocation5 + $0x68] sm:$0xf0]  ;;  %v4204_v7 = vld [vmem:[#allocation5 + $0x1e4] sm:$0xf] }
 0x1f9   : > { %v2261_v37 = vadd.f32 %v2260_v20, %v2203_v59  ;;  %v5171_v62 = vpack.c.bf16 %v1331_v30, %v1331_v30  ;;  %v3642_v30 = vor.u32 %v4156_v1, %v3639_v21  ;;  %v5703_v1 = vld [vmem:[#allocation59_spill] sm:$0xff] }
 0x1fa   : > { %v5175_v20 = vpack.c.bf16 %v1332_v8, %v1332_v8  ;;  %v3831_v8 = vld [vmem:[#allocation5 + $0x1e8] sm:$0xf0] }
 0x1fb   : > { %2656 = vmatpush.bf16.msra.mxu0 %v3642_v30 }
 0x1fd   : > { %v2318_v13 = vpop.f32.mrf.mxu2 }
 0x1fe   : > { %v2319_v15 = vadd.f32 %v2318_v13, %v2261_v37  ;;  %v2205_v63 = vpop.f32.mrf.mxu0  ;;  %v3770_v37 = vor.u32 %v4188_v61, %v3767_v35  ;;  %v4172_v13 = vld [vmem:[#allocation5 + $0xe4] sm:$0xf]  ;;  %v5700_v61 = vld [vmem:[#allocation56_spill] sm:$0xff]  ;;  %v5701_v35 = vld [vmem:[#allocation57_spill] sm:$0xff] }
 0x1ff   : > { %v2376_v9 = vpop.f32.mrf.mxu3  ;;  %v2206_v22 = vadd.f32 %v2205_v63, %v5148_v34  ;;  %v2263_v51 = vpop.f32.mrf.mxu1  ;;  %v3834_v63 = vor.u32 %v4204_v7, %v3831_v8 }
 0x200   : > { %v5173_v59 = vadd.f32 %v2376_v9, %v2319_v15  ;;  %v3703_v15 = vld [vmem:[#allocation5 + $0xe8] sm:$0xf0]  ;;  %2772 = vmatpush.bf16.msra.mxu2 %v3770_v37  ;;  %v5702_v37 = vld [vmem:[#allocation58_spill] sm:$0xff] }
 0x201   : > { %v2264_v40 = vadd.f32 %v2263_v51, %v2206_v22  ;;  %2244 = vmatmul.bf16.gmra.mxu0 %v5166_v16  ;;  %v3706_v22 = vor.u32 %v4172_v13, %v3703_v15  ;;  %2830 = vmatpush.bf16.msra.mxu3 %v3834_v63 }
 0x202   : > { %2302 = vmatmul.bf16.gmra.mxu1 %v5169_v56  ;;  %2360 = vmatmul.bf16.gmra.mxu2 %v5171_v62 }
 0x203   : > { %2714 = vmatpush.bf16.msra.mxu1 %v3706_v22  ;;  %v4186_v22 = vld [vmem:[#allocation5 + $0x154] sm:$0xf] }
 0x204   : > { %2418 = vmatmul.bf16.gmra.mxu3 %v5175_v20 }
 0x205   : > { %v2321_v10 = vpop.f32.mrf.mxu2 }
 0x206   : > { %v2322_v60 = vadd.f32 %v2321_v10, %v2264_v40  ;;  %v2207_v27 = vpop.f32.mrf.mxu0 }
 0x207   : > { %v2379_v4 = vpop.f32.mrf.mxu3  ;;  %v2208_v54 = vadd.f32 %v2207_v27, %v5148_v34  ;;  %v2265_v28 = vpop.f32.mrf.mxu1 }
 0x208   : > { %v5182_v9 = vadd.f32 %v2379_v4, %v2322_v60 }
 0x209   : > { %v2266_v41 = vadd.f32 %v2265_v28, %v2208_v54 }
 0x20d   : > { %v2323_v51 = vpop.f32.mrf.mxu2 }
 0x20e   : > { %v2324_v40 = vadd.f32 %v2323_v51, %v2266_v41  ;;  %v2210_v60 = vpop.f32.mrf.mxu0  ;;  %v3759_v51 = vld [vmem:[#allocation5 + $0x158] sm:$0xf0] }
 0x20f   : > { %v2381_v10 = vpop.f32.mrf.mxu3  ;;  %v2211_v4 = vadd.f32 %v2210_v60, %v5148_v34  ;;  %v2268_v27 = vpop.f32.mrf.mxu1  ;;  %v3631_v60 = vld [vmem:[#allocation5 + $0x58] sm:$0xf0] }
 0x210   : > { %v5185_v54 = vadd.f32 %v2381_v10, %v2324_v40  ;;  %v4154_v40 = vld [vmem:[#allocation5 + $0x54] sm:$0xf]  ;;  %v3762_v10 = vor.u32 %v4186_v22, %v3759_v51 }
 0x211   : > { %v2269_v28 = vadd.f32 %v2268_v27, %v2211_v4  ;;  %2431 = vmatmul.bf16.vlgmr.msrb.gmra.mxu0 %v5700_v61  ;;  %v4202_v4 = vld [vmem:[#allocation5 + $0x1d4] sm:$0xf]  ;;  %v3823_v27 = vld [vmem:[#allocation5 + $0x1d8] sm:$0xf0] }
 0x212   : > { %2489 = vmatmul.bf16.vlgmr.msrb.gmra.mxu1 %v5701_v35  ;;  %2547 = vmatmul.bf16.vlgmr.msrb.gmra.mxu2 %v5702_v37  ;;  %v3634_v37 = vor.u32 %v4154_v40, %v3631_v60  ;;  %v3826_v35 = vor.u32 %v4202_v4, %v3823_v27  ;;  %v3695_v61 = vld [vmem:[#allocation5 + $0xd8] sm:$0xf0] }
 0x213   : > { %2773 = vmatpush.bf16.msra.mxu2 %v3762_v10 }
 0x214   : > { %2605 = vmatmul.bf16.vlgmr.msrb.gmra.mxu3 %v5703_v1  ;;  %2657 = vmatpush.bf16.msra.mxu0 %v3634_v37 }
 0x215   : > { %v2326_v21 = vpop.f32.mrf.mxu2  ;;  %2831 = vmatpush.bf16.msra.mxu3 %v3826_v35 }
 0x216   : > { %v2327_v7 = vadd.f32 %v2326_v21, %v2269_v28  ;;  %v2212_v41 = vpop.f32.mrf.mxu0 }
 0x217   : > { %v2384_v30 = vpop.f32.mrf.mxu3  ;;  %v2213_v8 = vadd.f32 %v2212_v41, %v5148_v34  ;;  %v2270_v13 = vpop.f32.mrf.mxu1 }
 0x218   : > { %v5192_v15 = vadd.f32 %v2384_v30, %v2327_v7 }
 0x219   : > { %v2271_v63 = vadd.f32 %v2270_v13, %v2213_v8  ;;  %v4170_v13 = vld [vmem:[#allocation5 + $0xd4] sm:$0xf] }
 0x21a   : > { %v3698_v51 = vor.u32 %v4170_v13, %v3695_v61  ;;  %v4184_v13 = vld [vmem:[#allocation5 + $0x144] sm:$0xf] }
 0x21c   : > { %2715 = vmatpush.bf16.msra.mxu1 %v3698_v51  ;;  %v3751_v51 = vld [vmem:[#allocation5 + $0x148] sm:$0xf0] }
 0x21d   : > { %v2328_v1 = vpop.f32.mrf.mxu2 }
 0x21e   : > { %v2329_v28 = vadd.f32 %v2328_v1, %v2271_v63  ;;  %v2215_v41 = vpop.f32.mrf.mxu0 }
 0x21f   : > { %v2386_v21 = vpop.f32.mrf.mxu3  ;;  %v2216_v7 = vadd.f32 %v2215_v41, %v5148_v34  ;;  %v2273_v30 = vpop.f32.mrf.mxu1 }
 0x220   : > { %v5195_v8 = vadd.f32 %v2386_v21, %v2329_v28 }
 0x221   : > { %v2274_v22 = vadd.f32 %v2273_v30, %v2216_v7  ;;  %2436 = vmatmul.bf16.gmra.mxu0 %v4983_v6 }
 0x222   : > { %2494 = vmatmul.bf16.gmra.mxu1 %v4986_v39  ;;  %2552 = vmatmul.bf16.gmra.mxu2 %v4995_v45 }
 0x224   : > { %2610 = vmatmul.bf16.gmra.mxu3 %v4997_v17  ;;  %v3623_v17 = vld [vmem:[#allocation5 + $0x48] sm:$0xf0] }
 0x225   : > { %v2331_v35 = vpop.f32.mrf.mxu2 }
 0x226   : > { %v2332_v37 = vadd.f32 %v2331_v35, %v2274_v22  ;;  %v2217_v63 = vpop.f32.mrf.mxu0  ;;  %v3754_v35 = vor.u32 %v4184_v13, %v3751_v51 }
 0x227   : > { %v2389_v1 = vpop.f32.mrf.mxu3  ;;  %v2218_v40 = vadd.f32 %v2217_v63, %v5148_v34  ;;  %v2275_v10 = vpop.f32.mrf.mxu1  ;;  %v4152_v63 = vld [vmem:[#allocation5 + $0x44] sm:$0xf] }
 0x228   : > { %v5202_v60 = vadd.f32 %v2389_v1, %v2332_v37  ;;  %v4200_v37 = vld [vmem:[#allocation5 + $0x1c4] sm:$0xf]  ;;  %v3626_v1 = vor.u32 %v4152_v63, %v3623_v17  ;;  %2774 = vmatpush.bf16.msra.mxu2 %v3754_v35 }
 0x229   : > { %v2276_v4 = vadd.f32 %v2275_v10, %v2218_v40  ;;  %v3815_v40 = vld [vmem:[#allocation5 + $0x1c8] sm:$0xf0] }
 0x22a   : > { %v3818_v10 = vor.u32 %v4200_v37, %v3815_v40  ;;  %2658 = vmatpush.bf16.msra.mxu0 %v3626_v1 }
 0x22c   : > { %2832 = vmatpush.bf16.msra.mxu3 %v3818_v10 }
 0x22d   : > { %v2333_v27 = vpop.f32.mrf.mxu2 }
 0x22e   : > { %v2334_v28 = vadd.f32 %v2333_v27, %v2276_v4  ;;  %v2220_v21 = vpop.f32.mrf.mxu0  ;;  %v4168_v4 = vld [vmem:[#allocation5 + $0xc4] sm:$0xf]  ;;  %v3687_v27 = vld [vmem:[#allocation5 + $0xc8] sm:$0xf0] }
 0x22f   : > { %v2391_v61 = vpop.f32.mrf.mxu3  ;;  %v2221_v41 = vadd.f32 %v2220_v21, %v5148_v34  ;;  %v2278_v7 = vpop.f32.mrf.mxu1 }
 0x230   : > { %v5205_v30 = vadd.f32 %v2391_v61, %v2334_v28  ;;  %v3690_v28 = vor.u32 %v4168_v4, %v3687_v27  ;;  %v3743_v27 = vld [vmem:[#allocation5 + $0x138] sm:$0xf0] }
 0x231   : > { %v2279_v22 = vadd.f32 %v2278_v7, %v2221_v41  ;;  %2441 = vmatmul.bf16.gmra.mxu0 %v5003_v44 }
 0x232   : > { %2499 = vmatmul.bf16.gmra.mxu1 %v5006_v33  ;;  %2557 = vmatmul.bf16.gmra.mxu2 %v5015_v46 }
 0x233   : > { %2716 = vmatpush.bf16.msra.mxu1 %v3690_v28  ;;  %v4150_v28 = vld [vmem:[#allocation5 + $0x34] sm:$0xf] }
 0x234   : > { %2615 = vmatmul.bf16.gmra.mxu3 %v5017_v49 }
 0x235   : > { %v2336_v61 = vpop.f32.mrf.mxu2 }
 0x236   : > { %v2337_v21 = vadd.f32 %v2336_v61, %v2279_v22  ;;  %v2222_v7 = vpop.f32.mrf.mxu0  ;;  %v4182_v22 = vld [vmem:[#allocation5 + $0x134] sm:$0xf] }
 0x237   : > { %v2394_v41 = vpop.f32.mrf.mxu3  ;;  %v2223_v13 = vadd.f32 %v2222_v7, %v5148_v34  ;;  %v2280_v51 = vpop.f32.mrf.mxu1  ;;  %v3746_v61 = vor.u32 %v4182_v22, %v3743_v27  ;;  %v3807_v7 = vld [vmem:[#allocation5 + $0x1b8] sm:$0xf0] }
 0x238   : > { %v5212_v46 = vadd.f32 %v2394_v41, %v2337_v21  ;;  %v3615_v21 = vld [vmem:[#allocation5 + $0x38] sm:$0xf0]  ;;  %v4198_v41 = vld [vmem:[#allocation5 + $0x1b4] sm:$0xf] }
 0x239   : > { %v2281_v17 = vadd.f32 %v2280_v51, %v2223_v13  ;;  %v3618_v51 = vor.u32 %v4150_v28, %v3615_v21  ;;  %2775 = vmatpush.bf16.msra.mxu2 %v3746_v61 }
 0x23b   : > { %2659 = vmatpush.bf16.msra.mxu0 %v3618_v51 }
 0x23d   : > { %v2338_v63 = vpop.f32.mrf.mxu2 }
 0x23e   : > { %v2339_v49 = vadd.f32 %v2338_v63, %v2281_v17  ;;  %v2225_v37 = vpop.f32.mrf.mxu0 }
 0x23f   : > { %v2396_v35 = vpop.f32.mrf.mxu3  ;;  %v2226_v40 = vadd.f32 %v2225_v37, %v5148_v34  ;;  %v2283_v1 = vpop.f32.mrf.mxu1 }
 0x240   : > { %v5215_v4 = vadd.f32 %v2396_v35, %v2339_v49  ;;  %v3810_v49 = vor.u32 %v4198_v41, %v3807_v7 }
 0x241   : > { %v2284_v10 = vadd.f32 %v2283_v1, %v2226_v40  ;;  %2446 = vmatmul.bf16.gmra.mxu0 %v5023_v47 }
 0x242   : > { %2504 = vmatmul.bf16.gmra.mxu1 %v5026_v43  ;;  %2562 = vmatmul.bf16.gmra.mxu2 %v5035_v25  ;;  %v3679_v25 = vld [vmem:[#allocation5 + $0xb8] sm:$0xf0] }
 0x243   : > { %2833 = vmatpush.bf16.msra.mxu3 %v3810_v49 }
 0x244   : > { %2620 = vmatmul.bf16.gmra.mxu3 %v5037_v57  ;;  %v4166_v57 = vld [vmem:[#allocation5 + $0xb4] sm:$0xf] }
 0x245   : > { %v2341_v13 = vpop.f32.mrf.mxu2  ;;  %v3682_v27 = vor.u32 %v4166_v57, %v3679_v25 }
 0x246   : > { %v2342_v17 = vadd.f32 %v2341_v13, %v2284_v10  ;;  %v2227_v35 = vpop.f32.mrf.mxu0 }
 0x247   : > { %v2399_v63 = vpop.f32.mrf.mxu3  ;;  %v2228_v37 = vadd.f32 %v2227_v35, %v5148_v34  ;;  %v2285_v40 = vpop.f32.mrf.mxu1  ;;  %2717 = vmatpush.bf16.msra.mxu1 %v3682_v27  ;;  %v4196_v27 = vld [vmem:[#allocation5 + $0x1a4] sm:$0xf] }
 0x248   : > { %v5222_v1 = vadd.f32 %v2399_v63, %v2342_v17  ;;  %v3735_v63 = vld [vmem:[#allocation5 + $0x128] sm:$0xf0] }
 0x249   : > { %v2286_v22 = vadd.f32 %v2285_v40, %v2228_v37  ;;  %v4148_v40 = vld [vmem:[#allocation5 + $0x24] sm:$0xf] }
 0x24d   : > { %v2343_v43 = vpop.f32.mrf.mxu2 }
 0x24e   : > { %v2344_v47 = vadd.f32 %v2343_v43, %v2286_v22  ;;  %v2230_v21 = vpop.f32.mrf.mxu0  ;;  %v3607_v22 = vld [vmem:[#allocation5 + $0x28] sm:$0xf0] }
 0x24f   : > { %v2401_v28 = vpop.f32.mrf.mxu3  ;;  %v2231_v10 = vadd.f32 %v2230_v21, %v5148_v34  ;;  %v2288_v41 = vpop.f32.mrf.mxu1  ;;  %v3799_v21 = vld [vmem:[#allocation5 + $0x1a8] sm:$0xf0] }
 0x250   : > { %v5225_v61 = vadd.f32 %v2401_v28, %v2344_v47  ;;  %v4180_v47 = vld [vmem:[#allocation5 + $0x124] sm:$0xf]  ;;  %v3610_v28 = vor.u32 %v4148_v40, %v3607_v22 }
 0x251   : > { %v2289_v7 = vadd.f32 %v2288_v41, %v2231_v10  ;;  %2451 = vmatmul.bf16.gmra.mxu0 %v5043_v42  ;;  %v3738_v37 = vor.u32 %v4180_v47, %v3735_v63  ;;  %v4164_v10 = vld [vmem:[#allocation5 + $0xa4] sm:$0xf]  ;;  %v3671_v41 = vld [vmem:[#allocation5 + $0xa8] sm:$0xf0] }
 0x252   : > { %2509 = vmatmul.bf16.gmra.mxu1 %v5046_v23  ;;  %2567 = vmatmul.bf16.gmra.mxu2 %v5055_v38 }
 0x253   : > { %2776 = vmatpush.bf16.msra.mxu2 %v3738_v37  ;;  %2660 = vmatpush.bf16.msra.mxu0 %v3610_v28 }
 0x254   : > { %2625 = vmatmul.bf16.gmra.mxu3 %v5057_v26 }
 0x255   : > { %v2346_v25 = vpop.f32.mrf.mxu2 }
 0x256   : > { %v2347_v57 = vadd.f32 %v2346_v25, %v2289_v7  ;;  %v2232_v43 = vpop.f32.mrf.mxu0  ;;  %v3802_v7 = vor.u32 %v4196_v27, %v3799_v21  ;;  %v3674_v25 = vor.u32 %v4164_v10, %v3671_v41  ;;  %v4178_v21 = vld [vmem:[#allocation5 + $0x114] sm:$0xf]  ;;  %v3727_v10 = vld [vmem:[#allocation5 + $0x118] sm:$0xf0] }
 0x257   : > { %v2404_v13 = vpop.f32.mrf.mxu3  ;;  %v2233_v51 = vadd.f32 %v2232_v43, %v5148_v34  ;;  %v2290_v49 = vpop.f32.mrf.mxu1  ;;  %v4146_v41 = vld [vmem:[#allocation5 + $0x14] sm:$0xf] }
 0x258   : > { %v5232_v17 = vadd.f32 %v2404_v13, %v2347_v57  ;;  %2834 = vmatpush.bf16.msra.mxu3 %v3802_v7  ;;  %2718 = vmatpush.bf16.msra.mxu1 %v3674_v25  ;;  %v3730_v25 = vor.u32 %v4178_v21, %v3727_v10 }
 0x259   : > { %v2291_v35 = vadd.f32 %v2290_v49, %v2233_v51 }
 0x25a   : > { %2777 = vmatpush.bf16.msra.mxu2 %v3730_v25 }
 0x25d   : > { %v2348_v26 = vpop.f32.mrf.mxu2 }
 0x25e   : > { %v2349_v57 = vadd.f32 %v2348_v26, %v2291_v35  ;;  %v2235_v43 = vpop.f32.mrf.mxu0 }
 0x25f   : > { %v2406_v13 = vpop.f32.mrf.mxu3  ;;  %v2236_v51 = vadd.f32 %v2235_v43, %v5148_v34  ;;  %v2293_v49 = vpop.f32.mrf.mxu1  ;;  %v3791_v43 = vld [vmem:[#allocation5 + $0x198] sm:$0xf0] }
 0x260   : > { %v5235_v47 = vadd.f32 %v2406_v13, %v2349_v57  ;;  %v3599_v57 = vld [vmem:[#allocation5 + $0x18] sm:$0xf0]  ;;  %v4194_v13 = vld [vmem:[#allocation5 + $0x194] sm:$0xf] }
 0x261   : > { %v2294_v63 = vadd.f32 %v2293_v49, %v2236_v51  ;;  %2456 = vmatmul.bf16.gmra.mxu0 %v5063_v24  ;;  %v3602_v51 = vor.u32 %v4146_v41, %v3599_v57  ;;  %v3794_v49 = vor.u32 %v4194_v13, %v3791_v43 }
 0x262   : > { %2514 = vmatmul.bf16.gmra.mxu1 %v5066_v2  ;;  %2572 = vmatmul.bf16.gmra.mxu2 %v5075_v50  ;;  %v4162_v50 = vld [vmem:[#allocation5 + $0x94] sm:$0xf] }
 0x263   : > { %2661 = vmatpush.bf16.msra.mxu0 %v3602_v51  ;;  %2835 = vmatpush.bf16.msra.mxu3 %v3794_v49 }
 0x264   : > { %2630 = vmatmul.bf16.gmra.mxu3 %v5077_v3 }
 0x265   : > { %v2351_v37 = vpop.f32.mrf.mxu2 }
 0x266   : > { %v2352_v40 = vadd.f32 %v2351_v37, %v2294_v63  ;;  %v2237_v26 = vpop.f32.mrf.mxu0 }
 0x267   : > { %v2409_v22 = vpop.f32.mrf.mxu3  ;;  %v2238_v35 = vadd.f32 %v2237_v26, %v5148_v34  ;;  %v2295_v27 = vpop.f32.mrf.mxu1 }
 0x268   : > { %v5242_v28 = vadd.f32 %v2409_v22, %v2352_v40  ;;  %v3663_v40 = vld [vmem:[#allocation5 + $0x98] sm:$0xf0] }
 0x269   : > { %v2296_v7 = vadd.f32 %v2295_v27, %v2238_v35  ;;  %v3666_v24 = vor.u32 %v4162_v50, %v3663_v40 }
 0x26b   : > { %2719 = vmatpush.bf16.msra.mxu1 %v3666_v24 }
 0x26d   : > { %v2353_v63 = vpop.f32.mrf.mxu2 }
 0x26e   : > { %v2354_v37 = vadd.f32 %v2353_v63, %v2296_v7  ;;  %v2240_v26 = vpop.f32.mrf.mxu0 }
 0x26f   : > { %v2411_v3 = vpop.f32.mrf.mxu3  ;;  %v2241_v22 = vadd.f32 %v2240_v26, %v5148_v34  ;;  %v2298_v2 = vpop.f32.mrf.mxu1 }
 0x270   : > { %v5245_v35 = vadd.f32 %v2411_v3, %v2354_v37 }
 0x271   : > { %v2299_v27 = vadd.f32 %v2298_v2, %v2241_v22  ;;  %2461 = vmatmul.bf16.gmra.mxu0 %v5083_v18 }
 0x272   : > { %2519 = vmatmul.bf16.gmra.mxu1 %v5086_v0  ;;  %2577 = vmatmul.bf16.gmra.mxu2 %v5095_v5 }
 0x274   : > { %2635 = vmatmul.bf16.gmra.mxu3 %v5097_v19 }
 0x275   : > { %v2356_v21 = vpop.f32.mrf.mxu2 }
 0x276   : > { %v2357_v10 = vadd.f32 %v2356_v21, %v2299_v27  ;;  %v2242_v7 = vpop.f32.mrf.mxu0  ;;  %v4176_v21 = vld [vmem:[#allocation5 + $0x104] sm:$0xf] }
 0x277   : > { %v2414_v41 = vpop.f32.mrf.mxu3  ;;  %v2243_v25 = vadd.f32 %v2242_v7, %v5148_v34  ;;  %v2300_v57 = vpop.f32.mrf.mxu1 }
 0x278   : > { %v5252_v50 = vadd.f32 %v2414_v41, %v2357_v10  ;;  %v3719_v10 = vld [vmem:[#allocation5 + $0x108] sm:$0xf0]  ;;  %v4144_v41 = vld [vmem:[#allocation5 + $0x4] sm:$0xf] }
 0x279   : > { %v2301_v3 = vadd.f32 %v2300_v57, %v2243_v25  ;;  %v3722_v7 = vor.u32 %v4176_v21, %v3719_v10  ;;  %v3591_v25 = vld [vmem:[#allocation5 + $0x8] sm:$0xf0]  ;;  %v4192_v57 = vld [vmem:[#allocation5 + $0x184] sm:$0xf]  ;;  %v856_v21 = vadd.f32 %v5126_v11, %v4937_v52  ;;  %v972_v10 = vadd.f32 %v5139_v58, %v4951_v55 }
 0x27b   : > { %2778 = vmatpush.bf16.msra.mxu2 %v3722_v7  ;;  %v5705_v7 = vld [vmem:[#allocation78_spill] sm:$0xff]  ;;  %v1183_v11 = vmul.f32 0.01, %v972_v10 }
 0x27d   : > { %v2358_v2 = vpop.f32.mrf.mxu2 }
 0x27e   : > { %v2359_v13 = vadd.f32 %v2358_v2, %v2301_v3  ;;  %v2245_v24 = vpop.f32.mrf.mxu0  ;;  %v3783_v3 = vld [vmem:[#allocation5 + $0x188] sm:$0xf0] }
 0x27f   : > { %v2416_v43 = vpop.f32.mrf.mxu3  ;;  %v2246_v51 = vadd.f32 %v2245_v24, %v5148_v34  ;;  %v2303_v49 = vpop.f32.mrf.mxu1  ;;  %v4160_v24 = vld [vmem:[#allocation5 + $0x84] sm:$0xf] }
 0x280   : > { %v5255_v63 = vadd.f32 %v2416_v43, %v2359_v13  ;;  %v3594_v13 = vor.u32 %v4144_v41, %v3591_v25  ;;  %v3786_v43 = vor.u32 %v4192_v57, %v3783_v3  ;;  %v5704_v41 = vld [vmem:[#allocation77_spill] sm:$0xff]  ;;  %v5706_v25 = vld [vmem:[#allocation79_spill] sm:$0xff]  ;;  %v1181_v57 = vmul.f32 0.01, %v856_v21 }
 0x281   : > { %v2304_v37 = vadd.f32 %v2303_v49, %v2246_v51  ;;  %2466 = vmatmul.bf16.gmra.mxu0 %v5103_v48  ;;  %v3655_v51 = vld [vmem:[#allocation5 + $0x88] sm:$0xf0] }
 0x282   : > { %2524 = vmatmul.bf16.gmra.mxu1 %v5106_v53  ;;  %2582 = vmatmul.bf16.gmra.mxu2 %v5115_v29  ;;  %v3658_v49 = vor.u32 %v4160_v24, %v3655_v51  ;;  %v4254_v24 = vld [vmem:[#allocation5 + $0x374] sm:$0xf]  ;;  %v4031_v51 = vld [vmem:[#allocation5 + $0x378] sm:$0xf0] }
 0x283   : > { %2662 = vmatpush.bf16.msra.mxu0 %v3594_v13  ;;  %2836 = vmatpush.bf16.msra.mxu3 %v3786_v43  ;;  %v5708_v13 = vld [vmem:[#allocation80_spill] sm:$0xff] }
 0x284   : > { %2640 = vmatmul.bf16.gmra.mxu3 %v5117_v12  ;;  %2720 = vmatpush.bf16.msra.mxu1 %v3658_v49  ;;  %v4222_v49 = vld [vmem:[#allocation5 + $0x274] sm:$0xf]  ;;  %v1335_v12 = vmax.f32 %v972_v10, %v1183_v11 }
 0x285   : > { %v2361_v26 = vpop.f32.mrf.mxu2 }
 0x286   : > { %v2362_v40 = vadd.f32 %v2361_v26, %v2304_v37  ;;  %v2247_v27 = vpop.f32.mrf.mxu0 }
 0x287   : > { %v2419_v22 = vpop.f32.mrf.mxu3  ;;  %v2305_v34 = vpop.f32.mrf.mxu1 }
 0x288   : > { %v5261_v2 = vadd.f32 %v2419_v22, %v2362_v40  ;;  %v914_v22 = vadd.f32 %v5131_v14, %v4942_v36 }
 0x28a   : > { %v1182_v52 = vmul.f32 0.01, %v914_v22 }
 0x28d   : > { %v2363_v37 = vpop.f32.mrf.mxu2 }
 0x28e   : > { %v2432_v27 = vpop.f32.mrf.mxu0 }
 0x28f   : > { %v2421_v26 = vpop.f32.mrf.mxu3  ;;  %v2490_v34 = vpop.f32.mrf.mxu1  ;;  %v2433_v40 = vadd.f32 %v2432_v27, %v5164_v32  ;;  %v5707_v32 = vld [vmem:[#allocation55_spill] sm:$0xff]  ;;  %v3903_v27 = vld [vmem:[#allocation5 + $0x278] sm:$0xf0] }
 0x290   : > { %v1030_v43 = vadd.f32 %v5708_v13, %v5707_v32  ;;  %v4034_v26 = vor.u32 %v4254_v24, %v4031_v51 }
 0x291   : > { %2471 = vmatmul.bf16.gmra.mxu0 %v5123_v31  ;;  %v2491_v3 = vadd.f32 %v2490_v34, %v2433_v40 }
 0x292   : > { %2529 = vmatmul.bf16.gmra.mxu1 %v5704_v41  ;;  %2587 = vmatmul.bf16.gmra.mxu2 %v5705_v7  ;;  %v4095_v7 = vld [vmem:[#allocation5 + $0x3f8] sm:$0xf0]  ;;  %v3906_v41 = vor.u32 %v4222_v49, %v3903_v27  ;;  %v1184_v32 = vmul.f32 0.01, %v1030_v43 }
 0x293   : > { %3003 = vmatpush.bf16.msrb.mxu2 %v4034_v26 }
 0x294   : > { %2645 = vmatmul.bf16.gmra.mxu3 %v5706_v25  ;;  %v4270_v25 = vld [vmem:[#allocation5 + $0x3f4] sm:$0xf]  ;;  %2887 = vmatpush.bf16.msrb.mxu0 %v3906_v41  ;;  %v1336_v48 = vmax.f32 %v1030_v43, %v1184_v32 }
 0x295   : > { %v2548_v36 = vpop.f32.mrf.mxu2  ;;  %v4098_v31 = vor.u32 %v4270_v25, %v4095_v7  ;;  %v4238_v7 = vld [vmem:[#allocation5 + $0x2f4] sm:$0xf]  ;;  %v3967_v25 = vld [vmem:[#allocation5 + $0x2f8] sm:$0xf0] }
 0x296   : > { %v2549_v55 = vadd.f32 %v2548_v36, %v2491_v3  ;;  %v2434_v58 = vpop.f32.mrf.mxu0  ;;  %v1333_v3 = vmax.f32 %v856_v21, %v1181_v57  ;;  %v1334_v36 = vmax.f32 %v914_v22, %v1182_v52  ;;  %v5287_v22 = vpack.c.bf16 %v1335_v12, %v1335_v12 }
 0x297   : > { %v2606_v14 = vpop.f32.mrf.mxu3  ;;  %v2492_v37 = vpop.f32.mrf.mxu1  ;;  %v2435_v40 = vadd.f32 %v2434_v58, %v5173_v59  ;;  %3061 = vmatpush.bf16.msrb.mxu3 %v4098_v31  ;;  %v3970_v31 = vor.u32 %v4238_v7, %v3967_v25  ;;  %v5290_v52 = vpack.c.bf16 %v1336_v48, %v1336_v48  ;;  %v3895_v7 = vld [vmem:[#allocation5 + $0x268] sm:$0xf0]  ;;  %v4268_v25 = vld [vmem:[#allocation5 + $0x3e4] sm:$0xf] }
 0x298   : > { %v2607_v34 = vadd.f32 %v2606_v14, %v2549_v55  ;;  %v5283_v58 = vpack.c.bf16 %v1333_v3, %v1333_v3  ;;  %v5285_v21 = vpack.c.bf16 %v1334_v36, %v1334_v36  ;;  %v4252_v36 = vld [vmem:[#allocation5 + $0x364] sm:$0xf] }
 0x299   : > { %v2493_v53 = vadd.f32 %v2492_v37, %v2435_v40  ;;  %2945 = vmatpush.bf16.msrb.mxu1 %v3970_v31 }
 0x29a   : > { %v3119_v13 = vmul.f32 0.01, %v2607_v34 }
 0x29c   : > { %v3157_v29 = vmax.f32 %v2607_v34, %v3119_v13 }
 0x29d   : > { %v2550_v24 = vpop.f32.mrf.mxu2 }
 0x29e   : > { %3195 = vst [vmem:[%s5280_s17] sm:$0xff] %v3157_v29  ;;  %v2551_v55 = vadd.f32 %v2550_v24, %v2493_v53  ;;  %v2437_v14 = vpop.f32.mrf.mxu0  ;;  %v4023_v24 = vld [vmem:[#allocation5 + $0x368] sm:$0xf0] }
 0x29f   : > { %v2608_v59 = vpop.f32.mrf.mxu3  ;;  %v2495_v41 = vpop.f32.mrf.mxu1  ;;  %v2438_v57 = vadd.f32 %v2437_v14, %v5182_v9  ;;  %v4220_v14 = vld [vmem:[#allocation5 + $0x264] sm:$0xf] }
 0x2a0   : > { %v2609_v10 = vadd.f32 %v2608_v59, %v2551_v55  ;;  %v4026_v59 = vor.u32 %v4252_v36, %v4023_v24 }
 0x2a1   : > { %2476 = vmatmul.bf16.gmra.mxu0 %v5283_v58  ;;  %v2496_v11 = vadd.f32 %v2495_v41, %v2438_v57  ;;  %v4236_v57 = vld [vmem:[#allocation5 + $0x2e4] sm:$0xf] }
 0x2a2   : > { %v3121_v53 = vmul.f32 0.01, %v2609_v10  ;;  %2534 = vmatmul.bf16.gmra.mxu1 %v5285_v21  ;;  %2592 = vmatmul.bf16.gmra.mxu2 %v5287_v22 }
 0x2a3   : > { %3004 = vmatpush.bf16.msrb.mxu2 %v4026_v59 }
 0x2a4   : > { %2650 = vmatmul.bf16.gmra.mxu3 %v5290_v52  ;;  %v3159_v29 = vmax.f32 %v2609_v10, %v3121_v53  ;;  %v3898_v10 = vor.u32 %v4220_v14, %v3895_v7  ;;  %v3959_v53 = vld [vmem:[#allocation5 + $0x2e8] sm:$0xf0] }
 0x2a5   : > { %v2553_v12 = vpop.f32.mrf.mxu2 }
 0x2a6   : > { %3197 = vst [vmem:[%s5280_s17 + $0x10] sm:$0xff] %v3159_v29  ;;  %v2554_v43 = vadd.f32 %v2553_v12, %v2496_v11  ;;  %v2439_v9 = vpop.f32.mrf.mxu0  ;;  %v5709_v29 = vld [vmem:[#allocation15_spill] sm:$0xff]  ;;  %v3962_v12 = vor.u32 %v4236_v57, %v3959_v53  ;;  %2888 = vmatpush.bf16.msrb.mxu0 %v3898_v10  ;;  %v3887_v57 = vld [vmem:[#allocation5 + $0x258] sm:$0xf0]  ;;  %v4266_v53 = vld [vmem:[#allocation5 + $0x3d4] sm:$0xf] }
 0x2a7   : > { %v2611_v51 = vpop.f32.mrf.mxu3  ;;  %v2497_v48 = vpop.f32.mrf.mxu1  ;;  %v2440_v37 = vadd.f32 %v2439_v9, %v5185_v54  ;;  %v4087_v54 = vld [vmem:[#allocation5 + $0x3e8] sm:$0xf0]  ;;  %v5711_v9 = vld [vmem:[#allocation17_spill] sm:$0xff] }
 0x2a8   : > { %v2612_v49 = vadd.f32 %v2611_v51, %v2554_v43  ;;  %v4090_v11 = vor.u32 %v4268_v25, %v4087_v54  ;;  %v5710_v51 = vld [vmem:[#allocation16_spill] sm:$0xff]  ;;  %2946 = vmatpush.bf16.msrb.mxu1 %v3962_v12  ;;  %v4218_v54 = vld [vmem:[#allocation5 + $0x254] sm:$0xf]  ;;  %v4079_v12 = vld [vmem:[#allocation5 + $0x3d8] sm:$0xf0] }
 0x2a9   : > { %v2498_v34 = vadd.f32 %v2497_v48, %v2440_v37  ;;  %v5712_v48 = vld [vmem:[#allocation18_spill] sm:$0xff] }
 0x2aa   : > { %v3123_v26 = vmul.f32 0.01, %v2612_v49  ;;  %3062 = vmatpush.bf16.msrb.mxu3 %v4090_v11 }
 0x2ac   : > { %v3161_v27 = vmax.f32 %v2612_v49, %v3123_v26 }
 0x2ad   : > { %v2555_v40 = vpop.f32.mrf.mxu2 }
 0x2ae   : > { %3199 = vst [vmem:[%s5280_s17 + $0x20] sm:$0xff] %v3161_v27  ;;  %v2556_v32 = vadd.f32 %v2555_v40, %v2498_v34  ;;  %v2442_v3 = vpop.f32.mrf.mxu0 }
 0x2af   : > { %v2613_v13 = vpop.f32.mrf.mxu3  ;;  %v2500_v55 = vpop.f32.mrf.mxu1  ;;  %v2443_v31 = vadd.f32 %v2442_v3, %v5192_v15 }
 0x2b0   : > { %v2614_v41 = vadd.f32 %v2613_v13, %v2556_v32 }
 0x2b1   : > { %2663 = vmatmul.bf16.vlgmr.msra.gmra.mxu0 %v5709_v29  ;;  %v2501_v15 = vadd.f32 %v2500_v55, %v2443_v31  ;;  %v4250_v55 = vld [vmem:[#allocation5 + $0x354] sm:$0xf] }
 0x2b2   : > { %v3125_v43 = vmul.f32 0.01, %v2614_v41  ;;  %2721 = vmatmul.bf16.vlgmr.msra.gmra.mxu1 %v5710_v51  ;;  %2779 = vmatmul.bf16.vlgmr.msra.gmra.mxu2 %v5711_v9  ;;  %v4082_v51 = vor.u32 %v4266_v53, %v4079_v12  ;;  %v5720_v12 = vld [vmem:[#allocation26_spill] sm:$0xff] }
 0x2b4   : > { %2837 = vmatmul.bf16.vlgmr.msra.gmra.mxu3 %v5712_v48  ;;  %v3163_v49 = vmax.f32 %v2614_v41, %v3125_v43  ;;  %v4015_v41 = vld [vmem:[#allocation5 + $0x358] sm:$0xf0]  ;;  %v5713_v43 = vld [vmem:[#allocation19_spill] sm:$0xff]  ;;  %v5714_v48 = vld [vmem:[#allocation20_spill] sm:$0xff] }
 0x2b5   : > { %v2558_v37 = vpop.f32.mrf.mxu2  ;;  %v4018_v10 = vor.u32 %v4250_v55, %v4015_v41  ;;  %3063 = vmatpush.bf16.msrb.mxu3 %v4082_v51 }
 0x2b6   : > { %3201 = vst [vmem:[%s5280_s17 + $0x30] sm:$0xff] %v3163_v49  ;;  %v2559_v26 = vadd.f32 %v2558_v37, %v2501_v15  ;;  %v2444_v34 = vpop.f32.mrf.mxu0  ;;  %v5715_v49 = vld [vmem:[#allocation21_spill] sm:$0xff]  ;;  %v5716_v15 = vld [vmem:[#allocation22_spill] sm:$0xff] }
 0x2b7   : > { %v2616_v27 = vpop.f32.mrf.mxu3  ;;  %v2502_v40 = vpop.f32.mrf.mxu1  ;;  %v2445_v13 = vadd.f32 %v2444_v34, %v5195_v8  ;;  %v3890_v8 = vor.u32 %v4218_v54, %v3887_v57  ;;  %3005 = vmatpush.bf16.msrb.mxu2 %v4018_v10 }
 0x2b8   : > { %v2617_v32 = vadd.f32 %v2616_v27, %v2559_v26 }
 0x2b9   : > { %v2503_v24 = vadd.f32 %v2502_v40, %v2445_v13  ;;  %2889 = vmatpush.bf16.msrb.mxu0 %v3890_v8  ;;  %v3951_v13 = vld [vmem:[#allocation5 + $0x2d8] sm:$0xf0]  ;;  %v5718_v8 = vld [vmem:[#allocation24_spill] sm:$0xff] }
 0x2ba   : > { %v3127_v3 = vmul.f32 0.01, %v2617_v32 }
 0x2bc   : > { %v3165_v36 = vmax.f32 %v2617_v32, %v3127_v3  ;;  %v4234_v32 = vld [vmem:[#allocation5 + $0x2d4] sm:$0xf] }
 0x2bd   : > { %v2560_v59 = vpop.f32.mrf.mxu2 }
 0x2be   : > { %3203 = vst [vmem:[%s5280_s17 + $0x40] sm:$0xff] %v3165_v36  ;;  %v2561_v14 = vadd.f32 %v2560_v59, %v2503_v24  ;;  %v2447_v25 = vpop.f32.mrf.mxu0  ;;  %v3954_v36 = vor.u32 %v4234_v32, %v3951_v13 }
 0x2bf   : > { %v2618_v7 = vpop.f32.mrf.mxu3  ;;  %v2505_v31 = vpop.f32.mrf.mxu1  ;;  %v2448_v11 = vadd.f32 %v2447_v25, %v5202_v60 }
 0x2c0   : > { %v2619_v29 = vadd.f32 %v2618_v7, %v2561_v14  ;;  %2947 = vmatpush.bf16.msrb.mxu1 %v3954_v36  ;;  %v4071_v36 = vld [vmem:[#allocation5 + $0x3c8] sm:$0xf0] }
 0x2c1   : > { %2668 = vmatmul.bf16.gmra.mxu0 %v5713_v43  ;;  %v2506_v26 = vadd.f32 %v2505_v31, %v2448_v11 }
 0x2c2   : > { %v3129_v9 = vmul.f32 0.01, %v2619_v29  ;;  %2726 = vmatmul.bf16.gmra.mxu1 %v5714_v48  ;;  %2784 = vmatmul.bf16.gmra.mxu2 %v5715_v49 }
 0x2c4   : > { %2842 = vmatmul.bf16.gmra.mxu3 %v5716_v15  ;;  %v3167_v37 = vmax.f32 %v2619_v29, %v3129_v9  ;;  %v5717_v29 = vld [vmem:[#allocation23_spill] sm:$0xff] }
 0x2c5   : > { %v2563_v27 = vpop.f32.mrf.mxu2 }
 0x2c6   : > { %3205 = vst [vmem:[%s5280_s17 + $0x50] sm:$0xff] %v3167_v37  ;;  %v2564_v60 = vadd.f32 %v2563_v27, %v2506_v26  ;;  %v2449_v40 = vpop.f32.mrf.mxu0  ;;  %v4248_v37 = vld [vmem:[#allocation5 + $0x344] sm:$0xf]  ;;  %v4007_v26 = vld [vmem:[#allocation5 + $0x348] sm:$0xf0] }
 0x2c7   : > { %v2621_v34 = vpop.f32.mrf.mxu3  ;;  %v2507_v3 = vpop.f32.mrf.mxu1  ;;  %v2450_v59 = vadd.f32 %v2449_v40, %v5205_v30  ;;  %v5719_v30 = vld [vmem:[#allocation25_spill] sm:$0xff]  ;;  %v4264_v40 = vld [vmem:[#allocation5 + $0x3c4] sm:$0xf] }
 0x2c8   : > { %v2622_v24 = vadd.f32 %v2621_v34, %v2564_v60  ;;  %v4216_v60 = vld [vmem:[#allocation5 + $0x244] sm:$0xf]  ;;  %v3879_v34 = vld [vmem:[#allocation5 + $0x248] sm:$0xf0] }
 0x2c9   : > { %v2508_v25 = vadd.f32 %v2507_v3, %v2450_v59  ;;  %v3882_v3 = vor.u32 %v4216_v60, %v3879_v34  ;;  %v3943_v59 = vld [vmem:[#allocation5 + $0x2c8] sm:$0xf0]  ;;  %v4214_v60 = vld [vmem:[#allocation5 + $0x234] sm:$0xf]  ;;  %v3871_v34 = vld [vmem:[#allocation5 + $0x238] sm:$0xf0] }
 0x2ca   : > { %v3131_v14 = vmul.f32 0.01, %v2622_v24 }
 0x2cb   : > { %2890 = vmatpush.bf16.msrb.mxu0 %v3882_v3  ;;  %v3874_v3 = vor.u32 %v4214_v60, %v3871_v34 }
 0x2cc   : > { %v3169_v7 = vmax.f32 %v2622_v24, %v3131_v14  ;;  %v4232_v24 = vld [vmem:[#allocation5 + $0x2c4] sm:$0xf]  ;;  %v4074_v14 = vor.u32 %v4264_v40, %v4071_v36  ;;  %v4262_v40 = vld [vmem:[#allocation5 + $0x3b4] sm:$0xf]  ;;  %v4063_v36 = vld [vmem:[#allocation5 + $0x3b8] sm:$0xf0] }
 0x2cd   : > { %v2565_v55 = vpop.f32.mrf.mxu2 }
 0x2ce   : > { %3207 = vst [vmem:[%s5280_s17 + $0x60] sm:$0xff] %v3169_v7  ;;  %v2566_v41 = vadd.f32 %v2565_v55, %v2508_v25  ;;  %v2452_v10 = vpop.f32.mrf.mxu0  ;;  %v3946_v7 = vor.u32 %v4232_v24, %v3943_v59  ;;  %3064 = vmatpush.bf16.msrb.mxu3 %v4074_v14  ;;  %v4066_v24 = vor.u32 %v4262_v40, %v4063_v36 }
 0x2cf   : > { %v2623_v31 = vpop.f32.mrf.mxu3  ;;  %v2510_v54 = vpop.f32.mrf.mxu1  ;;  %v2453_v53 = vadd.f32 %v2452_v10, %v5212_v46  ;;  %v4010_v46 = vor.u32 %v4248_v37, %v4007_v26  ;;  %v4246_v26 = vld [vmem:[#allocation5 + $0x334] sm:$0xf]  ;;  %2891 = vmatpush.bf16.msrb.mxu0 %v3874_v3  ;;  %v3991_v3 = vld [vmem:[#allocation5 + $0x328] sm:$0xf0] }
 0x2d0   : > { %v2624_v57 = vadd.f32 %v2623_v31, %v2566_v41  ;;  %2948 = vmatpush.bf16.msrb.mxu1 %v3946_v7 }
 0x2d1   : > { %2673 = vmatmul.bf16.gmra.mxu0 %v5717_v29  ;;  %v2511_v51 = vadd.f32 %v2510_v54, %v2453_v53  ;;  %3006 = vmatpush.bf16.msrb.mxu2 %v4010_v46 }
 0x2d2   : > { %v3133_v11 = vmul.f32 0.01, %v2624_v57  ;;  %2731 = vmatmul.bf16.gmra.mxu1 %v5718_v8  ;;  %2789 = vmatmul.bf16.gmra.mxu2 %v5719_v30  ;;  %v5722_v30 = vld [vmem:[#allocation28_spill] sm:$0xff] }
 0x2d3   : > { %3065 = vmatpush.bf16.msrb.mxu3 %v4066_v24 }
 0x2d4   : > { %2847 = vmatmul.bf16.gmra.mxu3 %v5720_v12  ;;  %v3171_v43 = vmax.f32 %v2624_v57, %v3133_v11  ;;  %v5721_v11 = vld [vmem:[#allocation27_spill] sm:$0xff]  ;;  %v5723_v12 = vld [vmem:[#allocation29_spill] sm:$0xff] }
 0x2d5   : > { %v2568_v9 = vpop.f32.mrf.mxu2 }
 0x2d6   : > { %3209 = vst [vmem:[%s5280_s17 + $0x70] sm:$0xff] %v3171_v43  ;;  %v2569_v48 = vadd.f32 %v2568_v9, %v2511_v51  ;;  %v2454_v15 = vpop.f32.mrf.mxu0  ;;  %v5724_v43 = vld [vmem:[#allocation30_spill] sm:$0xff] }
 0x2d7   : > { %v2626_v49 = vpop.f32.mrf.mxu3  ;;  %v2512_v27 = vpop.f32.mrf.mxu1  ;;  %v2455_v13 = vadd.f32 %v2454_v15, %v5215_v4 }
 0x2d8   : > { %v2627_v32 = vadd.f32 %v2626_v49, %v2569_v48 }
 0x2d9   : > { %v2513_v41 = vadd.f32 %v2512_v27, %v2455_v13  ;;  %v3999_v27 = vld [vmem:[#allocation5 + $0x338] sm:$0xf0] }
 0x2da   : > { %v3135_v25 = vmul.f32 0.01, %v2627_v32 }
 0x2dc   : > { %v3173_v55 = vmax.f32 %v2627_v32, %v3135_v25 }
 0x2dd   : > { %v2570_v31 = vpop.f32.mrf.mxu2 }
 0x2de   : > { %3211 = vst [vmem:[%s5280_s17 + $0x80] sm:$0xff] %v3173_v55  ;;  %v2571_v10 = vadd.f32 %v2570_v31, %v2513_v41  ;;  %v2457_v57 = vpop.f32.mrf.mxu0 }
 0x2df   : > { %v2628_v54 = vpop.f32.mrf.mxu3  ;;  %v2515_v4 = vpop.f32.mrf.mxu1  ;;  %v2458_v29 = vadd.f32 %v2457_v57, %v5222_v1  ;;  %v4002_v1 = vor.u32 %v4246_v26, %v3999_v27 }
 0x2e0   : > { %v2629_v53 = vadd.f32 %v2628_v54, %v2571_v10  ;;  %v4230_v10 = vld [vmem:[#allocation5 + $0x2b4] sm:$0xf]  ;;  %v3935_v54 = vld [vmem:[#allocation5 + $0x2b8] sm:$0xf0] }
 0x2e1   : > { %2678 = vmatmul.bf16.gmra.mxu0 %v5721_v11  ;;  %v2516_v9 = vadd.f32 %v2515_v4, %v2458_v29  ;;  %3007 = vmatpush.bf16.msrb.mxu2 %v4002_v1  ;;  %v3938_v4 = vor.u32 %v4230_v10, %v3935_v54  ;;  %v5725_v29 = vld [vmem:[#allocation31_spill] sm:$0xff]  ;;  %v3927_v10 = vld [vmem:[#allocation5 + $0x2a8] sm:$0xf0] }
 0x2e2   : > { %v3137_v8 = vmul.f32 0.01, %v2629_v53  ;;  %2736 = vmatmul.bf16.gmra.mxu1 %v5722_v30  ;;  %2794 = vmatmul.bf16.gmra.mxu2 %v5723_v12  ;;  %v5727_v30 = vld [vmem:[#allocation33_spill] sm:$0xff]  ;;  %v5728_v12 = vld [vmem:[#allocation34_spill] sm:$0xff]  ;;  %v5729_v54 = vld [vmem:[#allocation35_spill] sm:$0xff] }
 0x2e3   : > { %2949 = vmatpush.bf16.msrb.mxu1 %v3938_v4 }
 0x2e4   : > { %2852 = vmatmul.bf16.gmra.mxu3 %v5724_v43  ;;  %v3175_v51 = vmax.f32 %v2629_v53, %v3137_v8  ;;  %v5726_v8 = vld [vmem:[#allocation32_spill] sm:$0xff] }
 0x2e5   : > { %v2573_v48 = vpop.f32.mrf.mxu2 }
 0x2e6   : > { %3213 = vst [vmem:[%s5280_s17 + $0x90] sm:$0xff] %v3175_v51  ;;  %v2574_v49 = vadd.f32 %v2573_v48, %v2516_v9  ;;  %v2459_v37 = vpop.f32.mrf.mxu0 }
 0x2e7   : > { %v2631_v15 = vpop.f32.mrf.mxu3  ;;  %v2517_v46 = vpop.f32.mrf.mxu1  ;;  %v2460_v13 = vadd.f32 %v2459_v37, %v5225_v61 }
 0x2e8   : > { %v2632_v32 = vadd.f32 %v2631_v15, %v2574_v49 }
 0x2e9   : > { %v2518_v7 = vadd.f32 %v2517_v46, %v2460_v13  ;;  %v4244_v13 = vld [vmem:[#allocation5 + $0x324] sm:$0xf] }
 0x2ea   : > { %v3139_v59 = vmul.f32 0.01, %v2632_v32  ;;  %v3994_v24 = vor.u32 %v4244_v13, %v3991_v3  ;;  %v4210_v13 = vld [vmem:[#allocation5 + $0x214] sm:$0xf]  ;;  %v3855_v3 = vld [vmem:[#allocation5 + $0x218] sm:$0xf0] }
 0x2ec   : > { %v3177_v14 = vmax.f32 %v2632_v32, %v3139_v59  ;;  %v4212_v59 = vld [vmem:[#allocation5 + $0x224] sm:$0xf]  ;;  %3008 = vmatpush.bf16.msrb.mxu2 %v3994_v24 }
 0x2ed   : > { %v2575_v25 = vpop.f32.mrf.mxu2 }
 0x2ee   : > { %3215 = vst [vmem:[%s5280_s17 + $0xa0] sm:$0xff] %v3177_v14  ;;  %v2576_v55 = vadd.f32 %v2575_v25, %v2518_v7  ;;  %v2462_v31 = vpop.f32.mrf.mxu0  ;;  %v3863_v14 = vld [vmem:[#allocation5 + $0x228] sm:$0xf0]  ;;  %v4260_v7 = vld [vmem:[#allocation5 + $0x3a4] sm:$0xf] }
 0x2ef   : > { %v2633_v41 = vpop.f32.mrf.mxu3  ;;  %v2520_v57 = vpop.f32.mrf.mxu1  ;;  %v2463_v53 = vadd.f32 %v2462_v31, %v5232_v17  ;;  %v4228_v31 = vld [vmem:[#allocation5 + $0x2a4] sm:$0xf] }
 0x2f0   : > { %v2634_v61 = vadd.f32 %v2633_v41, %v2576_v55  ;;  %v3866_v41 = vor.u32 %v4212_v59, %v3863_v14  ;;  %v3930_v4 = vor.u32 %v4228_v31, %v3927_v10  ;;  %v3858_v14 = vor.u32 %v4210_v13, %v3855_v3  ;;  %v5734_v10 = vld [vmem:[#allocation40_spill] sm:$0xff]  ;;  %v5739_v3 = vld [vmem:[#allocation45_spill] sm:$0xff] }
 0x2f1   : > { %2683 = vmatmul.bf16.gmra.mxu0 %v5725_v29  ;;  %v2521_v51 = vadd.f32 %v2520_v57, %v2463_v53  ;;  %v5730_v53 = vld [vmem:[#allocation36_spill] sm:$0xff]  ;;  %v5731_v29 = vld [vmem:[#allocation37_spill] sm:$0xff] }
 0x2f2   : > { %v3141_v11 = vmul.f32 0.01, %v2634_v61  ;;  %2741 = vmatmul.bf16.gmra.mxu1 %v5726_v8  ;;  %2799 = vmatmul.bf16.gmra.mxu2 %v5727_v30  ;;  %v5738_v13 = vld [vmem:[#allocation44_spill] sm:$0xff] }
 0x2f3   : > { %2892 = vmatpush.bf16.msrb.mxu0 %v3866_v41  ;;  %2950 = vmatpush.bf16.msrb.mxu1 %v3930_v4 }
 0x2f4   : > { %2857 = vmatmul.bf16.gmra.mxu3 %v5728_v12  ;;  %v3179_v43 = vmax.f32 %v2634_v61, %v3141_v11  ;;  %v5732_v11 = vld [vmem:[#allocation38_spill] sm:$0xff] }
 0x2f5   : > { %v2578_v9 = vpop.f32.mrf.mxu2 }
 0x2f6   : > { %3217 = vst [vmem:[%s5280_s17 + $0xb0] sm:$0xff] %v3179_v43  ;;  %v2579_v48 = vadd.f32 %v2578_v9, %v2521_v51  ;;  %v2464_v15 = vpop.f32.mrf.mxu0 }
 0x2f7   : > { %v2636_v49 = vpop.f32.mrf.mxu3  ;;  %v2522_v37 = vpop.f32.mrf.mxu1  ;;  %v2465_v26 = vadd.f32 %v2464_v15, %v5235_v47  ;;  %v4055_v47 = vld [vmem:[#allocation5 + $0x3a8] sm:$0xf0]  ;;  %2893 = vmatpush.bf16.msrb.mxu0 %v3858_v14  ;;  %v4224_v14 = vld [vmem:[#allocation5 + $0x284] sm:$0xf] }
 0x2f8   : > { %v2637_v17 = vadd.f32 %v2636_v49, %v2579_v48  ;;  %v4058_v57 = vor.u32 %v4260_v7, %v4055_v47  ;;  %v4226_v7 = vld [vmem:[#allocation5 + $0x294] sm:$0xf] }
 0x2f9   : > { %v2523_v1 = vadd.f32 %v2522_v37, %v2465_v26 }
 0x2fa   : > { %v3143_v27 = vmul.f32 0.01, %v2637_v17  ;;  %3066 = vmatpush.bf16.msrb.mxu3 %v4058_v57  ;;  %v5736_v57 = vld [vmem:[#allocation42_spill] sm:$0xff] }
 0x2fc   : > { %v3181_v46 = vmax.f32 %v2637_v17, %v3143_v27 }
 0x2fd   : > { %v2580_v60 = vpop.f32.mrf.mxu2 }
 0x2fe   : > { %3219 = vst [vmem:[%s5280_s17 + $0xc0] sm:$0xff] %v3181_v46  ;;  %v2581_v34 = vadd.f32 %v2580_v60, %v2523_v1  ;;  %v2467_v32 = vpop.f32.mrf.mxu0  ;;  %v4242_v60 = vld [vmem:[#allocation5 + $0x314] sm:$0xf] }
 0x2ff   : > { %v2638_v40 = vpop.f32.mrf.mxu3  ;;  %v2525_v36 = vpop.f32.mrf.mxu1  ;;  %v2468_v55 = vadd.f32 %v2467_v32, %v5242_v28 }
 0x300   : > { %v2639_v25 = vadd.f32 %v2638_v40, %v2581_v34  ;;  %v3983_v34 = vld [vmem:[#allocation5 + $0x318] sm:$0xf0] }
 0x301   : > { %2688 = vmatmul.bf16.gmra.mxu0 %v5729_v54  ;;  %v2526_v28 = vadd.f32 %v2525_v36, %v2468_v55  ;;  %v3986_v32 = vor.u32 %v4242_v60, %v3983_v34  ;;  %v4258_v36 = vld [vmem:[#allocation5 + $0x394] sm:$0xf]  ;;  %v5733_v55 = vld [vmem:[#allocation39_spill] sm:$0xff] }
 0x302   : > { %v3145_v61 = vmul.f32 0.01, %v2639_v25  ;;  %2746 = vmatmul.bf16.gmra.mxu1 %v5730_v53  ;;  %2804 = vmatmul.bf16.gmra.mxu2 %v5731_v29  ;;  %v5735_v54 = vld [vmem:[#allocation41_spill] sm:$0xff]  ;;  %v4208_v34 = vld [vmem:[#allocation5 + $0x204] sm:$0xf] }
 0x303   : > { %3009 = vmatpush.bf16.msrb.mxu2 %v3986_v32 }
 0x304   : > { %2862 = vmatmul.bf16.gmra.mxu3 %v5732_v11  ;;  %v3183_v8 = vmax.f32 %v2639_v25, %v3145_v61  ;;  %v3919_v25 = vld [vmem:[#allocation5 + $0x298] sm:$0xf0] }
 0x305   : > { %v2583_v30 = vpop.f32.mrf.mxu2  ;;  %v3922_v47 = vor.u32 %v4226_v7, %v3919_v25 }
 0x306   : > { %3221 = vst [vmem:[%s5280_s17 + $0xd0] sm:$0xff] %v3183_v8  ;;  %v2584_v12 = vadd.f32 %v2583_v30, %v2526_v28  ;;  %v2469_v51 = vpop.f32.mrf.mxu0 }
 0x307   : > { %v2641_v43 = vpop.f32.mrf.mxu3  ;;  %v2527_v9 = vpop.f32.mrf.mxu1  ;;  %v2470_v49 = vadd.f32 %v2469_v51, %v5245_v35  ;;  %v4047_v35 = vld [vmem:[#allocation5 + $0x398] sm:$0xf0]  ;;  %2951 = vmatpush.bf16.msrb.mxu1 %v3922_v47 }
 0x308   : > { %v2642_v48 = vadd.f32 %v2641_v43, %v2584_v12  ;;  %v4050_v41 = vor.u32 %v4258_v36, %v4047_v35  ;;  %v3911_v35 = vld [vmem:[#allocation5 + $0x288] sm:$0xf0] }
 0x309   : > { %v2528_v17 = vadd.f32 %v2527_v9, %v2470_v49 }
 0x30a   : > { %v3147_v15 = vmul.f32 0.01, %v2642_v48  ;;  %3067 = vmatpush.bf16.msrb.mxu3 %v4050_v41 }
 0x30c   : > { %v3185_v37 = vmax.f32 %v2642_v48, %v3147_v15 }
 0x30d   : > { %v2585_v26 = vpop.f32.mrf.mxu2 }
 0x30e   : > { %3223 = vst [vmem:[%s5280_s17 + $0xe0] sm:$0xff] %v3185_v37  ;;  %v2586_v27 = vadd.f32 %v2585_v26, %v2528_v17  ;;  %v2472_v1 = vpop.f32.mrf.mxu0 }
 0x30f   : > { %v2643_v46 = vpop.f32.mrf.mxu3  ;;  %v2530_v40 = vpop.f32.mrf.mxu1  ;;  %v2473_v59 = vadd.f32 %v2472_v1, %v5252_v50  ;;  %v5737_v1 = vld [vmem:[#allocation43_spill] sm:$0xff] }
 0x310   : > { %v2644_v24 = vadd.f32 %v2643_v46, %v2586_v27  ;;  %v4240_v27 = vld [vmem:[#allocation5 + $0x304] sm:$0xf]  ;;  %v3975_v46 = vld [vmem:[#allocation5 + $0x308] sm:$0xf0] }
 0x311   : > { %2693 = vmatmul.bf16.gmra.mxu0 %v5733_v55  ;;  %v2531_v50 = vadd.f32 %v2530_v40, %v2473_v59  ;;  %v3978_v60 = vor.u32 %v4240_v27, %v3975_v46  ;;  %v3847_v40 = vld [vmem:[#allocation5 + $0x208] sm:$0xf0]  ;;  %v5740_v59 = vld [vmem:[#allocation46_spill] sm:$0xff]  ;;  %v3914_v55 = vor.u32 %v4224_v14, %v3911_v35 }
 0x312   : > { %v3149_v31 = vmul.f32 0.01, %v2644_v24  ;;  %2751 = vmatmul.bf16.gmra.mxu1 %v5734_v10  ;;  %2809 = vmatmul.bf16.gmra.mxu2 %v5735_v54  ;;  %v3850_v36 = vor.u32 %v4208_v34, %v3847_v40 }
 0x313   : > { %3010 = vmatpush.bf16.msrb.mxu2 %v3978_v60  ;;  %2952 = vmatpush.bf16.msrb.mxu1 %v3914_v55 }
 0x314   : > { %2867 = vmatmul.bf16.gmra.mxu3 %v5736_v57  ;;  %v3187_v4 = vmax.f32 %v2644_v24, %v3149_v31  ;;  %v4039_v24 = vld [vmem:[#allocation5 + $0x388] sm:$0xf0]  ;;  %2894 = vmatpush.bf16.msrb.mxu0 %v3850_v36 }
 0x315   : > { %v2588_v61 = vpop.f32.mrf.mxu2 }
 0x316   : > { %3225 = vst [vmem:[%s5280_s17 + $0xf0] sm:$0xff] %v3187_v4  ;;  %v2589_v53 = vadd.f32 %v2588_v61, %v2531_v50  ;;  %v2474_v11 = vpop.f32.mrf.mxu0  ;;  %v4344_v50 = vld [vmem:[%s5548_s4] sm:$0x3] }
 0x317   : > { %v2646_v29 = vpop.f32.mrf.mxu3  ;;  %v2532_v8 = vpop.f32.mrf.mxu1  ;;  %v2475_v30 = vadd.f32 %v2474_v11, %v5255_v63  ;;  %v4256_v63 = vld [vmem:[#allocation5 + $0x384] sm:$0xf]  ;;  %v5364_v61 = vperm.slane %v4344_v50, 1 }
 0x318   : > { %v2647_v28 = vadd.f32 %v2646_v29, %v2589_v53  ;;  %v5748_v50 = vld [vmem:[#allocation59_spill] sm:$0xff] }
 0x319   : > { %v2533_v51 = vadd.f32 %v2532_v8, %v2475_v30 }
 0x31a   : > { %v3151_v12 = vmul.f32 0.01, %v2647_v28 }
 0x31c   : > { %v3189_v43 = vmax.f32 %v2647_v28, %v3151_v12 }
 0x31d   : > { %v2590_v9 = vpop.f32.mrf.mxu2 }
 0x31e   : > { %3227 = vst [vmem:[%s5280_s17 + $0x100] sm:$0xff] %v3189_v43  ;;  %v2591_v48 = vadd.f32 %v2590_v9, %v2533_v51  ;;  %v2477_v15 = vpop.f32.mrf.mxu0  ;;  %v5741_v43 = vld [vmem:[#allocation47_spill] sm:$0xff]  ;;  %v5742_v51 = vld [vmem:[#allocation49_spill] sm:$0xff] }
 0x31f   : > { %v2648_v49 = vpop.f32.mrf.mxu3  ;;  %v2535_v37 = vpop.f32.mrf.mxu1  ;;  %v2478_v26 = vadd.f32 %v2477_v15, %v5261_v2  ;;  %v4042_v2 = vor.u32 %v4256_v63, %v4039_v24  ;;  %v5743_v9 = vld [vmem:[#allocation51_spill] sm:$0xff] }
 0x320   : > { %v2649_v17 = vadd.f32 %v2648_v49, %v2591_v48  ;;  %v5744_v48 = vld [vmem:[#allocation53_spill] sm:$0xff] }
 0x321   : > { %2698 = vmatmul.bf16.gmra.mxu0 %v5737_v1  ;;  %v2536_v25 = vadd.f32 %v2535_v37, %v2478_v26  ;;  %3068 = vmatpush.bf16.msrb.mxu3 %v4042_v2 }
 0x322   : > { %v3153_v32 = vmul.f32 0.01, %v2649_v17  ;;  %2756 = vmatmul.bf16.gmra.mxu1 %v5738_v13  ;;  %2814 = vmatmul.bf16.gmra.mxu2 %v5739_v3 }
 0x324   : > { %2872 = vmatmul.bf16.gmra.mxu3 %v5740_v59  ;;  %v3191_v7 = vmax.f32 %v2649_v17, %v3153_v32 }
 0x325   : > { %v2593_v41 = vpop.f32.mrf.mxu2 }
 0x326   : > { %3229 = vst [vmem:[%s5280_s17 + $0x110] sm:$0xff] %v3191_v7  ;;  %v2594_v47 = vadd.f32 %v2593_v41, %v2536_v25  ;;  %v2479_v10 = vpop.f32.mrf.mxu0 }
 0x327   : > { %v2651_v31 = vpop.f32.mrf.mxu3  ;;  %v2537_v54 = vpop.f32.mrf.mxu1 }
 0x328   : > { %v2652_v57 = vadd.f32 %v2651_v31, %v2594_v47  ;;  %v5745_v54 = vld [vmem:[#allocation56_spill] sm:$0xff] }
 0x32a   : > { %v3155_v4 = vmul.f32 0.01, %v2652_v57 }
 0x32c   : > { %v3193_v53 = vmax.f32 %v2652_v57, %v3155_v4  ;;  %v5746_v57 = vld [vmem:[#allocation57_spill] sm:$0xff]  ;;  %v5747_v4 = vld [vmem:[#allocation58_spill] sm:$0xff] }
 0x32d   : > { %v2595_v29 = vpop.f32.mrf.mxu2 }
 0x32e   : > { %3231 = vst [vmem:[%s5280_s17 + $0x120] sm:$0xff] %v3193_v53  ;;  %v2664_v8 = vpop.f32.mrf.mxu0 }
 0x32f   : > { %v2653_v11 = vpop.f32.mrf.mxu3  ;;  %v2665_v28 = vadd.f32 %v2664_v8, %v5364_v61  ;;  %v2722_v30 = vpop.f32.mrf.mxu1 }
 0x331   : > { %v2723_v12 = vadd.f32 %v2722_v30, %v2665_v28  ;;  %2703 = vmatmul.bf16.gmra.mxu0 %v5741_v43 }
 0x332   : > { %2761 = vmatmul.bf16.gmra.mxu1 %v5742_v51  ;;  %2819 = vmatmul.bf16.gmra.mxu2 %v5743_v9 }
 0x334   : > { %2877 = vmatmul.bf16.gmra.mxu3 %v5744_v48 }
 0x335   : > { %v2780_v49 = vpop.f32.mrf.mxu2 }
 0x336   : > { %v2781_v15 = vadd.f32 %v2780_v49, %v2723_v12  ;;  %v2666_v17 = vpop.f32.mrf.mxu0 }
 0x337   : > { %v2838_v37 = vpop.f32.mrf.mxu3  ;;  %v2667_v26 = vadd.f32 %v2666_v17, %v5364_v61  ;;  %v2724_v27 = vpop.f32.mrf.mxu1 }
 0x338   : > { %v5373_v46 = vadd.f32 %v2838_v37, %v2781_v15 }
 0x339   : > { %v2725_v1 = vadd.f32 %v2724_v27, %v2667_v26  ;;  %v5749_v27 = vld [vmem:[#allocation60_spill] sm:$0xff] }
 0x33d   : > { %v2782_v60 = vpop.f32.mrf.mxu2 }
 0x33e   : > { %v2783_v34 = vadd.f32 %v2782_v60, %v2725_v1  ;;  %v2669_v63 = vpop.f32.mrf.mxu0 }
 0x33f   : > { %v2840_v40 = vpop.f32.mrf.mxu3  ;;  %v2670_v32 = vadd.f32 %v2669_v63, %v5364_v61  ;;  %v2727_v13 = vpop.f32.mrf.mxu1 }
 0x340   : > { %v5376_v3 = vadd.f32 %v2840_v40, %v2783_v34 }
 0x341   : > { %v2728_v36 = vadd.f32 %v2727_v13, %v2670_v32  ;;  %2708 = vmatmul.bf16.gmra.mxu0 %v5166_v16 }
 0x342   : > { %2766 = vmatmul.bf16.gmra.mxu1 %v5169_v56  ;;  %2824 = vmatmul.bf16.gmra.mxu2 %v5171_v62 }
 0x344   : > { %2882 = vmatmul.bf16.gmra.mxu3 %v5175_v20 }
 0x345   : > { %v2785_v24 = vpop.f32.mrf.mxu2 }
 0x346   : > { %v2786_v59 = vadd.f32 %v2785_v24, %v2728_v36  ;;  %v2671_v14 = vpop.f32.mrf.mxu0 }
 0x347   : > { %v2843_v2 = vpop.f32.mrf.mxu3  ;;  %v2672_v35 = vadd.f32 %v2671_v14, %v5364_v61  ;;  %v2729_v7 = vpop.f32.mrf.mxu1 }
 0x348   : > { %v5383_v25 = vadd.f32 %v2843_v2, %v2786_v59 }
 0x349   : > { %v2730_v55 = vadd.f32 %v2729_v7, %v2672_v35  ;;  %v5750_v7 = vld [vmem:[#allocation61_spill] sm:$0xff] }
 0x34d   : > { %v2787_v41 = vpop.f32.mrf.mxu2 }
 0x34e   : > { %v2788_v47 = vadd.f32 %v2787_v41, %v2730_v55  ;;  %v2674_v16 = vpop.f32.mrf.mxu0  ;;  %v5751_v55 = vld [vmem:[#allocation62_spill] sm:$0xff] }
 0x34f   : > { %v2845_v31 = vpop.f32.mrf.mxu3  ;;  %v2675_v56 = vadd.f32 %v2674_v16, %v5364_v61  ;;  %v2732_v10 = vpop.f32.mrf.mxu1 }
 0x350   : > { %v5386_v62 = vadd.f32 %v2845_v31, %v2788_v47 }
 0x351   : > { %v2733_v20 = vadd.f32 %v2732_v10, %v2675_v56  ;;  %2895 = vmatmul.bf16.vlgmr.msrb.gmra.mxu0 %v5745_v54 }
 0x352   : > { %2953 = vmatmul.bf16.vlgmr.msrb.gmra.mxu1 %v5746_v57  ;;  %3011 = vmatmul.bf16.vlgmr.msrb.gmra.mxu2 %v5747_v4 }
 0x354   : > { %3069 = vmatmul.bf16.vlgmr.msrb.gmra.mxu3 %v5748_v50 }
 0x355   : > { %v2790_v53 = vpop.f32.mrf.mxu2 }
 0x356   : > { %v2791_v29 = vadd.f32 %v2790_v53, %v2733_v20  ;;  %v2676_v8 = vpop.f32.mrf.mxu0 }
 0x357   : > { %v2848_v11 = vpop.f32.mrf.mxu3  ;;  %v2677_v28 = vadd.f32 %v2676_v8, %v5364_v61  ;;  %v2734_v30 = vpop.f32.mrf.mxu1  ;;  %v5752_v8 = vld [vmem:[#allocation63_spill] sm:$0xff] }
 0x358   : > { %v5393_v12 = vadd.f32 %v2848_v11, %v2791_v29 }
 0x359   : > { %v2735_v43 = vadd.f32 %v2734_v30, %v2677_v28  ;;  %v5753_v28 = vld [vmem:[#allocation64_spill] sm:$0xff]  ;;  %v5754_v30 = vld [vmem:[#allocation65_spill] sm:$0xff] }
 0x35d   : > { %v2792_v51 = vpop.f32.mrf.mxu2 }
 0x35e   : > { %v2793_v9 = vadd.f32 %v2792_v51, %v2735_v43  ;;  %v2679_v49 = vpop.f32.mrf.mxu0  ;;  %v5755_v43 = vld [vmem:[#allocation66_spill] sm:$0xff] }
 0x35f   : > { %v2850_v48 = vpop.f32.mrf.mxu3  ;;  %v2680_v15 = vadd.f32 %v2679_v49, %v5364_v61  ;;  %v2737_v37 = vpop.f32.mrf.mxu1 }
 0x360   : > { %v5396_v17 = vadd.f32 %v2850_v48, %v2793_v9 }
 0x361   : > { %v2738_v26 = vadd.f32 %v2737_v37, %v2680_v15  ;;  %2900 = vmatmul.bf16.gmra.mxu0 %v4983_v6 }
 0x362   : > { %2958 = vmatmul.bf16.gmra.mxu1 %v4986_v39  ;;  %3016 = vmatmul.bf16.gmra.mxu2 %v4995_v45 }
 0x364   : > { %3074 = vmatmul.bf16.gmra.mxu3 %v5749_v27 }
 0x365   : > { %v2795_v1 = vpop.f32.mrf.mxu2 }
 0x366   : > { %v2796_v60 = vadd.f32 %v2795_v1, %v2738_v26  ;;  %v2681_v40 = vpop.f32.mrf.mxu0 }
 0x367   : > { %v2853_v34 = vpop.f32.mrf.mxu3  ;;  %v2682_v63 = vadd.f32 %v2681_v40, %v5364_v61  ;;  %v2739_v32 = vpop.f32.mrf.mxu1 }
 0x368   : > { %v5403_v13 = vadd.f32 %v2853_v34, %v2796_v60 }
 0x369   : > { %v2740_v36 = vadd.f32 %v2739_v32, %v2682_v63 }
 0x36d   : > { %v2797_v24 = vpop.f32.mrf.mxu2 }
 0x36e   : > { %v2798_v59 = vadd.f32 %v2797_v24, %v2740_v36  ;;  %v2684_v6 = vpop.f32.mrf.mxu0 }
 0x36f   : > { %v2855_v2 = vpop.f32.mrf.mxu3  ;;  %v2685_v39 = vadd.f32 %v2684_v6, %v5364_v61  ;;  %v2742_v14 = vpop.f32.mrf.mxu1 }
 0x370   : > { %v5406_v45 = vadd.f32 %v2855_v2, %v2798_v59  ;;  %v5756_v59 = vld [vmem:[#allocation67_spill] sm:$0xff] }
 0x371   : > { %v2743_v35 = vadd.f32 %v2742_v14, %v2685_v39  ;;  %2905 = vmatmul.bf16.gmra.mxu0 %v5003_v44 }
 0x372   : > { %2963 = vmatmul.bf16.gmra.mxu1 %v5006_v33  ;;  %3021 = vmatmul.bf16.gmra.mxu2 %v5750_v7 }
 0x374   : > { %3079 = vmatmul.bf16.gmra.mxu3 %v5751_v55 }
 0x375   : > { %v2800_v41 = vpop.f32.mrf.mxu2 }
 0x376   : > { %v2801_v47 = vadd.f32 %v2800_v41, %v2743_v35  ;;  %v2686_v16 = vpop.f32.mrf.mxu0 }
 0x377   : > { %v2858_v31 = vpop.f32.mrf.mxu3  ;;  %v2687_v56 = vadd.f32 %v2686_v16, %v5364_v61  ;;  %v2744_v10 = vpop.f32.mrf.mxu1 }
 0x378   : > { %v5413_v20 = vadd.f32 %v2858_v31, %v2801_v47 }
 0x379   : > { %v2745_v54 = vadd.f32 %v2744_v10, %v2687_v56 }
 0x37d   : > { %v2802_v57 = vpop.f32.mrf.mxu2 }
 0x37e   : > { %v2803_v4 = vadd.f32 %v2802_v57, %v2745_v54  ;;  %v2689_v44 = vpop.f32.mrf.mxu0  ;;  %v5757_v54 = vld [vmem:[#allocation68_spill] sm:$0xff]  ;;  %v5758_v57 = vld [vmem:[#allocation69_spill] sm:$0xff] }
 0x37f   : > { %v2860_v50 = vpop.f32.mrf.mxu3  ;;  %v2690_v33 = vadd.f32 %v2689_v44, %v5364_v61  ;;  %v2747_v53 = vpop.f32.mrf.mxu1 }
 0x380   : > { %v5416_v29 = vadd.f32 %v2860_v50, %v2803_v4  ;;  %v5759_v4 = vld [vmem:[#allocation70_spill] sm:$0xff]  ;;  %v5760_v50 = vld [vmem:[#allocation71_spill] sm:$0xff] }
 0x381   : > { %v2748_v11 = vadd.f32 %v2747_v53, %v2690_v33  ;;  %2910 = vmatmul.bf16.gmra.mxu0 %v5752_v8 }
 0x382   : > { %2968 = vmatmul.bf16.gmra.mxu1 %v5753_v28  ;;  %3026 = vmatmul.bf16.gmra.mxu2 %v5754_v30 }
 0x384   : > { %3084 = vmatmul.bf16.gmra.mxu3 %v5755_v43 }
 0x385   : > { %v2805_v51 = vpop.f32.mrf.mxu2 }
 0x386   : > { %v2806_v9 = vadd.f32 %v2805_v51, %v2748_v11  ;;  %v2691_v49 = vpop.f32.mrf.mxu0 }
 0x387   : > { %v2863_v48 = vpop.f32.mrf.mxu3  ;;  %v2692_v15 = vadd.f32 %v2691_v49, %v5364_v61  ;;  %v2749_v37 = vpop.f32.mrf.mxu1 }
 0x388   : > { %v5423_v26 = vadd.f32 %v2863_v48, %v2806_v9 }
 0x389   : > { %v2750_v27 = vadd.f32 %v2749_v37, %v2692_v15 }
 0x38d   : > { %v2807_v1 = vpop.f32.mrf.mxu2 }
 0x38e   : > { %v2808_v60 = vadd.f32 %v2807_v1, %v2750_v27  ;;  %v2694_v40 = vpop.f32.mrf.mxu0 }
 0x38f   : > { %v2865_v34 = vpop.f32.mrf.mxu3  ;;  %v2695_v63 = vadd.f32 %v2694_v40, %v5364_v61  ;;  %v2752_v32 = vpop.f32.mrf.mxu1 }
 0x390   : > { %v5426_v36 = vadd.f32 %v2865_v34, %v2808_v60 }
 0x391   : > { %v2753_v24 = vadd.f32 %v2752_v32, %v2695_v63  ;;  %2915 = vmatmul.bf16.gmra.mxu0 %v5043_v42 }
 0x392   : > { %2973 = vmatmul.bf16.gmra.mxu1 %v5046_v23  ;;  %3031 = vmatmul.bf16.gmra.mxu2 %v5055_v38 }
 0x394   : > { %3089 = vmatmul.bf16.gmra.mxu3 %v5756_v59 }
 0x395   : > { %v2810_v2 = vpop.f32.mrf.mxu2 }
 0x396   : > { %v2811_v6 = vadd.f32 %v2810_v2, %v2753_v24  ;;  %v2696_v14 = vpop.f32.mrf.mxu0 }
 0x397   : > { %v2868_v39 = vpop.f32.mrf.mxu3  ;;  %v2697_v35 = vadd.f32 %v2696_v14, %v5364_v61  ;;  %v2754_v7 = vpop.f32.mrf.mxu1 }
 0x398   : > { %v5433_v55 = vadd.f32 %v2868_v39, %v2811_v6 }
 0x399   : > { %v2755_v41 = vadd.f32 %v2754_v7, %v2697_v35  ;;  %v5761_v7 = vld [vmem:[#allocation72_spill] sm:$0xff] }
 0x39d   : > { %v2812_v47 = vpop.f32.mrf.mxu2 }
 0x39e   : > { %v2813_v31 = vadd.f32 %v2812_v47, %v2755_v41  ;;  %v2699_v42 = vpop.f32.mrf.mxu0  ;;  %v5762_v41 = vld [vmem:[#allocation73_spill] sm:$0xff]  ;;  %v5763_v47 = vld [vmem:[#allocation74_spill] sm:$0xff] }
 0x39f   : > { %v2870_v16 = vpop.f32.mrf.mxu3  ;;  %v2700_v23 = vadd.f32 %v2699_v42, %v5364_v61  ;;  %v2757_v56 = vpop.f32.mrf.mxu1 }
 0x3a0   : > { %v5436_v38 = vadd.f32 %v2870_v16, %v2813_v31  ;;  %v5764_v31 = vld [vmem:[#allocation75_spill] sm:$0xff] }
 0x3a1   : > { %v2758_v10 = vadd.f32 %v2757_v56, %v2700_v23  ;;  %2920 = vmatmul.bf16.gmra.mxu0 %v5757_v54 }
 0x3a2   : > { %2978 = vmatmul.bf16.gmra.mxu1 %v5758_v57  ;;  %3036 = vmatmul.bf16.gmra.mxu2 %v5759_v4 }
 0x3a4   : > { %3094 = vmatmul.bf16.gmra.mxu3 %v5760_v50 }
 0x3a5   : > { %v2815_v44 = vpop.f32.mrf.mxu2 }
 0x3a6   : > { %v2816_v33 = vadd.f32 %v2815_v44, %v2758_v10  ;;  %v2701_v11 = vpop.f32.mrf.mxu0 }
 0x3a7   : > { %v2873_v53 = vpop.f32.mrf.mxu3  ;;  %v2702_v8 = vadd.f32 %v2701_v11, %v5364_v61  ;;  %v2759_v28 = vpop.f32.mrf.mxu1  ;;  %v5767_v11 = vld [vmem:[#allocation78_spill] sm:$0xff] }
 0x3a8   : > { %v5443_v30 = vadd.f32 %v2873_v53, %v2816_v33  ;;  %v5765_v33 = vld [vmem:[#allocation76_spill] sm:$0xff]  ;;  %v5766_v53 = vld [vmem:[#allocation77_spill] sm:$0xff] }
 0x3a9   : > { %v2760_v43 = vadd.f32 %v2759_v28, %v2702_v8  ;;  %v5768_v8 = vld [vmem:[#allocation79_spill] sm:$0xff] }
 0x3ad   : > { %v2817_v51 = vpop.f32.mrf.mxu2 }
 0x3ae   : > { %v2818_v9 = vadd.f32 %v2817_v51, %v2760_v43  ;;  %v2704_v49 = vpop.f32.mrf.mxu0 }
 0x3af   : > { %v2875_v48 = vpop.f32.mrf.mxu3  ;;  %v2705_v15 = vadd.f32 %v2704_v49, %v5364_v61  ;;  %v2762_v37 = vpop.f32.mrf.mxu1 }
 0x3b0   : > { %v5446_v27 = vadd.f32 %v2875_v48, %v2818_v9 }
 0x3b1   : > { %v2763_v1 = vadd.f32 %v2762_v37, %v2705_v15  ;;  %2925 = vmatmul.bf16.gmra.mxu0 %v5083_v18 }
 0x3b2   : > { %2983 = vmatmul.bf16.gmra.mxu1 %v5086_v0  ;;  %3041 = vmatmul.bf16.gmra.mxu2 %v5095_v5 }
 0x3b4   : > { %3099 = vmatmul.bf16.gmra.mxu3 %v5097_v19 }
 0x3b5   : > { %v2820_v60 = vpop.f32.mrf.mxu2 }
 0x3b6   : > { %v2821_v34 = vadd.f32 %v2820_v60, %v2763_v1  ;;  %v2706_v63 = vpop.f32.mrf.mxu0 }
 0x3b7   : > { %v2878_v40 = vpop.f32.mrf.mxu3  ;;  %v2707_v32 = vadd.f32 %v2706_v63, %v5364_v61  ;;  %v2764_v24 = vpop.f32.mrf.mxu1 }
 0x3b8   : > { %v5453_v59 = vadd.f32 %v2878_v40, %v2821_v34 }
 0x3b9   : > { %v2765_v2 = vadd.f32 %v2764_v24, %v2707_v32 }
 0x3bd   : > { %v2822_v6 = vpop.f32.mrf.mxu2 }
 0x3be   : > { %v2823_v39 = vadd.f32 %v2822_v6, %v2765_v2  ;;  %v2709_v18 = vpop.f32.mrf.mxu0 }
 0x3bf   : > { %v2880_v14 = vpop.f32.mrf.mxu3  ;;  %v2710_v0 = vadd.f32 %v2709_v18, %v5364_v61  ;;  %v2767_v35 = vpop.f32.mrf.mxu1 }
 0x3c0   : > { %v5456_v5 = vadd.f32 %v2880_v14, %v2823_v39 }
 0x3c1   : > { %v2768_v19 = vadd.f32 %v2767_v35, %v2710_v0  ;;  %2930 = vmatmul.bf16.gmra.mxu0 %v5761_v7 }
 0x3c2   : > { %2988 = vmatmul.bf16.gmra.mxu1 %v5762_v41  ;;  %3046 = vmatmul.bf16.gmra.mxu2 %v5763_v47 }
 0x3c4   : > { %3104 = vmatmul.bf16.gmra.mxu3 %v5764_v31 }
 0x3c5   : > { %v2825_v16 = vpop.f32.mrf.mxu2 }
 0x3c6   : > { %v2826_v42 = vadd.f32 %v2825_v16, %v2768_v19  ;;  %v2711_v56 = vpop.f32.mrf.mxu0 }
 0x3c7   : > { %v2883_v23 = vpop.f32.mrf.mxu3  ;;  %v2769_v10 = vpop.f32.mrf.mxu1 }
 0x3c8   : > { %v5462_v54 = vadd.f32 %v2883_v23, %v2826_v42 }
 0x3cd   : > { %v2827_v61 = vpop.f32.mrf.mxu2 }
 0x3ce   : > { %v2896_v4 = vpop.f32.mrf.mxu0 }
 0x3cf   : > { %v2885_v57 = vpop.f32.mrf.mxu3  ;;  %v2954_v50 = vpop.f32.mrf.mxu1  ;;  %v2897_v44 = vadd.f32 %v2896_v4, %v5373_v46 }
 0x3d1   : > { %2935 = vmatmul.bf16.gmra.mxu0 %v5765_v33  ;;  %v2955_v28 = vadd.f32 %v2954_v50, %v2897_v44 }
 0x3d2   : > { %2993 = vmatmul.bf16.gmra.mxu1 %v5766_v53  ;;  %3051 = vmatmul.bf16.gmra.mxu2 %v5767_v11 }
 0x3d4   : > { %3109 = vmatmul.bf16.gmra.mxu3 %v5768_v8 }
 0x3d5   : > { %v3012_v43 = vpop.f32.mrf.mxu2 }
 0x3d6   : > { %v3013_v51 = vadd.f32 %v3012_v43, %v2955_v28  ;;  %v2898_v48 = vpop.f32.mrf.mxu0 }
 0x3d7   : > { %v3070_v9 = vpop.f32.mrf.mxu3  ;;  %v2956_v49 = vpop.f32.mrf.mxu1  ;;  %v2899_v37 = vadd.f32 %v2898_v48, %v5376_v3 }
 0x3d8   : > { %v3071_v15 = vadd.f32 %v3070_v9, %v3013_v51 }
 0x3d9   : > { %v2957_v60 = vadd.f32 %v2956_v49, %v2899_v37 }
 0x3da   : > { %v3120_v1 = vmul.f32 0.01, %v3071_v15 }
 0x3dc   : > { %v3158_v46 = vmax.f32 %v3071_v15, %v3120_v1 }
 0x3dd   : > { %v3014_v34 = vpop.f32.mrf.mxu2 }
 0x3de   : > { %3196 = vst [vmem:[%s5280_s17 + $0x8] sm:$0xff] %v3158_v46  ;;  %v3015_v40 = vadd.f32 %v3014_v34, %v2957_v60  ;;  %v2901_v32 = vpop.f32.mrf.mxu0 }
 0x3df   : > { %v3072_v63 = vpop.f32.mrf.mxu3  ;;  %v2959_v24 = vpop.f32.mrf.mxu1  ;;  %v2902_v6 = vadd.f32 %v2901_v32, %v5383_v25 }
 0x3e0   : > { %v3073_v2 = vadd.f32 %v3072_v63, %v3015_v40 }
 0x3e1   : > { %2940 = vmatmul.bf16.gmra.mxu0 %v5283_v58  ;;  %v2960_v14 = vadd.f32 %v2959_v24, %v2902_v6 }
 0x3e2   : > { %v3122_v39 = vmul.f32 0.01, %v3073_v2  ;;  %2998 = vmatmul.bf16.gmra.mxu1 %v5285_v21  ;;  %3056 = vmatmul.bf16.gmra.mxu2 %v5287_v22 }
 0x3e4   : > { %3114 = vmatmul.bf16.gmra.mxu3 %v5290_v52  ;;  %v3160_v3 = vmax.f32 %v3073_v2, %v3122_v39 }
 0x3e5   : > { %v3017_v18 = vpop.f32.mrf.mxu2 }
 0x3e6   : > { %3198 = vst [vmem:[%s5280_s17 + $0x18] sm:$0xff] %v3160_v3  ;;  %v3018_v0 = vadd.f32 %v3017_v18, %v2960_v14  ;;  %v2903_v19 = vpop.f32.mrf.mxu0 }
 0x3e7   : > { %v3075_v35 = vpop.f32.mrf.mxu3  ;;  %v2961_v7 = vpop.f32.mrf.mxu1  ;;  %v2904_v25 = vadd.f32 %v2903_v19, %v5386_v62 }
 0x3e8   : > { %v3076_v41 = vadd.f32 %v3075_v35, %v3018_v0 }
 0x3e9   : > { %v2962_v21 = vadd.f32 %v2961_v7, %v2904_v25 }
 0x3ea   : > { %v3124_v58 = vmul.f32 0.01, %v3076_v41 }
 0x3ec   : > { %v3162_v47 = vmax.f32 %v3076_v41, %v3124_v58 }
 0x3ed   : > { %v3019_v31 = vpop.f32.mrf.mxu2 }
 0x3ee   : > { %3200 = vst [vmem:[%s5280_s17 + $0x28] sm:$0xff] %v3162_v47  ;;  %v3020_v22 = vadd.f32 %v3019_v31, %v2962_v21  ;;  %v2906_v52 = vpop.f32.mrf.mxu0 }
 0x3ef   : > { %v3077_v16 = vpop.f32.mrf.mxu3  ;;  %v2964_v42 = vpop.f32.mrf.mxu1  ;;  %v2907_v56 = vadd.f32 %v2906_v52, %v5393_v12 }
 0x3f0   : > { %v3078_v23 = vadd.f32 %v3077_v16, %v3020_v22 }
 0x3f1   : > { %v2965_v57 = vadd.f32 %v2964_v42, %v2907_v56 }
 0x3f2   : > { %v3126_v10 = vmul.f32 0.01, %v3078_v23 }
 0x3f4   : > { %v3164_v61 = vmax.f32 %v3078_v23, %v3126_v10 }
 0x3f5   : > { %v3022_v4 = vpop.f32.mrf.mxu2 }
 0x3f6   : > { %3202 = vst [vmem:[%s5280_s17 + $0x38] sm:$0xff] %v3164_v61  ;;  %v3023_v62 = vadd.f32 %v3022_v4, %v2965_v57  ;;  %v2908_v44 = vpop.f32.mrf.mxu0 }
 0x3f7   : > { %v3080_v50 = vpop.f32.mrf.mxu3  ;;  %v2966_v33 = vpop.f32.mrf.mxu1  ;;  %v2909_v11 = vadd.f32 %v2908_v44, %v5396_v17 }
 0x3f8   : > { %v3081_v53 = vadd.f32 %v3080_v50, %v3023_v62 }
 0x3f9   : > { %v2967_v43 = vadd.f32 %v2966_v33, %v2909_v11 }
 0x3fa   : > { %v3128_v8 = vmul.f32 0.01, %v3081_v53 }
 0x3fc   : > { %v3166_v28 = vmax.f32 %v3081_v53, %v3128_v8 }
 0x3fd   : > { %v3024_v51 = vpop.f32.mrf.mxu2 }
 0x3fe   : > { %3204 = vst [vmem:[%s5280_s17 + $0x48] sm:$0xff] %v3166_v28  ;;  %v3025_v12 = vadd.f32 %v3024_v51, %v2967_v43  ;;  %v2911_v48 = vpop.f32.mrf.mxu0 }
 0x3ff   : > { %v3082_v9 = vpop.f32.mrf.mxu3  ;;  %v2969_v49 = vpop.f32.mrf.mxu1  ;;  %v2912_v37 = vadd.f32 %v2911_v48, %v5403_v13 }
 0x400   : > { %v3083_v15 = vadd.f32 %v3082_v9, %v3025_v12 }
 0x401   : > { %v2970_v60 = vadd.f32 %v2969_v49, %v2912_v37 }
 0x402   : > { %v3130_v1 = vmul.f32 0.01, %v3083_v15 }
 0x404   : > { %v3168_v46 = vmax.f32 %v3083_v15, %v3130_v1 }
 0x405   : > { %v3027_v34 = vpop.f32.mrf.mxu2 }
 0x406   : > { %3206 = vst [vmem:[%s5280_s17 + $0x58] sm:$0xff] %v3168_v46  ;;  %v3028_v17 = vadd.f32 %v3027_v34, %v2970_v60  ;;  %v2913_v63 = vpop.f32.mrf.mxu0 }
 0x407   : > { %v3085_v40 = vpop.f32.mrf.mxu3  ;;  %v2971_v32 = vpop.f32.mrf.mxu1  ;;  %v2914_v2 = vadd.f32 %v2913_v63, %v5406_v45 }
 0x408   : > { %v3086_v24 = vadd.f32 %v3085_v40, %v3028_v17 }
 0x409   : > { %v2972_v3 = vadd.f32 %v2971_v32, %v2914_v2 }
 0x40a   : > { %v3132_v6 = vmul.f32 0.01, %v3086_v24 }
 0x40c   : > { %v3170_v39 = vmax.f32 %v3086_v24, %v3132_v6 }
 0x40d   : > { %v3029_v14 = vpop.f32.mrf.mxu2 }
 0x40e   : > { %3208 = vst [vmem:[%s5280_s17 + $0x68] sm:$0xff] %v3170_v39  ;;  %v3030_v13 = vadd.f32 %v3029_v14, %v2972_v3  ;;  %v2916_v0 = vpop.f32.mrf.mxu0 }
 0x40f   : > { %v3087_v18 = vpop.f32.mrf.mxu3  ;;  %v2974_v35 = vpop.f32.mrf.mxu1  ;;  %v2917_v7 = vadd.f32 %v2916_v0, %v5413_v20 }
 0x410   : > { %v3088_v19 = vadd.f32 %v3087_v18, %v3030_v13 }
 0x411   : > { %v2975_v58 = vadd.f32 %v2974_v35, %v2917_v7 }
 0x412   : > { %v3134_v41 = vmul.f32 0.01, %v3088_v19 }
 0x414   : > { %v3172_v25 = vmax.f32 %v3088_v19, %v3134_v41 }
 0x415   : > { %v3032_v47 = vpop.f32.mrf.mxu2 }
 0x416   : > { %3210 = vst [vmem:[%s5280_s17 + $0x78] sm:$0xff] %v3172_v25  ;;  %v3033_v45 = vadd.f32 %v3032_v47, %v2975_v58  ;;  %v2918_v31 = vpop.f32.mrf.mxu0 }
 0x417   : > { %v3090_v21 = vpop.f32.mrf.mxu3  ;;  %v2976_v22 = vpop.f32.mrf.mxu1  ;;  %v2919_v52 = vadd.f32 %v2918_v31, %v5416_v29 }
 0x418   : > { %v3091_v16 = vadd.f32 %v3090_v21, %v3033_v45 }
 0x419   : > { %v2977_v56 = vadd.f32 %v2976_v22, %v2919_v52 }
 0x41a   : > { %v3136_v42 = vmul.f32 0.01, %v3091_v16 }
 0x41c   : > { %v3174_v23 = vmax.f32 %v3091_v16, %v3136_v42 }
 0x41d   : > { %v3034_v10 = vpop.f32.mrf.mxu2 }
 0x41e   : > { %3212 = vst [vmem:[%s5280_s17 + $0x88] sm:$0xff] %v3174_v23  ;;  %v3035_v20 = vadd.f32 %v3034_v10, %v2977_v56  ;;  %v2921_v57 = vpop.f32.mrf.mxu0 }
 0x41f   : > { %v3092_v61 = vpop.f32.mrf.mxu3  ;;  %v2979_v4 = vpop.f32.mrf.mxu1  ;;  %v2922_v50 = vadd.f32 %v2921_v57, %v5423_v26 }
 0x420   : > { %v3093_v62 = vadd.f32 %v3092_v61, %v3035_v20 }
 0x421   : > { %v2980_v53 = vadd.f32 %v2979_v4, %v2922_v50 }
 0x422   : > { %v3138_v44 = vmul.f32 0.01, %v3093_v62 }
 0x424   : > { %v3176_v33 = vmax.f32 %v3093_v62, %v3138_v44 }
 0x425   : > { %v3037_v11 = vpop.f32.mrf.mxu2 }
 0x426   : > { %3214 = vst [vmem:[%s5280_s17 + $0x98] sm:$0xff] %v3176_v33  ;;  %v3038_v29 = vadd.f32 %v3037_v11, %v2980_v53  ;;  %v2923_v28 = vpop.f32.mrf.mxu0 }
 0x427   : > { %v3095_v8 = vpop.f32.mrf.mxu3  ;;  %v2981_v43 = vpop.f32.mrf.mxu1  ;;  %v2924_v12 = vadd.f32 %v2923_v28, %v5426_v36 }
 0x428   : > { %v3096_v51 = vadd.f32 %v3095_v8, %v3038_v29 }
 0x429   : > { %v2982_v49 = vadd.f32 %v2981_v43, %v2924_v12 }
 0x42a   : > { %v3140_v9 = vmul.f32 0.01, %v3096_v51 }
 0x42c   : > { %v3178_v48 = vmax.f32 %v3096_v51, %v3140_v9 }
 0x42d   : > { %v3039_v15 = vpop.f32.mrf.mxu2 }
 0x42e   : > { %3216 = vst [vmem:[%s5280_s17 + $0xa8] sm:$0xff] %v3178_v48  ;;  %v3040_v26 = vadd.f32 %v3039_v15, %v2982_v49  ;;  %v2926_v1 = vpop.f32.mrf.mxu0 }
 0x42f   : > { %v3097_v37 = vpop.f32.mrf.mxu3  ;;  %v2984_v46 = vpop.f32.mrf.mxu1  ;;  %v2927_v34 = vadd.f32 %v2926_v1, %v5433_v55 }
 0x430   : > { %v3098_v60 = vadd.f32 %v3097_v37, %v3040_v26 }
 0x431   : > { %v2985_v63 = vadd.f32 %v2984_v46, %v2927_v34 }
 0x432   : > { %v3142_v17 = vmul.f32 0.01, %v3098_v60 }
 0x434   : > { %v3180_v40 = vmax.f32 %v3098_v60, %v3142_v17 }
 0x435   : > { %v3042_v32 = vpop.f32.mrf.mxu2 }
 0x436   : > { %3218 = vst [vmem:[%s5280_s17 + $0xb8] sm:$0xff] %v3180_v40  ;;  %v3043_v36 = vadd.f32 %v3042_v32, %v2985_v63  ;;  %v2928_v2 = vpop.f32.mrf.mxu0 }
 0x437   : > { %v3100_v24 = vpop.f32.mrf.mxu3  ;;  %v2986_v6 = vpop.f32.mrf.mxu1  ;;  %v2929_v3 = vadd.f32 %v2928_v2, %v5436_v38 }
 0x438   : > { %v3101_v39 = vadd.f32 %v3100_v24, %v3043_v36 }
 0x439   : > { %v2987_v18 = vadd.f32 %v2986_v6, %v2929_v3 }
 0x43a   : > { %v3144_v14 = vmul.f32 0.01, %v3101_v39 }
 0x43c   : > { %v3182_v13 = vmax.f32 %v3101_v39, %v3144_v14 }
 0x43d   : > { %v3044_v0 = vpop.f32.mrf.mxu2 }
 0x43e   : > { %3220 = vst [vmem:[%s5280_s17 + $0xc8] sm:$0xff] %v3182_v13  ;;  %v3045_v55 = vadd.f32 %v3044_v0, %v2987_v18  ;;  %v2931_v19 = vpop.f32.mrf.mxu0 }
 0x43f   : > { %v3102_v35 = vpop.f32.mrf.mxu3  ;;  %v2989_v7 = vpop.f32.mrf.mxu1  ;;  %v2932_v25 = vadd.f32 %v2931_v19, %v5443_v30 }
 0x440   : > { %v3103_v41 = vadd.f32 %v3102_v35, %v3045_v55 }
 0x441   : > { %v2990_v45 = vadd.f32 %v2989_v7, %v2932_v25 }
 0x442   : > { %v3146_v58 = vmul.f32 0.01, %v3103_v41 }
 0x444   : > { %v3184_v47 = vmax.f32 %v3103_v41, %v3146_v58 }
 0x445   : > { %v3047_v21 = vpop.f32.mrf.mxu2 }
 0x446   : > { %3222 = vst [vmem:[%s5280_s17 + $0xd8] sm:$0xff] %v3184_v47  ;;  %v3048_v38 = vadd.f32 %v3047_v21, %v2990_v45  ;;  %v2933_v22 = vpop.f32.mrf.mxu0 }
 0x447   : > { %v3105_v31 = vpop.f32.mrf.mxu3  ;;  %v2991_v16 = vpop.f32.mrf.mxu1  ;;  %v2934_v42 = vadd.f32 %v2933_v22, %v5446_v27 }
 0x448   : > { %v3106_v52 = vadd.f32 %v3105_v31, %v3048_v38 }
 0x449   : > { %v2992_v10 = vadd.f32 %v2991_v16, %v2934_v42 }
 0x44a   : > { %v3148_v23 = vmul.f32 0.01, %v3106_v52 }
 0x44c   : > { %v3186_v56 = vmax.f32 %v3106_v52, %v3148_v23 }
 0x44d   : > { %v3049_v20 = vpop.f32.mrf.mxu2 }
 0x44e   : > { %3224 = vst [vmem:[%s5280_s17 + $0xe8] sm:$0xff] %v3186_v56  ;;  %v3050_v30 = vadd.f32 %v3049_v20, %v2992_v10  ;;  %v2936_v57 = vpop.f32.mrf.mxu0 }
 0x44f   : > { %v3107_v61 = vpop.f32.mrf.mxu3  ;;  %v2994_v4 = vpop.f32.mrf.mxu1  ;;  %v2937_v50 = vadd.f32 %v2936_v57, %v5453_v59 }
 0x450   : > { %v3108_v62 = vadd.f32 %v3107_v61, %v3050_v30 }
 0x451   : > { %v2995_v53 = vadd.f32 %v2994_v4, %v2937_v50 }
 0x452   : > { %v3150_v44 = vmul.f32 0.01, %v3108_v62 }
 0x454   : > { %v3188_v33 = vmax.f32 %v3108_v62, %v3150_v44 }
 0x455   : > { %v3052_v11 = vpop.f32.mrf.mxu2 }
 0x456   : > { %3226 = vst [vmem:[%s5280_s17 + $0xf8] sm:$0xff] %v3188_v33  ;;  %v3053_v27 = vadd.f32 %v3052_v11, %v2995_v53  ;;  %v2938_v8 = vpop.f32.mrf.mxu0 }
 0x457   : > { %v3110_v29 = vpop.f32.mrf.mxu3  ;;  %v2996_v28 = vpop.f32.mrf.mxu1  ;;  %v2939_v51 = vadd.f32 %v2938_v8, %v5456_v5 }
 0x458   : > { %v3111_v43 = vadd.f32 %v3110_v29, %v3053_v27 }
 0x459   : > { %v2997_v48 = vadd.f32 %v2996_v28, %v2939_v51 }
 0x45a   : > { %v3152_v12 = vmul.f32 0.01, %v3111_v43 }
 0x45c   : > { %v3190_v9 = vmax.f32 %v3111_v43, %v3152_v12 }
 0x45d   : > { %v3054_v49 = vpop.f32.mrf.mxu2 }
 0x45e   : > { %3228 = vst [vmem:[%s5280_s17 + $0x108] sm:$0xff] %v3190_v9  ;;  %v3055_v59 = vadd.f32 %v3054_v49, %v2997_v48  ;;  %v2941_v26 = vpop.f32.mrf.mxu0 }
 0x45f   : > { %v3112_v15 = vpop.f32.mrf.mxu3  ;;  %v2999_v37 = vpop.f32.mrf.mxu1  ;;  %v2942_v46 = vadd.f32 %v2941_v26, %v5462_v54 }
 0x460   : > { %v3113_v1 = vadd.f32 %v3112_v15, %v3055_v59 }
 0x461   : > { %v3000_v17 = vadd.f32 %v2999_v37, %v2942_v46 }
 0x462   : > { %v3154_v60 = vmul.f32 0.01, %v3113_v1 }
 0x464   : > { %v3192_v34 = vmax.f32 %v3113_v1, %v3154_v60 }
 0x465   : > { %v3057_v5 = vpop.f32.mrf.mxu2 }
 0x466   : > { %3230 = vst [vmem:[%s5280_s17 + $0x118] sm:$0xff] %v3192_v34  ;;  %v3058_v40 = vadd.f32 %v3057_v5, %v3000_v17  ;;  %v2943_v32 = vpop.f32.mrf.mxu0 }
 0x467   : > { %v3115_v63 = vpop.f32.mrf.mxu3  ;;  %v3001_v36 = vpop.f32.mrf.mxu1 }
 0x468   : > { %v3116_v24 = vadd.f32 %v3115_v63, %v3058_v40 }
 0x46a   : > { %v3156_v54 = vmul.f32 0.01, %v3116_v24 }
 0x46c   : > { %v3194_v2 = vmax.f32 %v3116_v24, %v3156_v54 }
 0x46d   : > { %v3059_v6 = vpop.f32.mrf.mxu2 }
 0x46e   : > { %3232 = vst [vmem:[%s5280_s17 + $0x128] sm:$0xff] %v3194_v2 }
 0x46f   : > { %v3117_v39 = vpop.f32.mrf.mxu3 }
 0x470   : > { %4432 = shalt.err (!%p4429_p8)
}
 0x471   : > { %s4483_s15 = smov 256   ;;  %s4484_s17 = smov 16  }
 0x472   : > { %4284 = dma.vmem_to_hbm [thread:$0]  (%p4553_p5), %s3248_s8, 4864, %s3250_s9, %s3234_s22, %s4483_s15, %s4483_s15, %s4484_s17  }
 0x473 PF: > { %p4301_p9 = scmp.ge.s32.totalorder %s4475_s21, 2  ;;  %s3264_s25 = sand.u32 1, %s4463_s18  }
 0x474   : > { %s3265_s26 = scalar_lea.sflag [#allocation4], %s3264_s25 }
 0x475   : > { %p4294_p10 = pnand %p4301_p9, %p4557_p6 }
 0x477   : > { %p4295_p11 = pneg %p4294_p10 }
 0x479   : > { %4458 = dma.done.wait (%p4295_p11), %s3265_s26, 4864  }
 0x47a   : > { %4460 = vsyncadd (%p4295_p11), %s3265_s26, 4294962432  ;;  %p17_p12 = scmp.ge.s32.totalorder %s4540_s24, 4   ;;  %s5769_s18 = smov %s4467_s19 }
 0x47b   : > { %s5770_s19 = smov %s4471_s20  ;;  %s5771_s20 = smov %s4551_s27 }
 0x47c   : > { %s5772_s21 = smov %s4540_s24  ;;  %19 = sbr.rel (!%p17_p12) target bundleno = 5 (0x5), region = 84 }
 0x481   :  { %3271 = vsyncpa [#allocation3], 1 }
 0x482   :  { %3273 = vsyncpa [#allocation3 + $0x1], 1 }
 0x483   :  { %3274 = vsyncpa [#allocation6], 1 }
 0x484   :  { %3275 = vsyncpa [#allocation4], 1 }
 0x485   :  { %3277 = vsyncpa [#allocation4 + $0x1], 1 }

</bundles_post_ra>
